<compile_context>
chip_gen: v7x
topology: tpu7x:2x2x1
jax: 0.10.0
libtpu: 0.0.40
codegen_flags: <defaults>
</compile_context>

<pallas_src>
import math
from functools import partial

import jax
import jax.numpy as jnp
from jax.experimental import pallas as pl
from jax.experimental.pallas import tpu as pltpu


# -----------------------------------------------------------------------------
# Pallas kernel: one grid step = one batch element, everything fused.
# -----------------------------------------------------------------------------
def _linear_attention_kernel(x_ref, g_in_ref, w_qkv_ref, w_out_ref, g_out_ref,
                             bmask_ref, o_ref, *, heads, dim_head, true_c, eps):
    f32 = jnp.float32
    x = x_ref[0].astype(f32)                       # (N, Cp), padded lanes are 0
    n, cp = x.shape
    inner = heads * dim_head
    inv_c = f32(1.0 / true_c)

    # Lane-validity mask for the padded channel axis (true_c <= Cp).
    lane = jax.lax.broadcasted_iota(jnp.int32, (1, cp), 1)
    cmask = (lane < true_c).astype(f32)

    # --- ChanLayerNorm #1 (biased variance over the true C channels) ---------
    mean = jnp.sum(x, axis=-1, keepdims=True) * inv_c
    d = (x - mean) * cmask
    var = jnp.sum(d * d, axis=-1, keepdims=True) * inv_c
    xn = d * jax.lax.rsqrt(var + eps) * g_in_ref[...]        # padded lanes -> 0

    # --- to_qkv: 1x1 conv as (N, Cp) @ (Cp, 3*inner): bf16 MXU, f32 acc ------
    qkv = jnp.dot(xn.astype(jnp.bfloat16), w_qkv_ref[...],
                  preferred_element_type=f32)                # (N, 3*inner) f32
    q = qkv[:, :inner]                                       # lane-aligned slabs
    k = qkv[:, inner:2 * inner]
    v = qkv[:, 2 * inner:]

    bmask = bmask_ref[...]                     # (inner, inner) block-diag ones

    # q: softmax over each head's dim_head lanes.  Shifting by the global row
    # max (constant within every head group) is mathematically identical to the
    # per-head max and avoids lane-misaligned slicing; per-head sums are
    # broadcast back to every lane with one MXU matmul against bmask.
    q = jnp.exp(q - jnp.max(q, axis=-1, keepdims=True))
    q_den = jnp.dot(q, bmask, preferred_element_type=f32)
    q = q * pl.reciprocal(q_den, approx=True)

    # k: softmax over the sequence axis (N).
    k = jnp.exp(k - jnp.max(k, axis=0, keepdims=True))
    k = k * pl.reciprocal(jnp.sum(k, axis=0, keepdims=True), approx=True)

    # v: per-head l2norm.  F.normalize(v, eps=1e-12) == v * rsqrt(max(ss, 1e-24)).
    v_ss = jnp.dot(v * v, bmask, preferred_element_type=f32)
    v = v * jax.lax.rsqrt(jnp.maximum(v_ss, 1e-24))

    # context = einsum('n d, n e -> d e') for all heads at once, contraction
    # over N expressed directly (no materialized k.T), masked to the head
    # block diagonal.  q-scale and the 1/sqrt(seq_len) factors on k and v are
    # folded into a single scalar on the small (inner, inner) tile.
    context = jax.lax.dot_general(k, v, (((0,), (0,)), ((), ())),
                                  preferred_element_type=f32)  # (inner, inner)
    context = context * bmask * f32(dim_head ** (-0.5) / n)

    attn = jnp.dot(q, context, preferred_element_type=f32)     # (N, inner)

    # --- exact GELU (nn.GELU default, erf-based) ------------------------------
    attn = 0.5 * attn * (1.0 + jax.lax.erf(attn * f32(1.0 / math.sqrt(2.0))))

    # --- to_out: 1x1 conv (bf16 MXU) + ChanLayerNorm #2 -----------------------
    y = jnp.dot(attn.astype(jnp.bfloat16), w_out_ref[...],
                preferred_element_type=f32)                   # (N, Cp), pads 0
    mean2 = jnp.sum(y, axis=-1, keepdims=True) * inv_c
    d2 = (y - mean2) * cmask
    var2 = jnp.sum(d2 * d2, axis=-1, keepdims=True) * inv_c
    o_ref[0] = (d2 * jax.lax.rsqrt(var2 + eps) * g_out_ref[...]).astype(o_ref.dtype)


# -----------------------------------------------------------------------------
# Wrapper: NCHW in / NCHW out, weights passed in matmul layout (W^T).
# -----------------------------------------------------------------------------
def _round_up(x, m):
    return (x + m - 1) // m * m


def linear_attention(fmap, g_in, w_qkv_t, w_out_t, g_out, *, heads, dim_head,
                     eps=1e-5):
    B, C, H, W = fmap.shape
    N = H * W
    inner = heads * dim_head
    assert w_qkv_t.shape == (C, 3 * inner)
    assert w_out_t.shape == (inner, C)

    # Pad channel axis to a multiple of 128 -> lane-dense vregs, unmasked stores.
    Cp = _round_up(C, 128)
    pc = Cp - C

    # NCHW -> (B, N, Cp): channels on the lane axis, N = H*W (x outer, y inner).
    x = jnp.transpose(fmap, (0, 2, 3, 1)).reshape(B, N, C)
    x = jnp.pad(x, ((0, 0), (0, 0), (0, pc)))
    g_in_p = jnp.pad(g_in.reshape(1, C), ((0, 0), (0, pc)))
    g_out_p = jnp.pad(g_out.reshape(1, C), ((0, 0), (0, pc)))
    # bf16 weights (f32 accumulation happens inside the kernel).
    w_qkv_p = jnp.pad(w_qkv_t, ((0, pc), (0, 0))).astype(jnp.bfloat16)
    w_out_p = jnp.pad(w_out_t, ((0, 0), (0, pc))).astype(jnp.bfloat16)

    # Block-diagonal ones matrix: broadcasts per-head lane-group reductions via
    # the MXU and masks the fused (inner, inner) context to its heads.
    head_id = jnp.arange(inner) // dim_head
    bmask = (head_id[:, None] == head_id[None, :]).astype(jnp.float32)

    out = pl.pallas_call(
        partial(_linear_attention_kernel, heads=heads, dim_head=dim_head,
                true_c=C, eps=eps),
        out_shape=jax.ShapeDtypeStruct((B, N, Cp), fmap.dtype),
        grid=(B,),
        in_specs=[
            pl.BlockSpec((1, N, Cp), lambda b: (b, 0, 0)),        # x
            pl.BlockSpec((1, Cp), lambda b: (0, 0)),              # gamma (norm in)
            pl.BlockSpec((Cp, 3 * inner), lambda b: (0, 0)),      # W_qkv^T (bf16)
            pl.BlockSpec((inner, Cp), lambda b: (0, 0)),          # W_out^T (bf16)
            pl.BlockSpec((1, Cp), lambda b: (0, 0)),              # gamma (norm out)
            pl.BlockSpec((inner, inner), lambda b: (0, 0)),       # head block mask
        ],
        out_specs=pl.BlockSpec((1, N, Cp), lambda b: (b, 0, 0)),
        compiler_params=pltpu.CompilerParams(
            dimension_semantics=("parallel",),
            # Above the 16/32 MiB default scoped limit, below v7x's 64 MiB.
            vmem_limit_bytes=48 * 1024 * 1024),
    )(x, g_in_p, w_qkv_p, w_out_p, g_out_p, bmask)

    # TODO(synk): for very large H*W add an N-tiled two-pass variant (pass 1:
    # k-softmax stats + context accumulation; pass 2: q-side attention,
    # out-proj, LN per N-tile) to bound per-step VMEM on v7x.

    out = out[:, :, :C]
    return jnp.transpose(out.reshape(B, H, W, C), (0, 3, 1, 2))


# -----------------------------------------------------------------------------
# Pure-JAX f32 reference that mirrors the PyTorch module op-for-op (NCHW).
# -----------------------------------------------------------------------------
def reference(fmap, g_in, w_qkv_t, w_out_t, g_out, *, heads, dim_head, eps=1e-5):
    B, C, H, W = fmap.shape
    inner = heads * dim_head
    scale = dim_head ** (-0.5)
    seq_len = H * W

    mean = jnp.mean(fmap, axis=1, keepdims=True)
    var = jnp.var(fmap, axis=1, keepdims=True)
    x = (fmap - mean) / jnp.sqrt(var + eps) * g_in.reshape(1, C, 1, 1)

    qkv = jnp.einsum('oc,bchw->bohw', w_qkv_t.T, x)
    q, k, v = jnp.split(qkv, 3, axis=1)

    def rearr(t):  # b (h c) x y -> (b h) (x y) c
        t = t.reshape(B, heads, dim_head, H, W)
        return jnp.transpose(t, (0, 1, 3, 4, 2)).reshape(B * heads, seq_len,
                                                         dim_head)

    q, k, v = map(rearr, (q, k, v))
    q = jax.nn.softmax(q, axis=-1)
    k = jax.nn.softmax(k, axis=-2)
    q = q * scale
    v = v / jnp.maximum(jnp.linalg.norm(v, axis=-1, keepdims=True), 1e-12)
    k = k / math.sqrt(seq_len)
    v = v / math.sqrt(seq_len)
    context = jnp.einsum('bnd,bne->bde', k, v)
    out = jnp.einsum('bnd,bde->bne', q, context)

    out = out.reshape(B, heads, H, W, dim_head)
    out = jnp.transpose(out, (0, 1, 4, 2, 3)).reshape(B, inner, H, W)

    out = 0.5 * out * (1.0 + jax.lax.erf(out / math.sqrt(2.0)))  # exact GELU

    out = jnp.einsum('oc,bchw->bohw', w_out_t.T, out)
    mean = jnp.mean(out, axis=1, keepdims=True)
    var = jnp.var(out, axis=1, keepdims=True)
    return (out - mean) / jnp.sqrt(var + eps) * g_out.reshape(1, C, 1, 1)


if __name__ == "__main__":
    # Small shapes consistent with the module defaults (dim_head=32, heads=8).
    B, dim, H, W = 2, 64, 16, 16
    heads, dim_head = 8, 32
    inner = heads * dim_head

    key = jax.random.PRNGKey(0)
    k_x, k_qkv, k_out, k_g1, k_g2 = jax.random.split(key, 5)

    fmap = jax.random.normal(k_x, (B, dim, H, W), dtype=jnp.float32)
    w_qkv_t = jax.random.normal(k_qkv, (dim, 3 * inner), jnp.float32) / math.sqrt(dim)
    w_out_t = jax.random.normal(k_out, (inner, dim), jnp.float32) / math.sqrt(inner)
    g_in = 1.0 + 0.1 * jax.random.normal(k_g1, (dim,), jnp.float32)
    g_out = 1.0 + 0.1 * jax.random.normal(k_g2, (dim,), jnp.float32)

    out = linear_attention(fmap, g_in, w_qkv_t, w_out_t, g_out,
                           heads=heads, dim_head=dim_head)
    out = jax.block_until_ready(out)

    ref = reference(fmap, g_in, w_qkv_t, w_out_t, g_out,
                    heads=heads, dim_head=dim_head)
    assert out.shape == (B, dim, H, W)
    # Tolerance reflects bf16 operands on the two projection matmuls (f32 acc)
    # plus the approximate softmax reciprocals; structure bugs would be O(1).
    max_err = float(jnp.max(jnp.abs(out - ref)))
    assert max_err < 5e-2, f"mismatch vs pure-JAX reference: {max_err}"

    print("KERNEL_OK")
</pallas_src>

<mosaic_0001>
module attributes {stable_mosaic.version = 11 : i64} {
  func.func @_linear_attention_kernel(%arg0: i32, %arg1: memref<1x256x128xf32, #tpu.memory_space<vmem>>, %arg2: memref<1x128xf32, #tpu.memory_space<vmem>>, %arg3: memref<128x768xbf16, #tpu.memory_space<vmem>>, %arg4: memref<256x128xbf16, #tpu.memory_space<vmem>>, %arg5: memref<1x128xf32, #tpu.memory_space<vmem>>, %arg6: memref<256x256xf32, #tpu.memory_space<vmem>>, %arg7: memref<1x256x128xf32, #tpu.memory_space<vmem>>) attributes {dimension_semantics = [#tpu.dimension_semantics<parallel>], iteration_bounds = array<i64: 2>, scalar_prefetch = 0 : i64, scratch_operands = 0 : i64, tpu.core_type = #tpu.core_type<tc>, window_params = [{transform_indices = @transform_0, window_bounds = array<i64: 1, 256, 128>}, {pipeline_mode = #tpu.pipeline_mode<synchronous>, transform_indices = @transform_1, window_bounds = array<i64: 1, 128>}, {pipeline_mode = #tpu.pipeline_mode<synchronous>, transform_indices = @transform_2, window_bounds = array<i64: 128, 768>}, {pipeline_mode = #tpu.pipeline_mode<synchronous>, transform_indices = @transform_3, window_bounds = array<i64: 256, 128>}, {pipeline_mode = #tpu.pipeline_mode<synchronous>, transform_indices = @transform_4, window_bounds = array<i64: 1, 128>}, {pipeline_mode = #tpu.pipeline_mode<synchronous>, transform_indices = @transform_5, window_bounds = array<i64: 256, 256>}, {transform_indices = @transform_6, window_bounds = array<i64: 1, 256, 128>}]} {
    %c0 = arith.constant 0 : index
    %c0_0 = arith.constant 0 : index
    %c0_1 = arith.constant 0 : index
    %0 = vector.load %arg1[%c0, %c0_0, %c0_1] : memref<1x256x128xf32, #tpu.memory_space<vmem>>, vector<1x256x128xf32>
    %1 = vector.shape_cast %0 : vector<1x256x128xf32> to vector<256x128xf32>
    %2 = tpu.iota {dimensions = array<i32: 1>} : vector<1x128xi32>
    %c64_i32 = arith.constant 64 : i32
    %3 = vector.broadcast %c64_i32 : i32 to vector<1x128xi32>
    %4 = arith.cmpi slt, %2, %3 : vector<1x128xi32>
    %5 = arith.extui %4 : vector<1x128xi1> to vector<1x128xi32>
    %6 = arith.sitofp %5 : vector<1x128xi32> to vector<1x128xf32>
    %cst = arith.constant dense<0.000000e+00> : vector<256xf32>
    %7 = vector.multi_reduction <add>, %1, %cst [1] : vector<256x128xf32> to vector<256xf32>
    %8 = vector.shape_cast %7 : vector<256xf32> to vector<256x1xf32>
    %cst_2 = arith.constant 1.562500e-02 : f32
    %9 = vector.broadcast %cst_2 : f32 to vector<256x1xf32>
    %10 = arith.mulf %8, %9 : vector<256x1xf32>
    %11 = vector.broadcast %10 : vector<256x1xf32> to vector<256x128xf32>
    %12 = arith.subf %1, %11 : vector<256x128xf32>
    %13 = vector.broadcast %6 : vector<1x128xf32> to vector<256x128xf32>
    %14 = arith.mulf %12, %13 : vector<256x128xf32>
    %15 = arith.mulf %14, %14 : vector<256x128xf32>
    %cst_3 = arith.constant dense<0.000000e+00> : vector<256xf32>
    %16 = vector.multi_reduction <add>, %15, %cst_3 [1] : vector<256x128xf32> to vector<256xf32>
    %17 = vector.shape_cast %16 : vector<256xf32> to vector<256x1xf32>
    %cst_4 = arith.constant 1.562500e-02 : f32
    %18 = vector.broadcast %cst_4 : f32 to vector<256x1xf32>
    %19 = arith.mulf %17, %18 : vector<256x1xf32>
    %cst_5 = arith.constant 9.99999974E-6 : f32
    %20 = vector.broadcast %cst_5 : f32 to vector<256x1xf32>
    %21 = arith.addf %19, %20 : vector<256x1xf32>
    %22 = math.rsqrt %21 : vector<256x1xf32>
    %23 = vector.broadcast %22 : vector<256x1xf32> to vector<256x128xf32>
    %24 = arith.mulf %14, %23 : vector<256x128xf32>
    %c0_6 = arith.constant 0 : index
    %c0_7 = arith.constant 0 : index
    %25 = vector.load %arg2[%c0_6, %c0_7] : memref<1x128xf32, #tpu.memory_space<vmem>>, vector<1x128xf32>
    %26 = vector.broadcast %25 : vector<1x128xf32> to vector<256x128xf32>
    %27 = arith.mulf %24, %26 : vector<256x128xf32>
    %28 = arith.truncf %27 : vector<256x128xf32> to vector<256x128xbf16>
    %c0_8 = arith.constant 0 : index
    %c0_9 = arith.constant 0 : index
    %29 = vector.load %arg3[%c0_8, %c0_9] : memref<128x768xbf16, #tpu.memory_space<vmem>>, vector<128x768xbf16>
    %cst_10 = arith.constant dense<0.000000e+00> : vector<256x768xf32>
    %30 = tpu.matmul %28, %29, %cst_10 {dimension_numbers = #tpu.dot_dimension_numbers<[1], [0], [0], [1], [0, 0, 1, 1], [], []>} : vector<256x128xbf16>, vector<128x768xbf16>, vector<256x768xf32> -> vector<256x768xf32>
    %31 = vector.extract_strided_slice %30 {offsets = [0, 0], sizes = [256, 256], strides = [1, 1]} : vector<256x768xf32> to vector<256x256xf32>
    %32 = vector.extract_strided_slice %30 {offsets = [0, 256], sizes = [256, 256], strides = [1, 1]} : vector<256x768xf32> to vector<256x256xf32>
    %33 = vector.extract_strided_slice %30 {offsets = [0, 512], sizes = [256, 256], strides = [1, 1]} : vector<256x768xf32> to vector<256x256xf32>
    %c0_11 = arith.constant 0 : index
    %c0_12 = arith.constant 0 : index
    %34 = vector.load %arg6[%c0_11, %c0_12] : memref<256x256xf32, #tpu.memory_space<vmem>>, vector<256x256xf32>
    %cst_13 = arith.constant dense<0xFF800000> : vector<256xf32>
    %35 = vector.multi_reduction <maximumf>, %31, %cst_13 [1] : vector<256x256xf32> to vector<256xf32>
    %36 = vector.shape_cast %35 : vector<256xf32> to vector<256x1xf32>
    %37 = vector.broadcast %36 : vector<256x1xf32> to vector<256x256xf32>
    %38 = arith.subf %31, %37 : vector<256x256xf32>
    %39 = math.exp %38 : vector<256x256xf32>
    %cst_14 = arith.constant dense<0.000000e+00> : vector<256x256xf32>
    %40 = tpu.matmul %39, %34, %cst_14 {dimension_numbers = #tpu.dot_dimension_numbers<[1], [0], [0], [1], [0, 0, 1, 1], [], []>} : vector<256x256xf32>, vector<256x256xf32>, vector<256x256xf32> -> vector<256x256xf32>
    %41 = tpu.reciprocal %40 {approx = true} : vector<256x256xf32> -> vector<256x256xf32>
    %42 = arith.mulf %39, %41 : vector<256x256xf32>
    %cst_15 = arith.constant dense<0xFF800000> : vector<256xf32>
    %43 = vector.multi_reduction <maximumf>, %32, %cst_15 [0] : vector<256x256xf32> to vector<256xf32>
    %44 = vector.shape_cast %43 : vector<256xf32> to vector<1x256xf32>
    %45 = vector.broadcast %44 : vector<1x256xf32> to vector<256x256xf32>
    %46 = arith.subf %32, %45 : vector<256x256xf32>
    %47 = math.exp %46 : vector<256x256xf32>
    %cst_16 = arith.constant dense<0.000000e+00> : vector<256xf32>
    %48 = vector.multi_reduction <add>, %47, %cst_16 [0] : vector<256x256xf32> to vector<256xf32>
    %49 = vector.shape_cast %48 : vector<256xf32> to vector<1x256xf32>
    %50 = tpu.reciprocal %49 {approx = true} : vector<1x256xf32> -> vector<1x256xf32>
    %51 = vector.broadcast %50 : vector<1x256xf32> to vector<256x256xf32>
    %52 = arith.mulf %47, %51 : vector<256x256xf32>
    %53 = arith.mulf %33, %33 : vector<256x256xf32>
    %cst_17 = arith.constant dense<0.000000e+00> : vector<256x256xf32>
    %54 = tpu.matmul %53, %34, %cst_17 {dimension_numbers = #tpu.dot_dimension_numbers<[1], [0], [0], [1], [0, 0, 1, 1], [], []>} : vector<256x256xf32>, vector<256x256xf32>, vector<256x256xf32> -> vector<256x256xf32>
    %cst_18 = arith.constant 1.000000e-24 : f32
    %55 = vector.broadcast %cst_18 : f32 to vector<256x256xf32>
    %56 = arith.maximumf %54, %55 : vector<256x256xf32>
    %57 = math.rsqrt %56 : vector<256x256xf32>
    %58 = arith.mulf %33, %57 : vector<256x256xf32>
    %cst_19 = arith.constant dense<0.000000e+00> : vector<256x256xf32>
    %59 = tpu.matmul %52, %58, %cst_19 {dimension_numbers = #tpu.dot_dimension_numbers<[0], [0], [1], [1], [0, 1, 1, 1], [], []>} : vector<256x256xf32>, vector<256x256xf32>, vector<256x256xf32> -> vector<256x256xf32>
    %60 = arith.mulf %59, %34 : vector<256x256xf32>
    %cst_20 = arith.constant 6.90533954E-4 : f32
    %61 = vector.broadcast %cst_20 : f32 to vector<256x256xf32>
    %62 = arith.mulf %60, %61 : vector<256x256xf32>
    %cst_21 = arith.constant dense<0.000000e+00> : vector<256x256xf32>
    %63 = tpu.matmul %42, %62, %cst_21 {dimension_numbers = #tpu.dot_dimension_numbers<[1], [0], [0], [1], [0, 0, 1, 1], [], []>} : vector<256x256xf32>, vector<256x256xf32>, vector<256x256xf32> -> vector<256x256xf32>
    %cst_22 = arith.constant 5.000000e-01 : f32
    %64 = vector.broadcast %cst_22 : f32 to vector<256x256xf32>
    %65 = arith.mulf %64, %63 : vector<256x256xf32>
    %cst_23 = arith.constant 0.707106769 : f32
    %66 = vector.broadcast %cst_23 : f32 to vector<256x256xf32>
    %67 = arith.mulf %63, %66 : vector<256x256xf32>
    %68 = math.erf %67 : vector<256x256xf32>
    %cst_24 = arith.constant 1.000000e+00 : f32
    %69 = vector.broadcast %cst_24 : f32 to vector<256x256xf32>
    %70 = arith.addf %69, %68 : vector<256x256xf32>
    %71 = arith.mulf %65, %70 : vector<256x256xf32>
    %72 = arith.truncf %71 : vector<256x256xf32> to vector<256x256xbf16>
    %c0_25 = arith.constant 0 : index
    %c0_26 = arith.constant 0 : index
    %73 = vector.load %arg4[%c0_25, %c0_26] : memref<256x128xbf16, #tpu.memory_space<vmem>>, vector<256x128xbf16>
    %cst_27 = arith.constant dense<0.000000e+00> : vector<256x128xf32>
    %74 = tpu.matmul %72, %73, %cst_27 {dimension_numbers = #tpu.dot_dimension_numbers<[1], [0], [0], [1], [0, 0, 1, 1], [], []>} : vector<256x256xbf16>, vector<256x128xbf16>, vector<256x128xf32> -> vector<256x128xf32>
    %cst_28 = arith.constant dense<0.000000e+00> : vector<256xf32>
    %75 = vector.multi_reduction <add>, %74, %cst_28 [1] : vector<256x128xf32> to vector<256xf32>
    %76 = vector.shape_cast %75 : vector<256xf32> to vector<256x1xf32>
    %cst_29 = arith.constant 1.562500e-02 : f32
    %77 = vector.broadcast %cst_29 : f32 to vector<256x1xf32>
    %78 = arith.mulf %76, %77 : vector<256x1xf32>
    %79 = vector.broadcast %78 : vector<256x1xf32> to vector<256x128xf32>
    %80 = arith.subf %74, %79 : vector<256x128xf32>
    %81 = vector.broadcast %6 : vector<1x128xf32> to vector<256x128xf32>
    %82 = arith.mulf %80, %81 : vector<256x128xf32>
    %83 = arith.mulf %82, %82 : vector<256x128xf32>
    %cst_30 = arith.constant dense<0.000000e+00> : vector<256xf32>
    %84 = vector.multi_reduction <add>, %83, %cst_30 [1] : vector<256x128xf32> to vector<256xf32>
    %85 = vector.shape_cast %84 : vector<256xf32> to vector<256x1xf32>
    %cst_31 = arith.constant 1.562500e-02 : f32
    %86 = vector.broadcast %cst_31 : f32 to vector<256x1xf32>
    %87 = arith.mulf %85, %86 : vector<256x1xf32>
    %cst_32 = arith.constant 9.99999974E-6 : f32
    %88 = vector.broadcast %cst_32 : f32 to vector<256x1xf32>
    %89 = arith.addf %87, %88 : vector<256x1xf32>
    %90 = math.rsqrt %89 : vector<256x1xf32>
    %91 = vector.broadcast %90 : vector<256x1xf32> to vector<256x128xf32>
    %92 = arith.mulf %82, %91 : vector<256x128xf32>
    %c0_33 = arith.constant 0 : index
    %c0_34 = arith.constant 0 : index
    %93 = vector.load %arg5[%c0_33, %c0_34] : memref<1x128xf32, #tpu.memory_space<vmem>>, vector<1x128xf32>
    %94 = vector.broadcast %93 : vector<1x128xf32> to vector<256x128xf32>
    %95 = arith.mulf %92, %94 : vector<256x128xf32>
    %c0_35 = arith.constant 0 : index
    %c0_36 = arith.constant 0 : index
    %c0_37 = arith.constant 0 : index
    %96 = vector.load %arg7[%c0_35, %c0_36, %c0_37] : memref<1x256x128xf32, #tpu.memory_space<vmem>>, vector<1x256x128xf32>
    %97 = vector.shape_cast %96 : vector<1x256x128xf32> to vector<256x128xf32>
    %98 = vector.shape_cast %95 : vector<256x128xf32> to vector<1x256x128xf32>
    tpu.vector_store %arg7[%c0_35, %c0_36, %c0_37], %98 {strides = array<i32>} : memref<1x256x128xf32, #tpu.memory_space<vmem>>, vector<1x256x128xf32>,
    return
  }
  func.func @transform_0(%arg0: i32) -> (i32, i32, i32) {
    %c0_i32 = arith.constant 0 : i32
    %c0_i32_0 = arith.constant 0 : i32
    %c0_i32_1 = arith.constant 0 : i32
    return %arg0, %c0_i32, %c0_i32_0 : i32, i32, i32
  }
  func.func @transform_1(%arg0: i32) -> (i32, i32) {
    %c0_i32 = arith.constant 0 : i32
    %c0_i32_0 = arith.constant 0 : i32
    %c0_i32_1 = arith.constant 0 : i32
    return %c0_i32, %c0_i32_0 : i32, i32
  }
  func.func @transform_2(%arg0: i32) -> (i32, i32) {
    %c0_i32 = arith.constant 0 : i32
    %c0_i32_0 = arith.constant 0 : i32
    %c0_i32_1 = arith.constant 0 : i32
    return %c0_i32, %c0_i32_0 : i32, i32
  }
  func.func @transform_3(%arg0: i32) -> (i32, i32) {
    %c0_i32 = arith.constant 0 : i32
    %c0_i32_0 = arith.constant 0 : i32
    %c0_i32_1 = arith.constant 0 : i32
    return %c0_i32, %c0_i32_0 : i32, i32
  }
  func.func @transform_4(%arg0: i32) -> (i32, i32) {
    %c0_i32 = arith.constant 0 : i32
    %c0_i32_0 = arith.constant 0 : i32
    %c0_i32_1 = arith.constant 0 : i32
    return %c0_i32, %c0_i32_0 : i32, i32
  }
  func.func @transform_5(%arg0: i32) -> (i32, i32) {
    %c0_i32 = arith.constant 0 : i32
    %c0_i32_0 = arith.constant 0 : i32
    %c0_i32_1 = arith.constant 0 : i32
    return %c0_i32, %c0_i32_0 : i32, i32
  }
  func.func @transform_6(%arg0: i32) -> (i32, i32, i32) {
    %c0_i32 = arith.constant 0 : i32
    %c0_i32_0 = arith.constant 0 : i32
    %c0_i32_1 = arith.constant 0 : i32
    return %arg0, %c0_i32, %c0_i32_0 : i32, i32, i32
  }
}

</mosaic_0001>

<bundles_post_ra>
// kernel: tpu_custom_call.1
= control target key start
LH: loop header
LB: loop body
LE: loop exit
PB: predicated region body
PF: predicated region fallthrough
CT: control target
= control target key end

     0   :  { %11 = vsyncpa [#allocation3], 0  ;;  %s10805_s0 = inlined_call_operand.hbm [shape: f32[2,256,128], index: 0, kind: input, shape index: {}]   ;;  %s10806_s1 = inlined_call_operand.vmem [shape: f32[1,128], index: 1, kind: input, shape index: {}]   ;;  %s10807_s2 = inlined_call_operand.hbm [shape: bf16[128,768], index: 2, kind: input, shape index: {}]   ;;  %s10808_s3 = inlined_call_operand.hbm [shape: bf16[256,128], index: 3, kind: input, shape index: {}]   ;;  %s10809_s4 = inlined_call_operand.vmem [shape: f32[1,128], index: 4, kind: input, shape index: {}]   ;;  %s10810_s5 = inlined_call_operand.hbm [shape: f32[256,256], index: 5, kind: input, shape index: {}]   ;;  %s10811_s6 = inlined_call_operand.hbm [shape: f32[2,256,128], index: 6, kind: output, shape index: {}]  }
   0x1   :  { %13 = vsyncpa [#allocation3 + $0x1], 0 }
   0x2   :  { %14 = vsyncpa [#allocation6], 0 }
   0x3   :  { %15 = vsyncpa [#allocation9], 0 }
   0x4   :  { %16 = vsyncpa [#allocation4], 0 }
   0x5   :  { %18 = vsyncpa [#allocation4 + $0x1], 0  ;;  %s7232_s21 = smov 0   ;;  %s7234_s22 = smov 0  }
   0x6   :  { %s7236_s23 = smov 0   ;;  %s7238_s24 = smov 0  }
   0x7 LB: > { %s7253_s25 = sadd.s32 4294967295, %s7178_s24   ;;  %s5296_s26 = sadd.s32 4294967294, %s7178_s24   ;;  %s7178_s24 = sphi %s7238_s24, %s11739_s24   ;;  %s7174_s23 = sphi %s7236_s23, %s11738_s23   ;;  %s7170_s22 = sphi %s7234_s22, %s11737_s22   ;;  %s7166_s21 = sphi %s7232_s21, %s11736_s21  }
   0x8   : > { %p44_p0 = scmp.ne.s32.totalorder %s7170_s22, %s7166_s21  ;;  %p10812_p1 = scmp.eq.s32.totalorder %s7253_s25, 0 }
   0x9   : > { %p179_p3 = scmp.eq.s32.totalorder %s5296_s26, 1  ;;  %p5297_p5 = scmp.ge.s32.totalorder %s7178_s24, 1 }
   0xa   : > { %p7262_p4 = por %p10812_p1, %p44_p0  ;;  %p186_p7 = scmp.lt.s32.totalorder %s7178_s24, 3 }
   0xb   : > { %p7267_p6 = por %p179_p3, %p44_p0  ;;  %s7180_s30 = smov [#allocation5]  }
   0xc   : > { %s11073_s27 = scalar_select %p7262_p4, 1, 0 }
   0xd   : > { %s11074_s28 = scalar_select %p7267_p6, 1, 0 }
   0xe   : > { %p7272_p8 = pnand %p5297_p5, %p186_p7  ;;  %s201_s7 = sshll.u32 %s7180_s30, 4  ;;  %s7276_s7 = int_to_ptr.vmem [resolvable:$true] %s201_s7 }
   0xf   : > { %s7181_s9 = smov [#allocation7]   ;;  %s6990_s13 = scalar_lea.hbm %s10807_s2, 6144 }
  0x10   : > { %s11075_s29 = scalar_select %p7272_p8, 1, 0 }
  0x11   : > { %p5769_p9 = pneg %p7272_p8  ;;  %s214_s10 = sshll.u32 %s7181_s9, 4  ;;  %s7287_s10 = int_to_ptr.vmem [resolvable:$true] %s214_s10 }
  0x12   : > { %p6991_p12 = scmp.ne.s32.totalorder %s10807_s2, %s6990_s13  ;;  %p6997_p5 = scmp.lt.u32.totalorder %s6990_s13, %s10807_s2 }
  0x13   : > { %p7283_p11 = pnand %p5769_p9, %p10812_p1 }
  0x15   : > { %p7297_p13 = pneg %p7283_p11 }
  0x17   : > { %p6993_p0 = pnand %p7297_p13, %p6991_p12 }
  0x19   : > { %p6994_p3 = pneg %p6993_p0 }
  0x1b   : > { %p6999_p7 = pnand %p6997_p5, %p6994_p3 }
  0x1d   : > { %7002 = shalt.err (!%p6999_p7)
}
  0x1e   : > { %s7003_s19 = scalar_lea.vmem %s7276_s7, 6144  ;;  %p7011_p2 = scmp.lt.s32.totalorder %s7276_s7, %s7276_s7 }
  0x1f   : > { %p7004_p9 = scmp.ne.s32.totalorder %s7276_s7, %s7003_s19  ;;  %p7012_p6 = scmp.lt.s32.totalorder %s7003_s19, %s7003_s19 }
  0x21   : > { %p7006_p10 = pnand %p7004_p9, %p7297_p13  ;;  %p7013_p12 = por %p7012_p6, %p7011_p2 }
  0x23   : > { %p7007_p1 = pneg %p7006_p10 }
  0x25   : > { %p7014_p0 = pnand %p7013_p12, %p7007_p1 }
  0x27   : > { %7017 = shalt.err (!%p7014_p0)
}
  0x28   : > { %s7182_s20 = smov 384   ;;  %s7183_s26 = smov 24  }
  0x29   : > { %5772 = dma.hbm_to_vmem [thread:$0]  (!%p7283_p11), %s10807_s2, 6144, %s7276_s7, [#allocation6], %s7182_s20, %s7182_s20, %s7183_s26  }
  0x2a   : > { %s7018_s13 = scalar_lea.hbm %s10808_s3, 2048 }
  0x2b   : > { %p7019_p2 = scmp.ne.s32.totalorder %s10808_s3, %s7018_s13  ;;  %p7025_p10 = scmp.lt.u32.totalorder %s7018_s13, %s10808_s3 }
  0x2d   : > { %p7021_p1 = pnand %p7019_p2, %p7297_p13 }
  0x2f   : > { %p7022_p6 = pneg %p7021_p1 }
  0x31   : > { %p7027_p3 = pnand %p7025_p10, %p7022_p6 }
  0x33   : > { %7030 = shalt.err (!%p7027_p3)
}
  0x34   : > { %s7031_s7 = scalar_lea.vmem %s7287_s10, 2048  ;;  %p7039_p12 = scmp.lt.s32.totalorder %s7287_s10, %s7287_s10 }
  0x35   : > { %p7032_p5 = scmp.ne.s32.totalorder %s7287_s10, %s7031_s7  ;;  %p7040_p0 = scmp.lt.s32.totalorder %s7031_s7, %s7031_s7 }
  0x37   : > { %p7034_p7 = pnand %p7032_p5, %p7297_p13  ;;  %p7041_p2 = por %p7040_p0, %p7039_p12 }
  0x39   : > { %p7035_p9 = pneg %p7034_p7 }
  0x3b   : > { %p7042_p1 = pnand %p7041_p2, %p7035_p9 }
  0x3d   : > { %7045 = shalt.err (!%p7042_p1)
}
  0x3e   : > { %s7184_s19 = smov 64   ;;  %s7185_s20 = smov 4  }
  0x3f   : > { %5775 = dma.hbm_to_vmem [thread:$0]  (!%p7283_p11), %s10808_s3, 2048, %s7287_s10, [#allocation6], %s7184_s19, %s7184_s19, %s7185_s20  }
  0x40   : > { %s7186_s9 = smov [#allocation8]   ;;  %s7046_s14 = scalar_lea.hbm %s10810_s5, 8192 }
  0x41   : > { %s230_s11 = sshll.u32 %s7186_s9, 4  ;;  %p7047_p6 = scmp.ne.s32.totalorder %s10810_s5, %s7046_s14  ;;  %s231_s11 = int_to_ptr.vmem [resolvable:$true] %s230_s11 }
  0x42   : > { %p7053_p5 = scmp.lt.u32.totalorder %s7046_s14, %s10810_s5 }
  0x43   : > { %p7049_p10 = pnand %p7047_p6, %p7297_p13 }
  0x45   : > { %p7050_p3 = pneg %p7049_p10 }
  0x47   : > { %p7055_p7 = pnand %p7053_p5, %p7050_p3 }
  0x49   : > { %7058 = shalt.err (!%p7055_p7)
}
  0x4a   : > { %s7059_s10 = scalar_lea.vmem %s231_s11, 8192  ;;  %p7067_p2 = scmp.lt.s32.totalorder %s231_s11, %s231_s11 }
  0x4b   : > { %p7060_p9 = scmp.ne.s32.totalorder %s231_s11, %s7059_s10  ;;  %p7068_p1 = scmp.lt.s32.totalorder %s7059_s10, %s7059_s10 }
  0x4d   : > { %p7062_p12 = pnand %p7060_p9, %p7297_p13  ;;  %p7069_p4 = por %p7068_p1, %p7067_p2 }
  0x4f   : > { %p7063_p0 = pneg %p7062_p12 }
  0x51   : > { %p7070_p8 = pnand %p7069_p4, %p7063_p0 }
  0x53   : > { %7073 = shalt.err (!%p7070_p8)
}
  0x54   : > { %s7187_s19 = smov 256   ;;  %s7188_s16 = smov 16  }
  0x55   : > { %5778 = dma.hbm_to_vmem [thread:$0]  (!%p7283_p11), %s10810_s5, 8192, %s231_s11, [#allocation9], %s7187_s19, %s7187_s19, %s7188_s16  }
  0x56   : > { %s7360_s30 = sadd.s32 1, %s7178_s24   ;;  %s31_s12 = sadd.s32 1, %s7174_s23 }
  0x57   : > { %s28_s9 = ssub.s32 %s7178_s24, %s7360_s30  ;;  %p38_p8 = scmp.ne.s32.totalorder %s7174_s23, %s7170_s22 }
  0x58   : > { %p29_p4 = scmp.eq.s32.totalorder %s28_s9, 0  ;;  %p39_p13 = scmp.eq.s32.totalorder %s7178_s24, 0 }
  0x59   : > { %p5790_p6 = scmp.lt.s32.totalorder %s7178_s24, 2  ;;  %p11078_p3 = scmp.eq.s32.totalorder %s7253_s25, 1 }
  0x5a   : > { %s7370_s13 = scalar_select %p29_p4, %s7174_s23, %s31_s12  }
  0x5b   : > { %p40_p10 = por %p39_p13, %p38_p8  ;;  %p7374_p5 = por %p11078_p3, %p38_p8 }
  0x5c   : > { %s244_s8 = sand.u32 1, %s7174_s23   ;;  %s5383_s15 = sshll.u32 %s7178_s24, 12 }
  0x5d   : > { %s5302_s11 = sshll.u32 %s244_s8, 8  ;;  %s7383_s7 = scalar_lea.hbm %s10805_s0, %s5383_s15 }
  0x5e   : > { %s248_s10 = scalar_lea.vmem [#allocation2], %s5302_s11  ;;  %p7385_p11 = pnand %p5790_p6, %p40_p10 }
  0x5f   : > { %s255_s19 = sshll.u32 %s248_s10, 4  ;;  %s7391_s20 = scalar_lea.sflag [#allocation3], %s244_s8  ;;  %s7389_s19 = int_to_ptr.vmem [resolvable:$true] %s255_s19 }
  0x60   : > { %s7074_s26 = scalar_lea.hbm %s7383_s7, 4096  ;;  %p7076_p9 = pneg %p7385_p11 }
  0x61   : > { %p7075_p7 = scmp.ne.s32.totalorder %s7383_s7, %s7074_s26  ;;  %s7079_s15 = scalar_lea.hbm %s10805_s0, 8192 }
  0x62   : > { %p7080_p2 = scmp.lt.u32.totalorder %s7383_s7, %s10805_s0  ;;  %p7081_p1 = scmp.lt.u32.totalorder %s7079_s15, %s7074_s26 }
  0x63   : > { %p7077_p12 = pnand %p7076_p9, %p7075_p7  ;;  %p7083_p8 = scmp.lt.u32.totalorder %s7074_s26, %s7383_s7 }
  0x64   : > { %p7082_p4 = por %p7081_p1, %p7080_p2 }
  0x65   : > { %p7078_p0 = pneg %p7077_p12 }
  0x66   : > { %p7084_p13 = por %p7083_p8, %p7082_p4 }
  0x68   : > { %p7085_p6 = pnand %p7084_p13, %p7078_p0 }
  0x6a   : > { %7088 = shalt.err (!%p7085_p6)
}
  0x6b   : > { %s7089_s8 = scalar_lea.vmem %s7389_s19, 4096  ;;  %s7189_s18 = smov [#allocation2]  }
  0x6c   : > { %p7090_p10 = scmp.ne.s32.totalorder %s7389_s19, %s7089_s8  ;;  %s7094_s10 = sshll.u32 %s7189_s18, 4  ;;  %s7095_s10 = int_to_ptr.vmem [resolvable:$false] %s7094_s10 }
  0x6d   : > { %s7096_s9 = scalar_lea.vmem %s7095_s10, 8192  ;;  %p7097_p12 = scmp.lt.s32.totalorder %s7389_s19, %s7095_s10 }
  0x6e   : > { %p7092_p3 = pnand %p7090_p10, %p7076_p9  ;;  %p7098_p2 = scmp.lt.s32.totalorder %s7096_s9, %s7089_s8 }
  0x70   : > { %p7093_p7 = pneg %p7092_p3  ;;  %p7099_p1 = por %p7098_p2, %p7097_p12 }
  0x72   : > { %p7100_p4 = pnand %p7099_p1, %p7093_p7 }
  0x74   : > { %7103 = shalt.err (!%p7100_p4)
}
  0x75   : > { %s7190_s26 = smov 128   ;;  %s7191_s12 = smov 8  }
  0x76   : > { %5782 = dma.hbm_to_vmem [thread:$0]  (!%p7385_p11), %s7383_s7, 4096, %s7389_s19, %s7391_s20, %s7190_s26, %s7190_s26, %s7191_s12  }
  0x77   : > { %p11081_p9 = scmp.ne.s32.totalorder %s11075_s29, 0 }
  0x79   : > { %267 = sbr.rel (%p11081_p9) target bundleno = 2515 (0x9d3), region = 44 }
  0x80   : > { %s7422_s15 = sand.u32 1, %s7170_s22   ;;  %p11082_p0 = scmp.ne.s32.totalorder %s11073_s27, 0 }
  0x81   : > { %s5306_s11 = sshll.u32 %s7422_s15, 8  ;;  %s270_s17 = scalar_lea.sflag [#allocation3], %s7422_s15 }
  0x82   : > { %s7428_s8 = scalar_lea.vmem [#allocation2], %s5306_s11 }
  0x83   : > { %7149 = dma.done.wait (%p11082_p0), %s270_s17, 4096  }
  0x84   : > { %7151 = vsyncadd (%p11082_p0), %s270_s17, 4294963200  ;;  %p11083_p11 = scmp.eq.s32.totalorder %s7253_s25, 0 }
  0x86   : > { %7153 = dma.done.wait (%p11083_p11), [#allocation6], 8192   ;;  %p11084_p8 = pmov %p11083_p11 }
  0x88   : > { %7155 = vsyncadd (%p11084_p8), [#allocation6], 4294959104  ;;  %p11085_p13 = pmov %p11084_p8 }
  0x89   : > { %p11086_p6 = pmov %p11084_p8 }
  0x8a   : > { %7157 = dma.done.wait (%p11085_p13), [#allocation9], 8192  }
  0x8b   : > { %7159 = vsyncadd (%p11086_p6), [#allocation9], 4294959104  ;;  %v7443_v0 = vld [vmem:[%s7428_s8] sm:$0xff]  ;;  %v7446_v1 = vld [vmem:[%s7428_s8 + $0x10] sm:$0xff]  ;;  %v347_v30 = vlaneseq  ;;  %v7192_v36 = vmov 0.0   ;;  %s10659_s16 = scalar_lea.vmem [#allocation10], %s5306_s11 }
  0x8c   : > { %352 = vadd.xlane.f32.xlu0 %v7443_v0  ;;  %356 = vadd.xlane.f32.xlu1 %v7446_v1  ;;  %v7451_v2 = vld [vmem:[%s7428_s8 + $0x8] sm:$0xff]  ;;  %v7454_v3 = vld [vmem:[%s7428_s8 + $0x18] sm:$0xff]  ;;  %v7459_v4 = vld [vmem:[%s7428_s8 + $0x20] sm:$0xff]  ;;  %s5384_s20 = sshll.u32 %s7253_s25, 12  ;;  %s5194_s18 = sshll.u32 %s10659_s16, 4  ;;  %s10758_s18 = int_to_ptr.vmem [resolvable:$true] %s5194_s18 }
  0x8d   : > { %v7462_v5 = vld [vmem:[%s7428_s8 + $0x28] sm:$0xff]  ;;  %v7465_v6 = vld [vmem:[%s7428_s8 + $0x30] sm:$0xff]  ;;  %v7468_v7 = vld [vmem:[%s7428_s8 + $0x38] sm:$0xff]  ;;  %v348_v31 = vand.u32 127, %v347_v30  ;;  %s10756_s26 = scalar_lea.hbm %s10811_s6, %s5384_s20  ;;  %s5181_s25 = scalar_lea.sflag [#allocation4], %s7422_s15 }
  0x8e   : > { %v7473_v8 = vld [vmem:[%s7428_s8 + $0x40] sm:$0xff]  ;;  %v7476_v9 = vld [vmem:[%s7428_s8 + $0x48] sm:$0xff]  ;;  %v7481_v10 = vld [vmem:[%s7428_s8 + $0x50] sm:$0xff]  ;;  %s7104_s12 = scalar_lea.vmem %s10758_s18, 4096  ;;  %s7194_s11 = smov [#allocation10]  }
  0x8f   : > { %v7484_v11 = vld [vmem:[%s7428_s8 + $0x58] sm:$0xff]  ;;  %v7489_v12 = vld [vmem:[%s7428_s8 + $0x60] sm:$0xff]  ;;  %v7492_v13 = vld [vmem:[%s7428_s8 + $0x68] sm:$0xff]  ;;  %vm349_vm0 = vcmp.lt.s32.totalorder %v348_v31, 64  ;;  %p7105_p10 = scmp.ne.s32.totalorder %s10758_s18, %s7104_s12  ;;  %s7108_s17 = sshll.u32 %s7194_s11, 4  ;;  %s7109_s17 = int_to_ptr.vmem [resolvable:$false] %s7108_s17 }
  0x90   : > { %354 = vadd.xlane.f32.xlu0 %v7451_v2  ;;  %358 = vadd.xlane.f32.xlu1 %v7454_v3  ;;  %v7497_v14 = vld [vmem:[%s7428_s8 + $0x70] sm:$0xff]  ;;  %v7500_v15 = vld [vmem:[%s7428_s8 + $0x78] sm:$0xff]  ;;  %v7505_v16 = vld [vmem:[%s7428_s8 + $0x80] sm:$0xff]  ;;  %v7530_v37 = vsel %vm349_vm0, 1.0, %v7192_v36  ;;  %p7111_p12 = scmp.lt.s32.totalorder %s10758_s18, %s7109_s17 }
  0x91   : > { %v7510_v17 = vld [vmem:[%s7428_s8 + $0x88] sm:$0xff]  ;;  %v7513_v18 = vld [vmem:[%s7428_s8 + $0x90] sm:$0xff]  ;;  %v7516_v19 = vld [vmem:[%s7428_s8 + $0x98] sm:$0xff]  ;;  %11087 = vst [vmem:[#allocation15_spill] sm:$0xff] %v7530_v37  ;;  %p7106_p3 = pnand %p7105_p10, %p7374_p5 }
  0x92   : > { %v7523_v20 = vld [vmem:[%s7428_s8 + $0xa0] sm:$0xff]  ;;  %v7526_v21 = vld [vmem:[%s7428_s8 + $0xa8] sm:$0xff]  ;;  %v6074_v27 = vld [vmem:[#allocation5 + $0x3c] ss:$24 sps:$4 sm:$0xff]  }
  0x93   : > { %v6066_v22 = vld [vmem:[#allocation5 + $0x4] ss:$24 sps:$4 sm:$0xff]   ;;  %v6070_v24 = vld [vmem:[#allocation5] ss:$24 sps:$4 sm:$0xff]   ;;  %v6072_v26 = vld [vmem:[#allocation5 + $0x34] ss:$24 sps:$4 sm:$0xff]   ;;  %p7107_p7 = pneg %p7106_p3 }
  0x94   : > { %360 = vadd.xlane.f32.xlu0 %v7459_v4  ;;  %362 = vadd.xlane.f32.xlu1 %v7462_v5  ;;  %v6068_v23 = vld [vmem:[#allocation5 + $0xc] ss:$24 sps:$4 sm:$0xff]   ;;  %v6071_v25 = vld [vmem:[#allocation5 + $0x8] ss:$24 sps:$4 sm:$0xff]   ;;  %v6077_v29 = vld [vmem:[#allocation5 + $0x38] ss:$24 sps:$4 sm:$0xff]  }
  0x95   : > { %1079 = vmatprep.subr.bf16.mxu0 %v6066_v22  ;;  %1272 = vmatprep.subr.bf16.mxu1 %v6068_v23  ;;  %v6076_v28 = vld [vmem:[#allocation5 + $0x30] ss:$24 sps:$4 sm:$0xff]   ;;  %v7560_v60 = vld [vmem:[%s7428_s8 + $0xb8] sm:$0xff] }
  0x96   : > { %1080 = vmatpush1.bf16.msra.mxu0 %v6070_v24  ;;  %1273 = vmatpush1.bf16.msra.mxu1 %v6071_v25  ;;  %v7548_v52 = vld [vmem:[%s7428_s8 + $0xb0] sm:$0xff]  ;;  %v6083_v30 = vld [vmem:[#allocation5 + $0x68] ss:$24 sps:$4 sm:$0xff]  }
  0x97   : > { %1081 = vmatprep.subr.bf16.mxu0 %v6072_v26  ;;  %1274 = vmatprep.subr.bf16.mxu1 %v6074_v27  ;;  %v7580_v26 = vld [vmem:[%s7428_s8 + $0xc8] sm:$0xff]  ;;  %v6078_v27 = vld [vmem:[#allocation5 + $0x64] ss:$24 sps:$4 sm:$0xff]  }
  0x98   : > { %364 = vadd.xlane.f32.xlu0 %v7465_v6  ;;  %366 = vadd.xlane.f32.xlu1 %v7468_v7 }
  0x9a   : > { %1082 = vmatpush1.bf16.msra.mxu0 %v6076_v28  ;;  %1275 = vmatpush1.bf16.msra.mxu1 %v6077_v29  ;;  %v6080_v28 = vld [vmem:[#allocation5 + $0x6c] ss:$24 sps:$4 sm:$0xff]   ;;  %v6082_v29 = vld [vmem:[#allocation5 + $0x60] ss:$24 sps:$4 sm:$0xff]  }
  0x9b   : > { %1083 = vmatprep.subr.bf16.mxu0 %v6078_v27  ;;  %1276 = vmatprep.subr.bf16.mxu1 %v6080_v28  ;;  %v7620_v27 = vld [vmem:[%s7428_s8 + $0xe8] sm:$0xff] }
  0x9c   : > { %368 = vadd.xlane.f32.xlu0 %v7473_v8  ;;  %370 = vadd.xlane.f32.xlu1 %v7476_v9 }
  0x9e   : > { %1084 = vmatpush1.bf16.msra.mxu0 %v6082_v29  ;;  %1277 = vmatpush1.bf16.msra.mxu1 %v6083_v30  ;;  %v6102_v29 = vld [vmem:[#allocation5 + $0x124] ss:$24 sps:$4 sm:$0xff]  }
  0x9f   : > { %v6104_v30 = vld [vmem:[#allocation5 + $0x12c] ss:$24 sps:$4 sm:$0xff]  }
  0xa0   : > { %372 = vadd.xlane.f32.xlu0 %v7481_v10  ;;  %374 = vadd.xlane.f32.xlu1 %v7484_v11 }
  0xa4   : > { %376 = vadd.xlane.f32.xlu0 %v7489_v12  ;;  %378 = vadd.xlane.f32.xlu1 %v7492_v13 }
  0xa8   : > { %380 = vadd.xlane.f32.xlu0 %v7497_v14  ;;  %382 = vadd.xlane.f32.xlu1 %v7500_v15 }
  0xac   : > { %384 = vadd.xlane.f32.xlu0 %v7505_v16  ;;  %386 = vadd.xlane.f32.xlu1 %v7510_v17 }
  0xb0   : > { %388 = vadd.xlane.f32.xlu0 %v7513_v18  ;;  %390 = vadd.xlane.f32.xlu1 %v7516_v19 }
  0xb4   : > { %392 = vadd.xlane.f32.xlu0 %v7523_v20  ;;  %394 = vadd.xlane.f32.xlu1 %v7526_v21 }
 0x119   : > { %v353_v32 = vpop.xlane.xlu0 %352  ;;  %v357_v33 = vpop.xlane.xlu1 %356 }
 0x11a   : > { %v416_v34 = vmul.f32 0.015625, %v353_v32  ;;  %v418_v35 = vmul.f32 0.015625, %v357_v33 }
 0x11c   : > { %v448_v38 = vsub.f32 %v7443_v0, %v416_v34  ;;  %v450_v42 = vsub.f32 %v7446_v1, %v418_v35  ;;  %v7590_v35 = vld [vmem:[%s7428_s8 + $0xd0] sm:$0xff] }
 0x11d   : > { %v355_v39 = vpop.xlane.xlu0 %354  ;;  %v359_v40 = vpop.xlane.xlu1 %358 }
 0x11e   : > { %v417_v41 = vmul.f32 0.015625, %v355_v39  ;;  %v7535_v43 = vmul.f32 %v7530_v37, %v448_v38  ;;  %v419_v44 = vmul.f32 0.015625, %v359_v40  ;;  %v7545_v51 = vmul.f32 %v7530_v37, %v450_v42  ;;  %v6084_v38 = vld [vmem:[#allocation5 + $0x94] ss:$24 sps:$4 sm:$0xff]   ;;  %v6088_v40 = vld [vmem:[#allocation5 + $0x90] ss:$24 sps:$4 sm:$0xff]  }
 0x11f   : > { %v6086_v39 = vld [vmem:[#allocation5 + $0x9c] ss:$24 sps:$4 sm:$0xff]   ;;  %1085 = vmatprep.subr.bf16.mxu0 %v6084_v38 }
 0x120   : > { %v449_v45 = vsub.f32 %v7451_v2, %v417_v41  ;;  %v512_v46 = vmul.f32 %v7535_v43, %v7535_v43  ;;  %v451_v48 = vsub.f32 %v7454_v3, %v419_v44  ;;  %v514_v57 = vmul.f32 %v7545_v51, %v7545_v51  ;;  %v7570_v3 = vld [vmem:[%s7428_s8 + $0xc0] sm:$0xff]  ;;  %v6089_v41 = vld [vmem:[#allocation5 + $0x98] ss:$24 sps:$4 sm:$0xff]   ;;  %1278 = vmatprep.subr.bf16.mxu1 %v6086_v39 }
 0x121   : > { %v361_v47 = vpop.xlane.xlu0 %360  ;;  %v363_v53 = vpop.xlane.xlu1 %362  ;;  %1086 = vmatpush1.bf16.msra.mxu0 %v6088_v40  ;;  %1279 = vmatpush1.bf16.msra.mxu1 %v6089_v41  ;;  %v7631_v40 = vld [vmem:[%s7428_s8 + $0xf0] sm:$0xff] }
 0x122   : > { %544 = vadd.xlane.f32.xlu0 %v512_v46  ;;  %v7542_v49 = vmul.f32 %v7530_v37, %v449_v45  ;;  %v420_v50 = vmul.f32 0.015625, %v361_v47  ;;  %v421_v58 = vmul.f32 0.015625, %v363_v53  ;;  %v7557_v59 = vmul.f32 %v7530_v37, %v451_v48  ;;  %v7600_v46 = vld [vmem:[%s7428_s8 + $0xd8] sm:$0xff] }
 0x123   : > { %v6090_v48 = vld [vmem:[#allocation5 + $0xc4] ss:$24 sps:$4 sm:$0xff]   ;;  %v6094_v53 = vld [vmem:[#allocation5 + $0xc0] ss:$24 sps:$4 sm:$0xff]  }
 0x124   : > { %v513_v54 = vmul.f32 %v7542_v49, %v7542_v49  ;;  %v452_v56 = vsub.f32 %v7459_v4, %v420_v50  ;;  %v453_v63 = vsub.f32 %v7462_v5, %v421_v58  ;;  %v515_v0 = vmul.f32 %v7557_v59, %v7557_v59  ;;  %v6092_v50 = vld [vmem:[#allocation5 + $0xcc] ss:$24 sps:$4 sm:$0xff]   ;;  %1087 = vmatprep.subr.bf16.mxu0 %v6090_v48 }
 0x125   : > { %v365_v55 = vpop.xlane.xlu0 %364  ;;  %v367_v61 = vpop.xlane.xlu1 %366  ;;  %1280 = vmatprep.subr.bf16.mxu1 %v6092_v50  ;;  %1088 = vmatpush1.bf16.msra.mxu0 %v6094_v53 }
 0x126   : > { %396 = vadd.xlane.f32.xlu0 %v7548_v52  ;;  %546 = vadd.xlane.f32.xlu1 %v513_v54  ;;  %v422_v1 = vmul.f32 0.015625, %v365_v55  ;;  %v7567_v2 = vmul.f32 %v7530_v37, %v452_v56  ;;  %v423_v5 = vmul.f32 0.015625, %v367_v61  ;;  %v7577_v25 = vmul.f32 %v7530_v37, %v453_v63  ;;  %v6095_v54 = vld [vmem:[#allocation5 + $0xc8] ss:$24 sps:$4 sm:$0xff]   ;;  %v6098_v63 = vld [vmem:[#allocation5 + $0xfc] ss:$24 sps:$4 sm:$0xff]  }
 0x127   : > { %v7610_v61 = vld [vmem:[%s7428_s8 + $0xe0] sm:$0xff]  ;;  %1281 = vmatpush1.bf16.msra.mxu1 %v6095_v54 }
 0x128   : > { %v454_v23 = vsub.f32 %v7465_v6, %v422_v1  ;;  %v516_v24 = vmul.f32 %v7567_v2, %v7567_v2  ;;  %v455_v6 = vsub.f32 %v7468_v7, %v423_v5  ;;  %v517_v32 = vmul.f32 %v7577_v25, %v7577_v25  ;;  %v6101_v1 = vld [vmem:[#allocation5 + $0xf8] ss:$24 sps:$4 sm:$0xff]   ;;  %1282 = vmatprep.subr.bf16.mxu1 %v6098_v63 }
 0x129   : > { %v369_v62 = vpop.xlane.xlu0 %368  ;;  %v371_v4 = vpop.xlane.xlu1 %370 }
 0x12a   : > { %548 = vadd.xlane.f32.xlu0 %v514_v57  ;;  %398 = vadd.xlane.f32.xlu1 %v7560_v60  ;;  %v424_v33 = vmul.f32 0.015625, %v369_v62  ;;  %v7587_v34 = vmul.f32 %v7530_v37, %v454_v23  ;;  %v425_v44 = vmul.f32 0.015625, %v371_v4  ;;  %v7597_v45 = vmul.f32 %v7530_v37, %v455_v6  ;;  %v6096_v62 = vld [vmem:[#allocation5 + $0xf4] ss:$24 sps:$4 sm:$0xff]   ;;  %v6107_v6 = vld [vmem:[#allocation5 + $0x128] ss:$24 sps:$4 sm:$0xff]  }
 0x12b   : > { %1089 = vmatprep.subr.bf16.mxu0 %v6096_v62  ;;  %1283 = vmatpush1.bf16.msra.mxu1 %v6101_v1 }
 0x12c   : > { %v456_v7 = vsub.f32 %v7473_v8, %v424_v33  ;;  %v518_v42 = vmul.f32 %v7587_v34, %v7587_v34  ;;  %v457_v8 = vsub.f32 %v7476_v9, %v425_v44  ;;  %v519_v56 = vmul.f32 %v7597_v45, %v7597_v45  ;;  %1284 = vmatprep.subr.bf16.mxu1 %v6104_v30  ;;  %v6113_v44 = vld [vmem:[#allocation5 + $0x158] ss:$24 sps:$4 sm:$0xff]  }
 0x12d   : > { %v373_v22 = vpop.xlane.xlu0 %372  ;;  %v375_v31 = vpop.xlane.xlu1 %374 }
 0x12e   : > { %400 = vadd.xlane.f32.xlu0 %v7570_v3  ;;  %550 = vadd.xlane.f32.xlu1 %v515_v0  ;;  %v426_v57 = vmul.f32 0.015625, %v373_v22  ;;  %v7607_v58 = vmul.f32 %v7530_v37, %v456_v7  ;;  %v6100_v0 = vld [vmem:[#allocation5 + $0xf0] ss:$24 sps:$4 sm:$0xff]   ;;  %v427_v4 = vmul.f32 0.015625, %v375_v31  ;;  %v7617_v5 = vmul.f32 %v7530_v37, %v457_v8  ;;  %v6106_v31 = vld [vmem:[#allocation5 + $0x120] ss:$24 sps:$4 sm:$0xff]  }
 0x12f   : > { %1090 = vmatpush1.bf16.msra.mxu0 %v6100_v0  ;;  %1285 = vmatpush1.bf16.msra.mxu1 %v6107_v6  ;;  %v6110_v7 = vld [vmem:[#allocation5 + $0x15c] ss:$24 sps:$4 sm:$0xff]  }
 0x130   : > { %v458_v9 = vsub.f32 %v7481_v10, %v426_v57  ;;  %v520_v22 = vmul.f32 %v7607_v58, %v7607_v58  ;;  %1091 = vmatprep.subr.bf16.mxu0 %v6102_v29  ;;  %1286 = vmatprep.subr.bf16.mxu1 %v6110_v7 }
 0x131   : > { %v377_v36 = vpop.xlane.xlu0 %376  ;;  %v379_v47 = vpop.xlane.xlu1 %378 }
 0x132   : > { %402 = vadd.xlane.f32.xlu1 %v7580_v26  ;;  %552 = vadd.xlane.f32.xlu0 %v516_v24  ;;  %v428_v24 = vmul.f32 0.015625, %v377_v36  ;;  %v429_v10 = vmul.f32 0.015625, %v379_v47  ;;  %v521_v36 = vmul.f32 %v7617_v5, %v7617_v5  ;;  %v7628_v39 = vmul.f32 %v7530_v37, %v458_v9 }
 0x133   : > { %1092 = vmatpush1.bf16.msra.mxu0 %v6106_v31  ;;  %1287 = vmatpush1.bf16.msra.mxu1 %v6113_v44 }
 0x134   : > { %v460_v33 = vsub.f32 %v7489_v12, %v428_v24  ;;  %v461_v47 = vsub.f32 %v7492_v13, %v429_v10  ;;  %v522_v54 = vmul.f32 %v7628_v39, %v7628_v39  ;;  %v7645_v13 = vld [vmem:[%s7428_s8 + $0xf8] sm:$0xff]  ;;  %s7110_s8 = scalar_lea.vmem %s7109_s17, 8192 }
 0x135   : > { %v381_v55 = vpop.xlane.xlu0 %380  ;;  %v383_v23 = vpop.xlane.xlu1 %382  ;;  %p7112_p2 = scmp.lt.s32.totalorder %s7110_s8, %s7104_s12 }
 0x136   : > { %554 = vadd.xlane.f32.xlu1 %v517_v32  ;;  %404 = vadd.xlane.f32.xlu0 %v7590_v35  ;;  %v459_v32 = vsub.f32 %v7484_v11, %v427_v4  ;;  %v430_v38 = vmul.f32 0.015625, %v381_v55  ;;  %v6108_v11 = vld [vmem:[#allocation5 + $0x154] ss:$24 sps:$4 sm:$0xff]   ;;  %v431_v12 = vmul.f32 0.015625, %v383_v23  ;;  %v7642_v8 = vmul.f32 %v7530_v37, %v460_v33 }
 0x137   : > { %1093 = vmatprep.subr.bf16.mxu0 %v6108_v11  ;;  %v7653_v63 = vmul.f32 %v7530_v37, %v461_v47  ;;  %p7113_p1 = por %p7112_p2, %p7111_p12 }
 0x138   : > { %v7635_v48 = vmul.f32 %v7530_v37, %v459_v32  ;;  %v462_v53 = vsub.f32 %v7497_v14, %v430_v38  ;;  %v463_v57 = vsub.f32 %v7500_v15, %v431_v12  ;;  %v524_v4 = vmul.f32 %v7642_v8, %v7642_v8 }
 0x139   : > { %v385_v28 = vpop.xlane.xlu0 %384  ;;  %v387_v41 = vpop.xlane.xlu1 %386  ;;  %v525_v24 = vmul.f32 %v7653_v63, %v7653_v63  ;;  %p7114_p4 = pnand %p7113_p1, %p7107_p7 }
 0x13a   : > { %406 = vadd.xlane.f32.xlu1 %v7600_v46  ;;  %556 = vadd.xlane.f32.xlu0 %v518_v42  ;;  %v6112_v42 = vld [vmem:[#allocation5 + $0x150] ss:$24 sps:$4 sm:$0xff]   ;;  %v432_v55 = vmul.f32 0.015625, %v385_v28  ;;  %v523_v14 = vmul.f32 %v7635_v48, %v7635_v48  ;;  %v433_v62 = vmul.f32 0.015625, %v387_v41  ;;  %v7660_v9 = vmul.f32 %v7530_v37, %v462_v53 }
 0x13b   : > { %1094 = vmatpush1.bf16.msra.mxu0 %v6112_v42  ;;  %v7666_v29 = vmul.f32 %v7530_v37, %v463_v57 }
 0x13c   : > { %v464_v1 = vsub.f32 %v7505_v16, %v432_v55  ;;  %v526_v30 = vmul.f32 %v7660_v9, %v7660_v9 }
 0x13d   : > { %v389_v50 = vpop.xlane.xlu0 %388  ;;  %v391_v0 = vpop.xlane.xlu1 %390  ;;  %v527_v10 = vmul.f32 %v7666_v29, %v7666_v29 }
 0x13e   : > { %558 = vadd.xlane.f32.xlu1 %v519_v56  ;;  %408 = vadd.xlane.f32.xlu0 %v7610_v61  ;;  %v10817_v56 = vmov 0   ;;  %v434_v23 = vmul.f32 0.015625, %v389_v50  ;;  %v435_v28 = vmul.f32 0.015625, %v391_v0  ;;  %v7672_v6 = vmul.f32 %v7530_v37, %v464_v1  ;;  %v6116_v50 = vld [vmem:[#allocation5 + $0x14] ss:$24 sps:$4 sm:$0xff]  }
 0x13f   : > { %1111 = vmatprep.mubr.bf16.mxu0 %v10817_v56  ;;  %1304 = vmatprep.mubr.bf16.mxu1 %v10817_v56 }
 0x140   : > { %v466_v16 = vsub.f32 %v7513_v18, %v434_v23  ;;  %1465 = vmatprep.subr.bf16.mxu0 %v6116_v50 }
 0x141   : > { %v393_v15 = vpop.xlane.xlu0 %392  ;;  %v395_v32 = vpop.xlane.xlu1 %394 }
 0x142   : > { %410 = vadd.xlane.f32.xlu1 %v7620_v27  ;;  %560 = vadd.xlane.f32.xlu0 %v520_v22  ;;  %v465_v22 = vsub.f32 %v7510_v17, %v433_v62  ;;  %v436_v31 = vmul.f32 0.015625, %v393_v15  ;;  %v467_v17 = vsub.f32 %v7516_v19, %v435_v28  ;;  %v437_v38 = vmul.f32 0.015625, %v395_v32 }
 0x143   : > { %v7684_v41 = vmul.f32 %v7530_v37, %v466_v16 }
 0x144   : > { %v7678_v33 = vmul.f32 %v7530_v37, %v465_v22  ;;  %v468_v18 = vsub.f32 %v7523_v20, %v436_v31  ;;  %v7689_v11 = vmul.f32 %v7530_v37, %v467_v17  ;;  %v469_v7 = vsub.f32 %v7526_v21, %v437_v38 }
 0x145   : > { %v530_v20 = vmul.f32 %v7684_v41, %v7684_v41 }
 0x146   : > { %562 = vadd.xlane.f32.xlu1 %v521_v36  ;;  %412 = vadd.xlane.f32.xlu0 %v7631_v40  ;;  %v528_v36 = vmul.f32 %v7672_v6, %v7672_v6  ;;  %v529_v19 = vmul.f32 %v7678_v33, %v7678_v33  ;;  %v7695_v42 = vmul.f32 %v7530_v37, %v468_v18 }
 0x147   : > { %v531_v44 = vmul.f32 %v7689_v11, %v7689_v11  ;;  %v7702_v12 = vmul.f32 %v7530_v37, %v469_v7 }
 0x148   : > { %v532_v47 = vmul.f32 %v7695_v42, %v7695_v42 }
 0x149   : > { %v533_v21 = vmul.f32 %v7702_v12, %v7702_v12 }
 0x14a   : > { %414 = vadd.xlane.f32.xlu1 %v7645_v13  ;;  %564 = vadd.xlane.f32.xlu0 %v522_v54 }
 0x14e   : > { %566 = vadd.xlane.f32.xlu1 %v523_v14  ;;  %568 = vadd.xlane.f32.xlu0 %v524_v4 }
 0x152   : > { %570 = vadd.xlane.f32.xlu1 %v525_v24  ;;  %572 = vadd.xlane.f32.xlu0 %v526_v30 }
 0x156   : > { %574 = vadd.xlane.f32.xlu1 %v527_v10  ;;  %576 = vadd.xlane.f32.xlu0 %v528_v36 }
 0x15a   : > { %578 = vadd.xlane.f32.xlu1 %v529_v19  ;;  %580 = vadd.xlane.f32.xlu0 %v530_v20 }
 0x15e   : > { %582 = vadd.xlane.f32.xlu1 %v531_v44  ;;  %584 = vadd.xlane.f32.xlu0 %v532_v47 }
 0x162   : > { %586 = vadd.xlane.f32.xlu1 %v533_v21 }
 0x1af   : > { %v545_v53 = vpop.xlane.xlu0 %544 }
 0x1b0   : > { %v608_v54 = vmul.f32 0.015625, %v545_v53 }
 0x1b2   : > { %v640_v55 = vadd.f32 1e-05, %v608_v54 }
 0x1b3   : > { %v547_v57 = vpop.xlane.xlu1 %546  ;;  %v397_v14 = vpop.xlane.xlu0 %396 }
 0x1b4   : > { %6154 = vrsqrt.f32 %v640_v55  ;;  %v609_v62 = vmul.f32 0.015625, %v547_v57  ;;  %v438_v0 = vmul.f32 0.015625, %v397_v14  ;;  %v7729_v57 = vld [vmem:[%s10806_s1] ss:$0 sm:$0xff] }
 0x1b6   : > { %v641_v1 = vadd.f32 1e-05, %v609_v62  ;;  %v470_v4 = vsub.f32 %v7548_v52, %v438_v0 }
 0x1b7   : > { %v399_v23 = vpop.xlane.xlu1 %398  ;;  %v549_v15 = vpop.xlane.xlu0 %548 }
 0x1b8   : > { %6156 = vrsqrt.f32 %v641_v1  ;;  %v439_v22 = vmul.f32 0.015625, %v399_v23  ;;  %v610_v24 = vmul.f32 0.015625, %v549_v15  ;;  %v7708_v28 = vmul.f32 %v7530_v37, %v470_v4 }
 0x1ba   : > { %v471_v16 = vsub.f32 %v7560_v60, %v439_v22  ;;  %v642_v30 = vadd.f32 1e-05, %v610_v24  ;;  %v534_v31 = vmul.f32 %v7708_v28, %v7708_v28 }
 0x1bb   : > { %v551_v32 = vpop.xlane.xlu1 %550  ;;  %v401_v17 = vpop.xlane.xlu0 %400 }
 0x1bc   : > { %6158 = vrsqrt.f32 %v642_v30  ;;  %v611_v10 = vmul.f32 0.015625, %v551_v32  ;;  %v440_v18 = vmul.f32 0.015625, %v401_v17  ;;  %588 = vadd.xlane.f32.xlu0 %v534_v31  ;;  %v7714_v52 = vmul.f32 %v7530_v37, %v471_v16  ;;  %v6114_v32 = vld [vmem:[#allocation5 + $0x10] ss:$24 sps:$4 sm:$0xff]  }
 0x1be   : > { %v6155_v36 = vpop.eup %6154  ;;  %v643_v38 = vadd.f32 1e-05, %v611_v10  ;;  %v472_v19 = vsub.f32 %v7570_v3, %v440_v18  ;;  %v535_v60 = vmul.f32 %v7714_v52, %v7714_v52 }
 0x1bf   : > { %v403_v7 = vpop.xlane.xlu1 %402  ;;  %v553_v20 = vpop.xlane.xlu0 %552  ;;  %v704_v50 = vmul.f32 %v6155_v36, %v7535_v43  ;;  %v6119_v36 = vld [vmem:[#allocation5 + $0x44] ss:$24 sps:$4 sm:$0xff]  }
 0x1c0   : > { %6160 = vrsqrt.f32 %v643_v38  ;;  %v441_v44 = vmul.f32 0.015625, %v403_v7  ;;  %v612_v47 = vmul.f32 0.015625, %v553_v20  ;;  %590 = vadd.xlane.f32.xlu1 %v535_v60  ;;  %v7720_v21 = vmul.f32 %v7530_v37, %v472_v19 }
 0x1c2   : > { %v6157_v53 = vpop.eup %6156  ;;  %v473_v54 = vsub.f32 %v7580_v26, %v441_v44  ;;  %v644_v55 = vadd.f32 1e-05, %v612_v47  ;;  %v536_v3 = vmul.f32 %v7720_v21, %v7720_v21  ;;  %v743_v26 = vmul.f32 %v7729_v57, %v704_v50  ;;  %v6117_v50 = vld [vmem:[#allocation5 + $0x40] ss:$24 sps:$4 sm:$0xff]  }
 0x1c3   : > { %v555_v14 = vpop.xlane.xlu1 %554  ;;  %v405_v62 = vpop.xlane.xlu0 %404  ;;  %v705_v0 = vmul.f32 %v6157_v53, %v7542_v49 }
 0x1c4   : > { %6162 = vrsqrt.f32 %v644_v55  ;;  %v613_v1 = vmul.f32 0.015625, %v555_v14  ;;  %v442_v4 = vmul.f32 0.015625, %v405_v62  ;;  %592 = vadd.xlane.f32.xlu0 %v536_v3  ;;  %v7733_v43 = vmul.f32 %v7530_v37, %v473_v54  ;;  %v6122_v54 = vld [vmem:[#allocation5 + $0x74] ss:$24 sps:$4 sm:$0xff]  }
 0x1c5   : > { %v744_v23 = vmul.f32 %v7729_v57, %v705_v0 }
 0x1c6   : > { %v6159_v15 = vpop.eup %6158  ;;  %v645_v22 = vadd.f32 1e-05, %v613_v1  ;;  %v474_v24 = vsub.f32 %v7590_v35, %v442_v4  ;;  %v537_v16 = vmul.f32 %v7733_v43, %v7733_v43 }
 0x1c7   : > { %v407_v30 = vpop.xlane.xlu1 %406  ;;  %v557_v49 = vpop.xlane.xlu0 %556  ;;  %v7740_v31 = vpack.c.bf16 %v744_v23, %v743_v26  ;;  %v706_v35 = vmul.f32 %v6159_v15, %v7545_v51  ;;  %v6120_v23 = vld [vmem:[#allocation5 + $0x70] ss:$24 sps:$4 sm:$0xff]  }
 0x1c8   : > { %6164 = vrsqrt.f32 %v645_v22  ;;  %v443_v17 = vmul.f32 0.015625, %v407_v30  ;;  %v614_v10 = vmul.f32 0.015625, %v557_v49  ;;  %594 = vadd.xlane.f32.xlu1 %v537_v16  ;;  %v7743_v18 = vmul.f32 %v7530_v37, %v474_v24  ;;  %v6125_v16 = vld [vmem:[#allocation5 + $0xa4] ss:$24 sps:$4 sm:$0xff]  }
 0x1c9   : > { %1112 = vmatmul.mubr.bf16.vlgmr.msra.gmra.mrb[0].mxu0 %v7740_v31  ;;  %1305 = vmatmul.mubr.bf16.vlgmr.msra.gmra.mrb[0].mxu1 %v7740_v31  ;;  %v745_v55 = vmul.f32 %v7729_v57, %v706_v35 }
 0x1ca   : > { %v6161_v38 = vpop.eup %6160  ;;  %v475_v19 = vsub.f32 %v7600_v46, %v443_v17  ;;  %v646_v60 = vadd.f32 1e-05, %v614_v10  ;;  %v538_v7 = vmul.f32 %v7743_v18, %v7743_v18  ;;  %1121 = vmatprep.mubr.bf16.mxu0 %v10817_v56  ;;  %1314 = vmatprep.mubr.bf16.mxu1 %v10817_v56 }
 0x1cb   : > { %v559_v20 = vpop.xlane.xlu1 %558  ;;  %v409_v44 = vpop.xlane.xlu0 %408  ;;  %v707_v47 = vmul.f32 %v6161_v38, %v7557_v59  ;;  %1466 = vmatpush1.bf16.msra.mxu0 %v6114_v32  ;;  %v6123_v38 = vld [vmem:[#allocation5 + $0xa0] ss:$24 sps:$4 sm:$0xff]  }
 0x1cc   : > { %6166 = vrsqrt.f32 %v646_v60  ;;  %v615_v53 = vmul.f32 0.015625, %v559_v20  ;;  %v444_v51 = vmul.f32 0.015625, %v409_v44  ;;  %596 = vadd.xlane.f32.xlu0 %v538_v7  ;;  %v7755_v46 = vmul.f32 %v7530_v37, %v475_v19  ;;  %1467 = vmatprep.subr.bf16.mxu0 %v6119_v36  ;;  %v6128_v60 = vld [vmem:[#allocation5 + $0xd4] ss:$24 sps:$4 sm:$0xff]  }
 0x1cd   : > { %v746_v3 = vmul.f32 %v7729_v57, %v707_v47 }
 0x1ce   : > { %v6163_v14 = vpop.eup %6162  ;;  %v647_v62 = vadd.f32 1e-05, %v615_v53  ;;  %v476_v0 = vsub.f32 %v7610_v61, %v444_v51  ;;  %v539_v59 = vmul.f32 %v7755_v46, %v7755_v46 }
 0x1cf   : > { %v411_v1 = vpop.xlane.xlu1 %410  ;;  %v561_v4 = vpop.xlane.xlu0 %560  ;;  %v7762_v26 = vpack.c.bf16 %v746_v3, %v745_v55  ;;  %1468 = vmatpush1.bf16.msra.mxu0 %v6117_v50  ;;  %v708_v61 = vmul.f32 %v6163_v14, %v7567_v2  ;;  %v6126_v55 = vld [vmem:[#allocation5 + $0xd0] ss:$24 sps:$4 sm:$0xff]  }
 0x1d0   : > { %6168 = vrsqrt.f32 %v647_v62  ;;  %v445_v15 = vmul.f32 0.015625, %v411_v1  ;;  %v616_v22 = vmul.f32 0.015625, %v561_v4  ;;  %598 = vadd.xlane.f32.xlu1 %v539_v59  ;;  %v7765_v24 = vmul.f32 %v7530_v37, %v476_v0  ;;  %1469 = vmatprep.subr.bf16.mxu0 %v6122_v54 }
 0x1d1   : > { %1122 = vmatmul.mubr.bf16.gmra.mrb[4].mxu0 %v7762_v26  ;;  %1315 = vmatmul.mubr.bf16.gmra.mrb[4].mxu1 %v7762_v26  ;;  %v747_v7 = vmul.f32 %v7729_v57, %v708_v61 }
 0x1d2   : > { %v6165_v30 = vpop.eup %6164  ;;  %v477_v49 = vsub.f32 %v7620_v27, %v445_v15  ;;  %v648_v32 = vadd.f32 1e-05, %v616_v22  ;;  %v540_v17 = vmul.f32 %v7765_v24, %v7765_v24  ;;  %1131 = vmatprep.mubr.bf16.mxu0 %v10817_v56  ;;  %1324 = vmatprep.mubr.bf16.mxu1 %v10817_v56 }
 0x1d3   : > { %v563_v10 = vpop.xlane.xlu1 %562  ;;  %v413_v36 = vpop.xlane.xlu0 %412  ;;  %v709_v35 = vmul.f32 %v6165_v30, %v7577_v25  ;;  %1470 = vmatpush1.bf16.msra.mxu0 %v6120_v23 }
 0x1d4   : > { %6170 = vrsqrt.f32 %v648_v32  ;;  %v617_v19 = vmul.f32 0.015625, %v563_v10  ;;  %v446_v2 = vmul.f32 0.015625, %v413_v36  ;;  %600 = vadd.xlane.f32.xlu0 %v540_v17  ;;  %v7777_v27 = vmul.f32 %v7530_v37, %v477_v49  ;;  %1471 = vmatprep.subr.bf16.mxu0 %v6125_v16 }
 0x1d5   : > { %v748_v20 = vmul.f32 %v7729_v57, %v709_v35 }
 0x1d6   : > { %v6167_v44 = vpop.eup %6166  ;;  %v649_v47 = vadd.f32 1e-05, %v617_v19  ;;  %v478_v50 = vsub.f32 %v7631_v40, %v446_v2  ;;  %v541_v25 = vmul.f32 %v7777_v27, %v7777_v27 }
 0x1d7   : > { %v415_v53 = vpop.xlane.xlu1 %414  ;;  %v565_v51 = vpop.xlane.xlu0 %564  ;;  %v7784_v54 = vpack.c.bf16 %v748_v20, %v747_v7  ;;  %1472 = vmatpush1.bf16.msra.mxu0 %v6123_v38  ;;  %v710_v40 = vmul.f32 %v6167_v44, %v7587_v34  ;;  %v6129_v7 = vld [vmem:[#allocation5 + $0x100] ss:$24 sps:$4 sm:$0xff]  }
 0x1d8   : > { %6172 = vrsqrt.f32 %v649_v47  ;;  %v447_v3 = vmul.f32 0.015625, %v415_v53  ;;  %v618_v14 = vmul.f32 0.015625, %v565_v51  ;;  %602 = vadd.xlane.f32.xlu1 %v541_v25  ;;  %v7787_v62 = vmul.f32 %v7530_v37, %v478_v50  ;;  %1473 = vmatprep.subr.bf16.mxu0 %v6128_v60  ;;  %v6131_v47 = vld [vmem:[#allocation5 + $0x104] ss:$24 sps:$4 sm:$0xff]  }
 0x1d9   : > { %1132 = vmatmul.mubr.bf16.gmra.mrb[8].mxu0 %v7784_v54  ;;  %1325 = vmatmul.mubr.bf16.gmra.mrb[8].mxu1 %v7784_v54 }
 0x1da   : > { %v6169_v0 = vpop.eup %6168  ;;  %v479_v59 = vsub.f32 %v7645_v13, %v447_v3  ;;  %v650_v1 = vadd.f32 1e-05, %v618_v14  ;;  %v542_v4 = vmul.f32 %v7787_v62, %v7787_v62  ;;  %1141 = vmatprep.mubr.bf16.mxu0 %v10817_v56  ;;  %1334 = vmatprep.mubr.bf16.mxu1 %v10817_v56  ;;  %v749_v13 = vmul.f32 %v7729_v57, %v710_v40 }
 0x1db   : > { %v567_v23 = vpop.xlane.xlu1 %566  ;;  %v569_v15 = vpop.xlane.xlu0 %568  ;;  %v711_v22 = vmul.f32 %v6169_v0, %v7597_v45  ;;  %1474 = vmatpush1.bf16.msra.mxu0 %v6126_v55 }
 0x1dc   : > { %6174 = vrsqrt.f32 %v650_v1  ;;  %v619_v16 = vmul.f32 0.015625, %v567_v23  ;;  %v620_v61 = vmul.f32 0.015625, %v569_v15  ;;  %604 = vadd.xlane.f32.xlu0 %v542_v4  ;;  %v7799_v34 = vmul.f32 %v7530_v37, %v479_v59  ;;  %1475 = vmatprep.subr.bf16.mxu0 %v6131_v47 }
 0x1dd   : > { %v750_v30 = vmul.f32 %v7729_v57, %v711_v22 }
 0x1de   : > { %v6171_v49 = vpop.eup %6170  ;;  %v651_v32 = vadd.f32 1e-05, %v619_v16  ;;  %v543_v17 = vmul.f32 %v7799_v34, %v7799_v34  ;;  %v652_v10 = vadd.f32 1e-05, %v620_v61 }
 0x1df   : > { %v571_v36 = vpop.xlane.xlu1 %570  ;;  %v7805_v45 = vpack.c.bf16 %v750_v30, %v749_v13  ;;  %v573_v38 = vpop.xlane.xlu0 %572  ;;  %v712_v19 = vmul.f32 %v6171_v49, %v7607_v58  ;;  %1476 = vmatpush1.bf16.msra.mxu0 %v6129_v7 }
 0x1e0   : > { %6176 = vrsqrt.f32 %v651_v32  ;;  %v621_v35 = vmul.f32 0.015625, %v571_v36  ;;  %606 = vadd.xlane.f32.xlu1 %v543_v17  ;;  %v622_v50 = vmul.f32 0.015625, %v573_v38  ;;  %v6132_v36 = vld [vmem:[#allocation5 + $0x130] ss:$24 sps:$4 sm:$0xff]  }
 0x1e1   : > { %1142 = vmatmul.mubr.bf16.gmra.mrb[12].mxu0 %v7805_v45  ;;  %1335 = vmatmul.mubr.bf16.gmra.mrb[12].mxu1 %v7805_v45  ;;  %6178 = vrsqrt.f32 %v652_v10  ;;  %v751_v53 = vmul.f32 %v7729_v57, %v712_v19 }
 0x1e2   : > { %v6173_v2 = vpop.eup %6172  ;;  %v653_v60 = vadd.f32 1e-05, %v621_v35  ;;  %1151 = vmatprep.mubr.bf16.mxu0 %v10817_v56  ;;  %1344 = vmatprep.mubr.bf16.mxu1 %v10817_v56  ;;  %v654_v40 = vadd.f32 1e-05, %v622_v50  ;;  %v6134_v35 = vld [vmem:[#allocation5 + $0x134] ss:$24 sps:$4 sm:$0xff]  }
 0x1e3   : > { %v575_v20 = vpop.xlane.xlu1 %574  ;;  %v713_v44 = vmul.f32 %v6173_v2, %v7617_v5  ;;  %v577_v0 = vpop.xlane.xlu0 %576  ;;  %1477 = vmatprep.subr.bf16.mxu0 %v6134_v35 }
 0x1e4   : > { %6180 = vrsqrt.f32 %v653_v60  ;;  %v623_v25 = vmul.f32 0.015625, %v575_v20  ;;  %v624_v23 = vmul.f32 0.015625, %v577_v0  ;;  %1478 = vmatpush1.bf16.msra.mxu0 %v6132_v36 }
 0x1e5   : > { %v752_v51 = vmul.f32 %v7729_v57, %v713_v44 }
 0x1e6   : > { %v6175_v58 = vpop.eup %6174  ;;  %v655_v55 = vadd.f32 1e-05, %v623_v25  ;;  %v656_v32 = vadd.f32 1e-05, %v624_v23 }
 0x1e7   : > { %v579_v3 = vpop.xlane.xlu1 %578  ;;  %v7815_v14 = vpack.c.bf16 %v752_v51, %v751_v53  ;;  %v714_v5 = vmul.f32 %v6175_v58, %v7628_v39  ;;  %v581_v17 = vpop.xlane.xlu0 %580  ;;  %v6135_v58 = vld [vmem:[#allocation5 + $0x160] ss:$24 sps:$4 sm:$0xff]  }
 0x1e8   : > { %6182 = vrsqrt.f32 %v655_v55  ;;  %v625_v1 = vmul.f32 0.015625, %v579_v3  ;;  %v6137_v55 = vld [vmem:[#allocation5 + $0x164] ss:$24 sps:$4 sm:$0xff]  }
 0x1e9   : > { %1152 = vmatmul.mubr.bf16.gmra.mrb[16].mxu0 %v7815_v14  ;;  %1345 = vmatmul.mubr.bf16.gmra.mrb[16].mxu1 %v7815_v14  ;;  %6184 = vrsqrt.f32 %v654_v40  ;;  %v753_v22 = vmul.f32 %v7729_v57, %v714_v5 }
 0x1ea   : > { %v6177_v59 = vpop.eup %6176  ;;  %1161 = vmatprep.mubr.bf16.mxu0 %v10817_v56  ;;  %1354 = vmatprep.mubr.bf16.mxu1 %v10817_v56  ;;  %v657_v13 = vadd.f32 1e-05, %v625_v1 }
 0x1eb   : > { %v715_v4 = vmul.f32 %v6177_v59, %v7635_v48  ;;  %v6179_v15 = vpop.eup %6178  ;;  %v583_v30 = vpop.xlane.xlu1 %582  ;;  %1479 = vmatprep.subr.bf16.mxu0 %v6137_v55 }
 0x1ec   : > { %v716_v48 = vmul.f32 %v6179_v15, %v7642_v8  ;;  %6186 = vrsqrt.f32 %v657_v13  ;;  %v627_v10 = vmul.f32 0.015625, %v583_v30  ;;  %v585_v50 = vpop.xlane.xlu0 %584  ;;  %1480 = vmatpush1.bf16.msra.mxu0 %v6135_v58 }
 0x1ed   : > { %v754_v16 = vmul.f32 %v7729_v57, %v715_v4  ;;  %6188 = vrsqrt.f32 %v656_v32 }
 0x1ee   : > { %v6181_v61 = vpop.eup %6180  ;;  %v755_v2 = vmul.f32 %v7729_v57, %v716_v48  ;;  %v659_v7 = vadd.f32 1e-05, %v627_v10 }
 0x1ef   : > { %v7825_v39 = vpack.c.bf16 %v754_v16, %v753_v22  ;;  %v717_v49 = vmul.f32 %v6181_v61, %v7653_v63  ;;  %v626_v63 = vmul.f32 0.015625, %v581_v17  ;;  %v587_v8 = vpop.xlane.xlu1 %586 }
 0x1f0   : > { %6190 = vrsqrt.f32 %v659_v7  ;;  %v629_v53 = vmul.f32 0.015625, %v587_v8 }
 0x1f1   : > { %1162 = vmatmul.mubr.bf16.gmra.mrb[20].mxu0 %v7825_v39  ;;  %1355 = vmatmul.mubr.bf16.gmra.mrb[20].mxu1 %v7825_v39  ;;  %v756_v38 = vmul.f32 %v7729_v57, %v717_v49  ;;  %v658_v47 = vadd.f32 1e-05, %v626_v63 }
 0x1f2   : > { %1171 = vmatprep.mubr.bf16.mxu0 %v10817_v56  ;;  %1364 = vmatprep.mubr.bf16.mxu1 %v10817_v56  ;;  %v6183_v19 = vpop.eup %6182  ;;  %v661_v5 = vadd.f32 1e-05, %v629_v53 }
 0x1f3   : > { %v6185_v60 = vpop.eup %6184  ;;  %v7835_v20 = vpack.c.bf16 %v756_v38, %v755_v2  ;;  %v719_v44 = vmul.f32 %v6183_v19, %v7666_v29  ;;  %6192 = vrsqrt.f32 %v658_v47  ;;  %v628_v29 = vmul.f32 0.015625, %v585_v50 }
 0x1f4   : > { %v718_v25 = vmul.f32 %v6185_v60, %v7660_v9  ;;  %6194 = vrsqrt.f32 %v661_v5 }
 0x1f5   : > { %v758_v51 = vmul.f32 %v7729_v57, %v719_v44  ;;  %v660_v1 = vadd.f32 1e-05, %v628_v29 }
 0x1f6   : > { %v6187_v3 = vpop.eup %6186  ;;  %v757_v40 = vmul.f32 %v7729_v57, %v718_v25 }
 0x1f7   : > { %v6189_v0 = vpop.eup %6188  ;;  %v721_v59 = vmul.f32 %v6187_v3, %v7678_v33  ;;  %6196 = vrsqrt.f32 %v660_v1 }
 0x1f8   : > { %v7845_v9 = vpack.c.bf16 %v758_v51, %v757_v40  ;;  %v720_v4 = vmul.f32 %v6189_v0, %v7672_v6 }
 0x1f9   : > { %1172 = vmatmul.mubr.bf16.gmra.mrb[24].mxu0 %v7835_v20  ;;  %1365 = vmatmul.mubr.bf16.gmra.mrb[24].mxu1 %v7835_v20  ;;  %v760_v23 = vmul.f32 %v7729_v57, %v721_v59 }
 0x1fa   : > { %1181 = vmatprep.mubr.bf16.mxu0 %v10817_v56  ;;  %1374 = vmatprep.mubr.bf16.mxu1 %v10817_v56  ;;  %v6191_v15 = vpop.eup %6190  ;;  %v759_v22 = vmul.f32 %v7729_v57, %v720_v4 }
 0x1fb   : > { %v723_v61 = vmul.f32 %v6191_v15, %v7689_v11 }
 0x1fc   : > { %v7855_v33 = vpack.c.bf16 %v760_v23, %v759_v22 }
 0x1fd   : > { %v6193_v16 = vpop.eup %6192  ;;  %v762_v13 = vmul.f32 %v7729_v57, %v723_v61 }
 0x1fe   : > { %v722_v6 = vmul.f32 %v6193_v16, %v7684_v41  ;;  %v6195_v30 = vpop.eup %6194 }
 0x1ff   : > { %v725_v11 = vmul.f32 %v6195_v30, %v7702_v12 }
 0x200   : > { %v761_v49 = vmul.f32 %v7729_v57, %v722_v6 }
 0x201   : > { %1182 = vmatmul.mubr.bf16.gmra.mrb[28].mxu0 %v7845_v9  ;;  %1375 = vmatmul.mubr.bf16.gmra.mrb[28].mxu1 %v7845_v9  ;;  %v6197_v32 = vpop.eup %6196  ;;  %v764_v48 = vmul.f32 %v7729_v57, %v725_v11  ;;  %v1659_v11 = vld [vmem:[#allocation8 + $0x8] sm:$0xff] }
 0x202   : > { %1191 = vmatprep.mubr.bf16.mxu0 %v10817_v56  ;;  %1384 = vmatprep.mubr.bf16.mxu1 %v10817_v56  ;;  %v7865_v17 = vpack.c.bf16 %v762_v13, %v761_v49  ;;  %v724_v41 = vmul.f32 %v6197_v32, %v7695_v42 }
 0x204   : > { %v763_v10 = vmul.f32 %v7729_v57, %v724_v41  ;;  %v1661_v41 = vld [vmem:[#allocation8 + $0x18] sm:$0xff] }
 0x206   : > { %v7875_v36 = vpack.c.bf16 %v764_v48, %v763_v10 }
 0x209   : > { %1192 = vmatmul.mubr.bf16.gmra.mrb[32].mxu0 %v7855_v33  ;;  %1385 = vmatmul.mubr.bf16.gmra.mrb[32].mxu1 %v7855_v33 }
 0x20a   : > { %1201 = vmatprep.mubr.bf16.mxu0 %v10817_v56  ;;  %1394 = vmatprep.mubr.bf16.mxu1 %v10817_v56 }
 0x211   : > { %1202 = vmatmul.mubr.bf16.gmra.mrb[36].mxu0 %v7865_v17  ;;  %1395 = vmatmul.mubr.bf16.gmra.mrb[36].mxu1 %v7865_v17 }
 0x212   : > { %1211 = vmatprep.mubr.bf16.mxu0 %v10817_v56  ;;  %1404 = vmatprep.mubr.bf16.mxu1 %v10817_v56 }
 0x219   : > { %1212 = vmatmul.mubr.bf16.gmra.mrb[40].mxu0 %v7875_v36  ;;  %1405 = vmatmul.mubr.bf16.gmra.mrb[40].mxu1 %v7875_v36 }
 0x21a   : > { %1221 = vmatprep.mubr.bf16.mxu0 %v10817_v56  ;;  %1414 = vmatprep.mubr.bf16.mxu1 %v10817_v56 }
 0x249   : > { %v589_v12 = vpop.xlane.xlu0 %588 }
 0x24a   : > { %v630_v42 = vmul.f32 0.015625, %v589_v12  ;;  %v5497_v12 = vpack.c.bf16 %v1661_v41, %v1659_v11 }
 0x24c   : > { %v662_v35 = vadd.f32 1e-05, %v630_v42  ;;  %v1660_v42 = vld [vmem:[#allocation8 + $0x10] sm:$0xff]  ;;  %5562 = vmatprep.subr.bf16.mxu0 %v5497_v12  ;;  %5498 = vmatprep.subr.bf16.mxu1 %v5497_v12  ;;  %v1677_v12 = vld [vmem:[#allocation8 + $0x98] sm:$0xff] }
 0x24d   : > { %v591_v38 = vpop.xlane.xlu1 %590 }
 0x24e   : > { %6198 = vrsqrt.f32 %v662_v35  ;;  %v631_v19 = vmul.f32 0.015625, %v591_v38 }
 0x250   : > { %v663_v63 = vadd.f32 1e-05, %v631_v19 }
 0x251   : > { %v593_v2 = vpop.xlane.xlu0 %592 }
 0x252   : > { %6200 = vrsqrt.f32 %v663_v63  ;;  %v632_v60 = vmul.f32 0.015625, %v593_v2 }
 0x254   : > { %v664_v7 = vadd.f32 1e-05, %v632_v60 }
 0x255   : > { %v595_v8 = vpop.xlane.xlu1 %594 }
 0x256   : > { %6202 = vrsqrt.f32 %v664_v7  ;;  %v633_v44 = vmul.f32 0.015625, %v595_v8 }
 0x258   : > { %v6199_v47 = vpop.eup %6198  ;;  %v665_v50 = vadd.f32 1e-05, %v633_v44 }
 0x259   : > { %v597_v25 = vpop.xlane.xlu0 %596  ;;  %v726_v51 = vmul.f32 %v6199_v47, %v7708_v28 }
 0x25a   : > { %6204 = vrsqrt.f32 %v665_v50  ;;  %v634_v53 = vmul.f32 0.015625, %v597_v25  ;;  %v1663_v50 = vld [vmem:[#allocation8 + $0x28] sm:$0xff]  ;;  %v1665_v25 = vld [vmem:[#allocation8 + $0x38] sm:$0xff] }
 0x25b   : > { %v765_v0 = vmul.f32 %v7729_v57, %v726_v51 }
 0x25c   : > { %v6201_v58 = vpop.eup %6200  ;;  %v666_v55 = vadd.f32 1e-05, %v634_v53  ;;  %v1662_v53 = vld [vmem:[#allocation8 + $0x20] sm:$0xff] }
 0x25d   : > { %v599_v3 = vpop.xlane.xlu1 %598  ;;  %v727_v29 = vmul.f32 %v6201_v58, %v7714_v52  ;;  %v7910_v58 = vpack.c.bf16 %v1665_v25, %v1663_v50  ;;  %v1687_v25 = vld [vmem:[#allocation8 + $0xe8] sm:$0xff] }
 0x25e   : > { %6206 = vrsqrt.f32 %v666_v55  ;;  %v635_v40 = vmul.f32 0.015625, %v599_v3 }
 0x25f   : > { %v766_v5 = vmul.f32 %v7729_v57, %v727_v29  ;;  %v1667_v29 = vld [vmem:[#allocation8 + $0x48] sm:$0xff] }
 0x260   : > { %v6203_v59 = vpop.eup %6202  ;;  %v667_v1 = vadd.f32 1e-05, %v635_v40  ;;  %v1669_v40 = vld [vmem:[#allocation8 + $0x58] sm:$0xff] }
 0x261   : > { %v601_v4 = vpop.xlane.xlu0 %600  ;;  %v7885_v23 = vpack.c.bf16 %v766_v5, %v765_v0  ;;  %v728_v28 = vmul.f32 %v6203_v59, %v7720_v21  ;;  %v1658_v21 = vld [vmem:[#allocation8] sm:$0xff]  ;;  %v7919_v59 = vpack.c.bf16 %v1669_v40, %v1667_v29  ;;  %v1688_v40 = vld [vmem:[#allocation8 + $0xf0] sm:$0xff] }
 0x262   : > { %6208 = vrsqrt.f32 %v667_v1  ;;  %v636_v15 = vmul.f32 0.015625, %v601_v4  ;;  %v7897_v38 = vpack.c.bf16 %v1660_v42, %v1658_v21  ;;  %v1666_v0 = vld [vmem:[#allocation8 + $0x40] sm:$0xff]  ;;  %v1668_v1 = vld [vmem:[#allocation8 + $0x50] sm:$0xff] }
 0x263   : > { %1222 = vmatmul.mubr.bf16.gmra.mrb[44].mxu0 %v7885_v23  ;;  %1415 = vmatmul.mubr.bf16.gmra.mrb[44].mxu1 %v7885_v23  ;;  %v767_v13 = vmul.f32 %v7729_v57, %v728_v28  ;;  %v1674_v42 = vld [vmem:[#allocation8 + $0x80] sm:$0xff] }
 0x264   : > { %v6205_v52 = vpop.eup %6204  ;;  %v668_v22 = vadd.f32 1e-05, %v636_v15  ;;  %1231 = vmatprep.mubr.bf16.mxu0 %v10817_v56  ;;  %1424 = vmatprep.mubr.bf16.mxu1 %v10817_v56  ;;  %v7923_v15 = vpack.c.bf16 %v1668_v1, %v1666_v0  ;;  %v1686_v29 = vld [vmem:[#allocation8 + $0xe0] sm:$0xff]  ;;  %v1691_v0 = vld [vmem:[#allocation8 + $0x108] sm:$0xff] }
 0x265   : > { %v603_v16 = vpop.xlane.xlu1 %602  ;;  %v729_v61 = vmul.f32 %v6205_v52, %v7733_v43  ;;  %5500 = vmatpush1.bf16.msra.mxu1 %v7897_v38  ;;  %v1690_v1 = vld [vmem:[#allocation8 + $0x100] sm:$0xff] }
 0x266   : > { %6210 = vrsqrt.f32 %v668_v22  ;;  %v637_v6 = vmul.f32 0.015625, %v603_v16  ;;  %5502 = vmatprep.subr.bf16.mxu1 %v7910_v58  ;;  %v1671_v16 = vld [vmem:[#allocation8 + $0x68] sm:$0xff] }
 0x267   : > { %v768_v30 = vmul.f32 %v7729_v57, %v729_v61  ;;  %v1673_v61 = vld [vmem:[#allocation8 + $0x78] sm:$0xff] }
 0x268   : > { %v6207_v49 = vpop.eup %6206  ;;  %v669_v32 = vadd.f32 1e-05, %v637_v6  ;;  %v1670_v6 = vld [vmem:[#allocation8 + $0x60] sm:$0xff] }
 0x269   : > { %v605_v48 = vpop.xlane.xlu0 %604  ;;  %v7895_v10 = vpack.c.bf16 %v768_v30, %v767_v13  ;;  %v730_v43 = vmul.f32 %v6207_v49, %v7743_v18  ;;  %v7937_v30 = vpack.c.bf16 %v1673_v61, %v1671_v16  ;;  %v1672_v49 = vld [vmem:[#allocation8 + $0x70] sm:$0xff]  ;;  %v1701_v16 = vld [vmem:[#allocation8 + $0x158] sm:$0xff]  ;;  %v1698_v61 = vld [vmem:[#allocation8 + $0x140] sm:$0xff] }
 0x26a   : > { %6212 = vrsqrt.f32 %v669_v32  ;;  %v638_v35 = vmul.f32 0.015625, %v605_v48  ;;  %v7940_v11 = vpack.c.bf16 %v1672_v49, %v1670_v6  ;;  %v1675_v48 = vld [vmem:[#allocation8 + $0x88] sm:$0xff]  ;;  %v1705_v49 = vld [vmem:[#allocation8 + $0x178] sm:$0xff] }
 0x26b   : > { %1232 = vmatmul.mubr.bf16.gmra.mrb[48].mxu0 %v7895_v10  ;;  %1425 = vmatmul.mubr.bf16.gmra.mrb[48].mxu1 %v7895_v10  ;;  %v769_v8 = vmul.f32 %v7729_v57, %v730_v43  ;;  %v1679_v43 = vld [vmem:[#allocation8 + $0xa8] sm:$0xff] }
 0x26c   : > { %v6209_v19 = vpop.eup %6208  ;;  %v670_v63 = vadd.f32 1e-05, %v638_v35  ;;  %1241 = vmatprep.mubr.bf16.mxu0 %v10817_v56  ;;  %1434 = vmatprep.mubr.bf16.mxu1 %v10817_v56  ;;  %v1676_v35 = vld [vmem:[#allocation8 + $0x90] sm:$0xff] }
 0x26d   : > { %v607_v2 = vpop.xlane.xlu1 %606  ;;  %v731_v60 = vmul.f32 %v6209_v19, %v7755_v46  ;;  %v1664_v46 = vld [vmem:[#allocation8 + $0x30] sm:$0xff]  ;;  %v1681_v19 = vld [vmem:[#allocation8 + $0xb8] sm:$0xff] }
 0x26e   : > { %6214 = vrsqrt.f32 %v670_v63  ;;  %v639_v7 = vmul.f32 0.015625, %v607_v2  ;;  %v7912_v55 = vpack.c.bf16 %v1664_v46, %v1662_v53  ;;  %v7951_v63 = vpack.c.bf16 %v1676_v35, %v1674_v42  ;;  %v1678_v2 = vld [vmem:[#allocation8 + $0xa0] sm:$0xff]  ;;  %v1689_v53 = vld [vmem:[#allocation8 + $0xf8] sm:$0xff] }
 0x26f   : > { %v770_v44 = vmul.f32 %v7729_v57, %v731_v60  ;;  %v1680_v60 = vld [vmem:[#allocation8 + $0xb0] sm:$0xff] }
 0x270   : > { %v6211_v18 = vpop.eup %6210  ;;  %v671_v47 = vadd.f32 1e-05, %v639_v7  ;;  %5504 = vmatpush1.bf16.msra.mxu1 %v7912_v55  ;;  %v1683_v7 = vld [vmem:[#allocation8 + $0xc8] sm:$0xff] }
 0x271   : > { %v7908_v51 = vpack.c.bf16 %v770_v44, %v769_v8  ;;  %v732_v3 = vmul.f32 %v6211_v18, %v7765_v24  ;;  %5506 = vmatprep.subr.bf16.mxu1 %v7919_v59  ;;  %v1685_v8 = vld [vmem:[#allocation8 + $0xd8] sm:$0xff]  ;;  %v7956_v44 = vpack.c.bf16 %v1680_v60, %v1678_v2  ;;  %v1682_v18 = vld [vmem:[#allocation8 + $0xc0] sm:$0xff] }
 0x272   : > { %6216 = vrsqrt.f32 %v671_v47  ;;  %v1684_v47 = vld [vmem:[#allocation8 + $0xd0] sm:$0xff]  ;;  %v7959_v50 = vpack.c.bf16 %v1685_v8, %v1683_v7 }
 0x273   : > { %1242 = vmatmul.mubr.bf16.gmra.mrb[52].mxu0 %v7908_v51  ;;  %1435 = vmatmul.mubr.bf16.gmra.mrb[52].mxu1 %v7908_v51  ;;  %v771_v24 = vmul.f32 %v7729_v57, %v732_v3  ;;  %v7963_v46 = vpack.c.bf16 %v1684_v47, %v1682_v18  ;;  %v7967_v3 = vpack.c.bf16 %v1689_v53, %v1687_v25 }
 0x274   : > { %v6213_v5 = vpop.eup %6212  ;;  %1251 = vmatprep.mubr.bf16.mxu0 %v10817_v56  ;;  %1444 = vmatprep.mubr.bf16.mxu1 %v10817_v56 }
 0x275   : > { %v733_v4 = vmul.f32 %v6213_v5, %v7777_v27  ;;  %5508 = vmatpush1.bf16.msra.mxu1 %v7923_v15  ;;  %v1693_v5 = vld [vmem:[#allocation8 + $0x118] sm:$0xff] }
 0x276   : > { %5510 = vmatprep.subr.bf16.mxu1 %v7937_v30 }
 0x277   : > { %v772_v28 = vmul.f32 %v7729_v57, %v733_v4  ;;  %v7977_v4 = vpack.c.bf16 %v1693_v5, %v1691_v0  ;;  %v1707_v5 = vld [vmem:[#allocation8 + $0x188] sm:$0xff] }
 0x278   : > { %v6215_v52 = vpop.eup %6214 }
 0x279   : > { %v7929_v22 = vpack.c.bf16 %v772_v28, %v771_v24  ;;  %v734_v27 = vmul.f32 %v6215_v52, %v7787_v62  ;;  %5512 = vmatpush1.bf16.msra.mxu1 %v7940_v11  ;;  %v1695_v24 = vld [vmem:[#allocation8 + $0x128] sm:$0xff]  ;;  %v1694_v52 = vld [vmem:[#allocation8 + $0x120] sm:$0xff] }
 0x27b   : > { %1252 = vmatmul.mubr.bf16.gmra.mrb[56].mxu0 %v7929_v22  ;;  %1445 = vmatmul.mubr.bf16.gmra.mrb[56].mxu1 %v7929_v22  ;;  %v773_v41 = vmul.f32 %v7729_v57, %v734_v27  ;;  %v1696_v27 = vld [vmem:[#allocation8 + $0x130] sm:$0xff] }
 0x27c   : > { %v6217_v13 = vpop.eup %6216  ;;  %1261 = vmatprep.mubr.bf16.mxu0 %v10817_v56  ;;  %1454 = vmatprep.mubr.bf16.mxu1 %v10817_v56 }
 0x27d   : > { %v735_v32 = vmul.f32 %v6217_v13, %v7799_v34  ;;  %v5513_v34 = vpack.c.bf16 %v1677_v12, %v1675_v48  ;;  %v1703_v13 = vld [vmem:[#allocation8 + $0x168] sm:$0xff] }
 0x27f   : > { %v774_v62 = vmul.f32 %v7729_v57, %v735_v32  ;;  %v7953_v57 = vpack.c.bf16 %v1681_v19, %v1679_v43  ;;  %5514 = vmatprep.subr.bf16.mxu1 %v5513_v34 }
 0x280   : > { %5516 = vmatpush1.bf16.msra.mxu1 %v7951_v63 }
 0x281   : > { %v7946_v21 = vpack.c.bf16 %v774_v62, %v773_v41  ;;  %5518 = vmatprep.subr.bf16.mxu1 %v7953_v57  ;;  %v1704_v62 = vld [vmem:[#allocation8 + $0x170] sm:$0xff] }
 0x283   : > { %1262 = vmatmul.mubr.bf16.gmra.mrb[60].mxu0 %v7946_v21  ;;  %1455 = vmatmul.mubr.bf16.gmra.mrb[60].mxu1 %v7946_v21 }
 0x284   : > { %1497 = vmatprep.mubr.bf16.mxu0 %v10817_v56  ;;  %5520 = vmatpush1.bf16.msra.mxu1 %v7956_v44 }
 0x285   : > { %5522 = vmatprep.subr.bf16.mxu1 %v7959_v50 }
 0x288   : > { %5524 = vmatpush1.bf16.msra.mxu1 %v7963_v46 }
 0x289   : > { %5526 = vmatprep.subr.bf16.mxu1 %v7967_v3 }
 0x28b   : > { %1498 = vmatmul.mubr.bf16.vlgmr.msra.gmra.mrb[64].mxu0 %v7740_v31  ;;  %v7972_v31 = vpack.c.bf16 %v1688_v40, %v1686_v29 }
 0x28c   : > { %1507 = vmatprep.mubr.bf16.mxu0 %v10817_v56  ;;  %5564 = vmatpush1.bf16.msra.mxu0 %v7897_v38  ;;  %v1692_v38 = vld [vmem:[#allocation8 + $0x110] sm:$0xff] }
 0x28d   : > { %5566 = vmatprep.subr.bf16.mxu0 %v7910_v58  ;;  %v1697_v58 = vld [vmem:[#allocation8 + $0x138] sm:$0xff]  ;;  %5528 = vmatpush1.bf16.msra.mxu1 %v7972_v31  ;;  %v7981_v28 = vpack.c.bf16 %v1692_v38, %v1690_v1 }
 0x28e   : > { %5530 = vmatprep.subr.bf16.mxu1 %v7977_v4  ;;  %v1709_v1 = vld [vmem:[#allocation8 + $0x198] sm:$0xff] }
 0x290   : > { %5568 = vmatpush1.bf16.msra.mxu0 %v7912_v55  ;;  %v7985_v55 = vpack.c.bf16 %v1697_v58, %v1695_v24  ;;  %v1708_v58 = vld [vmem:[#allocation8 + $0x190] sm:$0xff] }
 0x291   : > { %5570 = vmatprep.subr.bf16.mxu0 %v7919_v59  ;;  %v1699_v59 = vld [vmem:[#allocation8 + $0x148] sm:$0xff]  ;;  %5532 = vmatpush1.bf16.msra.mxu1 %v7981_v28 }
 0x292   : > { %5534 = vmatprep.subr.bf16.mxu1 %v7985_v55  ;;  %v7994_v6 = vpack.c.bf16 %v1701_v16, %v1699_v59 }
 0x293   : > { %1508 = vmatmul.mubr.bf16.gmra.mrb[68].mxu0 %v7762_v26  ;;  %v7990_v26 = vpack.c.bf16 %v1696_v27, %v1694_v52 }
 0x294   : > { %1517 = vmatprep.mubr.bf16.mxu0 %v10817_v56  ;;  %5572 = vmatpush1.bf16.msra.mxu0 %v7923_v15  ;;  %v1700_v15 = vld [vmem:[#allocation8 + $0x150] sm:$0xff] }
 0x295   : > { %5574 = vmatprep.subr.bf16.mxu0 %v7937_v30  ;;  %5536 = vmatpush1.bf16.msra.mxu1 %v7990_v26  ;;  %v7998_v30 = vpack.c.bf16 %v1700_v15, %v1698_v61 }
 0x296   : > { %5538 = vmatprep.subr.bf16.mxu1 %v7994_v6 }
 0x298   : > { %5576 = vmatpush1.bf16.msra.mxu0 %v7940_v11  ;;  %v1702_v11 = vld [vmem:[#allocation8 + $0x160] sm:$0xff] }
 0x299   : > { %5578 = vmatprep.subr.bf16.mxu0 %v5513_v34  ;;  %5540 = vmatpush1.bf16.msra.mxu1 %v7998_v30 }
 0x29b   : > { %1518 = vmatmul.mubr.bf16.gmra.mrb[72].mxu0 %v7784_v54  ;;  %v8012_v54 = vpack.c.bf16 %v1705_v49, %v1703_v13 }
 0x29c   : > { %v8000_v32 = vpop.f32.mrb[0].mxu0  ;;  %v8002_v41 = vpop.f32.mrb[0].mxu1  ;;  %1527 = vmatprep.mubr.bf16.mxu0 %v10817_v56  ;;  %5580 = vmatpush1.bf16.msra.mxu0 %v7951_v63  ;;  %v8025_v63 = vpack.c.bf16 %v1704_v62, %v1702_v11  ;;  %v1711_v11 = vld [vmem:[#allocation8 + $0x1a8] sm:$0xff]  ;;  %v1713_v62 = vld [vmem:[#allocation8 + $0x1b8] sm:$0xff] }
 0x29d   : > { %v8006_v48 = vpop.f32.mrb[1].mxu0  ;;  %v8008_v12 = vpop.f32.mrb[1].mxu1  ;;  %5582 = vmatprep.subr.bf16.mxu0 %v7953_v57  ;;  %5542 = vmatprep.subr.bf16.mxu1 %v8012_v54 }
 0x29e   : > { %11088 = vst [vmem:[#allocation16_spill] sm:$0xff] %v8008_v12  ;;  %v8014_v42 = vpop.f32.mrb[2].mxu0  ;;  %v8016_v34 = vpop.f32.mrb[2].mxu1  ;;  %v1722_v35 = vmax.f32 %v8000_v32, %v8006_v48  ;;  %5544 = vmatpush1.bf16.msra.mxu1 %v8025_v63 }
 0x29f   : > { %v8020_v43 = vpop.f32.mrb[3].mxu0  ;;  %v8022_v19 = vpop.f32.mrb[3].mxu1 }
 0x2a0   : > { %11089 = vst [vmem:[#allocation17_spill] sm:$0xff] %v8022_v19  ;;  %1723 = vmax.xlane.f32.xlu0 %v1722_v35  ;;  %v1725_v57 = vmax.f32 %v8014_v42, %v8020_v43  ;;  %5584 = vmatpush1.bf16.msra.mxu0 %v7956_v44  ;;  %v5549_v35 = vpack.c.bf16 %v1713_v62, %v1711_v11 }
 0x2a1   : > { %5586 = vmatprep.subr.bf16.mxu0 %v7959_v50 }
 0x2a2   : > { %1726 = vmax.xlane.f32.xlu1 %v1725_v57  ;;  %v1710_v57 = vld [vmem:[#allocation8 + $0x1a0] sm:$0xff] }
 0x2a3   : > { %1528 = vmatmul.mubr.bf16.gmra.mrb[76].mxu0 %v7805_v45 }
 0x2a4   : > { %v8034_v2 = vpop.f32.mrb[4].mxu0  ;;  %v8036_v60 = vpop.f32.mrb[4].mxu1  ;;  %1537 = vmatprep.mubr.bf16.mxu0 %v10817_v56  ;;  %5588 = vmatpush1.bf16.msra.mxu0 %v7963_v46 }
 0x2a5   : > { %v2395_v7 = vmax.f32 %v8002_v41, %v8036_v60  ;;  %v8042_v8 = vpop.f32.mrb[5].mxu0  ;;  %v8044_v44 = vpop.f32.mrb[5].mxu1  ;;  %5590 = vmatprep.subr.bf16.mxu0 %v7967_v3 }
 0x2a6   : > { %11090 = vst [vmem:[#allocation18_spill] sm:$0xff] %v8044_v44  ;;  %v2432_v45 = vmax.f32 %v8008_v12, %v8044_v44  ;;  %v8049_v18 = vpop.f32.mrb[6].mxu0  ;;  %v8051_v47 = vpop.f32.mrb[6].mxu1  ;;  %v1728_v50 = vmax.f32 %v8034_v2, %v8042_v8 }
 0x2a7   : > { %v2396_v25 = vmax.f32 %v8016_v34, %v8051_v47  ;;  %v8057_v53 = vpop.f32.mrb[7].mxu0  ;;  %v8059_v46 = vpop.f32.mrb[7].mxu1 }
 0x2a8   : > { %11091 = vst [vmem:[#allocation19_spill] sm:$0xff] %v8059_v46  ;;  %v2433_v3 = vmax.f32 %v8022_v19, %v8059_v46  ;;  %1729 = vmax.xlane.f32.xlu0 %v1728_v50  ;;  %v1731_v29 = vmax.f32 %v8049_v18, %v8057_v53  ;;  %5592 = vmatpush1.bf16.msra.mxu0 %v7972_v31 }
 0x2a9   : > { %5594 = vmatprep.subr.bf16.mxu0 %v7977_v4  ;;  %v8081_v4 = vpack.c.bf16 %v1709_v1, %v1707_v5 }
 0x2aa   : > { %1732 = vmax.xlane.f32.xlu1 %v1731_v29  ;;  %v1717_v29 = vld [vmem:[#allocation8 + $0x1d8] sm:$0xff] }
 0x2ab   : > { %1538 = vmatmul.mubr.bf16.gmra.mrb[80].mxu0 %v7815_v14  ;;  %v1706_v14 = vld [vmem:[#allocation8 + $0x180] sm:$0xff]  ;;  %5546 = vmatprep.subr.bf16.mxu1 %v8081_v4 }
 0x2ac   : > { %v8068_v40 = vpop.f32.mrb[8].mxu0  ;;  %v8070_v0 = vpop.f32.mrb[8].mxu1  ;;  %1547 = vmatprep.mubr.bf16.mxu0 %v10817_v56  ;;  %5596 = vmatpush1.bf16.msra.mxu0 %v7981_v28  ;;  %v8093_v16 = vpack.c.bf16 %v1708_v58, %v1706_v14  ;;  %v1714_v14 = vld [vmem:[#allocation8 + $0x1c0] sm:$0xff] }
 0x2ad   : > { %v8075_v38 = vmax.f32 %v2395_v7, %v8070_v0  ;;  %v8077_v24 = vpop.f32.mrb[9].mxu0  ;;  %v8079_v31 = vpop.f32.mrb[9].mxu1  ;;  %5598 = vmatprep.subr.bf16.mxu0 %v7985_v55  ;;  %v1712_v7 = vld [vmem:[#allocation8 + $0x1b0] sm:$0xff] }
 0x2ae   : > { %11092 = vst [vmem:[#allocation20_spill] sm:$0xff] %v8079_v31  ;;  %v8085_v52 = vmax.f32 %v2432_v45, %v8079_v31  ;;  %v8087_v27 = vpop.f32.mrb[10].mxu0  ;;  %v8089_v28 = vpop.f32.mrb[10].mxu1  ;;  %v1734_v59 = vmax.f32 %v8068_v40, %v8077_v24  ;;  %5548 = vmatpush1.bf16.msra.mxu1 %v8093_v16  ;;  %v5551_v45 = vpack.c.bf16 %v1712_v7, %v1710_v57 }
 0x2af   : > { %v8096_v61 = vmax.f32 %v2396_v25, %v8089_v28  ;;  %v8098_v15 = vpop.f32.mrb[11].mxu0  ;;  %v8100_v13 = vpop.f32.mrb[11].mxu1  ;;  %5550 = vmatprep.subr.bf16.mxu1 %v5549_v35 }
 0x2b0   : > { %11093 = vst [vmem:[#allocation21_spill] sm:$0xff] %v8100_v13  ;;  %v8104_v55 = vmax.f32 %v2433_v3, %v8100_v13  ;;  %1735 = vmax.xlane.f32.xlu0 %v1734_v59  ;;  %v1737_v49 = vmax.f32 %v8087_v27, %v8098_v15  ;;  %5600 = vmatpush1.bf16.msra.mxu0 %v7990_v26  ;;  %v1715_v3 = vld [vmem:[#allocation8 + $0x1c8] sm:$0xff] }
 0x2b1   : > { %5602 = vmatprep.subr.bf16.mxu0 %v7994_v6  ;;  %v5553_v6 = vpack.c.bf16 %v1717_v29, %v1715_v3  ;;  %v1719_v3 = vld [vmem:[#allocation8 + $0x1e8] sm:$0xff]  ;;  %v1721_v29 = vld [vmem:[#allocation8 + $0x1f8] sm:$0xff] }
 0x2b2   : > { %1738 = vmax.xlane.f32.xlu1 %v1737_v49  ;;  %5552 = vmatpush1.bf16.msra.mxu1 %v5551_v45 }
 0x2b3   : > { %1548 = vmatmul.mubr.bf16.gmra.mrb[84].mxu0 %v7825_v39  ;;  %v1716_v39 = vld [vmem:[#allocation8 + $0x1d0] sm:$0xff]  ;;  %5554 = vmatprep.subr.bf16.mxu1 %v5553_v6 }
 0x2b4   : > { %v8112_v50 = vpop.f32.mrb[12].mxu0  ;;  %v8114_v25 = vpop.f32.mrb[12].mxu1  ;;  %1557 = vmatprep.mubr.bf16.mxu0 %v10817_v56  ;;  %5604 = vmatpush1.bf16.msra.mxu0 %v7998_v30 }
 0x2b5   : > { %v2399_v26 = vmax.f32 %v8075_v38, %v8114_v25  ;;  %v8119_v5 = vpop.f32.mrb[13].mxu0  ;;  %v8121_v1 = vpop.f32.mrb[13].mxu1  ;;  %v5555_v38 = vpack.c.bf16 %v1716_v39, %v1714_v14  ;;  %5606 = vmatprep.subr.bf16.mxu0 %v8012_v54  ;;  %v5557_v14 = vpack.c.bf16 %v1721_v29, %v1719_v3  ;;  %v1718_v54 = vld [vmem:[#allocation8 + $0x1e0] sm:$0xff]  ;;  %v1720_v39 = vld [vmem:[#allocation8 + $0x1f0] sm:$0xff] }
 0x2b6   : > { %11094 = vst [vmem:[#allocation22_spill] sm:$0xff] %v8121_v1  ;;  %v2436_v58 = vmax.f32 %v8085_v52, %v8121_v1  ;;  %v8126_v59 = vpop.f32.mrb[14].mxu0  ;;  %v8128_v49 = vpop.f32.mrb[14].mxu1  ;;  %v1740_v11 = vmax.f32 %v8112_v50, %v8119_v5 }
 0x2b7   : > { %v2400_v62 = vmax.f32 %v8096_v61, %v8128_v49  ;;  %v8135_v57 = vpop.f32.mrb[15].mxu0  ;;  %v8137_v7 = vpop.f32.mrb[15].mxu1  ;;  %5556 = vmatpush1.bf16.msra.mxu1 %v5555_v38  ;;  %v5559_v61 = vpack.c.bf16 %v1720_v39, %v1718_v54 }
 0x2b8   : > { %11095 = vst [vmem:[#allocation23_spill] sm:$0xff] %v8137_v7  ;;  %v2437_v30 = vmax.f32 %v8104_v55, %v8137_v7  ;;  %1741 = vmax.xlane.f32.xlu0 %v1740_v11  ;;  %v1743_v52 = vmax.f32 %v8126_v59, %v8135_v57  ;;  %5608 = vmatpush1.bf16.msra.mxu0 %v8025_v63 }
 0x2b9   : > { %5610 = vmatprep.subr.bf16.mxu0 %v8081_v4  ;;  %5558 = vmatprep.subr.bf16.mxu1 %v5557_v14 }
 0x2ba   : > { %1744 = vmax.xlane.f32.xlu1 %v1743_v52 }
 0x2bb   : > { %1558 = vmatmul.mubr.bf16.gmra.mrb[88].mxu0 %v7835_v20  ;;  %5560 = vmatpush1.bf16.msra.mxu1 %v5559_v61 }
 0x2bc   : > { %v8146_v55 = vpop.f32.mrb[16].mxu0  ;;  %v8148_v11 = vpop.f32.mrb[16].mxu1  ;;  %1567 = vmatprep.mubr.bf16.mxu0 %v10817_v56  ;;  %5612 = vmatpush1.bf16.msra.mxu0 %v8093_v16 }
 0x2bd   : > { %v2401_v3 = vmax.f32 %v2399_v26, %v8148_v11  ;;  %v8152_v29 = vpop.f32.mrb[17].mxu0  ;;  %v8154_v37 = vpop.f32.mrb[17].mxu1  ;;  %5614 = vmatprep.subr.bf16.mxu0 %v5549_v35 }
 0x2be   : > { %11096 = vst [vmem:[#allocation24_spill] sm:$0xff] %v8154_v37  ;;  %v2438_v63 = vmax.f32 %v2436_v58, %v8154_v37  ;;  %v8158_v4 = vpop.f32.mrb[18].mxu0  ;;  %v8160_v20 = vpop.f32.mrb[18].mxu1  ;;  %v1746_v52 = vmax.f32 %v8146_v55, %v8152_v29 }
 0x2bf   : > { %v2402_v54 = vmax.f32 %v2400_v62, %v8160_v20  ;;  %v8165_v39 = vpop.f32.mrb[19].mxu0  ;;  %v8167_v26 = vpop.f32.mrb[19].mxu1  ;;  %v11098_v62 = vmov 0  }
 0x2c0   : > { %11097 = vst [vmem:[#allocation25_spill] sm:$0xff] %v8167_v26  ;;  %v2439_v56 = vmax.f32 %v2437_v30, %v8167_v26  ;;  %1747 = vmax.xlane.f32.xlu0 %v1746_v52  ;;  %v1749_v16 = vmax.f32 %v8158_v4, %v8165_v39  ;;  %5616 = vmatpush1.bf16.msra.mxu0 %v5551_v45 }
 0x2c1   : > { %5618 = vmatprep.subr.bf16.mxu0 %v5553_v6 }
 0x2c2   : > { %1750 = vmax.xlane.f32.xlu1 %v1749_v16 }
 0x2c3   : > { %1568 = vmatmul.mubr.bf16.gmra.mrb[92].mxu0 %v7845_v9 }
 0x2c4   : > { %v8173_v58 = vpop.f32.mrb[20].mxu0  ;;  %v8175_v35 = vpop.f32.mrb[20].mxu1  ;;  %1577 = vmatprep.mubr.bf16.mxu0 %v11098_v62  ;;  %5620 = vmatpush1.bf16.msra.mxu0 %v5555_v38 }
 0x2c5   : > { %v2403_v37 = vmax.f32 %v2401_v3, %v8175_v35  ;;  %v8179_v7 = vpop.f32.mrb[21].mxu0  ;;  %v8181_v30 = vpop.f32.mrb[21].mxu1  ;;  %5622 = vmatprep.subr.bf16.mxu0 %v5557_v14 }
 0x2c6   : > { %11099 = vst [vmem:[#allocation26_spill] sm:$0xff] %v8181_v30  ;;  %v2440_v52 = vmax.f32 %v2438_v63, %v8181_v30  ;;  %v8184_v45 = vpop.f32.mrb[22].mxu0  ;;  %v8186_v6 = vpop.f32.mrb[22].mxu1  ;;  %v1752_v9 = vmax.f32 %v8173_v58, %v8179_v7 }
 0x2c7   : > { %v2404_v16 = vmax.f32 %v2402_v54, %v8186_v6  ;;  %v8191_v26 = vpop.f32.mrb[23].mxu0  ;;  %v8193_v3 = vpop.f32.mrb[23].mxu1 }
 0x2c8   : > { %11100 = vst [vmem:[#allocation27_spill] sm:$0xff] %v8193_v3  ;;  %v2441_v1 = vmax.f32 %v2439_v56, %v8193_v3  ;;  %1753 = vmax.xlane.f32.xlu0 %v1752_v9  ;;  %v1755_v38 = vmax.f32 %v8184_v45, %v8191_v26  ;;  %5624 = vmatpush1.bf16.msra.mxu0 %v5559_v61 }
 0x2ca   : > { %1756 = vmax.xlane.f32.xlu1 %v1755_v38 }
 0x2cb   : > { %1578 = vmatmul.mubr.bf16.gmra.mrb[96].mxu0 %v7855_v33 }
 0x2cc   : > { %v8199_v63 = vpop.f32.mrb[24].mxu0  ;;  %v8201_v30 = vpop.f32.mrb[24].mxu1  ;;  %1587 = vmatprep.mubr.bf16.mxu0 %v11098_v62 }
 0x2cd   : > { %v2405_v14 = vmax.f32 %v2403_v37, %v8201_v30  ;;  %v8205_v54 = vpop.f32.mrb[25].mxu0  ;;  %v8207_v13 = vpop.f32.mrb[25].mxu1 }
 0x2ce   : > { %11101 = vst [vmem:[#allocation28_spill] sm:$0xff] %v8207_v13  ;;  %v2442_v56 = vmax.f32 %v2440_v52, %v8207_v13  ;;  %v8210_v9 = vpop.f32.mrb[26].mxu0  ;;  %v8212_v61 = vpop.f32.mrb[26].mxu1  ;;  %v1758_v33 = vmax.f32 %v8199_v63, %v8205_v54 }
 0x2cf   : > { %11102 = vst [vmem:[#allocation29_spill] sm:$0xff] %v8212_v61  ;;  %v2406_v38 = vmax.f32 %v2404_v16, %v8212_v61  ;;  %v8217_v3 = vpop.f32.mrb[27].mxu0  ;;  %v8219_v31 = vpop.f32.mrb[27].mxu1 }
 0x2d0   : > { %11103 = vst [vmem:[#allocation30_spill] sm:$0xff] %v8219_v31  ;;  %v2443_v37 = vmax.f32 %v2441_v1, %v8219_v31  ;;  %1759 = vmax.xlane.f32.xlu0 %v1758_v33  ;;  %v1761_v46 = vmax.f32 %v8210_v9, %v8217_v3 }
 0x2d2   : > { %1762 = vmax.xlane.f32.xlu1 %v1761_v46 }
 0x2d3   : > { %1588 = vmatmul.mubr.bf16.gmra.mrb[100].mxu0 %v7865_v17 }
 0x2d4   : > { %v8225_v52 = vpop.f32.mrb[28].mxu0  ;;  %v8227_v13 = vpop.f32.mrb[28].mxu1  ;;  %1597 = vmatprep.mubr.bf16.mxu0 %v11098_v62 }
 0x2d5   : > { %11104 = vst [vmem:[#allocation31_spill] sm:$0xff] %v8225_v52  ;;  %11105 = vst [vmem:[#allocation32_spill] sm:$0xff] %v8227_v13  ;;  %v2407_v16 = vmax.f32 %v2405_v14, %v8227_v13  ;;  %v8231_v44 = vpop.f32.mrb[29].mxu0  ;;  %v8233_v19 = vpop.f32.mrb[29].mxu1 }
 0x2d6   : > { %11106 = vst [vmem:[#allocation33_spill] sm:$0xff] %v8231_v44  ;;  %11107 = vst [vmem:[#allocation34_spill] sm:$0xff] %v8233_v19  ;;  %v2444_v1 = vmax.f32 %v2442_v56, %v8233_v19  ;;  %v8236_v33 = vpop.f32.mrb[30].mxu0  ;;  %v8238_v31 = vpop.f32.mrb[30].mxu1  ;;  %v1764_v17 = vmax.f32 %v8225_v52, %v8231_v44 }
 0x2d7   : > { %11108 = vst [vmem:[#allocation35_spill] sm:$0xff] %v8236_v33  ;;  %v2408_v46 = vmax.f32 %v2406_v38, %v8238_v31  ;;  %v8243_v12 = vpop.f32.mrb[31].mxu0  ;;  %v8245_v61 = vpop.f32.mrb[31].mxu1 }
 0x2d8   : > { %11109 = vst [vmem:[#allocation36_spill] sm:$0xff] %v8243_v12  ;;  %11110 = vst [vmem:[#allocation37_spill] sm:$0xff] %v8245_v61  ;;  %v2445_v14 = vmax.f32 %v2443_v37, %v8245_v61  ;;  %1765 = vmax.xlane.f32.xlu0 %v1764_v17  ;;  %v1767_v13 = vmax.f32 %v8236_v33, %v8243_v12 }
 0x2da   : > { %1768 = vmax.xlane.f32.xlu1 %v1767_v13 }
 0x2db   : > { %1598 = vmatmul.mubr.bf16.gmra.mrb[104].mxu0 %v7875_v36 }
 0x2dc   : > { %v8251_v56 = vpop.f32.mrb[32].mxu0  ;;  %v8253_v19 = vpop.f32.mrb[32].mxu1  ;;  %1607 = vmatprep.mubr.bf16.mxu0 %v11098_v62 }
 0x2dd   : > { %11111 = vst [vmem:[#allocation38_spill] sm:$0xff] %v8251_v56  ;;  %11112 = vst [vmem:[#allocation39_spill] sm:$0xff] %v8253_v19  ;;  %v2409_v38 = vmax.f32 %v2407_v16, %v8253_v19  ;;  %v8257_v44 = vpop.f32.mrb[33].mxu0  ;;  %v8259_v52 = vpop.f32.mrb[33].mxu1 }
 0x2de   : > { %11113 = vst [vmem:[#allocation40_spill] sm:$0xff] %v8257_v44  ;;  %11114 = vst [vmem:[#allocation41_spill] sm:$0xff] %v8259_v52  ;;  %v2446_v37 = vmax.f32 %v2444_v1, %v8259_v52  ;;  %v8262_v17 = vpop.f32.mrb[34].mxu0  ;;  %v8264_v12 = vpop.f32.mrb[34].mxu1  ;;  %v1770_v36 = vmax.f32 %v8251_v56, %v8257_v44 }
 0x2df   : > { %11115 = vst [vmem:[#allocation42_spill] sm:$0xff] %v8262_v17  ;;  %v2410_v13 = vmax.f32 %v2408_v46, %v8264_v12  ;;  %v8269_v33 = vpop.f32.mrb[35].mxu0  ;;  %v8271_v61 = vpop.f32.mrb[35].mxu1 }
 0x2e0   : > { %11116 = vst [vmem:[#allocation43_spill] sm:$0xff] %v8269_v33  ;;  %11117 = vst [vmem:[#allocation44_spill] sm:$0xff] %v8271_v61  ;;  %v2447_v16 = vmax.f32 %v2445_v14, %v8271_v61  ;;  %1771 = vmax.xlane.f32.xlu0 %v1770_v36  ;;  %v1773_v19 = vmax.f32 %v8262_v17, %v8269_v33 }
 0x2e2   : > { %1774 = vmax.xlane.f32.xlu1 %v1773_v19 }
 0x2e3   : > { %1608 = vmatmul.mubr.bf16.gmra.mrb[108].mxu0 %v7885_v23 }
 0x2e4   : > { %v8277_v1 = vpop.f32.mrb[36].mxu0  ;;  %v8279_v52 = vpop.f32.mrb[36].mxu1  ;;  %1617 = vmatprep.mubr.bf16.mxu0 %v11098_v62 }
 0x2e5   : > { %11118 = vst [vmem:[#allocation45_spill] sm:$0xff] %v8277_v1  ;;  %11119 = vst [vmem:[#allocation46_spill] sm:$0xff] %v8279_v52  ;;  %v2411_v46 = vmax.f32 %v2409_v38, %v8279_v52  ;;  %v8283_v56 = vpop.f32.mrb[37].mxu0  ;;  %v8285_v44 = vpop.f32.mrb[37].mxu1 }
 0x2e6   : > { %11120 = vst [vmem:[#allocation47_spill] sm:$0xff] %v8283_v56  ;;  %11121 = vst [vmem:[#allocation48_spill] sm:$0xff] %v8285_v44  ;;  %v2448_v14 = vmax.f32 %v2446_v37, %v8285_v44  ;;  %v8288_v36 = vpop.f32.mrb[38].mxu0  ;;  %v8290_v17 = vpop.f32.mrb[38].mxu1  ;;  %v1776_v23 = vmax.f32 %v8277_v1, %v8283_v56 }
 0x2e7   : > { %11122 = vst [vmem:[#allocation49_spill] sm:$0xff] %v8288_v36  ;;  %v2412_v19 = vmax.f32 %v2410_v13, %v8290_v17  ;;  %v8295_v33 = vpop.f32.mrb[39].mxu0  ;;  %v8297_v61 = vpop.f32.mrb[39].mxu1 }
 0x2e8   : > { %11123 = vst [vmem:[#allocation50_spill] sm:$0xff] %v8295_v33  ;;  %11124 = vst [vmem:[#allocation51_spill] sm:$0xff] %v8297_v61  ;;  %v2449_v38 = vmax.f32 %v2447_v16, %v8297_v61  ;;  %1777 = vmax.xlane.f32.xlu0 %v1776_v23  ;;  %v1779_v52 = vmax.f32 %v8288_v36, %v8295_v33 }
 0x2ea   : > { %1780 = vmax.xlane.f32.xlu1 %v1779_v52 }
 0x2eb   : > { %1618 = vmatmul.mubr.bf16.gmra.mrb[112].mxu0 %v7895_v10 }
 0x2ec   : > { %v8303_v37 = vpop.f32.mrb[40].mxu0  ;;  %v8305_v44 = vpop.f32.mrb[40].mxu1  ;;  %1627 = vmatprep.mubr.bf16.mxu0 %v11098_v62 }
 0x2ed   : > { %11125 = vst [vmem:[#allocation52_spill] sm:$0xff] %v8303_v37  ;;  %v8309_v13 = vmax.f32 %v2411_v46, %v8305_v44  ;;  %v8311_v1 = vpop.f32.mrb[41].mxu0  ;;  %v8313_v56 = vpop.f32.mrb[41].mxu1 }
 0x2ee   : > { %11126 = vst [vmem:[#allocation53_spill] sm:$0xff] %v8311_v1  ;;  %v8316_v16 = vmax.f32 %v2448_v14, %v8313_v56  ;;  %v8318_v23 = vpop.f32.mrb[42].mxu0  ;;  %v8320_v52 = vpop.f32.mrb[42].mxu1  ;;  %v1782_v10 = vmax.f32 %v8303_v37, %v8311_v1 }
 0x2ef   : > { %11127 = vst [vmem:[#allocation54_spill] sm:$0xff] %v8318_v23  ;;  %v8325_v36 = vmax.f32 %v2412_v19, %v8320_v52  ;;  %v8327_v33 = vpop.f32.mrb[43].mxu0  ;;  %v8329_v46 = vpop.f32.mrb[43].mxu1 }
 0x2f0   : > { %11128 = vst [vmem:[#allocation55_spill] sm:$0xff] %v8327_v33  ;;  %11129 = vst [vmem:[#allocation56_spill] sm:$0xff] %v8329_v46  ;;  %v8332_v61 = vmax.f32 %v2449_v38, %v8329_v46  ;;  %1783 = vmax.xlane.f32.xlu0 %v1782_v10  ;;  %v1785_v14 = vmax.f32 %v8318_v23, %v8327_v33 }
 0x2f2   : > { %1786 = vmax.xlane.f32.xlu1 %v1785_v14 }
 0x2f3   : > { %1628 = vmatmul.mubr.bf16.gmra.mrb[116].mxu0 %v7908_v51 }
 0x2f4   : > { %1637 = vmatprep.mubr.bf16.mxu0 %v11098_v62 }
 0x2fb   : > { %1638 = vmatmul.mubr.bf16.gmra.mrb[120].mxu0 %v7929_v22 }
 0x2fc   : > { %1647 = vmatprep.mubr.bf16.mxu0 %v11098_v62 }
 0x303   : > { %1648 = vmatmul.mubr.bf16.gmra.mrb[124].mxu0 %v7946_v21 }
 0x32d   : > { %v1724_v19 = vpop.xlane.xlu0 %1723 }
 0x32e   : > { %v1818_v37 = vsub.f32 %v8000_v32, %v1724_v19  ;;  %v1819_v38 = vsub.f32 %v8006_v48, %v1724_v19 }
 0x32f   : > { %v1727_v10 = vpop.xlane.xlu1 %1726 }
 0x330   : > { %v1882_v1 = vmul.f32 1.442695, %v1818_v37  ;;  %v1884_v46 = vmul.f32 1.442695, %v1819_v38  ;;  %v1820_v14 = vsub.f32 %v8014_v42, %v1727_v10  ;;  %v1821_v51 = vsub.f32 %v8020_v43, %v1727_v10 }
 0x332   : > { %6218 = vpow2.f32 %v1882_v1  ;;  %v1888_v23 = vmul.f32 1.442695, %v1821_v51  ;;  %v1886_v22 = vmul.f32 1.442695, %v1820_v14 }
 0x333   : > { %6220 = vpow2.f32 %v1884_v46 }
 0x334   : > { %6222 = vpow2.f32 %v1888_v23 }
 0x335   : > { %v1730_v62 = vpop.xlane.xlu0 %1729  ;;  %6224 = vpow2.f32 %v1886_v22 }
 0x336   : > { %v1822_v21 = vsub.f32 %v8034_v2, %v1730_v62  ;;  %v1823_v33 = vsub.f32 %v8042_v8, %v1730_v62  ;;  %v8347_v32 = vpop.f32.mrb[44].mxu0  ;;  %v8349_v48 = vpop.f32.mrb[44].mxu1 }
 0x337   : > { %11130 = vst [vmem:[#allocation57_spill] sm:$0xff] %v8347_v32  ;;  %v2415_v42 = vmax.f32 %v8309_v13, %v8349_v48  ;;  %v1733_v37 = vpop.xlane.xlu1 %1732  ;;  %v8353_v43 = vpop.f32.mrb[45].mxu0 }
 0x338   : > { %11131 = vst [vmem:[#allocation58_spill] sm:$0xff] %v8353_v43  ;;  %v1890_v1 = vmul.f32 1.442695, %v1822_v21  ;;  %v1892_v46 = vmul.f32 1.442695, %v1823_v33  ;;  %v1824_v23 = vsub.f32 %v8049_v18, %v1733_v37  ;;  %v1825_v19 = vsub.f32 %v8057_v53, %v1733_v37  ;;  %v8357_v2 = vpop.f32.mrb[45].mxu1 }
 0x339   : > { %v8359_v8 = vpop.f32.mrb[46].mxu0  ;;  %v2452_v38 = vmax.f32 %v8316_v16, %v8357_v2  ;;  %v8363_v10 = vpop.f32.mrb[46].mxu1  ;;  %v1788_v13 = vmax.f32 %v8347_v32, %v8353_v43 }
 0x33a   : > { %11132 = vst [vmem:[#allocation59_spill] sm:$0xff] %v8359_v8  ;;  %v8365_v14 = vpop.f32.mrb[47].mxu0  ;;  %6226 = vpow2.f32 %v1890_v1  ;;  %v1896_v33 = vmul.f32 1.442695, %v1825_v19  ;;  %v2416_v18 = vmax.f32 %v8325_v36, %v8363_v10  ;;  %v8371_v53 = vpop.f32.mrb[47].mxu1 }
 0x33b   : > { %11133 = vst [vmem:[#allocation60_spill] sm:$0xff] %v8365_v14  ;;  %6228 = vpow2.f32 %v1892_v46  ;;  %v1894_v51 = vmul.f32 1.442695, %v1824_v23  ;;  %v2453_v22 = vmax.f32 %v8332_v61, %v8371_v53  ;;  %1789 = vmax.xlane.f32.xlu0 %v1788_v13  ;;  %v1791_v16 = vmax.f32 %v8359_v8, %v8365_v14 }
 0x33c   : > { %v8377_v62 = vpop.eup %6218  ;;  %6230 = vpow2.f32 %v1896_v33 }
 0x33d   : > { %11134 = vst [vmem:[#allocation61_spill] sm:$0xff] %v8377_v62  ;;  %v8379_v21 = vpop.eup %6220  ;;  %1792 = vmax.xlane.f32.xlu1 %v1791_v16  ;;  %v1736_v37 = vpop.xlane.xlu0 %1735  ;;  %6232 = vpow2.f32 %v1894_v51 }
 0x33e   : > { %11135 = vst [vmem:[#allocation62_spill] sm:$0xff] %v8379_v21  ;;  %2074 = vmatprep.mubr.f32.mxu1 %v8379_v21  ;;  %v1826_v36 = vsub.f32 %v8068_v40, %v1736_v37  ;;  %v1827_v1 = vsub.f32 %v8077_v24, %v1736_v37  ;;  %v8384_v46 = vpop.f32.mrb[48].mxu0  ;;  %v8386_v61 = vpop.f32.mrb[48].mxu1 }
 0x33f   : > { %11136 = vst [vmem:[#allocation63_spill] sm:$0xff] %v8384_v46  ;;  %v8388_v23 = vpop.eup %6222  ;;  %v8391_v19 = vmax.f32 %v2415_v42, %v8386_v61  ;;  %2075 = vmatmul.mubr.f32.vlgmr.msra.gmra.mrb[64].mxu1 %v8377_v62  ;;  %v1739_v13 = vpop.xlane.xlu1 %1738 }
 0x340   : > { %11137 = vst [vmem:[#allocation64_spill] sm:$0xff] %v8388_v23  ;;  %v8394_v33 = vpop.f32.mrb[49].mxu0  ;;  %v1898_v16 = vmul.f32 1.442695, %v1826_v36  ;;  %v1900_v21 = vmul.f32 1.442695, %v1827_v1  ;;  %v1828_v40 = vsub.f32 %v8087_v27, %v1739_v13  ;;  %v1829_v24 = vsub.f32 %v8098_v15, %v1739_v13  ;;  %2080 = vmatprep.mubr.f32.mxu1 %v8388_v23  ;;  %v8403_v51 = vpop.eup %6224 }
 0x341   : > { %11138 = vst [vmem:[#allocation65_spill] sm:$0xff] %v8394_v33  ;;  %v8398_v37 = vpop.f32.mrb[49].mxu1  ;;  %v8401_v8 = vpop.f32.mrb[50].mxu0  ;;  %11140 = vst [vmem:[#allocation67_spill] sm:$0xff] %v8403_v51  ;;  %v1794_v27 = vmax.f32 %v8384_v46, %v8394_v33 }
 0x342   : > { %11139 = vst [vmem:[#allocation66_spill] sm:$0xff] %v8401_v8  ;;  %v8406_v42 = vmax.f32 %v2452_v38, %v8398_v37  ;;  %v8408_v62 = vpop.f32.mrb[50].mxu1  ;;  %v8410_v14 = vpop.f32.mrb[51].mxu0  ;;  %6234 = vpow2.f32 %v1898_v16  ;;  %v1904_v15 = vmul.f32 1.442695, %v1829_v24 }
 0x343   : > { %11141 = vst [vmem:[#allocation68_spill] sm:$0xff] %v8410_v14  ;;  %v8415_v36 = vmax.f32 %v2416_v18, %v8408_v62  ;;  %v8417_v1 = vpop.f32.mrb[51].mxu1  ;;  %6236 = vpow2.f32 %v1900_v21  ;;  %v1902_v13 = vmul.f32 1.442695, %v1828_v40  ;;  %1795 = vmax.xlane.f32.xlu0 %v1794_v27  ;;  %2081 = vmatmul.mubr.f32.gmra.mrb[66].mxu1 %v8403_v51  ;;  %v1797_v38 = vmax.f32 %v8401_v8, %v8410_v14 }
 0x344   : > { %v8420_v23 = vmax.f32 %v2453_v22, %v8417_v1  ;;  %v8425_v32 = vpop.eup %6226  ;;  %6238 = vpow2.f32 %v1904_v15 }
 0x345   : > { %11142 = vst [vmem:[#allocation69_spill] sm:$0xff] %v8425_v32  ;;  %v8427_v16 = vpop.eup %6228  ;;  %1798 = vmax.xlane.f32.xlu1 %v1797_v38  ;;  %v1742_v18 = vpop.xlane.xlu0 %1741  ;;  %6240 = vpow2.f32 %v1902_v13 }
 0x346   : > { %11143 = vst [vmem:[#allocation70_spill] sm:$0xff] %v8427_v16  ;;  %2086 = vmatprep.mubr.f32.mxu1 %v8427_v16  ;;  %v1830_v21 = vsub.f32 %v8112_v50, %v1742_v18  ;;  %v1831_v22 = vsub.f32 %v8119_v5, %v1742_v18  ;;  %v8432_v40 = vpop.f32.mrb[52].mxu0  ;;  %v8434_v24 = vpop.f32.mrb[52].mxu1 }
 0x347   : > { %11144 = vst [vmem:[#allocation71_spill] sm:$0xff] %v8432_v40  ;;  %v8436_v27 = vpop.eup %6230  ;;  %v2419_v51 = vmax.f32 %v8391_v19, %v8434_v24  ;;  %2087 = vmatmul.mubr.f32.gmra.mrb[68].mxu1 %v8425_v32  ;;  %v1745_v15 = vpop.xlane.xlu1 %1744 }
 0x348   : > { %11145 = vst [vmem:[#allocation72_spill] sm:$0xff] %v8436_v27  ;;  %v8441_v38 = vpop.f32.mrb[53].mxu0  ;;  %v1906_v16 = vmul.f32 1.442695, %v1830_v21  ;;  %v1908_v8 = vmul.f32 1.442695, %v1831_v22  ;;  %v1832_v50 = vsub.f32 %v8126_v59, %v1745_v15  ;;  %v1833_v5 = vsub.f32 %v8135_v57, %v1745_v15  ;;  %2092 = vmatprep.mubr.f32.mxu1 %v8436_v27  ;;  %v8450_v13 = vpop.eup %6232 }
 0x349   : > { %11146 = vst [vmem:[#allocation73_spill] sm:$0xff] %v8441_v38  ;;  %v8445_v18 = vpop.f32.mrb[53].mxu1  ;;  %v8448_v14 = vpop.f32.mrb[54].mxu0  ;;  %11148 = vst [vmem:[#allocation75_spill] sm:$0xff] %v8450_v13  ;;  %v1800_v59 = vmax.f32 %v8432_v40, %v8441_v38 }
 0x34a   : > { %11147 = vst [vmem:[#allocation74_spill] sm:$0xff] %v8448_v14  ;;  %v2456_v19 = vmax.f32 %v8406_v42, %v8445_v18  ;;  %v8454_v32 = vpop.f32.mrb[54].mxu1  ;;  %v8456_v46 = vpop.f32.mrb[55].mxu0  ;;  %6242 = vpow2.f32 %v1906_v16  ;;  %v1912_v57 = vmul.f32 1.442695, %v1833_v5 }
 0x34b   : > { %11149 = vst [vmem:[#allocation76_spill] sm:$0xff] %v8454_v32  ;;  %11150 = vst [vmem:[#allocation77_spill] sm:$0xff] %v8456_v46  ;;  %v2420_v21 = vmax.f32 %v8415_v36, %v8454_v32  ;;  %v8462_v22 = vpop.f32.mrb[55].mxu1  ;;  %6244 = vpow2.f32 %v1908_v8  ;;  %v1910_v15 = vmul.f32 1.442695, %v1832_v50  ;;  %1801 = vmax.xlane.f32.xlu0 %v1800_v59  ;;  %2093 = vmatmul.mubr.f32.gmra.mrb[70].mxu1 %v8450_v13 }
 0x34c   : > { %v2457_v27 = vmax.f32 %v8420_v23, %v8462_v22  ;;  %v1803_v42 = vmax.f32 %v8448_v14, %v8456_v46  ;;  %v8469_v33 = vpop.eup %6234  ;;  %6246 = vpow2.f32 %v1912_v57 }
 0x34d   : > { %11151 = vst [vmem:[#allocation78_spill] sm:$0xff] %v8469_v33  ;;  %v8471_v16 = vpop.eup %6236  ;;  %v1748_v36 = vpop.xlane.xlu0 %1747  ;;  %6248 = vpow2.f32 %v1910_v15 }
 0x34e   : > { %11152 = vst [vmem:[#allocation79_spill] sm:$0xff] %v8471_v16  ;;  %1804 = vmax.xlane.f32.xlu1 %v1803_v42  ;;  %2098 = vmatprep.mubr.f32.mxu1 %v8471_v16  ;;  %v1834_v8 = vsub.f32 %v8146_v55, %v1748_v36  ;;  %v1835_v50 = vsub.f32 %v8152_v29, %v1748_v36  ;;  %v8476_v23 = vpop.f32.mrb[56].mxu0  ;;  %v8478_v5 = vpop.f32.mrb[56].mxu1 }
 0x34f   : > { %11153 = vst [vmem:[#allocation80_spill] sm:$0xff] %v8476_v23  ;;  %11154 = vst [vmem:[#allocation81_spill] sm:$0xff] %v8478_v5  ;;  %v8480_v59 = vpop.eup %6238  ;;  %v8483_v13 = vmax.f32 %v2419_v51, %v8478_v5  ;;  %2099 = vmatmul.mubr.f32.gmra.mrb[72].mxu1 %v8469_v33  ;;  %v1751_v57 = vpop.xlane.xlu1 %1750 }
 0x350   : > { %11155 = vst [vmem:[#allocation82_spill] sm:$0xff] %v8480_v59  ;;  %v8486_v42 = vpop.f32.mrb[57].mxu0  ;;  %v1914_v16 = vmul.f32 1.442695, %v1834_v8  ;;  %v1916_v14 = vmul.f32 1.442695, %v1835_v50  ;;  %v1836_v55 = vsub.f32 %v8158_v4, %v1751_v57  ;;  %v1837_v29 = vsub.f32 %v8165_v39, %v1751_v57  ;;  %2104 = vmatprep.mubr.f32.mxu1 %v8480_v59  ;;  %v8495_v15 = vpop.eup %6240 }
 0x351   : > { %11156 = vst [vmem:[#allocation83_spill] sm:$0xff] %v8486_v42  ;;  %v8490_v36 = vpop.f32.mrb[57].mxu1  ;;  %v8493_v46 = vpop.f32.mrb[58].mxu0  ;;  %11158 = vst [vmem:[#allocation85_spill] sm:$0xff] %v8495_v15  ;;  %v1806_v8 = vmax.f32 %v8476_v23, %v8486_v42 }
 0x352   : > { %11157 = vst [vmem:[#allocation84_spill] sm:$0xff] %v8493_v46  ;;  %v2458_v51 = vmax.f32 %v2456_v19, %v8490_v36  ;;  %v8498_v33 = vpop.f32.mrb[58].mxu1  ;;  %v8500_v40 = vpop.f32.mrb[59].mxu0  ;;  %6250 = vpow2.f32 %v1914_v16  ;;  %v1920_v4 = vmul.f32 1.442695, %v1837_v29 }
 0x353   : > { %11159 = vst [vmem:[#allocation86_spill] sm:$0xff] %v8498_v33  ;;  %11160 = vst [vmem:[#allocation87_spill] sm:$0xff] %v8500_v40  ;;  %v2422_v39 = vmax.f32 %v2420_v21, %v8498_v33  ;;  %v8505_v50 = vpop.f32.mrb[59].mxu1  ;;  %6252 = vpow2.f32 %v1916_v14  ;;  %v1918_v57 = vmul.f32 1.442695, %v1836_v55  ;;  %1807 = vmax.xlane.f32.xlu0 %v1806_v8  ;;  %2105 = vmatmul.mubr.f32.gmra.mrb[74].mxu1 %v8495_v15 }
 0x354   : > { %11161 = vst [vmem:[#allocation88_spill] sm:$0xff] %v8505_v50  ;;  %v2459_v59 = vmax.f32 %v2457_v27, %v8505_v50  ;;  %v1809_v19 = vmax.f32 %v8493_v46, %v8500_v40  ;;  %v8511_v38 = vpop.eup %6242  ;;  %6254 = vpow2.f32 %v1920_v4 }
 0x355   : > { %11162 = vst [vmem:[#allocation89_spill] sm:$0xff] %v8511_v38  ;;  %v8513_v43 = vpop.eup %6244  ;;  %v1754_v16 = vpop.xlane.xlu0 %1753  ;;  %6256 = vpow2.f32 %v1918_v57 }
 0x356   : > { %11163 = vst [vmem:[#allocation90_spill] sm:$0xff] %v8513_v43  ;;  %1810 = vmax.xlane.f32.xlu1 %v1809_v19  ;;  %2110 = vmatprep.mubr.f32.mxu1 %v8513_v43  ;;  %v1838_v14 = vsub.f32 %v8173_v58, %v1754_v16  ;;  %v1839_v21 = vsub.f32 %v8179_v7, %v1754_v16  ;;  %v8518_v27 = vpop.f32.mrb[60].mxu0  ;;  %v8520_v55 = vpop.f32.mrb[60].mxu1 }
 0x357   : > { %11164 = vst [vmem:[#allocation91_spill] sm:$0xff] %v8518_v27  ;;  %11165 = vst [vmem:[#allocation92_spill] sm:$0xff] %v8520_v55  ;;  %v8522_v29 = vpop.eup %6246  ;;  %v2423_v8 = vmax.f32 %v8483_v13, %v8520_v55  ;;  %2111 = vmatmul.mubr.f32.gmra.mrb[76].mxu1 %v8511_v38  ;;  %v1757_v4 = vpop.xlane.xlu1 %1756 }
 0x358   : > { %11166 = vst [vmem:[#allocation93_spill] sm:$0xff] %v8522_v29  ;;  %v8527_v19 = vpop.f32.mrb[61].mxu0  ;;  %v1922_v43 = vmul.f32 1.442695, %v1838_v14  ;;  %v1924_v15 = vmul.f32 1.442695, %v1839_v21  ;;  %v1840_v58 = vsub.f32 %v8184_v45, %v1757_v4  ;;  %v1841_v7 = vsub.f32 %v8191_v26, %v1757_v4  ;;  %2116 = vmatprep.mubr.f32.mxu1 %v8522_v29  ;;  %v8536_v57 = vpop.eup %6248 }
 0x359   : > { %11167 = vst [vmem:[#allocation94_spill] sm:$0xff] %v8527_v19  ;;  %v8531_v16 = vpop.f32.mrb[61].mxu1  ;;  %v8534_v46 = vpop.f32.mrb[62].mxu0  ;;  %11170 = vst [vmem:[#allocation97_spill] sm:$0xff] %v8536_v57  ;;  %v1812_v14 = vmax.f32 %v8518_v27, %v8527_v19  ;;  %v11213_v27 = vld [vmem:[#allocation24_spill] sm:$0xff] }
 0x35a   : > { %11168 = vst [vmem:[#allocation95_spill] sm:$0xff] %v8531_v16  ;;  %11169 = vst [vmem:[#allocation96_spill] sm:$0xff] %v8534_v46  ;;  %v2460_v13 = vmax.f32 %v2458_v51, %v8531_v16  ;;  %v8539_v38 = vpop.f32.mrb[62].mxu1  ;;  %v8541_v40 = vpop.f32.mrb[63].mxu0  ;;  %6258 = vpow2.f32 %v1922_v43  ;;  %v1928_v45 = vmul.f32 1.442695, %v1841_v7 }
 0x35b   : > { %11171 = vst [vmem:[#allocation98_spill] sm:$0xff] %v8539_v38  ;;  %11172 = vst [vmem:[#allocation99_spill] sm:$0xff] %v8541_v40  ;;  %v2424_v26 = vmax.f32 %v2422_v39, %v8539_v38  ;;  %v8546_v21 = vpop.f32.mrb[63].mxu1  ;;  %6260 = vpow2.f32 %v1924_v15  ;;  %v1926_v4 = vmul.f32 1.442695, %v1840_v58  ;;  %1813 = vmax.xlane.f32.xlu0 %v1812_v14  ;;  %2117 = vmatmul.mubr.f32.gmra.mrb[78].mxu1 %v8536_v57  ;;  %v11230_v38 = vld [vmem:[#allocation44_spill] sm:$0xff] }
 0x35c   : > { %11173 = vst [vmem:[#allocation100_spill] sm:$0xff] %v8546_v21  ;;  %v2461_v29 = vmax.f32 %v2459_v59, %v8546_v21  ;;  %v1815_v51 = vmax.f32 %v8534_v46, %v8541_v40  ;;  %v8552_v42 = vpop.eup %6250  ;;  %6262 = vpow2.f32 %v1928_v45 }
 0x35d   : > { %11174 = vst [vmem:[#allocation101_spill] sm:$0xff] %v8552_v42  ;;  %v2425_v23 = vmax.f32 %v2423_v8, %v2424_v26  ;;  %v8554_v19 = vpop.eup %6252  ;;  %v1760_v39 = vpop.xlane.xlu0 %1759  ;;  %6264 = vpow2.f32 %v1926_v4 }
 0x35e   : > { %11175 = vst [vmem:[#allocation102_spill] sm:$0xff] %v8554_v19  ;;  %v2462_v43 = vmax.f32 %v2460_v13, %v2461_v29  ;;  %1816 = vmax.xlane.f32.xlu1 %v1815_v51  ;;  %2122 = vmatprep.mubr.f32.mxu1 %v8554_v19  ;;  %v1842_v59 = vsub.f32 %v8199_v63, %v1760_v39  ;;  %v8559_v58 = vpop.f32.mrb[64].mxu0  ;;  %v8561_v14 = vpop.eup %6254 }
 0x35f   : > { %v2426_v7 = vrot.slane %v2425_v23, 4  ;;  %v1843_v15 = vsub.f32 %v8205_v54, %v1760_v39  ;;  %11176 = vst [vmem:[#allocation103_spill] sm:$0xff] %v8559_v58  ;;  %11177 = vst [vmem:[#allocation104_spill] sm:$0xff] %v8561_v14  ;;  %2123 = vmatmul.mubr.f32.gmra.mrb[80].mxu1 %v8552_v42  ;;  %v1763_v8 = vpop.xlane.xlu1 %1762  ;;  %v8564_v45 = vpop.f32.mrb[65].mxu0 }
 0x360   : > { %v2463_v57 = vrot.slane %v2462_v43, 4  ;;  %11178 = vst [vmem:[#allocation105_spill] sm:$0xff] %v8564_v45  ;;  %v1930_v13 = vmul.f32 1.442695, %v1842_v59  ;;  %v1844_v51 = vsub.f32 %v8210_v9, %v1763_v8  ;;  %2128 = vmatprep.mubr.f32.mxu1 %v8561_v14  ;;  %v8568_v63 = vpop.f32.mrb[66].mxu0  ;;  %v8570_v54 = vpop.eup %6256  ;;  %v1845_v4 = vsub.f32 %v8217_v3, %v1763_v8 }
 0x361   : > { %v2427_v29 = vmax.f32 %v2425_v23, %v2426_v7  ;;  %v1932_v26 = vmul.f32 1.442695, %v1843_v15  ;;  %11179 = vst [vmem:[#allocation106_spill] sm:$0xff] %v8568_v63  ;;  %11180 = vst [vmem:[#allocation107_spill] sm:$0xff] %v8570_v54  ;;  %v2802_v42 = vmul.f32 %v8564_v45, %v8564_v45  ;;  %v8575_v19 = vpop.f32.mrb[67].mxu0  ;;  %v2801_v23 = vmul.f32 %v8559_v58, %v8559_v58 }
 0x362   : > { %v2464_v39 = vmax.f32 %v2462_v43, %v2463_v57  ;;  %11181 = vst [vmem:[#allocation108_spill] sm:$0xff] %v8575_v19  ;;  %6266 = vpow2.f32 %v1930_v13  ;;  %v2804_v9 = vmul.f32 %v8575_v19, %v8575_v19  ;;  %v1936_v59 = vmul.f32 1.442695, %v1845_v4  ;;  %v11202_v19 = vld [vmem:[#allocation16_spill] sm:$0xff] }
 0x363   : > { %v2428_v46 = vrot.slane %v2427_v29, 2  ;;  %6268 = vpow2.f32 %v1932_v26  ;;  %2129 = vmatmul.mubr.f32.gmra.mrb[82].mxu1 %v8570_v54  ;;  %2929 = vmatprep.mubr.f32.mxu0 %v2802_v42  ;;  %v1934_v43 = vmul.f32 1.442695, %v1844_v51  ;;  %v2803_v14 = vmul.f32 %v8568_v63, %v8568_v63 }
 0x364   : > { %v2465_v7 = vrot.slane %v2464_v39, 2  ;;  %v8582_v3 = vpop.eup %6258  ;;  %2930 = vmatmul.mubr.f32.vlgmr.msra.gmra.mrb[128].mxu0 %v2801_v23  ;;  %6270 = vpow2.f32 %v1936_v59 }
 0x365   : > { %11182 = vst [vmem:[#allocation109_spill] sm:$0xff] %v8582_v3  ;;  %v2429_v57 = vmax.f32 %v2427_v29, %v2428_v46  ;;  %v8584_v15 = vpop.eup %6260  ;;  %2935 = vmatprep.mubr.f32.mxu0 %v2804_v9  ;;  %6272 = vpow2.f32 %v1934_v43 }
 0x366   : > { %11183 = vst [vmem:[#allocation110_spill] sm:$0xff] %v8584_v15  ;;  %v2466_v8 = vmax.f32 %v2464_v39, %v2465_v7  ;;  %2134 = vmatprep.mubr.f32.mxu1 %v8584_v15  ;;  %v8589_v26 = vpop.f32.mrb[68].mxu0  ;;  %v8591_v4 = vpop.eup %6262 }
 0x367   : > { %v2430_v13 = vrot.slane %v2429_v57, 1  ;;  %11184 = vst [vmem:[#allocation111_spill] sm:$0xff] %v8589_v26  ;;  %11185 = vst [vmem:[#allocation112_spill] sm:$0xff] %v8591_v4  ;;  %2135 = vmatmul.mubr.f32.gmra.mrb[84].mxu1 %v8582_v3  ;;  %v8594_v46 = vpop.f32.mrb[69].mxu0  ;;  %v8601_v39 = vpop.eup %6264  ;;  %v2805_v9 = vmul.f32 %v8589_v26, %v8589_v26 }
 0x368   : > { %v2467_v42 = vrot.slane %v2466_v8, 1  ;;  %11186 = vst [vmem:[#allocation113_spill] sm:$0xff] %v8594_v46  ;;  %2140 = vmatprep.mubr.f32.mxu1 %v8591_v4  ;;  %2936 = vmatmul.mubr.f32.gmra.mrb[130].mxu0 %v2803_v14  ;;  %v8599_v51 = vpop.f32.mrb[70].mxu0  ;;  %11188 = vst [vmem:[#allocation115_spill] sm:$0xff] %v8601_v39  ;;  %v2806_v7 = vmul.f32 %v8594_v46, %v8594_v46  ;;  %v11203_v46 = vld [vmem:[#allocation17_spill] sm:$0xff] }
 0x369   : > { %v8596_v29 = vmax.f32 %v2429_v57, %v2430_v13  ;;  %11187 = vst [vmem:[#allocation114_spill] sm:$0xff] %v8599_v51  ;;  %v8609_v59 = vpop.f32.mrb[71].mxu0 }
 0x36a   : > { %v8603_v23 = vmax.f32 %v2466_v8, %v2467_v42  ;;  %11189 = vst [vmem:[#allocation116_spill] sm:$0xff] %v8609_v59  ;;  %2941 = vmatprep.mubr.f32.mxu0 %v2806_v7 }
 0x36b   : > { %v2469_v57 = vsub.f32 %v8002_v41, %v8596_v29  ;;  %v2471_v14 = vsub.f32 %v8016_v34, %v8596_v29  ;;  %v2473_v43 = vsub.f32 %v8036_v60, %v8596_v29  ;;  %v2475_v8 = vsub.f32 %v8051_v47, %v8596_v29  ;;  %2141 = vmatmul.mubr.f32.gmra.mrb[86].mxu1 %v8601_v39  ;;  %v11192_v39 = vld [vmem:[#allocation29_spill] sm:$0xff] }
 0x36c   : > { %v2477_v13 = vsub.f32 %v8070_v0, %v8596_v29  ;;  %v2479_v42 = vsub.f32 %v8089_v28, %v8596_v29  ;;  %v2481_v4 = vsub.f32 %v8114_v25, %v8596_v29  ;;  %v2483_v41 = vsub.f32 %v8128_v49, %v8596_v29  ;;  %v8628_v34 = vpop.eup %6266  ;;  %2942 = vmatmul.mubr.f32.gmra.mrb[132].mxu0 %v2805_v9  ;;  %v11194_v0 = vld [vmem:[#allocation39_spill] sm:$0xff]  ;;  %v11195_v28 = vld [vmem:[#allocation46_spill] sm:$0xff] }
 0x36d   : > { %11190 = vst [vmem:[#allocation117_spill] sm:$0xff] %v8628_v34  ;;  %v2485_v60 = vsub.f32 %v8148_v11, %v8596_v29  ;;  %v8638_v25 = vpop.eup %6268  ;;  %v11193_v11 = vld [vmem:[#allocation32_spill] sm:$0xff]  ;;  %v2533_v54 = vmul.f32 1.442695, %v2469_v57  ;;  %v2541_v45 = vmul.f32 1.442695, %v2473_v43  ;;  %v11229_v5 = vsub.f32 %v8175_v35, %v8596_v29 }
 0x36e   : > { %11191 = vst [vmem:[#allocation118_spill] sm:$0xff] %v8638_v25  ;;  %2146 = vmatprep.mubr.f32.mxu1 %v8638_v25  ;;  %v8657_v3 = vpop.f32.mrb[72].mxu0  ;;  %v8659_v15 = vpop.eup %6270  ;;  %v2545_v47 = vmul.f32 1.442695, %v2475_v8  ;;  %v2549_v25 = vmul.f32 1.442695, %v2477_v13 }
 0x36f   : > { %11196 = vst [vmem:[#allocation29_spill] sm:$0xff] %v8657_v3  ;;  %11197 = vst [vmem:[#allocation32_spill] sm:$0xff] %v8659_v15  ;;  %2147 = vmatmul.mubr.f32.gmra.mrb[88].mxu1 %v8628_v34  ;;  %v8670_v49 = vpop.f32.mrb[73].mxu0  ;;  %v8693_v26 = vpop.eup %6272  ;;  %6274 = vpow2.f32 %v2533_v54  ;;  %v2553_v34 = vmul.f32 1.442695, %v2479_v42  ;;  %v11206_v43 = vld [vmem:[#allocation19_spill] sm:$0xff] }
 0x370   : > { %11198 = vst [vmem:[#allocation39_spill] sm:$0xff] %v8670_v49  ;;  %2152 = vmatprep.mubr.f32.mxu1 %v8659_v15  ;;  %v8681_v7 = vpop.f32.mrb[74].mxu0  ;;  %11201 = vst [vmem:[#allocation120_spill] sm:$0xff] %v8693_v26  ;;  %v2537_v15 = vmul.f32 1.442695, %v2471_v14  ;;  %v11204_v14 = vld [vmem:[#allocation18_spill] sm:$0xff] }
 0x371   : > { %11199 = vst [vmem:[#allocation46_spill] sm:$0xff] %v8681_v7  ;;  %v8691_v9 = vpop.f32.mrb[75].mxu0  ;;  %v2557_v40 = vmul.f32 1.442695, %v2481_v4  ;;  %v2561_v57 = vmul.f32 1.442695, %v2483_v41 }
 0x372   : > { %11200 = vst [vmem:[#allocation119_spill] sm:$0xff] %v8691_v9  ;;  %6276 = vpow2.f32 %v2537_v15  ;;  %v11207_v54 = vld [vmem:[#allocation20_spill] sm:$0xff]  ;;  %v2565_v4 = vmul.f32 1.442695, %v2485_v60  ;;  %v11211_v41 = vld [vmem:[#allocation22_spill] sm:$0xff] }
 0x373   : > { %2153 = vmatmul.mubr.f32.gmra.mrb[90].mxu1 %v8693_v26  ;;  %6278 = vpow2.f32 %v2541_v45  ;;  %v11208_v45 = vld [vmem:[#allocation21_spill] sm:$0xff]  ;;  %v2573_v8 = vmul.f32 1.442695, %v11229_v5  ;;  %v11235_v5 = vld [vmem:[#allocation56_spill] sm:$0xff] }
 0x374   : > { %6280 = vpow2.f32 %v2545_v47 }
 0x375   : > { %6282 = vpow2.f32 %v2549_v25  ;;  %v11212_v25 = vld [vmem:[#allocation23_spill] sm:$0xff] }
 0x376   : > { %v8702_v63 = vpop.f32.mrb[76].mxu0  ;;  %6284 = vpow2.f32 %v2553_v34  ;;  %v11220_v34 = vsub.f32 %v8160_v20, %v8596_v29  ;;  %v11226_v20 = vld [vmem:[#allocation37_spill] sm:$0xff] }
 0x377   : > { %11205 = vst [vmem:[#allocation16_spill] sm:$0xff] %v8702_v63  ;;  %v8710_v13 = vpop.f32.mrb[77].mxu0  ;;  %6286 = vpow2.f32 %v2557_v40  ;;  %v11231_v40 = vld [vmem:[#allocation48_spill] sm:$0xff] }
 0x378   : > { %11209 = vst [vmem:[#allocation17_spill] sm:$0xff] %v8710_v13  ;;  %v8720_v26 = vpop.f32.mrb[78].mxu0  ;;  %v2569_v58 = vmul.f32 1.442695, %v11220_v34  ;;  %6288 = vpow2.f32 %v2561_v57  ;;  %v11237_v57 = vsub.f32 %v8186_v6, %v8596_v29  ;;  %v11246_v6 = vsub.f32 %v11193_v11, %v8596_v29 }
 0x379   : > { %v8712_v42 = vpop.eup %6274  ;;  %11214 = vst [vmem:[#allocation19_spill] sm:$0xff] %v8720_v26  ;;  %v8730_v63 = vpop.f32.mrb[79].mxu0  ;;  %6290 = vpow2.f32 %v2565_v4 }
 0x37a   : > { %11210 = vst [vmem:[#allocation18_spill] sm:$0xff] %v8712_v42  ;;  %11219 = vst [vmem:[#allocation21_spill] sm:$0xff] %v8730_v63  ;;  %v2577_v33 = vmul.f32 1.442695, %v11237_v57  ;;  %6292 = vpow2.f32 %v2569_v58 }
 0x37b   : > { %6294 = vpow2.f32 %v2573_v8  ;;  %v11245_v8 = vsub.f32 %v11192_v39, %v8596_v29 }
 0x37c   : > { %v8722_v15 = vpop.eup %6276  ;;  %6296 = vpow2.f32 %v2577_v33  ;;  %v11250_v33 = vsub.f32 %v11194_v0, %v8596_v29 }
 0x37d   : > { %11215 = vst [vmem:[#allocation20_spill] sm:$0xff] %v8722_v15  ;;  %v2661_v26 = vadd.f32 %v8722_v15, %v8712_v42  ;;  %v8743_v60 = vpop.eup %6278 }
 0x37e   : > { %v8741_v32 = vpop.f32.mrb[80].mxu0  ;;  %11224 = vst [vmem:[#allocation23_spill] sm:$0xff] %v8743_v60  ;;  %v8763_v34 = vpop.eup %6280  ;;  %v2597_v39 = vmul.f32 1.442695, %v11250_v33 }
 0x37f   : > { %11223 = vst [vmem:[#allocation22_spill] sm:$0xff] %v8741_v32  ;;  %v8751_v42 = vpop.f32.mrb[81].mxu0  ;;  %v2662_v32 = vadd.f32 %v8743_v60, %v2661_v26  ;;  %11233 = vst [vmem:[#allocation44_spill] sm:$0xff] %v8763_v34  ;;  %v8781_v15 = vpop.eup %6282 }
 0x380   : > { %11228 = vst [vmem:[#allocation24_spill] sm:$0xff] %v8751_v42  ;;  %v8761_v47 = vpop.f32.mrb[82].mxu0  ;;  %11238 = vst [vmem:[#allocation56_spill] sm:$0xff] %v8781_v15  ;;  %v8799_v26 = vpop.eup %6284 }
 0x381   : > { %11232 = vst [vmem:[#allocation37_spill] sm:$0xff] %v8761_v47  ;;  %v8771_v60 = vpop.f32.mrb[83].mxu0  ;;  %v2663_v47 = vadd.f32 %v8763_v34, %v2662_v32  ;;  %v11239_v32 = vsub.f32 %v8201_v30, %v8596_v29  ;;  %11241 = vst [vmem:[#allocation122_spill] sm:$0xff] %v8799_v26  ;;  %v8812_v58 = vpop.eup %6286  ;;  %v2589_v30 = vmul.f32 1.442695, %v11246_v6  ;;  %v11253_v6 = vsub.f32 %v11195_v28, %v8596_v29 }
 0x382   : > { %11236 = vst [vmem:[#allocation48_spill] sm:$0xff] %v8771_v60  ;;  %11244 = vst [vmem:[#allocation125_spill] sm:$0xff] %v8812_v58  ;;  %v8823_v21 = vpop.eup %6288 }
 0x383   : > { %v2581_v57 = vmul.f32 1.442695, %v11239_v32  ;;  %v2664_v4 = vadd.f32 %v8781_v15, %v2663_v47  ;;  %v2585_v15 = vmul.f32 1.442695, %v11245_v8  ;;  %11248 = vst [vmem:[#allocation127_spill] sm:$0xff] %v8823_v21  ;;  %v8832_v50 = vpop.eup %6290 }
 0x384   : > { %11251 = vst [vmem:[#allocation128_spill] sm:$0xff] %v8832_v50  ;;  %v8843_v0 = vpop.eup %6292 }
 0x385   : > { %v2665_v55 = vadd.f32 %v8799_v26, %v2664_v4  ;;  %6298 = vpow2.f32 %v2581_v57  ;;  %v11249_v4 = vsub.f32 %v8238_v31, %v8596_v29  ;;  %v2605_v57 = vmul.f32 1.442695, %v11253_v6  ;;  %11255 = vst [vmem:[#allocation130_spill] sm:$0xff] %v8843_v0 }
 0x386   : > { %v8797_v34 = vpop.f32.mrb[84].mxu0  ;;  %6300 = vpow2.f32 %v2585_v15 }
 0x387   : > { %11240 = vst [vmem:[#allocation121_spill] sm:$0xff] %v8797_v34  ;;  %v8807_v32 = vpop.f32.mrb[85].mxu0  ;;  %v2666_v16 = vadd.f32 %v8812_v58, %v2665_v55  ;;  %v2593_v26 = vmul.f32 1.442695, %v11249_v4  ;;  %v11252_v55 = vsub.f32 %v8264_v12, %v8596_v29  ;;  %6302 = vpow2.f32 %v2589_v30  ;;  %v11327_v58 = vld [vmem:[#allocation34_spill] sm:$0xff] }
 0x388   : > { %11242 = vst [vmem:[#allocation123_spill] sm:$0xff] %v8807_v32  ;;  %v8810_v35 = vpop.f32.mrb[86].mxu0  ;;  %v11257_v30 = vsub.f32 %v11202_v19, %v8603_v23 }
 0x389   : > { %11243 = vst [vmem:[#allocation124_spill] sm:$0xff] %v8810_v35  ;;  %v8821_v47 = vpop.f32.mrb[87].mxu0  ;;  %v2667_v8 = vadd.f32 %v8823_v21, %v2666_v16  ;;  %v2601_v11 = vmul.f32 1.442695, %v11252_v55  ;;  %6304 = vpow2.f32 %v2593_v26  ;;  %v11256_v16 = vsub.f32 %v8290_v17, %v8596_v29  ;;  %v8854_v55 = vpop.eup %6294 }
 0x38a   : > { %11247 = vst [vmem:[#allocation126_spill] sm:$0xff] %v8821_v47  ;;  %6306 = vpow2.f32 %v2597_v39  ;;  %v2535_v33 = vmul.f32 1.442695, %v11257_v30  ;;  %11259 = vst [vmem:[#allocation132_spill] sm:$0xff] %v8854_v55  ;;  %v11261_v17 = vsub.f32 %v8305_v44, %v8596_v29  ;;  %v8865_v19 = vpop.eup %6296 }
 0x38b   : > { %v2668_v31 = vadd.f32 %v8832_v50, %v2667_v8  ;;  %v2609_v15 = vmul.f32 1.442695, %v11256_v16  ;;  %6308 = vpow2.f32 %v2601_v11  ;;  %v11260_v8 = vsub.f32 %v11203_v46, %v8603_v23  ;;  %11263 = vst [vmem:[#allocation134_spill] sm:$0xff] %v8865_v19 }
 0x38c   : > { %6310 = vpow2.f32 %v2605_v57  ;;  %v2613_v39 = vmul.f32 1.442695, %v11261_v17  ;;  %v11264_v16 = vsub.f32 %v11204_v14, %v8603_v23  ;;  %v11265_v46 = vsub.f32 %v8320_v52, %v8596_v29 }
 0x38d   : > { %v2669_v12 = vadd.f32 %v8843_v0, %v2668_v31  ;;  %v2539_v26 = vmul.f32 1.442695, %v11260_v8  ;;  %6312 = vpow2.f32 %v2609_v15  ;;  %v2808_v14 = vmul.f32 %v8609_v59, %v8609_v59 }
 0x38e   : > { %v8841_v4 = vpop.f32.mrb[88].mxu0  ;;  %v2543_v11 = vmul.f32 1.442695, %v11264_v16  ;;  %v2617_v30 = vmul.f32 1.442695, %v11265_v46  ;;  %6314 = vpow2.f32 %v2535_v33  ;;  %v11269_v52 = vsub.f32 %v8349_v48, %v8596_v29 }
 0x38f   : > { %11254 = vst [vmem:[#allocation129_spill] sm:$0xff] %v8841_v4  ;;  %v8852_v28 = vpop.f32.mrb[89].mxu0  ;;  %v2670_v6 = vadd.f32 %v8854_v55, %v2669_v12  ;;  %v8876_v8 = vpop.eup %6298  ;;  %6316 = vpow2.f32 %v2539_v26  ;;  %v11268_v12 = vsub.f32 %v11206_v43, %v8603_v23  ;;  %v2807_v33 = vmul.f32 %v8599_v51, %v8599_v51  ;;  %2947 = vmatprep.mubr.f32.mxu0 %v2808_v14 }
 0x390   : > { %11258 = vst [vmem:[#allocation131_spill] sm:$0xff] %v8852_v28  ;;  %v8863_v31 = vpop.f32.mrb[90].mxu0  ;;  %11267 = vst [vmem:[#allocation136_spill] sm:$0xff] %v8876_v8  ;;  %6318 = vpow2.f32 %v2613_v39  ;;  %v2621_v17 = vmul.f32 1.442695, %v11269_v52  ;;  %v8891_v26 = vpop.eup %6300  ;;  %v11272_v43 = vsub.f32 %v11207_v54, %v8603_v23  ;;  %v11275_v48 = vsub.f32 %v8363_v10, %v8596_v29 }
 0x391   : > { %11262 = vst [vmem:[#allocation133_spill] sm:$0xff] %v8863_v31  ;;  %v2671_v57 = vadd.f32 %v8865_v19, %v2670_v6  ;;  %v8874_v44 = vpop.f32.mrb[91].mxu0  ;;  %v2547_v15 = vmul.f32 1.442695, %v11268_v12  ;;  %11271 = vst [vmem:[#allocation138_spill] sm:$0xff] %v8891_v26  ;;  %6320 = vpow2.f32 %v2543_v11  ;;  %v8898_v12 = vpop.eup %6302  ;;  %2948 = vmatmul.mubr.f32.gmra.mrb[134].mxu0 %v2807_v33  ;;  %v11278_v54 = vsub.f32 %v8386_v61, %v8596_v29  ;;  %v11310_v19 = vld [vmem:[#allocation27_spill] sm:$0xff] }
 0x392   : > { %11266 = vst [vmem:[#allocation135_spill] sm:$0xff] %v8874_v44  ;;  %v2551_v46 = vmul.f32 1.442695, %v11272_v43  ;;  %11274 = vst [vmem:[#allocation140_spill] sm:$0xff] %v8898_v12  ;;  %6322 = vpow2.f32 %v2617_v30  ;;  %v11279_v43 = vsub.f32 %v11208_v45, %v8603_v23  ;;  %v2810_v10 = vmul.f32 %v8670_v49, %v8670_v49 }
 0x393   : > { %v2672_v6 = vadd.f32 %v8876_v8, %v2671_v57  ;;  %v2625_v57 = vmul.f32 1.442695, %v11275_v48  ;;  %v8906_v11 = vpop.eup %6304  ;;  %v2629_v14 = vmul.f32 1.442695, %v11278_v54  ;;  %6324 = vpow2.f32 %v2547_v15 }
 0x394   : > { %11277 = vst [vmem:[#allocation142_spill] sm:$0xff] %v8906_v11  ;;  %v2555_v30 = vmul.f32 1.442695, %v11279_v43  ;;  %6326 = vpow2.f32 %v2621_v17  ;;  %v2809_v51 = vmul.f32 %v8657_v3, %v8657_v3  ;;  %v2812_v61 = vmul.f32 %v8691_v9, %v8691_v9  ;;  %2953 = vmatprep.mubr.f32.mxu0 %v2810_v10 }
 0x395   : > { %v2673_v52 = vadd.f32 %v8891_v26, %v2672_v6  ;;  %v8918_v6 = vpop.eup %6306  ;;  %6328 = vpow2.f32 %v2551_v46  ;;  %v11281_v45 = vsub.f32 %v11211_v41, %v8603_v23  ;;  %v11282_v17 = vsub.f32 %v8408_v62, %v8596_v29  ;;  %v11305_v26 = vld [vmem:[#allocation86_spill] sm:$0xff] }
 0x396   : > { %v8889_v16 = vpop.f32.mrb[92].mxu0  ;;  %v8925_v15 = vpop.eup %6308  ;;  %6330 = vpow2.f32 %v2625_v57  ;;  %2954 = vmatmul.mubr.f32.gmra.mrb[136].mxu0 %v2809_v51  ;;  %v11283_v46 = vsub.f32 %v11212_v25, %v8603_v23  ;;  %v2814_v41 = vmul.f32 %v8710_v13, %v8710_v13  ;;  %v11285_v62 = vsub.f32 %v8434_v24, %v8596_v29  ;;  %v11291_v24 = vld [vmem:[#allocation76_spill] sm:$0xff] }
 0x397   : > { %11270 = vst [vmem:[#allocation137_spill] sm:$0xff] %v8889_v16  ;;  %v8896_v39 = vpop.f32.mrb[93].mxu0  ;;  %v2674_v33 = vadd.f32 %v8898_v12, %v2673_v52  ;;  %v2559_v54 = vmul.f32 1.442695, %v11281_v45  ;;  %v8930_v43 = vpop.eup %6310  ;;  %v2633_v52 = vmul.f32 1.442695, %v11282_v17  ;;  %6332 = vpow2.f32 %v2555_v30  ;;  %2959 = vmatprep.mubr.f32.mxu0 %v2812_v61 }
 0x398   : > { %11273 = vst [vmem:[#allocation139_spill] sm:$0xff] %v8896_v39  ;;  %v8904_v59 = vpop.f32.mrb[94].mxu0  ;;  %v8936_v3 = vpop.eup %6312  ;;  %v2563_v9 = vmul.f32 1.442695, %v11283_v46  ;;  %6334 = vpow2.f32 %v2629_v14  ;;  %v2637_v57 = vmul.f32 1.442695, %v11285_v62  ;;  %v2811_v30 = vmul.f32 %v8681_v7, %v8681_v7 }
 0x399   : > { %11276 = vst [vmem:[#allocation141_spill] sm:$0xff] %v8904_v59  ;;  %v8916_v48 = vpop.f32.mrb[95].mxu0  ;;  %v2675_v49 = vadd.f32 %v8906_v11, %v2674_v33  ;;  %v8943_v10 = vpop.eup %6314  ;;  %6336 = vpow2.f32 %v2559_v54  ;;  %v11288_v61 = vsub.f32 %v11213_v27, %v8603_v23  ;;  %v11295_v27 = vld [vmem:[#allocation81_spill] sm:$0xff] }
 0x39a   : > { %11280 = vst [vmem:[#allocation143_spill] sm:$0xff] %v8916_v48  ;;  %11284 = vst [vmem:[#allocation144_spill] sm:$0xff] %v8943_v10  ;;  %v8953_v25 = vpop.eup %6316  ;;  %6338 = vpow2.f32 %v2633_v52  ;;  %2960 = vmatmul.mubr.f32.gmra.mrb[138].mxu0 %v2811_v30  ;;  %v11297_v52 = vld [vmem:[#allocation25_spill] sm:$0xff] }
 0x39b   : > { %v2676_v51 = vadd.f32 %v8918_v6, %v2675_v49  ;;  %11287 = vst [vmem:[#allocation146_spill] sm:$0xff] %v8953_v25  ;;  %v2567_v45 = vmul.f32 1.442695, %v11288_v61  ;;  %v8960_v14 = vpop.eup %6318  ;;  %v11292_v49 = vsub.f32 %v11291_v24, %v8596_v29  ;;  %v2698_v13 = vadd.f32 %v8953_v25, %v8943_v10  ;;  %2965 = vmatprep.mubr.f32.mxu0 %v2814_v41 }
 0x39c   : > { %11290 = vst [vmem:[#allocation148_spill] sm:$0xff] %v8960_v14  ;;  %v8970_v7 = vpop.eup %6320  ;;  %v11296_v61 = vsub.f32 %v11295_v27, %v8596_v29  ;;  %6340 = vpow2.f32 %v2563_v9  ;;  %v11298_v12 = vsub.f32 %v11297_v52, %v8603_v23  ;;  %v11300_v27 = vld [vmem:[#allocation16_spill] sm:$0xff] }
 0x39d   : > { %v2641_v46 = vmul.f32 1.442695, %v11292_v49  ;;  %v2677_v62 = vadd.f32 %v8925_v15, %v2676_v51  ;;  %11294 = vst [vmem:[#allocation149_spill] sm:$0xff] %v8970_v7  ;;  %v2816_v51 = vmul.f32 %v8730_v63, %v8730_v63  ;;  %v8982_v30 = vpop.eup %6322  ;;  %6342 = vpow2.f32 %v2637_v57 }
 0x39e   : > { %v8951_v33 = vpop.f32.mrb[96].mxu0  ;;  %v2645_v11 = vmul.f32 1.442695, %v11296_v61  ;;  %v2571_v24 = vmul.f32 1.442695, %v11298_v12  ;;  %v2699_v10 = vadd.f32 %v8970_v7, %v2698_v13  ;;  %v2813_v9 = vmul.f32 %v11300_v27, %v11300_v27  ;;  %v8988_v61 = vpop.eup %6324  ;;  %v11302_v12 = vld [vmem:[#allocation26_spill] sm:$0xff] }
 0x39f   : > { %11286 = vst [vmem:[#allocation145_spill] sm:$0xff] %v8951_v33  ;;  %v8958_v17 = vpop.f32.mrb[97].mxu0  ;;  %v2678_v25 = vadd.f32 %v8930_v43, %v2677_v62  ;;  %11301 = vst [vmem:[#allocation25_spill] sm:$0xff] %v8988_v61  ;;  %6344 = vpow2.f32 %v2567_v45  ;;  %v11303_v52 = vsub.f32 %v11302_v12, %v8603_v23  ;;  %v8993_v41 = vpop.eup %6326  ;;  %v11306_v57 = vsub.f32 %v11305_v26, %v8596_v29  ;;  %v11308_v45 = vld [vmem:[#allocation92_spill] sm:$0xff] }
 0x3a0   : > { %11289 = vst [vmem:[#allocation147_spill] sm:$0xff] %v8958_v17  ;;  %v8968_v54 = vpop.f32.mrb[98].mxu0  ;;  %11304 = vst [vmem:[#allocation26_spill] sm:$0xff] %v8993_v41  ;;  %6346 = vpow2.f32 %v2641_v46  ;;  %v2700_v13 = vadd.f32 %v8988_v61, %v2699_v10  ;;  %v9000_v7 = vpop.xlane.xlu0 %1765  ;;  %2966 = vmatmul.mubr.f32.gmra.mrb[140].mxu0 %v2813_v9  ;;  %v11309_v12 = vsub.f32 %v11308_v45, %v8596_v29 }
 0x3a1   : > { %11293 = vst [vmem:[#allocation76_spill] sm:$0xff] %v8968_v54  ;;  %v8980_v49 = vpop.f32.mrb[99].mxu0  ;;  %v2575_v63 = vmul.f32 1.442695, %v11303_v52  ;;  %v2649_v8 = vmul.f32 1.442695, %v11306_v57  ;;  %v2679_v62 = vadd.f32 %v8936_v3, %v2678_v25  ;;  %v9002_v27 = vpop.eup %6328  ;;  %6348 = vpow2.f32 %v2571_v24  ;;  %2971 = vmatprep.mubr.f32.mxu0 %v2816_v51 }
 0x3a2   : > { %11299 = vst [vmem:[#allocation81_spill] sm:$0xff] %v8980_v49  ;;  %11307 = vst [vmem:[#allocation86_spill] sm:$0xff] %v9002_v27  ;;  %v2653_v52 = vmul.f32 1.442695, %v11309_v12  ;;  %v11311_v46 = vsub.f32 %v11310_v19, %v8603_v23  ;;  %v2818_v26 = vmul.f32 %v8751_v42, %v8751_v42  ;;  %v9012_v25 = vpop.eup %6330  ;;  %6350 = vpow2.f32 %v2645_v11  ;;  %v11313_v57 = vld [vmem:[#allocation19_spill] sm:$0xff]  ;;  %v11316_v19 = vld [vmem:[#allocation28_spill] sm:$0xff] }
 0x3a3   : > { %11312 = vst [vmem:[#allocation92_spill] sm:$0xff] %v9012_v25  ;;  %v2680_v10 = vadd.f32 %v8960_v14, %v2679_v62  ;;  %v2701_v9 = vadd.f32 %v9002_v27, %v2700_v13  ;;  %v2815_v45 = vmul.f32 %v11313_v57, %v11313_v57  ;;  %v9020_v24 = vpop.eup %6332  ;;  %6352 = vpow2.f32 %v2575_v63  ;;  %v11318_v42 = vld [vmem:[#allocation31_spill] sm:$0xff]  ;;  %v11321_v13 = vld [vmem:[#allocation98_spill] sm:$0xff] }
 0x3a4   : > { %v2579_v55 = vmul.f32 1.442695, %v11311_v46  ;;  %11315 = vst [vmem:[#allocation150_spill] sm:$0xff] %v9020_v24  ;;  %v11317_v51 = vsub.f32 %v11316_v19, %v8603_v23  ;;  %v1846_v61 = vsub.f32 %v11318_v42, %v9000_v7  ;;  %v9029_v62 = vpop.eup %6334  ;;  %6354 = vpow2.f32 %v2649_v8  ;;  %v11325_v42 = vld [vmem:[#allocation30_spill] sm:$0xff] }
 0x3a5   : > { %11320 = vst [vmem:[#allocation31_spill] sm:$0xff] %v9029_v62  ;;  %v11322_v57 = vsub.f32 %v11321_v13, %v8596_v29  ;;  %v2681_v0 = vadd.f32 %v8982_v30, %v2680_v10  ;;  %v2702_v63 = vadd.f32 %v9020_v24, %v2701_v9  ;;  %2972 = vmatmul.mubr.f32.gmra.mrb[142].mxu0 %v2815_v45  ;;  %v9038_v19 = vpop.eup %6336  ;;  %v11330_v45 = vld [vmem:[#allocation22_spill] sm:$0xff] }
 0x3a6   : > { %v9018_v12 = vpop.f32.mrb[100].mxu0  ;;  %v2583_v46 = vmul.f32 1.442695, %v11317_v51  ;;  %11324 = vst [vmem:[#allocation151_spill] sm:$0xff] %v9038_v19  ;;  %6356 = vpow2.f32 %v2579_v55  ;;  %v11326_v51 = vsub.f32 %v11325_v42, %v8603_v23  ;;  %v11328_v8 = vsub.f32 %v11327_v58, %v8603_v23  ;;  %2977 = vmatprep.mubr.f32.mxu0 %v2818_v26  ;;  %v9050_v9 = vpop.eup %6338  ;;  %v11333_v26 = vld [vmem:[#allocation33_spill] sm:$0xff] }
 0x3a7   : > { %11314 = vst [vmem:[#allocation27_spill] sm:$0xff] %v9018_v12  ;;  %v9027_v11 = vpop.f32.mrb[101].mxu0  ;;  %v2657_v27 = vmul.f32 1.442695, %v11322_v57  ;;  %v2820_v29 = vmul.f32 %v8771_v60, %v8771_v60  ;;  %6358 = vpow2.f32 %v2653_v52  ;;  %v2682_v57 = vadd.f32 %v8993_v41, %v2681_v0  ;;  %v9056_v42 = vpop.eup %6340  ;;  %v11335_v52 = vld [vmem:[#allocation41_spill] sm:$0xff] }
 0x3a8   : > { %11319 = vst [vmem:[#allocation28_spill] sm:$0xff] %v9027_v11  ;;  %v9036_v50 = vpop.f32.mrb[102].mxu0  ;;  %v2587_v21 = vmul.f32 1.442695, %v11326_v51  ;;  %v2591_v14 = vmul.f32 1.442695, %v11328_v8  ;;  %v2703_v55 = vadd.f32 %v9038_v19, %v2702_v63  ;;  %v2817_v13 = vmul.f32 %v11330_v45, %v11330_v45  ;;  %v9063_v24 = vpop.eup %6342 }
 0x3a9   : > { %11323 = vst [vmem:[#allocation98_spill] sm:$0xff] %v9036_v50  ;;  %v9048_v10 = vpop.f32.mrb[103].mxu0  ;;  %11331 = vst [vmem:[#allocation34_spill] sm:$0xff] %v9056_v42  ;;  %6360 = vpow2.f32 %v2583_v46  ;;  %v11332_v58 = vsub.f32 %v11226_v20, %v8603_v23  ;;  %v1847_v8 = vsub.f32 %v11333_v26, %v9000_v7  ;;  %v1938_v60 = vmul.f32 1.442695, %v1846_v61  ;;  %v1769_v46 = vpop.xlane.xlu1 %1768  ;;  %v11340_v26 = vld [vmem:[#allocation37_spill] sm:$0xff] }
 0x3aa   : > { %11329 = vst [vmem:[#allocation30_spill] sm:$0xff] %v9048_v10  ;;  %11334 = vst [vmem:[#allocation33_spill] sm:$0xff] %v9063_v24  ;;  %6362 = vpow2.f32 %v2657_v27  ;;  %v2683_v0 = vadd.f32 %v9012_v25, %v2682_v57  ;;  %v11336_v63 = vsub.f32 %v11335_v52, %v8603_v23  ;;  %v2704_v19 = vadd.f32 %v9056_v42, %v2703_v55  ;;  %v9070_v41 = vpop.eup %6344 }
 0x3ab   : > { %v2595_v51 = vmul.f32 1.442695, %v11332_v58  ;;  %2978 = vmatmul.mubr.f32.gmra.mrb[144].mxu0 %v2817_v13  ;;  %11337 = vst [vmem:[#allocation41_spill] sm:$0xff] %v9070_v41  ;;  %6364 = vpow2.f32 %v2587_v21  ;;  %v11338_v7 = vsub.f32 %v11230_v38, %v8603_v23  ;;  %v11339_v27 = vsub.f32 %v11231_v40, %v8603_v23  ;;  %v9080_v58 = vpop.eup %6346  ;;  %v9084_v21 = vpop.xlane.xlu0 %1771 }
 0x3ac   : > { %v2599_v45 = vmul.f32 1.442695, %v11336_v63  ;;  %2983 = vmatprep.mubr.f32.mxu0 %v2820_v29  ;;  %v2822_v57 = vmul.f32 %v8807_v32, %v8807_v32  ;;  %v2684_v55 = vadd.f32 %v9029_v62, %v2683_v0  ;;  %6366 = vpow2.f32 %v2591_v14  ;;  %v9090_v40 = vpop.eup %6348  ;;  %v11343_v29 = vld [vmem:[#allocation51_spill] sm:$0xff]  ;;  %v11346_v0 = vld [vmem:[#allocation36_spill] sm:$0xff] }
 0x3ad   : > { %v2603_v20 = vmul.f32 1.442695, %v11338_v7  ;;  %v2607_v61 = vmul.f32 1.442695, %v11339_v27  ;;  %v2705_v13 = vadd.f32 %v9070_v41, %v2704_v19  ;;  %v2819_v38 = vmul.f32 %v11340_v26, %v11340_v26  ;;  %11342 = vst [vmem:[#allocation153_spill] sm:$0xff] %v9090_v40  ;;  %v11345_v27 = vld [vmem:[#allocation35_spill] sm:$0xff]  ;;  %v9099_v19 = vpop.eup %6350 }
 0x3ae   : > { %v9088_v52 = vpop.f32.mrb[104].mxu0  ;;  %6368 = vpow2.f32 %v2595_v51  ;;  %v11344_v63 = vsub.f32 %v11343_v29, %v8603_v23  ;;  %v1848_v32 = vsub.f32 %v11345_v27, %v1769_v46  ;;  %v1849_v14 = vsub.f32 %v11346_v0, %v1769_v46  ;;  %v9105_v25 = vpop.eup %6352 }
 0x3af   : > { %11341 = vst [vmem:[#allocation152_spill] sm:$0xff] %v9088_v52  ;;  %v9097_v42 = vpop.f32.mrb[105].mxu0  ;;  %v2685_v41 = vadd.f32 %v9050_v9, %v2684_v55  ;;  %6370 = vpow2.f32 %v2599_v45  ;;  %v2706_v26 = vadd.f32 %v9090_v40, %v2705_v13  ;;  %v1940_v62 = vmul.f32 1.442695, %v1847_v8  ;;  %2984 = vmatmul.mubr.f32.gmra.mrb[146].mxu0 %v2819_v38  ;;  %11349 = vst [vmem:[#allocation36_spill] sm:$0xff] %v9105_v25  ;;  %v9116_v8 = vpop.eup %6354 }
 0x3b0   : > { %v2611_v7 = vmul.f32 1.442695, %v11344_v63  ;;  %11347 = vst [vmem:[#allocation51_spill] sm:$0xff] %v9097_v42  ;;  %v9103_v51 = vpop.f32.mrb[106].mxu0  ;;  %6372 = vpow2.f32 %v2603_v20  ;;  %v11350_v29 = vsub.f32 %v8313_v56, %v8603_v23  ;;  %v11351_v63 = vld [vmem:[#allocation40_spill] sm:$0xff]  ;;  %v2824_v55 = vmul.f32 %v8821_v47, %v8821_v47  ;;  %2989 = vmatprep.mubr.f32.mxu0 %v2822_v57  ;;  %v1775_v38 = vpop.xlane.xlu1 %1774 }
 0x3b1   : > { %11348 = vst [vmem:[#allocation35_spill] sm:$0xff] %v9103_v51  ;;  %v1851_v27 = vsub.f32 %v11351_v63, %v9084_v21  ;;  %v9114_v45 = vpop.f32.mrb[107].mxu0  ;;  %v2686_v13 = vadd.f32 %v9063_v24, %v2685_v41  ;;  %6374 = vpow2.f32 %v2607_v61  ;;  %v2707_v20 = vadd.f32 %v9105_v25, %v2706_v26  ;;  %v9122_v0 = vpop.eup %6356  ;;  %v11355_v26 = vld [vmem:[#allocation38_spill] sm:$0xff]  ;;  %v11357_v24 = vld [vmem:[#allocation43_spill] sm:$0xff] }
 0x3b2   : > { %v2615_v46 = vmul.f32 1.442695, %v11350_v29  ;;  %11352 = vst [vmem:[#allocation40_spill] sm:$0xff] %v9114_v45  ;;  %v2821_v56 = vmul.f32 %v8797_v34, %v8797_v34  ;;  %11353 = vst [vmem:[#allocation154_spill] sm:$0xff] %v9122_v0  ;;  %6376 = vpow2.f32 %v2611_v7  ;;  %v11354_v29 = vsub.f32 %v11235_v5, %v8603_v23  ;;  %v9127_v40 = vpop.eup %6358 }
 0x3b3   : > { %v1942_v63 = vmul.f32 1.442695, %v1848_v32  ;;  %v1944_v47 = vmul.f32 1.442695, %v1849_v14  ;;  %v2687_v41 = vadd.f32 %v9080_v58, %v2686_v13  ;;  %v2708_v61 = vadd.f32 %v9122_v0, %v2707_v20  ;;  %v9133_v34 = vpop.eup %6360  ;;  %v9142_v20 = vpop.xlane.xlu0 %1777 }
 0x3b4   : > { %v2619_v57 = vmul.f32 1.442695, %v11354_v29  ;;  %6378 = vpow2.f32 %v1938_v60  ;;  %v1850_v25 = vsub.f32 %v11355_v26, %v9084_v21  ;;  %2990 = vmatmul.mubr.f32.gmra.mrb[148].mxu0 %v2821_v56  ;;  %11356 = vst [vmem:[#allocation38_spill] sm:$0xff] %v9133_v34  ;;  %v1948_v7 = vmul.f32 1.442695, %v1851_v27  ;;  %v9138_v14 = vpop.eup %6362 }
 0x3b5   : > { %6380 = vpow2.f32 %v1940_v62  ;;  %v1853_v5 = vsub.f32 %v11357_v24, %v1775_v38  ;;  %2995 = vmatprep.mubr.f32.mxu0 %v2824_v55  ;;  %v2826_v32 = vmul.f32 %v8852_v28, %v8852_v28  ;;  %v2688_v13 = vadd.f32 %v9099_v19, %v2687_v41  ;;  %v9148_v27 = vpop.eup %6364 }
 0x3b6   : > { %6382 = vpow2.f32 %v2615_v46  ;;  %v2709_v60 = vadd.f32 %v9133_v34, %v2708_v61  ;;  %v2823_v21 = vmul.f32 %v8810_v35, %v8810_v35  ;;  %v9146_v62 = vpop.f32.mrb[108].mxu0  ;;  %11359 = vst [vmem:[#allocation155_spill] sm:$0xff] %v9148_v27  ;;  %v11360_v24 = vsub.f32 %v8357_v2, %v8603_v23  ;;  %v11362_v46 = vld [vmem:[#allocation42_spill] sm:$0xff]  ;;  %v9159_v26 = vpop.eup %6366 }
 0x3b7   : > { %11358 = vst [vmem:[#allocation43_spill] sm:$0xff] %v9146_v62  ;;  %v11361_v56 = vsub.f32 %v8371_v53, %v8603_v23  ;;  %6384 = vpow2.f32 %v1944_v47  ;;  %v1852_v41 = vsub.f32 %v11362_v46, %v1775_v38  ;;  %v9157_v61 = vpop.f32.mrb[109].mxu0  ;;  %11364 = vst [vmem:[#allocation156_spill] sm:$0xff] %v9159_v26  ;;  %v2689_v28 = vadd.f32 %v9116_v8, %v2688_v13  ;;  %v11367_v47 = vld [vmem:[#allocation47_spill] sm:$0xff] }
 0x3b8   : > { %v2623_v55 = vmul.f32 1.442695, %v11360_v24  ;;  %11363 = vst [vmem:[#allocation42_spill] sm:$0xff] %v9157_v61  ;;  %6386 = vpow2.f32 %v2619_v57  ;;  %v2710_v35 = vadd.f32 %v9148_v27, %v2709_v60  ;;  %v1946_v34 = vmul.f32 1.442695, %v1850_v25  ;;  %2996 = vmatmul.mubr.f32.gmra.mrb[150].mxu0 %v2823_v21  ;;  %v9163_v2 = vpop.f32.mrb[110].mxu0  ;;  %v9165_v24 = vpop.eup %6368 }
 0x3b9   : > { %v2627_v29 = vmul.f32 1.442695, %v11361_v56  ;;  %11365 = vst [vmem:[#allocation157_spill] sm:$0xff] %v9163_v2  ;;  %11366 = vst [vmem:[#allocation158_spill] sm:$0xff] %v9165_v24  ;;  %6388 = vpow2.f32 %v1948_v7  ;;  %v1952_v53 = vmul.f32 1.442695, %v1853_v5  ;;  %v1855_v38 = vsub.f32 %v11367_v47, %v9142_v20  ;;  %3001 = vmatprep.mubr.f32.mxu0 %v2826_v32  ;;  %v9173_v57 = vpop.eup %6370  ;;  %v1781_v60 = vpop.xlane.xlu1 %1780 }
 0x3ba   : > { %v2828_v56 = vmul.f32 %v8874_v44, %v8874_v44  ;;  %v9171_v46 = vpop.f32.mrb[111].mxu0  ;;  %v2690_v25 = vadd.f32 %v9127_v40, %v2689_v28  ;;  %v2711_v13 = vadd.f32 %v9159_v26, %v2710_v35  ;;  %6390 = vpow2.f32 %v1942_v63  ;;  %v9179_v5 = vpop.eup %6372 }
 0x3bb   : > { %11368 = vst [vmem:[#allocation47_spill] sm:$0xff] %v9171_v46  ;;  %v2825_v7 = vmul.f32 %v8841_v4, %v8841_v4  ;;  %6392 = vpow2.f32 %v2623_v55  ;;  %v11369_v21 = vsub.f32 %v8398_v37, %v8603_v23  ;;  %v11370_v47 = vsub.f32 %v8417_v1, %v8603_v23  ;;  %v9187_v28 = vpop.eup %6374  ;;  %v11371_v4 = vld [vmem:[#allocation45_spill] sm:$0xff] }
 0x3bc   : > { %v1950_v27 = vmul.f32 1.442695, %v1852_v41  ;;  %v2691_v35 = vadd.f32 %v9138_v14, %v2690_v25  ;;  %v2712_v63 = vadd.f32 %v9165_v24, %v2711_v13  ;;  %6394 = vpow2.f32 %v1946_v34  ;;  %v9193_v55 = vpop.eup %6376  ;;  %v9201_v13 = vpop.xlane.xlu0 %1783 }
 0x3bd   : > { %v2631_v32 = vmul.f32 1.442695, %v11369_v21  ;;  %v2635_v44 = vmul.f32 1.442695, %v11370_v47  ;;  %v1854_v26 = vsub.f32 %v11371_v4, %v9142_v20  ;;  %3002 = vmatmul.mubr.f32.gmra.mrb[152].mxu0 %v2825_v7  ;;  %6396 = vpow2.f32 %v1952_v53  ;;  %v11372_v21 = vld [vmem:[#allocation50_spill] sm:$0xff]  ;;  %v11378_v47 = vld [vmem:[#allocation49_spill] sm:$0xff] }
 0x3be   : > { %v1956_v37 = vmul.f32 1.442695, %v1855_v38  ;;  %v1857_v0 = vsub.f32 %v11372_v21, %v1781_v60  ;;  %3007 = vmatprep.mubr.f32.mxu0 %v2828_v56  ;;  %v2830_v1 = vmul.f32 %v8896_v39, %v8896_v39  ;;  %v9198_v41 = vpop.eup %6378  ;;  %v2692_v25 = vrot.slane %v2691_v35, 4  ;;  %v9205_v20 = vpop.f32.mrb[112].mxu0 }
 0x3bf   : > { %11373 = vst [vmem:[#allocation45_spill] sm:$0xff] %v9198_v41  ;;  %6398 = vpow2.f32 %v2627_v29  ;;  %v2713_v34 = vadd.f32 %v9173_v57, %v2712_v63  ;;  %v2827_v4 = vmul.f32 %v8863_v31, %v8863_v31  ;;  %11374 = vst [vmem:[#allocation50_spill] sm:$0xff] %v9205_v20  ;;  %v9207_v53 = vpop.eup %6380  ;;  %v11376_v38 = vsub.f32 %v8445_v18, %v8603_v23  ;;  %v9216_v21 = vpop.f32.mrb[113].mxu0 }
 0x3c0   : > { %11375 = vst [vmem:[#allocation159_spill] sm:$0xff] %v9207_v53  ;;  %6400 = vpow2.f32 %v2631_v32  ;;  %v11377_v7 = vsub.f32 %v8462_v22, %v8603_v23  ;;  %v1856_v63 = vsub.f32 %v11378_v47, %v1781_v60  ;;  %11379 = vst [vmem:[#allocation49_spill] sm:$0xff] %v9216_v21  ;;  %v9218_v39 = vpop.eup %6382  ;;  %v2693_v31 = vadd.f32 %v2692_v25, %v2691_v35  ;;  %v9222_v18 = vpop.f32.mrb[114].mxu0  ;;  %v11382_v60 = vld [vmem:[#allocation53_spill] sm:$0xff] }
 0x3c1   : > { %v2639_v56 = vmul.f32 1.442695, %v11376_v38  ;;  %6402 = vpow2.f32 %v2635_v44  ;;  %v2714_v24 = vadd.f32 %v9179_v5, %v2713_v34  ;;  %2158 = vmatprep.mubr.f32.mxu1 %v9207_v53  ;;  %v1954_v32 = vmul.f32 1.442695, %v1854_v26  ;;  %3008 = vmatmul.mubr.f32.gmra.mrb[154].mxu0 %v2827_v4  ;;  %11380 = vst [vmem:[#allocation160_spill] sm:$0xff] %v9222_v18  ;;  %v9224_v38 = vpop.eup %6384  ;;  %v9231_v35 = vpop.f32.mrb[115].mxu0 }
 0x3c2   : > { %v2643_v29 = vmul.f32 1.442695, %v11377_v7  ;;  %11381 = vst [vmem:[#allocation161_spill] sm:$0xff] %v9224_v38  ;;  %6404 = vpow2.f32 %v1956_v37  ;;  %2159 = vmatmul.mubr.f32.gmra.mrb[92].mxu1 %v9198_v41  ;;  %v1960_v22 = vmul.f32 1.442695, %v1857_v0  ;;  %v1859_v7 = vsub.f32 %v11382_v60, %v9201_v13  ;;  %3013 = vmatprep.mubr.f32.mxu0 %v2830_v1  ;;  %11383 = vst [vmem:[#allocation53_spill] sm:$0xff] %v9231_v35  ;;  %v9233_v25 = vpop.eup %6386  ;;  %v9237_v37 = vpop.xlane.xlu1 %1786 }
 0x3c3   : > { %v2832_v44 = vmul.f32 %v8916_v48, %v8916_v48  ;;  %v2694_v26 = vrot.slane %v2693_v31, 2  ;;  %v2715_v34 = vadd.f32 %v9187_v28, %v2714_v24  ;;  %6406 = vpow2.f32 %v1950_v27  ;;  %2164 = vmatprep.mubr.f32.mxu1 %v9224_v38  ;;  %v9241_v4 = vpop.eup %6388  ;;  %v11387_v24 = vld [vmem:[#allocation52_spill] sm:$0xff] }
 0x3c4   : > { %v2829_v0 = vmul.f32 %v8889_v16, %v8889_v16  ;;  %11384 = vst [vmem:[#allocation162_spill] sm:$0xff] %v9241_v4  ;;  %6408 = vpow2.f32 %v2639_v56  ;;  %v11385_v1 = vsub.f32 %v8490_v36, %v8603_v23  ;;  %v1958_v60 = vmul.f32 1.442695, %v1856_v63  ;;  %v9246_v41 = vpop.eup %6390  ;;  %v11389_v36 = vld [vmem:[#allocation55_spill] sm:$0xff] }
 0x3c5   : > { %11386 = vst [vmem:[#allocation163_spill] sm:$0xff] %v9246_v41  ;;  %v2695_v53 = vadd.f32 %v2694_v26, %v2693_v31  ;;  %v2716_v27 = vadd.f32 %v9193_v55, %v2715_v34  ;;  %6410 = vpow2.f32 %v1954_v32  ;;  %v1858_v38 = vsub.f32 %v11387_v24, %v9201_v13  ;;  %v9251_v48 = vpop.eup %6392 }
 0x3c6   : > { %v2647_v47 = vmul.f32 1.442695, %v11385_v1  ;;  %3014 = vmatmul.mubr.f32.gmra.mrb[156].mxu0 %v2829_v0  ;;  %11388 = vst [vmem:[#allocation52_spill] sm:$0xff] %v9251_v48  ;;  %6412 = vpow2.f32 %v1960_v22  ;;  %2165 = vmatmul.mubr.f32.gmra.mrb[94].mxu1 %v9246_v41  ;;  %v1964_v56 = vmul.f32 1.442695, %v1859_v7  ;;  %v1861_v1 = vsub.f32 %v11389_v36, %v9237_v37  ;;  %v9258_v63 = vpop.eup %6394  ;;  %v9264_v26 = vpop.f32.mrb[116].mxu0 }
 0x3c7   : > { %3019 = vmatprep.mubr.f32.mxu0 %v2832_v44  ;;  %v2834_v31 = vmul.f32 %v8958_v17, %v8958_v17  ;;  %11390 = vst [vmem:[#allocation55_spill] sm:$0xff] %v9258_v63  ;;  %v2696_v32 = vrot.slane %v2695_v53, 1  ;;  %6414 = vpow2.f32 %v2643_v29  ;;  %v2717_v13 = vadd.f32 %v9218_v39, %v2716_v27  ;;  %2170 = vmatprep.mubr.f32.mxu1 %v9241_v4  ;;  %v9266_v7 = vpop.eup %6396  ;;  %v11392_v44 = vld [vmem:[#allocation88_spill] sm:$0xff]  ;;  %v9271_v24 = vpop.f32.mrb[117].mxu0 }
 0x3c8   : > { %v2831_v22 = vmul.f32 %v8904_v59, %v8904_v59  ;;  %11391 = vst [vmem:[#allocation164_spill] sm:$0xff] %v9266_v7  ;;  %6416 = vpow2.f32 %v2647_v47  ;;  %v11393_v34 = vsub.f32 %v11392_v44, %v8603_v23  ;;  %v1962_v4 = vmul.f32 1.442695, %v1858_v38  ;;  %v1790_v41 = vpop.xlane.xlu0 %1789  ;;  %v9276_v17 = vpop.f32.mrb[118].mxu0 }
 0x3c9   : > { %v9273_v36 = vpop.eup %6398  ;;  %v2697_v29 = vadd.f32 %v2696_v32, %v2695_v53  ;;  %v2718_v27 = vadd.f32 %v9233_v25, %v2717_v13  ;;  %6418 = vpow2.f32 %v1958_v60  ;;  %v1968_v47 = vmul.f32 1.442695, %v1861_v1  ;;  %v9284_v32 = vpop.f32.mrb[119].mxu0  ;;  %v11396_v13 = vld [vmem:[#allocation54_spill] sm:$0xff] }
 0x3ca   : > { %v2651_v0 = vmul.f32 1.442695, %v11393_v34  ;;  %3020 = vmatmul.mubr.f32.gmra.mrb[158].mxu0 %v2831_v22  ;;  %v9278_v59 = vpop.eup %6400  ;;  %6420 = vpow2.f32 %v1964_v56  ;;  %2171 = vmatmul.mubr.f32.gmra.mrb[96].mxu1 %v9258_v63  ;;  %v2836_v44 = vmul.f32 %v8980_v49, %v8980_v49  ;;  %v11394_v34 = vld [vmem:[#allocation58_spill] sm:$0xff]  ;;  %v1860_v22 = vsub.f32 %v11396_v13, %v9237_v37  ;;  %v9294_v1 = vpop.xlane.xlu1 %1792 }
 0x3cb   : > { %3025 = vmatprep.mubr.f32.mxu0 %v2834_v31  ;;  %v1863_v53 = vsub.f32 %v11394_v34, %v1790_v41  ;;  %v9286_v60 = vpop.eup %6402  ;;  %6422 = vrcp.f32 %v2697_v29  ;;  %v2719_v38 = vadd.f32 %v9251_v48, %v2718_v27  ;;  %2176 = vmatprep.mubr.f32.mxu1 %v9266_v7  ;;  %v2833_v56 = vmul.f32 %v8951_v33, %v8951_v33  ;;  %v11398_v34 = vld [vmem:[#allocation95_spill] sm:$0xff]  ;;  %v11401_v27 = vld [vmem:[#allocation100_spill] sm:$0xff]  ;;  %v11403_v7 = vld [vmem:[#allocation57_spill] sm:$0xff] }
 0x3cc   : > { %11395 = vst [vmem:[#allocation88_spill] sm:$0xff] %v9286_v60  ;;  %v9296_v31 = vpop.eup %6404  ;;  %6424 = vpow2.f32 %v2651_v0  ;;  %v11399_v63 = vsub.f32 %v11398_v34, %v8603_v23  ;;  %v11402_v16 = vsub.f32 %v11401_v27, %v8603_v23  ;;  %v1862_v33 = vsub.f32 %v11403_v7, %v1790_v41  ;;  %v11405_v34 = vld [vmem:[#allocation60_spill] sm:$0xff] }
 0x3cd   : > { %11397 = vst [vmem:[#allocation58_spill] sm:$0xff] %v9296_v31  ;;  %v9301_v29 = vpop.eup %6406  ;;  %v2720_v13 = vadd.f32 %v9273_v36, %v2719_v38  ;;  %6426 = vpow2.f32 %v1962_v4  ;;  %v1972_v0 = vmul.f32 1.442695, %v1863_v53  ;;  %v1865_v23 = vsub.f32 %v11405_v34, %v9294_v1 }
 0x3ce   : > { %v2655_v49 = vmul.f32 1.442695, %v11399_v63  ;;  %11400 = vst [vmem:[#allocation54_spill] sm:$0xff] %v9301_v29  ;;  %v2659_v37 = vmul.f32 1.442695, %v11402_v16  ;;  %3026 = vmatmul.mubr.f32.gmra.mrb[160].mxu0 %v2833_v56  ;;  %v9308_v48 = vpop.eup %6408  ;;  %6428 = vpow2.f32 %v1968_v47  ;;  %2177 = vmatmul.mubr.f32.gmra.mrb[98].mxu1 %v9301_v29  ;;  %v2838_v63 = vmul.f32 %v9027_v11, %v9027_v11  ;;  %v9321_v7 = vpop.f32.mrb[120].mxu0 }
 0x3cf   : > { %11404 = vst [vmem:[#allocation95_spill] sm:$0xff] %v9308_v48  ;;  %3031 = vmatprep.mubr.f32.mxu0 %v2836_v44  ;;  %v9315_v16 = vpop.eup %6410  ;;  %v2721_v4 = vadd.f32 %v9278_v59, %v2720_v13  ;;  %v1966_v38 = vmul.f32 1.442695, %v1860_v22  ;;  %2182 = vmatprep.mubr.f32.mxu1 %v9296_v31  ;;  %v2835_v41 = vmul.f32 %v8968_v54, %v8968_v54  ;;  %v9325_v44 = vpop.f32.mrb[121].mxu0  ;;  %v1970_v27 = vmul.f32 1.442695, %v1862_v33 }
 0x3d0   : > { %11406 = vst [vmem:[#allocation100_spill] sm:$0xff] %v9315_v16  ;;  %v9323_v47 = vpop.eup %6412  ;;  %6430 = vpow2.f32 %v2655_v49  ;;  %v1796_v22 = vpop.xlane.xlu0 %1795  ;;  %v2840_v31 = vmul.f32 %v9048_v10, %v9048_v10  ;;  %v1976_v49 = vmul.f32 1.442695, %v1865_v23  ;;  %v11410_v29 = vld [vmem:[#allocation65_spill] sm:$0xff]  ;;  %v2841_v23 = vmul.f32 %v9088_v52, %v9088_v52 }
 0x3d1   : > { %11407 = vst [vmem:[#allocation57_spill] sm:$0xff] %v9323_v47  ;;  %v9327_v53 = vpop.eup %6414  ;;  %6432 = vpow2.f32 %v2659_v37  ;;  %v2722_v56 = vadd.f32 %v9286_v60, %v2721_v4  ;;  %v9330_v13 = vpop.f32.mrb[122].mxu0  ;;  %v1867_v11 = vsub.f32 %v11410_v29, %v1796_v22  ;;  %v2839_v29 = vmul.f32 %v9036_v50, %v9036_v50 }
 0x3d2   : > { %11408 = vst [vmem:[#allocation60_spill] sm:$0xff] %v9327_v53  ;;  %3032 = vmatmul.mubr.f32.gmra.mrb[162].mxu0 %v2835_v41  ;;  %v9332_v34 = vpop.eup %6416  ;;  %2183 = vmatmul.mubr.f32.gmra.mrb[100].mxu1 %v9315_v16  ;;  %6434 = vpow2.f32 %v1972_v0  ;;  %v9338_v37 = vpop.f32.mrb[123].mxu0  ;;  %v2837_v41 = vmul.f32 %v9018_v12, %v9018_v12  ;;  %v11412_v16 = vld [vmem:[#allocation59_spill] sm:$0xff] }
 0x3d3   : > { %11409 = vst [vmem:[#allocation165_spill] sm:$0xff] %v9332_v34  ;;  %3037 = vmatprep.mubr.f32.mxu0 %v2838_v63  ;;  %v9340_v4 = vpop.eup %6418  ;;  %v2723_v33 = vadd.f32 %v9308_v48, %v2722_v56  ;;  %6436 = vpow2.f32 %v1966_v38  ;;  %2188 = vmatprep.mubr.f32.mxu1 %v9323_v47  ;;  %v1864_v10 = vsub.f32 %v11412_v16, %v9294_v1  ;;  %v9348_v63 = vpop.xlane.xlu1 %1798  ;;  %v11414_v56 = vld [vmem:[#allocation63_spill] sm:$0xff] }
 0x3d4   : > { %11411 = vst [vmem:[#allocation65_spill] sm:$0xff] %v9340_v4  ;;  %v9350_v0 = vpop.eup %6420  ;;  %v2842_v38 = vmul.f32 %v9097_v42, %v9097_v42  ;;  %v1866_v47 = vsub.f32 %v11414_v56, %v1796_v22  ;;  %v9364_v1 = vmul.f32 %v9103_v51, %v9103_v51  ;;  %v2844_v16 = vmul.f32 %v9114_v45, %v9114_v45  ;;  %v11416_v56 = vld [vmem:[#allocation68_spill] sm:$0xff] }
 0x3d5   : > { %11413 = vst [vmem:[#allocation59_spill] sm:$0xff] %v9350_v0  ;;  %v9359_v54 = vpop.eup %6422  ;;  %v2724_v12 = vadd.f32 %v9327_v53, %v2723_v33  ;;  %6438 = vpow2.f32 %v1970_v27  ;;  %v1980_v22 = vmul.f32 1.442695, %v1867_v11  ;;  %v1869_v42 = vsub.f32 %v11416_v56, %v9348_v63  ;;  %v11417_v33 = vld [vmem:[#allocation18_spill] sm:$0xff] }
 0x3d6   : > { %3038 = vmatmul.mubr.f32.gmra.mrb[164].mxu0 %v2837_v41  ;;  %v9368_v50 = vpop.eup %6424  ;;  %2189 = vmatmul.mubr.f32.gmra.mrb[102].mxu1 %v9340_v4  ;;  %6440 = vpow2.f32 %v1976_v49  ;;  %v2737_v41 = vmul.f32 %v9359_v54, %v11417_v33  ;;  %v1974_v27 = vmul.f32 1.442695, %v1864_v10  ;;  %v2769_v45 = vmul.f32 %v9359_v54, %v8918_v6  ;;  %v11419_v4 = vld [vmem:[#allocation20_spill] sm:$0xff]  ;;  %v9383_v11 = vpop.f32.mrb[124].mxu0 }
 0x3d7   : > { %11415 = vst [vmem:[#allocation63_spill] sm:$0xff] %v9368_v50  ;;  %3043 = vmatprep.mubr.f32.mxu0 %v2840_v31  ;;  %v9375_v52 = vpop.eup %6426  ;;  %v2725_v51 = vadd.f32 %v9332_v34, %v2724_v12  ;;  %2194 = vmatprep.mubr.f32.mxu1 %v9350_v0  ;;  %v2739_v31 = vmul.f32 %v9359_v54, %v11419_v4  ;;  %11420 = vst [vmem:[#allocation18_spill] sm:$0xff] %v9383_v11  ;;  %v1978_v33 = vmul.f32 1.442695, %v1866_v47  ;;  %v9395_v0 = vpop.f32.mrb[125].mxu0  ;;  %v11422_v4 = vld [vmem:[#allocation66_spill] sm:$0xff] }
 0x3d8   : > { %11418 = vst [vmem:[#allocation68_spill] sm:$0xff] %v9375_v52  ;;  %v9385_v49 = vpop.eup %6428  ;;  %v9389_v56 = vmul.f32 %v9146_v62, %v9146_v62  ;;  %v2846_v12 = vmul.f32 %v9157_v61, %v9157_v61  ;;  %v2771_v10 = vmul.f32 %v9359_v54, %v8925_v15  ;;  %v1868_v11 = vsub.f32 %v11422_v4, %v9348_v63  ;;  %v1802_v53 = vpop.xlane.xlu0 %1801  ;;  %v11423_v62 = vld [vmem:[#allocation23_spill] sm:$0xff] }
 0x3d9   : > { %11421 = vst [vmem:[#allocation20_spill] sm:$0xff] %v9385_v49  ;;  %v2726_v6 = vadd.f32 %v9368_v50, %v2725_v51  ;;  %v5842_v34 = vpack.i.bf16 %v2737_v41, %v2769_v45  ;;  %v9400_v48 = vpop.f32.mrb[126].mxu0  ;;  %v2741_v60 = vmul.f32 %v9359_v54, %v11423_v62  ;;  %6442 = vpow2.f32 %v1980_v22  ;;  %v11424_v51 = vld [vmem:[#allocation73_spill] sm:$0xff]  ;;  %v11425_v62 = vld [vmem:[#allocation71_spill] sm:$0xff] }
 0x3da   : > { %3044 = vmatmul.mubr.f32.gmra.mrb[166].mxu0 %v2839_v29  ;;  %v9404_v61 = vpop.eup %6430  ;;  %2195 = vmatmul.mubr.f32.gmra.mrb[104].mxu1 %v9375_v52  ;;  %v1984_v15 = vmul.f32 1.442695, %v1869_v42  ;;  %v5844_v47 = vpack.i.bf16 %v2739_v31, %v2771_v10  ;;  %v1871_v29 = vsub.f32 %v11424_v51, %v1802_v53  ;;  %v9408_v50 = vpop.f32.mrb[127].mxu0  ;;  %6444 = vpow2.f32 %v1974_v27 }
 0x3db   : > { %3049 = vmatprep.mubr.f32.mxu0 %v2842_v38  ;;  %v9410_v63 = vpop.eup %6432  ;;  %v2727_v45 = vadd.f32 %v9404_v61, %v2726_v6  ;;  %2200 = vmatprep.mubr.f32.mxu1 %v9385_v49  ;;  %v1870_v41 = vsub.f32 %v11425_v62, %v1802_v53  ;;  %v1805_v4 = vpop.xlane.xlu1 %1804  ;;  %v2773_v38 = vmul.f32 %v9359_v54, %v8930_v43  ;;  %6446 = vpow2.f32 %v1978_v33  ;;  %v11428_v6 = vld [vmem:[#allocation44_spill] sm:$0xff]  ;;  %v11429_v49 = vld [vmem:[#allocation77_spill] sm:$0xff] }
 0x3dc   : > { %5843 = vxpose.xlu0.b32.start [1/16] %v5842_v34, 128  ;;  %v9417_v42 = vpop.eup %6434  ;;  %v9421_v22 = vmul.f32 %v9163_v2, %v9163_v2  ;;  %v2848_v31 = vmul.f32 %v9171_v46, %v9171_v46  ;;  %v9427_v10 = vmul.f32 %v9205_v20, %v9205_v20  ;;  %v1982_v43 = vmul.f32 1.442695, %v1868_v11 }
 0x3dd   : > { %11426 = vst [vmem:[#allocation66_spill] sm:$0xff] %v9417_v42  ;;  %v9429_v34 = vpop.eup %6436  ;;  %v2728_v53 = vadd.f32 %v9410_v63, %v2727_v45  ;;  %v5846_v27 = vpack.i.bf16 %v2741_v60, %v2773_v38  ;;  %v2743_v51 = vmul.f32 %v9359_v54, %v11428_v6  ;;  %6448 = vpow2.f32 %v1984_v15  ;;  %v11432_v45 = vld [vmem:[#allocation148_spill] sm:$0xff]  ;;  %v11435_v38 = vld [vmem:[#allocation122_spill] sm:$0xff] }
 0x3de   : > { %11427 = vst [vmem:[#allocation23_spill] sm:$0xff] %v9429_v34  ;;  %3050 = vmatmul.mubr.f32.gmra.mrb[168].mxu0 %v2841_v23  ;;  %2201 = vmatmul.mubr.f32.gmra.mrb[106].mxu1 %v9429_v34  ;;  %v1988_v62 = vmul.f32 1.442695, %v1871_v29  ;;  %v1873_v52 = vsub.f32 %v11429_v49, %v1805_v4  ;;  %v2775_v33 = vmul.f32 %v9359_v54, %v8936_v3  ;;  %v1986_v60 = vmul.f32 1.442695, %v1870_v41  ;;  %v11431_v23 = vld [vmem:[#allocation56_spill] sm:$0xff] }
 0x3df   : > { %3055 = vmatprep.mubr.f32.mxu0 %v2844_v16  ;;  %v9438_v20 = vpop.eup %6438  ;;  %v2729_v46 = vrot.slane %v2728_v53, 4  ;;  %2206 = vmatprep.mubr.f32.mxu1 %v9417_v42  ;;  %v9443_v11 = vmul.f32 %v9359_v54, %v11431_v23  ;;  %v9447_v16 = vmul.f32 %v9359_v54, %v11432_v45  ;;  %v11434_v49 = vld [vmem:[#allocation74_spill] sm:$0xff]  ;;  %v9454_v6 = vmul.f32 %v9359_v54, %v11435_v38  ;;  %v11436_v42 = vld [vmem:[#allocation125_spill] sm:$0xff]  ;;  %v11450_v34 = vld [vmem:[#allocation132_spill] sm:$0xff] }
 0x3e0   : > { %11430 = vst [vmem:[#allocation73_spill] sm:$0xff] %v9438_v20  ;;  %5845 = vxpose.xlu0.b32.cont [2/16] %v5844_v47, 128  ;;  %v9449_v15 = vpop.eup %6440  ;;  %v1872_v29 = vsub.f32 %v11434_v49, %v1805_v4  ;;  %v5848_v3 = vpack.i.bf16 %v2743_v51, %v2775_v33  ;;  %v9458_v47 = vmul.f32 %v9359_v54, %v8982_v30  ;;  %6450 = vpow2.f32 %v1982_v43  ;;  %v1808_v23 = vpop.xlane.xlu0 %1807  ;;  %v11437_v33 = vld [vmem:[#allocation80_spill] sm:$0xff] }
 0x3e1   : > { %11433 = vst [vmem:[#allocation71_spill] sm:$0xff] %v9449_v15  ;;  %v2730_v41 = vadd.f32 %v2729_v46, %v2728_v53  ;;  %v5850_v45 = vpack.i.bf16 %v9443_v11, %v9447_v16  ;;  %v9465_v4 = vmul.f32 %v9359_v54, %v11436_v42  ;;  %6452 = vpow2.f32 %v1988_v62  ;;  %v11438_v53 = vld [vmem:[#allocation26_spill] sm:$0xff]  ;;  %v11439_v42 = vld [vmem:[#allocation127_spill] sm:$0xff]  ;;  %v11440_v62 = vld [vmem:[#allocation92_spill] sm:$0xff] }
 0x3e2   : > { %3056 = vmatmul.mubr.f32.gmra.mrb[170].mxu0 %v9364_v1  ;;  %2207 = vmatmul.mubr.f32.gmra.mrb[108].mxu1 %v9438_v20  ;;  %v1992_v51 = vmul.f32 1.442695, %v1873_v52  ;;  %v1874_v30 = vsub.f32 %v11437_v33, %v1808_v23  ;;  %v9474_v43 = vmul.f32 %v9359_v54, %v11438_v53  ;;  %v9482_v52 = vmul.f32 %v9359_v54, %v11440_v62  ;;  %v11443_v46 = vld [vmem:[#allocation128_spill] sm:$0xff] }
 0x3e3   : > { %3061 = vmatprep.mubr.f32.mxu0 %v2846_v12  ;;  %v2731_v1 = vrot.slane %v2730_v41, 2  ;;  %2212 = vmatprep.mubr.f32.mxu1 %v9449_v15  ;;  %v9478_v12 = vmul.f32 %v9359_v54, %v11439_v42  ;;  %v9484_v11 = vpop.eup %6442  ;;  %v2850_v16 = vmul.f32 %v9216_v21, %v9216_v21  ;;  %6454 = vpow2.f32 %v1986_v60  ;;  %v1811_v53 = vpop.xlane.xlu1 %1810  ;;  %v11447_v42 = vld [vmem:[#allocation130_spill] sm:$0xff] }
 0x3e4   : > { %5847 = vxpose.xlu0.b32.cont [3/16] %v5846_v27, 128  ;;  %11441 = vst [vmem:[#allocation44_spill] sm:$0xff] %v9484_v11  ;;  %v9490_v27 = vmul.f32 %v9222_v18, %v9222_v18  ;;  %v1990_v49 = vmul.f32 1.442695, %v1872_v29  ;;  %v9492_v38 = vpop.eup %6444  ;;  %v9501_v15 = vmul.f32 %v9359_v54, %v11443_v46  ;;  %v2852_v60 = vmul.f32 %v9231_v35, %v9231_v35  ;;  %v11460_v35 = vld [vmem:[#allocation138_spill] sm:$0xff] }
 0x3e5   : > { %11442 = vst [vmem:[#allocation77_spill] sm:$0xff] %v9492_v38  ;;  %v2732_v33 = vadd.f32 %v2731_v1, %v2730_v41  ;;  %v9503_v20 = vpop.eup %6446  ;;  %6456 = vpow2.f32 %v1992_v51  ;;  %v11446_v41 = vld [vmem:[#allocation31_spill] sm:$0xff]  ;;  %v1994_v46 = vmul.f32 1.442695, %v1874_v30  ;;  %v9520_v51 = vmul.f32 %v9359_v54, %v9050_v9  ;;  %v11451_v30 = vld [vmem:[#allocation33_spill] sm:$0xff] }
 0x3e6   : > { %3062 = vmatmul.mubr.f32.gmra.mrb[172].mxu0 %v9389_v56  ;;  %11444 = vst [vmem:[#allocation56_spill] sm:$0xff] %v9503_v20  ;;  %2213 = vmatmul.mubr.f32.gmra.mrb[110].mxu1 %v9492_v38  ;;  %v11445_v56 = vld [vmem:[#allocation83_spill] sm:$0xff]  ;;  %v9511_v1 = vmul.f32 %v9359_v54, %v11446_v41  ;;  %6458 = vpow2.f32 %v1990_v49 }
 0x3e7   : > { %3067 = vmatprep.mubr.f32.mxu0 %v2848_v31  ;;  %v1875_v29 = vsub.f32 %v11445_v56, %v1808_v23  ;;  %v2733_v62 = vrot.slane %v2732_v33, 1  ;;  %2218 = vmatprep.mubr.f32.mxu1 %v9484_v11  ;;  %v9516_v31 = vmul.f32 %v9359_v54, %v11447_v42  ;;  %v9522_v38 = vpop.eup %6448  ;;  %v11449_v23 = vld [vmem:[#allocation87_spill] sm:$0xff]  ;;  %v9533_v11 = vmul.f32 %v9359_v54, %v11451_v30 }
 0x3e8   : > { %5849 = vxpose.xlu0.b32.cont [4/16] %v5848_v3, 128  ;;  %11448 = vst [vmem:[#allocation148_spill] sm:$0xff] %v9522_v38  ;;  %v1877_v56 = vsub.f32 %v11449_v23, %v1811_v53  ;;  %v9529_v3 = vmul.f32 %v9359_v54, %v11450_v34  ;;  %v1814_v9 = vpop.xlane.xlu0 %1813  ;;  %v11452_v23 = vld [vmem:[#allocation134_spill] sm:$0xff]  ;;  %v11453_v34 = vld [vmem:[#allocation84_spill] sm:$0xff]  ;;  %v11454_v30 = vld [vmem:[#allocation91_spill] sm:$0xff] }
 0x3e9   : > { %v2734_v42 = vadd.f32 %v2733_v62, %v2732_v33  ;;  %v9540_v18 = vmul.f32 %v9359_v54, %v11452_v23  ;;  %v1996_v41 = vmul.f32 1.442695, %v1875_v29  ;;  %v1876_v21 = vsub.f32 %v11453_v34, %v1811_v53  ;;  %v11456_v62 = vld [vmem:[#allocation136_spill] sm:$0xff] }
 0x3ea   : > { %3068 = vmatmul.mubr.f32.gmra.mrb[174].mxu0 %v9421_v22  ;;  %2219 = vmatmul.mubr.f32.gmra.mrb[112].mxu1 %v9503_v20  ;;  %v1878_v2 = vsub.f32 %v11454_v30, %v1814_v9  ;;  %v9547_v49 = vpop.eup %6450  ;;  %v9556_v29 = vmul.f32 %v9359_v54, %v11456_v62  ;;  %v9560_v53 = vmul.f32 %v9359_v54, %v9099_v19  ;;  %v11459_v30 = vld [vmem:[#allocation99_spill] sm:$0xff] }
 0x3eb   : > { %3073 = vmatprep.mubr.f32.mxu0 %v2850_v16  ;;  %11455 = vst [vmem:[#allocation74_spill] sm:$0xff] %v9547_v49  ;;  %6460 = vrcp.f32 %v2734_v42  ;;  %2224 = vmatprep.mubr.f32.mxu1 %v9522_v38  ;;  %v1817_v33 = vpop.xlane.xlu1 %1816  ;;  %v9552_v16 = vmul.f32 %v9359_v54, %v9080_v58  ;;  %v9562_v23 = vpop.eup %6452  ;;  %v2000_v42 = vmul.f32 1.442695, %v1877_v56  ;;  %v9573_v19 = vmul.f32 %v9359_v54, %v11460_v35  ;;  %v11477_v38 = vld [vmem:[#allocation150_spill] sm:$0xff] }
 0x3ec   : > { %5851 = vxpose.xlu0.b32.cont [5/16] %v5850_v45, 128  ;;  %11457 = vst [vmem:[#allocation122_spill] sm:$0xff] %v9562_v23  ;;  %6462 = vpow2.f32 %v1994_v46  ;;  %v11458_v45 = vld [vmem:[#allocation94_spill] sm:$0xff]  ;;  %v1881_v22 = vsub.f32 %v11459_v30, %v1817_v33  ;;  %v9577_v46 = vmul.f32 %v9359_v54, %v9116_v8  ;;  %v11463_v35 = vpack.i.bf16 %v9454_v6, %v9458_v47 }
 0x3ed   : > { %v1879_v34 = vsub.f32 %v11458_v45, %v1814_v9  ;;  %v9579_v56 = vpop.eup %6454  ;;  %6464 = vpow2.f32 %v1996_v41  ;;  %v1998_v9 = vmul.f32 1.442695, %v1876_v21  ;;  %v11462_v45 = vld [vmem:[#allocation140_spill] sm:$0xff]  ;;  %v2002_v8 = vmul.f32 1.442695, %v1878_v2  ;;  %v11464_v21 = vld [vmem:[#allocation142_spill] sm:$0xff] }
 0x3ee   : > { %3074 = vmatmul.mubr.f32.gmra.mrb[176].mxu0 %v9427_v10  ;;  %11461 = vst [vmem:[#allocation125_spill] sm:$0xff] %v9579_v56  ;;  %v2854_v10 = vmul.f32 %v9271_v24, %v9271_v24  ;;  %2225 = vmatmul.mubr.f32.gmra.mrb[114].mxu1 %v9547_v49  ;;  %v9586_v30 = vmul.f32 %v9359_v54, %v11462_v45  ;;  %6466 = vpow2.f32 %v2000_v42  ;;  %v11466_v2 = vld [vmem:[#allocation96_spill] sm:$0xff]  ;;  %v11475_v49 = vld [vmem:[#allocation86_spill] sm:$0xff] }
 0x3ef   : > { %3079 = vmatprep.mubr.f32.mxu0 %v2852_v60  ;;  %2230 = vmatprep.mubr.f32.mxu1 %v9562_v23  ;;  %v9596_v41 = vmul.f32 %v9359_v54, %v9127_v40  ;;  %v9600_v62 = vmul.f32 %v9359_v54, %v11464_v21  ;;  %v9602_v45 = vpop.eup %6456  ;;  %v2004_v58 = vmul.f32 1.442695, %v1879_v34  ;;  %v9606_v6 = vmul.f32 %v9359_v54, %v9138_v14  ;;  %v11470_v42 = vld [vmem:[#allocation144_spill] sm:$0xff] }
 0x3f0   : > { %5853 = vxpose.xlu0.b32.cont [6/16] %v11463_v35, 128  ;;  %11465 = vst [vmem:[#allocation80_spill] sm:$0xff] %v9602_v45  ;;  %v1880_v47 = vsub.f32 %v11466_v2, %v1817_v33  ;;  %v2008_v35 = vmul.f32 1.442695, %v1881_v22  ;;  %v2856_v21 = vmul.f32 %v9284_v32, %v9284_v32  ;;  %6468 = vpow2.f32 %v1998_v9  ;;  %v9617_v54 = vpop.eup %6458 }
 0x3f1   : > { %11467 = vst [vmem:[#allocation26_spill] sm:$0xff] %v9617_v54  ;;  %v2853_v14 = vmul.f32 %v9264_v26, %v9264_v26  ;;  %v2857_v22 = vmul.f32 %v9321_v7, %v9321_v7  ;;  %6470 = vpow2.f32 %v2002_v8  ;;  %v11468_v33 = vpack.i.bf16 %v9465_v4, %v9474_v43 }
 0x3f2   : > { %3080 = vmatmul.mubr.f32.gmra.mrb[178].mxu0 %v9490_v27  ;;  %2231 = vmatmul.mubr.f32.gmra.mrb[116].mxu1 %v9579_v56  ;;  %v2855_v27 = vmul.f32 %v9276_v17, %v9276_v17  ;;  %v2858_v34 = vmul.f32 %v9325_v44, %v9325_v44  ;;  %v2860_v9 = vmul.f32 %v9338_v37, %v9338_v37  ;;  %6472 = vpow2.f32 %v2004_v58  ;;  %v11472_v56 = vld [vmem:[#allocation149_spill] sm:$0xff] }
 0x3f3   : > { %3085 = vmatprep.mubr.f32.mxu0 %v2854_v10  ;;  %2236 = vmatprep.mubr.f32.mxu1 %v9602_v45  ;;  %v9633_v10 = vmul.f32 %v9330_v13, %v9330_v13  ;;  %v9641_v4 = vmul.f32 %v9395_v0, %v9395_v0  ;;  %v9645_v43 = vmul.f32 %v9408_v50, %v9408_v50  ;;  %v2006_v8 = vmul.f32 1.442695, %v1880_v47 }
 0x3f4   : > { %5855 = vxpose.xlu0.b32.cont [7/16] %v11468_v33, 128  ;;  %6474 = vpow2.f32 %v2008_v35  ;;  %v11473_v35 = vld [vmem:[#allocation25_spill] sm:$0xff] }
 0x3f5   : > { %v9637_v2 = vpop.eup %6460  ;;  %6476 = vpow2.f32 %v2006_v8  ;;  %v11490_v8 = vld [vmem:[#allocation95_spill] sm:$0xff] }
 0x3f6   : > { %3086 = vmatmul.mubr.f32.gmra.mrb[180].mxu0 %v2853_v14  ;;  %v9647_v33 = vpop.eup %6462  ;;  %v2738_v40 = vmul.f32 %v9637_v2, %v11470_v42  ;;  %v2770_v58 = vmul.f32 %v9637_v2, %v9173_v57  ;;  %v11471_v14 = vld [vmem:[#allocation146_spill] sm:$0xff]  ;;  %v2772_v45 = vmul.f32 %v9637_v2, %v9179_v5  ;;  %v2742_v23 = vmul.f32 %v9637_v2, %v11472_v56 }
 0x3f7   : > { %11469 = vst [vmem:[#allocation127_spill] sm:$0xff] %v9647_v33  ;;  %3091 = vmatprep.mubr.f32.mxu0 %v2856_v21  ;;  %v2740_v60 = vmul.f32 %v9637_v2, %v11471_v14  ;;  %v2774_v47 = vmul.f32 %v9637_v2, %v9187_v28  ;;  %v9663_v21 = vmul.f32 %v9637_v2, %v11473_v35  ;;  %v9670_v57 = vpop.eup %6464 }
 0x3f8   : > { %v9667_v42 = vmul.f32 %v9637_v2, %v9193_v55  ;;  %2237 = vmatmul.mubr.f32.gmra.mrb[118].mxu1 %v9617_v54  ;;  %11474 = vst [vmem:[#allocation92_spill] sm:$0xff] %v9670_v57  ;;  %v5954_v14 = vpack.i.bf16 %v2738_v40, %v2770_v58  ;;  %v9674_v56 = vmul.f32 %v9637_v2, %v11475_v49  ;;  %v11482_v58 = vld [vmem:[#allocation41_spill] sm:$0xff] }
 0x3f9   : > { %v5956_v5 = vpack.i.bf16 %v2740_v60, %v2772_v45  ;;  %v9678_v28 = vmul.f32 %v9637_v2, %v9218_v39  ;;  %v11476_v35 = vpack.i.bf16 %v9478_v12, %v9482_v52  ;;  %v5958_v55 = vpack.i.bf16 %v2742_v23, %v2774_v47  ;;  %v9693_v45 = vpop.eup %6466  ;;  %v11479_v12 = vld [vmem:[#allocation151_spill] sm:$0xff]  ;;  %v11480_v23 = vld [vmem:[#allocation52_spill] sm:$0xff]  ;;  %2242 = vmatprep.mubr.f32.mxu1 %v9670_v57 }
 0x3fa   : > { %3092 = vmatmul.mubr.f32.gmra.mrb[182].mxu0 %v2855_v27  ;;  %v5960_v54 = vpack.i.bf16 %v9663_v21, %v9667_v42  ;;  %v9687_v60 = vmul.f32 %v9637_v2, %v11477_v38  ;;  %v9691_v49 = vmul.f32 %v9637_v2, %v9233_v25  ;;  %11478 = vst [vmem:[#allocation128_spill] sm:$0xff] %v9693_v45  ;;  %v11481_v25 = vld [vmem:[#allocation34_spill] sm:$0xff]  ;;  %v9720_v21 = vpop.eup %6468 }
 0x3fb   : > { %5857 = vxpose.xlu0.b32.cont [8/16] %v11476_v35, 128  ;;  %5955 = vxpose.xlu1.b32.start [1/16] %v5954_v14, 128  ;;  %v5962_v39 = vpack.i.bf16 %v9674_v56, %v9678_v28  ;;  %v9699_v52 = vmul.f32 %v9637_v2, %v11479_v12  ;;  %v9703_v40 = vmul.f32 %v9637_v2, %v11480_v23  ;;  %v11485_v56 = vld [vmem:[#allocation153_spill] sm:$0xff]  ;;  %v9736_v35 = vpop.eup %6470  ;;  %v11491_v23 = vld [vmem:[#allocation154_spill] sm:$0xff] }
 0x3fc   : > { %3097 = vmatprep.mubr.f32.mxu0 %v2858_v34  ;;  %v5964_v38 = vpack.i.bf16 %v9687_v60, %v9691_v49  ;;  %v9709_v27 = vmul.f32 %v9637_v2, %v11481_v25  ;;  %v9713_v34 = vmul.f32 %v9637_v2, %v9273_v36  ;;  %v9718_v47 = vmul.f32 %v9637_v2, %v11482_v58  ;;  %v11487_v49 = vld [vmem:[#allocation88_spill] sm:$0xff]  ;;  %v9747_v12 = vpop.eup %6472 }
 0x3fd   : > { %11483 = vst [vmem:[#allocation83_spill] sm:$0xff] %v9720_v21  ;;  %v5966_v42 = vpack.i.bf16 %v9699_v52, %v9703_v40  ;;  %2243 = vmatmul.mubr.f32.gmra.mrb[120].mxu1 %v9647_v33  ;;  %v11484_v14 = vpack.i.bf16 %v9501_v15, %v9511_v1  ;;  %v9730_v36 = vmul.f32 %v9637_v2, %v9278_v59  ;;  %11486 = vst [vmem:[#allocation31_spill] sm:$0xff] %v9736_v35  ;;  %v11488_v1 = vld [vmem:[#allocation36_spill] sm:$0xff] }
 0x3fe   : > { %v9734_v28 = vmul.f32 %v9637_v2, %v11485_v56  ;;  %3098 = vmatmul.mubr.f32.gmra.mrb[184].mxu0 %v2857_v22  ;;  %v5968_v60 = vpack.i.bf16 %v9709_v27, %v9713_v34  ;;  %2248 = vmatprep.mubr.f32.mxu1 %v9693_v45  ;;  %v2788_v15 = vmul.f32 %v9637_v2, %v11487_v49  ;;  %v9755_v25 = vpop.eup %6474  ;;  %v11493_v34 = vld [vmem:[#allocation60_spill] sm:$0xff]  ;;  %v11497_v49 = vld [vmem:[#allocation155_spill] sm:$0xff] }
 0x3ff   : > { %5859 = vxpose.xlu0.b32.cont [9/16] %v11484_v14, 128  ;;  %v9745_v59 = vmul.f32 %v9637_v2, %v11488_v1  ;;  %11489 = vst [vmem:[#allocation130_spill] sm:$0xff] %v9747_v12  ;;  %3103 = vmatprep.mubr.f32.mxu0 %v2860_v9  ;;  %v5970_v22 = vpack.i.bf16 %v9718_v47, %v9730_v36  ;;  %11492 = vst [vmem:[#allocation87_spill] sm:$0xff] %v9755_v25  ;;  %v11494_v14 = vld [vmem:[#allocation38_spill] sm:$0xff] }
 0x400   : > { %5957 = vxpose.xlu1.b32.cont [2/16] %v5956_v5, 128  ;;  %v2790_v52 = vmul.f32 %v9637_v2, %v11490_v8  ;;  %v2760_v40 = vmul.f32 %v9637_v2, %v11491_v23  ;;  %v5972_v27 = vpack.i.bf16 %v9734_v28, %v2788_v15  ;;  %v2792_v58 = vmul.f32 %v9637_v2, %v11493_v34  ;;  %v11495_v5 = vld [vmem:[#allocation165_spill] sm:$0xff]  ;;  %v11498_v15 = vld [vmem:[#allocation63_spill] sm:$0xff]  ;;  %v11499_v34 = vld [vmem:[#allocation156_spill] sm:$0xff] }
 0x401   : > { %v2762_v9 = vmul.f32 %v9637_v2, %v11494_v14  ;;  %v2794_v56 = vmul.f32 %v9637_v2, %v11495_v5  ;;  %2249 = vmatmul.mubr.f32.gmra.mrb[122].mxu1 %v9720_v21  ;;  %v11496_v47 = vpack.i.bf16 %v9516_v31, %v9520_v51  ;;  %v2764_v28 = vmul.f32 %v9637_v2, %v11497_v49  ;;  %v11501_v5 = vld [vmem:[#allocation18_spill] sm:$0xff] }
 0x402   : > { %v5974_v36 = vpack.i.bf16 %v9745_v59, %v2790_v52  ;;  %v2796_v1 = vmul.f32 %v9637_v2, %v11498_v15  ;;  %3104 = vmatmul.mubr.f32.gmra.mrb[186].mxu0 %v9633_v10  ;;  %2254 = vmatprep.mubr.f32.mxu1 %v9747_v12  ;;  %v5976_v8 = vpack.i.bf16 %v2760_v40, %v2792_v58  ;;  %v11500_v59 = vld [vmem:[#allocation158_spill] sm:$0xff]  ;;  %v9792_v58 = vpop.eup %6476 }
 0x403   : > { %5861 = vxpose.xlu0.b32.cont [10/16] %v11496_v47, 128  ;;  %v5978_v23 = vpack.i.bf16 %v2762_v9, %v2794_v56  ;;  %v2766_v14 = vmul.f32 %v9637_v2, %v11499_v34  ;;  %3109 = vmatprep.mubr.f32.mxu0 %v9641_v4  ;;  %v2798_v51 = vmul.f32 %v9637_v2, %v9404_v61 }
 0x404   : > { %5959 = vxpose.xlu1.b32.cont [3/16] %v5958_v55, 128  ;;  %v5980_v31 = vpack.i.bf16 %v2764_v28, %v2796_v1  ;;  %v2768_v52 = vmul.f32 %v9637_v2, %v11500_v59  ;;  %v2861_v10 = vmul.f32 %v11501_v5, %v11501_v5  ;;  %v2800_v40 = vmul.f32 %v9637_v2, %v9410_v63 }
 0x405   : > { %2255 = vmatmul.mubr.f32.gmra.mrb[124].mxu1 %v9736_v35  ;;  %v11502_v55 = vpack.i.bf16 %v9529_v3, %v9533_v11  ;;  %v5982_v4 = vpack.i.bf16 %v2766_v14, %v2798_v51  ;;  %11503 = vst [vmem:[#allocation132_spill] sm:$0xff] %v9792_v58  ;;  %v2863_v9 = vmul.f32 %v9400_v48, %v9400_v48 }
 0x406   : > { %3110 = vmatmul.mubr.f32.gmra.mrb[188].mxu0 %v2861_v10  ;;  %2260 = vmatprep.mubr.f32.mxu1 %v9755_v25  ;;  %v5984_v61 = vpack.i.bf16 %v2768_v52, %v2800_v40  ;;  %v11504_v63 = vpack.i.bf16 %v9540_v18, %v9552_v16  ;;  %v11505_v11 = vpack.i.bf16 %v9556_v29, %v9560_v53 }
 0x407   : > { %5863 = vxpose.xlu0.b32.cont [11/16] %v11502_v55, 128  ;;  %3115 = vmatprep.mubr.f32.mxu0 %v9645_v43  ;;  %v11506_v3 = vpack.i.bf16 %v9573_v19, %v9577_v46  ;;  %v11507_v2 = vpack.i.bf16 %v9586_v30, %v9596_v41  ;;  %v11508_v29 = vpack.i.bf16 %v9600_v62, %v9606_v6 }
 0x408   : > { %5961 = vxpose.xlu1.b32.cont [4/16] %v5960_v54, 128 }
 0x409   : > { %2261 = vmatmul.mubr.f32.gmra.mrb[126].mxu1 %v9792_v58 }
 0x40a   : > { %3116 = vmatmul.mubr.f32.gmra.mrb[190].mxu0 %v2863_v9 }
 0x40b   : > { %5865 = vxpose.xlu0.b32.cont [12/16] %v11504_v63, 128 }
 0x40c   : > { %5963 = vxpose.xlu1.b32.cont [5/16] %v5962_v39, 128  ;;  %v11511_v39 = vld [vmem:[#allocation62_spill] sm:$0xff] }
 0x40f   : > { %5867 = vxpose.xlu0.b32.cont [13/16] %v11505_v11, 128 }
 0x410   : > { %5965 = vxpose.xlu1.b32.cont [6/16] %v5964_v38, 128 }
 0x412   : > { %v9806_v54 = vpop.f32.mrb[64].mxu1 }
 0x413   : > { %5869 = vxpose.xlu0.b32.cont [14/16] %v11506_v3, 128  ;;  %v2078_v18 = vpop.f32.mrb[65].mxu1 }
 0x414   : > { %5967 = vxpose.xlu1.b32.cont [7/16] %v5966_v42, 128  ;;  %6478 = vrcp.f32 %v2078_v18 }
 0x416   : > { %v9811_v16 = vpop.f32.mrb[66].mxu1 }
 0x417   : > { %5871 = vxpose.xlu0.b32.cont [15/16] %v11507_v2, 128  ;;  %v9816_v53 = vpop.f32.mrb[67].mxu1 }
 0x418   : > { %5969 = vxpose.xlu1.b32.cont [8/16] %v5968_v60, 128 }
 0x41a   : > { %v9818_v19 = vpop.f32.mrb[68].mxu1 }
 0x41b   : > { %5873 = vxpose.xlu0.b32.end [16/16] %v11508_v29, 128  ;;  %v9820_v46 = vpop.f32.mrb[69].mxu1  ;;  %v11530_v29 = vld [vmem:[#allocation103_spill] sm:$0xff] }
 0x41c   : > { %5971 = vxpose.xlu1.b32.cont [9/16] %v5970_v22, 128 }
 0x41e   : > { %v6479_v43 = vpop.eup %6478  ;;  %v9822_v30 = vpop.f32.mrb[70].mxu1 }
 0x41f   : > { %11509 = vst [vmem:[#allocation33_spill] sm:$0xff] %v9822_v30  ;;  %v9824_v41 = vpop.f32.mrb[71].mxu1  ;;  %v2332_v38 = vmul.f32 %v6479_v43, %v11511_v39  ;;  %v11608_v30 = vld [vmem:[#allocation50_spill] sm:$0xff] }
 0x420   : > { %5973 = vxpose.xlu1.b32.cont [10/16] %v5972_v27, 128  ;;  %11510 = vst [vmem:[#allocation134_spill] sm:$0xff] %v9824_v41 }
 0x421   : > { %3891 = vmatprep.mubr.f32.mxu0 %v2332_v38  ;;  %v11532_v38 = vld [vmem:[#allocation105_spill] sm:$0xff] }
 0x422   : > { %v9827_v42 = vpop.f32.mrb[72].mxu1 }
 0x423   : > { %11512 = vst [vmem:[#allocation84_spill] sm:$0xff] %v9827_v42  ;;  %v9829_v62 = vpop.f32.mrb[73].mxu1  ;;  %v11601_v42 = vld [vmem:[#allocation43_spill] sm:$0xff] }
 0x424   : > { %5975 = vxpose.xlu1.b32.cont [11/16] %v5974_v36, 128  ;;  %11513 = vst [vmem:[#allocation91_spill] sm:$0xff] %v9829_v62 }
 0x426   : > { %v9831_v6 = vpop.f32.mrb[74].mxu1 }
 0x427   : > { %11514 = vst [vmem:[#allocation136_spill] sm:$0xff] %v9831_v6  ;;  %v9833_v60 = vpop.f32.mrb[75].mxu1 }
 0x428   : > { %5977 = vxpose.xlu1.b32.cont [12/16] %v5976_v8, 128  ;;  %11515 = vst [vmem:[#allocation94_spill] sm:$0xff] %v9833_v60 }
 0x42a   : > { %v9835_v22 = vpop.f32.mrb[76].mxu1 }
 0x42b   : > { %11516 = vst [vmem:[#allocation99_spill] sm:$0xff] %v9835_v22  ;;  %v9837_v27 = vpop.f32.mrb[77].mxu1 }
 0x42c   : > { %5979 = vxpose.xlu1.b32.cont [13/16] %v5978_v23, 128  ;;  %11517 = vst [vmem:[#allocation138_spill] sm:$0xff] %v9837_v27 }
 0x42e   : > { %v9839_v56 = vpop.f32.mrb[78].mxu1 }
 0x42f   : > { %11518 = vst [vmem:[#allocation140_spill] sm:$0xff] %v9839_v56  ;;  %v9841_v47 = vpop.f32.mrb[79].mxu1 }
 0x430   : > { %5981 = vxpose.xlu1.b32.cont [14/16] %v5980_v31, 128  ;;  %11519 = vst [vmem:[#allocation142_spill] sm:$0xff] %v9841_v47 }
 0x432   : > { %v9843_v36 = vpop.f32.mrb[80].mxu1 }
 0x433   : > { %11520 = vst [vmem:[#allocation96_spill] sm:$0xff] %v9843_v36  ;;  %v9845_v49 = vpop.f32.mrb[81].mxu1 }
 0x434   : > { %5983 = vxpose.xlu1.b32.cont [15/16] %v5982_v4, 128  ;;  %11521 = vst [vmem:[#allocation144_spill] sm:$0xff] %v9845_v49 }
 0x436   : > { %v9847_v28 = vpop.f32.mrb[82].mxu1 }
 0x437   : > { %11522 = vst [vmem:[#allocation146_spill] sm:$0xff] %v9847_v28  ;;  %v9849_v15 = vpop.f32.mrb[83].mxu1  ;;  %v2931_v1 = vpop.f32.mrb[128].mxu0 }
 0x438   : > { %5985 = vxpose.xlu1.b32.end [16/16] %v5984_v61, 128  ;;  %11523 = vst [vmem:[#allocation149_spill] sm:$0xff] %v9849_v15  ;;  %v3122_v8 = vmax.f32 %v2931_v1, 1e-24  ;;  %v2933_v23 = vpop.f32.mrb[129].mxu0  ;;  %v11570_v15 = vld [vmem:[#allocation137_spill] sm:$0xff] }
 0x439   : > { %v3123_v34 = vmax.f32 %v2933_v23, 1e-24 }
 0x43a   : > { %6480 = vrsqrt.f32 %v3122_v8  ;;  %v9851_v14 = vpop.f32.mrb[84].mxu1 }
 0x43b   : > { %11524 = vst [vmem:[#allocation25_spill] sm:$0xff] %v9851_v14  ;;  %6482 = vrsqrt.f32 %v3123_v34  ;;  %v9853_v31 = vpop.f32.mrb[85].mxu1  ;;  %v2937_v51 = vpop.f32.mrb[130].mxu0 }
 0x43c   : > { %11525 = vst [vmem:[#allocation86_spill] sm:$0xff] %v9853_v31  ;;  %v3124_v59 = vmax.f32 %v2937_v51, 1e-24  ;;  %v2939_v52 = vpop.f32.mrb[131].mxu0  ;;  %v11534_v51 = vld [vmem:[#allocation106_spill] sm:$0xff] }
 0x43d   : > { %v3125_v10 = vmax.f32 %v2939_v52, 1e-24  ;;  %v11535_v52 = vld [vmem:[#allocation108_spill] sm:$0xff] }
 0x43e   : > { %6484 = vrsqrt.f32 %v3124_v59  ;;  %v9855_v40 = vpop.f32.mrb[86].mxu1 }
 0x43f   : > { %11526 = vst [vmem:[#allocation150_spill] sm:$0xff] %v9855_v40  ;;  %6486 = vrsqrt.f32 %v3125_v10  ;;  %v9857_v55 = vpop.f32.mrb[87].mxu1  ;;  %v2943_v4 = vpop.f32.mrb[132].mxu0 }
 0x440   : > { %11527 = vst [vmem:[#allocation151_spill] sm:$0xff] %v9857_v55  ;;  %v3126_v61 = vmax.f32 %v2943_v4, 1e-24  ;;  %v2945_v9 = vpop.f32.mrb[133].mxu0  ;;  %v11554_v55 = vld [vmem:[#allocation121_spill] sm:$0xff] }
 0x441   : > { %v3127_v63 = vmax.f32 %v2945_v9, 1e-24 }
 0x442   : > { %v9859_v11 = vpop.f32.mrb[88].mxu1  ;;  %6488 = vrsqrt.f32 %v3126_v61 }
 0x443   : > { %11528 = vst [vmem:[#allocation52_spill] sm:$0xff] %v9859_v11  ;;  %v9861_v3 = vpop.f32.mrb[89].mxu1  ;;  %6490 = vrsqrt.f32 %v3127_v63  ;;  %v11536_v63 = vld [vmem:[#allocation111_spill] sm:$0xff] }
 0x444   : > { %11529 = vst [vmem:[#allocation34_spill] sm:$0xff] %v9861_v3  ;;  %v6481_v2 = vpop.eup %6480 }
 0x445   : > { %v6483_v18 = vpop.eup %6482  ;;  %v3250_v43 = vmul.f32 %v6481_v2, %v11530_v29  ;;  %v11537_v2 = vld [vmem:[#allocation113_spill] sm:$0xff] }
 0x446   : > { %v9864_v39 = vpop.f32.mrb[90].mxu1  ;;  %v3251_v1 = vmul.f32 %v6483_v18, %v11532_v38 }
 0x447   : > { %11531 = vst [vmem:[#allocation41_spill] sm:$0xff] %v9864_v39  ;;  %v9867_v8 = vpop.f32.mrb[91].mxu1 }
 0x448   : > { %11533 = vst [vmem:[#allocation153_spill] sm:$0xff] %v9867_v8  ;;  %v6485_v23 = vpop.eup %6484 }
 0x449   : > { %v6487_v34 = vpop.eup %6486  ;;  %v3252_v59 = vmul.f32 %v6485_v23, %v11534_v51 }
 0x44a   : > { %v3253_v10 = vmul.f32 %v6487_v34, %v11535_v52 }
 0x44b   : > { %v5627_v4 = vpack.c.bf16 %v3252_v59, %v3250_v43 }
 0x44c   : > { %v5625_v61 = vpack.c.bf16 %v3253_v10, %v3251_v1  ;;  %v6489_v9 = vpop.eup %6488 }
 0x44d   : > { %v6491_v58 = vpop.eup %6490  ;;  %v3254_v25 = vmul.f32 %v6489_v9, %v11536_v63 }
 0x44e   : > { %5626 = vmatprep.subr.bf16.mxu1 %v5625_v61  ;;  %v3255_v29 = vmul.f32 %v6491_v58, %v11537_v2 }
 0x44f   : > { %5628 = vmatpush1.bf16.msra.mxu1 %v5627_v4 }
 0x45f   : > { %v9873_v21 = vpop.trf.xlu0 }
 0x460   : > { %v5875_v1 = vunpack.i.l.bf16 %v9873_v21 }
 0x462   : > { %3506 = vmatprep.mubr.f32.mxu1 %v5875_v1 }
 0x463   : > { %v9876_v59 = vpop.trf.xlu0 }
 0x464   : > { %v2949_v35 = vpop.f32.mrb[134].mxu0 }
 0x465   : > { %v3128_v18 = vmax.f32 %v2949_v35, 1e-24  ;;  %v2951_v38 = vpop.f32.mrb[135].mxu0 }
 0x466   : > { %v3129_v12 = vmax.f32 %v2951_v38, 1e-24  ;;  %v11538_v38 = vld [vmem:[#allocation114_spill] sm:$0xff] }
 0x467   : > { %6492 = vrsqrt.f32 %v3128_v18  ;;  %v9878_v4 = vpop.trf.xlu0 }
 0x468   : > { %6494 = vrsqrt.f32 %v3129_v12 }
 0x469   : > { %v2955_v23 = vpop.f32.mrb[136].mxu0 }
 0x46a   : > { %v3130_v34 = vmax.f32 %v2955_v23, 1e-24  ;;  %v2957_v43 = vpop.f32.mrb[137].mxu0 }
 0x46b   : > { %v3131_v51 = vmax.f32 %v2957_v43, 1e-24  ;;  %v9882_v1 = vpop.trf.xlu0 }
 0x46c   : > { %6496 = vrsqrt.f32 %v3130_v34  ;;  %v11539_v34 = vld [vmem:[#allocation116_spill] sm:$0xff] }
 0x46d   : > { %6498 = vrsqrt.f32 %v3131_v51  ;;  %v2961_v58 = vpop.f32.mrb[138].mxu0 }
 0x46e   : > { %v3132_v52 = vmax.f32 %v2961_v58, 1e-24  ;;  %v2963_v35 = vpop.f32.mrb[139].mxu0 }
 0x46f   : > { %v3133_v10 = vmax.f32 %v2963_v35, 1e-24 }
 0x470   : > { %6500 = vrsqrt.f32 %v3132_v52 }
 0x471   : > { %6502 = vrsqrt.f32 %v3133_v10  ;;  %v6493_v61 = vpop.eup %6492 }
 0x472   : > { %v6495_v2 = vpop.eup %6494  ;;  %v3256_v23 = vmul.f32 %v6493_v61, %v11538_v38 }
 0x473   : > { %v2967_v12 = vpop.f32.mrb[140].mxu0  ;;  %v3257_v43 = vmul.f32 %v6495_v2, %v11539_v34 }
 0x474   : > { %v3134_v9 = vmax.f32 %v2967_v12, 1e-24  ;;  %v2969_v63 = vpop.f32.mrb[141].mxu0  ;;  %v5631_v58 = vpack.c.bf16 %v3256_v23, %v3254_v25  ;;  %v11540_v12 = vld [vmem:[#allocation29_spill] sm:$0xff] }
 0x475   : > { %v3135_v18 = vmax.f32 %v2969_v63, 1e-24  ;;  %v5629_v10 = vpack.c.bf16 %v3257_v43, %v3255_v29  ;;  %v11541_v63 = vld [vmem:[#allocation39_spill] sm:$0xff] }
 0x476   : > { %6504 = vrsqrt.f32 %v3134_v9  ;;  %v6497_v52 = vpop.eup %6496  ;;  %v9886_v9 = vpop.trf.xlu0 }
 0x477   : > { %6506 = vrsqrt.f32 %v3135_v18  ;;  %v6499_v33 = vpop.eup %6498  ;;  %v3258_v20 = vmul.f32 %v6497_v52, %v11540_v12  ;;  %5630 = vmatprep.subr.bf16.mxu1 %v5629_v10 }
 0x478   : > { %v2973_v51 = vpop.f32.mrb[142].mxu0  ;;  %v3259_v61 = vmul.f32 %v6499_v33, %v11541_v63  ;;  %5632 = vmatpush1.bf16.msra.mxu1 %v5631_v58 }
 0x479   : > { %v3136_v35 = vmax.f32 %v2973_v51, 1e-24  ;;  %v2975_v45 = vpop.f32.mrb[143].mxu0  ;;  %v11542_v51 = vld [vmem:[#allocation46_spill] sm:$0xff] }
 0x47a   : > { %v3137_v57 = vmax.f32 %v2975_v45, 1e-24  ;;  %v6501_v18 = vpop.eup %6500  ;;  %v11543_v45 = vld [vmem:[#allocation119_spill] sm:$0xff]  ;;  %v9890_v52 = vpop.trf.xlu0 }
 0x47b   : > { %6508 = vrsqrt.f32 %v3136_v35  ;;  %v6503_v23 = vpop.eup %6502  ;;  %v3260_v29 = vmul.f32 %v6501_v18, %v11542_v51 }
 0x47c   : > { %6510 = vrsqrt.f32 %v3137_v57  ;;  %v3261_v43 = vmul.f32 %v6503_v23, %v11543_v45 }
 0x47d   : > { %v5635_v33 = vpack.c.bf16 %v3260_v29, %v3258_v20 }
 0x47e   : > { %v2979_v2 = vpop.f32.mrb[144].mxu0  ;;  %v5633_v63 = vpack.c.bf16 %v3261_v43, %v3259_v61  ;;  %v11547_v43 = vld [vmem:[#allocation21_spill] sm:$0xff] }
 0x47f   : > { %v3138_v38 = vmax.f32 %v2979_v2, 1e-24  ;;  %v2981_v25 = vpop.f32.mrb[145].mxu0  ;;  %v11544_v2 = vld [vmem:[#allocation16_spill] sm:$0xff] }
 0x480   : > { %v3139_v34 = vmax.f32 %v2981_v25, 1e-24  ;;  %v6505_v10 = vpop.eup %6504  ;;  %5634 = vmatprep.subr.bf16.mxu1 %v5633_v63  ;;  %v11545_v25 = vld [vmem:[#allocation17_spill] sm:$0xff] }
 0x481   : > { %6512 = vrsqrt.f32 %v3138_v38  ;;  %v6507_v58 = vpop.eup %6506  ;;  %v3262_v8 = vmul.f32 %v6505_v10, %v11544_v2  ;;  %v9894_v38 = vpop.trf.xlu0  ;;  %5636 = vmatpush1.bf16.msra.mxu1 %v5635_v33 }
 0x482   : > { %6514 = vrsqrt.f32 %v3139_v34  ;;  %v2985_v35 = vpop.f32.mrb[146].mxu0  ;;  %v3263_v18 = vmul.f32 %v6507_v58, %v11545_v25 }
 0x483   : > { %v3140_v12 = vmax.f32 %v2985_v35, 1e-24  ;;  %v2987_v57 = vpop.f32.mrb[147].mxu0  ;;  %v11546_v35 = vld [vmem:[#allocation19_spill] sm:$0xff] }
 0x484   : > { %v3141_v39 = vmax.f32 %v2987_v57, 1e-24 }
 0x485   : > { %6516 = vrsqrt.f32 %v3140_v12  ;;  %v6509_v34 = vpop.eup %6508  ;;  %v9898_v10 = vpop.trf.xlu0 }
 0x486   : > { %6518 = vrsqrt.f32 %v3141_v39  ;;  %v6511_v29 = vpop.eup %6510  ;;  %v3264_v61 = vmul.f32 %v6509_v34, %v11546_v35 }
 0x487   : > { %v2991_v23 = vpop.f32.mrb[148].mxu0  ;;  %v3265_v57 = vmul.f32 %v6511_v29, %v11547_v43 }
 0x488   : > { %v3142_v51 = vmax.f32 %v2991_v23, 1e-24  ;;  %v2993_v20 = vpop.f32.mrb[149].mxu0  ;;  %v5639_v63 = vpack.c.bf16 %v3264_v61, %v3262_v8  ;;  %v11548_v23 = vld [vmem:[#allocation22_spill] sm:$0xff] }
 0x489   : > { %v3143_v45 = vmax.f32 %v2993_v20, 1e-24  ;;  %v5637_v25 = vpack.c.bf16 %v3265_v57, %v3263_v18  ;;  %v11549_v20 = vld [vmem:[#allocation24_spill] sm:$0xff] }
 0x48a   : > { %6520 = vrsqrt.f32 %v3142_v51  ;;  %v9902_v51 = vpop.trf.xlu0  ;;  %v11551_v57 = vld [vmem:[#allocation48_spill] sm:$0xff] }
 0x48b   : > { %6522 = vrsqrt.f32 %v3143_v45  ;;  %v2997_v12 = vpop.f32.mrb[150].mxu0  ;;  %v6513_v58 = vpop.eup %6512  ;;  %5638 = vmatprep.subr.bf16.mxu1 %v5637_v25 }
 0x48c   : > { %v3144_v2 = vmax.f32 %v2997_v12, 1e-24  ;;  %v2999_v39 = vpop.f32.mrb[151].mxu0  ;;  %v6515_v33 = vpop.eup %6514  ;;  %v3266_v3 = vmul.f32 %v6513_v58, %v11548_v23  ;;  %5640 = vmatpush1.bf16.msra.mxu1 %v5639_v63  ;;  %v11550_v12 = vld [vmem:[#allocation37_spill] sm:$0xff] }
 0x48d   : > { %v3145_v11 = vmax.f32 %v2999_v39, 1e-24  ;;  %v3267_v34 = vmul.f32 %v6515_v33, %v11549_v20 }
 0x48e   : > { %6524 = vrsqrt.f32 %v3144_v2  ;;  %v9906_v58 = vpop.trf.xlu0 }
 0x48f   : > { %6526 = vrsqrt.f32 %v3145_v11  ;;  %v6517_v45 = vpop.eup %6516 }
 0x490   : > { %v3003_v29 = vpop.f32.mrb[152].mxu0  ;;  %v6519_v61 = vpop.eup %6518  ;;  %v3268_v18 = vmul.f32 %v6517_v45, %v11550_v12 }
 0x491   : > { %v3146_v35 = vmax.f32 %v3003_v29, 1e-24  ;;  %v3005_v8 = vpop.f32.mrb[153].mxu0  ;;  %v3269_v39 = vmul.f32 %v6519_v61, %v11551_v57 }
 0x492   : > { %v3147_v43 = vmax.f32 %v3005_v8, 1e-24  ;;  %v5643_v25 = vpack.c.bf16 %v3268_v18, %v3266_v3  ;;  %v9914_v12 = vpop.trf.xlu0 }
 0x493   : > { %6528 = vrsqrt.f32 %v3146_v35  ;;  %v5641_v20 = vpack.c.bf16 %v3269_v39, %v3267_v34  ;;  %v11555_v35 = vld [vmem:[#allocation123_spill] sm:$0xff] }
 0x494   : > { %6530 = vrsqrt.f32 %v3147_v43  ;;  %v3009_v2 = vpop.f32.mrb[154].mxu0  ;;  %v6521_v33 = vpop.eup %6520 }
 0x495   : > { %v9908_v23 = vpop.f32.mrb[92].mxu1  ;;  %v3148_v11 = vmax.f32 %v3009_v2, 1e-24  ;;  %v3011_v63 = vpop.f32.mrb[155].mxu0  ;;  %v3270_v45 = vmul.f32 %v6521_v33, %v11554_v55  ;;  %5642 = vmatprep.subr.bf16.mxu1 %v5641_v20  ;;  %v11559_v33 = vld [vmem:[#allocation126_spill] sm:$0xff] }
 0x496   : > { %11552 = vst [vmem:[#allocation88_spill] sm:$0xff] %v9908_v23  ;;  %v6523_v29 = vpop.eup %6522  ;;  %v9910_v40 = vpop.f32.mrb[93].mxu1  ;;  %v3149_v8 = vmax.f32 %v3011_v63, 1e-24  ;;  %5644 = vmatpush1.bf16.msra.mxu1 %v5643_v25  ;;  %v11558_v23 = vld [vmem:[#allocation124_spill] sm:$0xff] }
 0x497   : > { %11553 = vst [vmem:[#allocation36_spill] sm:$0xff] %v9910_v40  ;;  %v3271_v61 = vmul.f32 %v6523_v29, %v11555_v35  ;;  %6532 = vrsqrt.f32 %v3148_v11  ;;  %v9922_v29 = vpop.trf.xlu0 }
 0x498   : > { %v6525_v3 = vpop.eup %6524  ;;  %6534 = vrsqrt.f32 %v3149_v8 }
 0x499   : > { %v3015_v43 = vpop.f32.mrb[156].mxu0  ;;  %v9916_v18 = vpop.f32.mrb[94].mxu1  ;;  %v3272_v55 = vmul.f32 %v6525_v3, %v11558_v23  ;;  %v11563_v3 = vld [vmem:[#allocation131_spill] sm:$0xff] }
 0x49a   : > { %11556 = vst [vmem:[#allocation95_spill] sm:$0xff] %v9916_v18  ;;  %v3150_v57 = vmax.f32 %v3015_v43, 1e-24  ;;  %v3017_v34 = vpop.f32.mrb[157].mxu0  ;;  %v6527_v39 = vpop.eup %6526 }
 0x49b   : > { %v9918_v2 = vpop.f32.mrb[95].mxu1  ;;  %v3151_v63 = vmax.f32 %v3017_v34, 1e-24  ;;  %v3273_v20 = vmul.f32 %v6527_v39, %v11559_v33  ;;  %v5647_v35 = vpack.c.bf16 %v3272_v55, %v3270_v45  ;;  %v9930_v33 = vpop.trf.xlu0 }
 0x49c   : > { %11557 = vst [vmem:[#allocation154_spill] sm:$0xff] %v9918_v2  ;;  %6536 = vrsqrt.f32 %v3150_v57  ;;  %v11562_v2 = vld [vmem:[#allocation129_spill] sm:$0xff] }
 0x49d   : > { %v3021_v11 = vpop.f32.mrb[158].mxu0  ;;  %v6529_v25 = vpop.eup %6528  ;;  %6538 = vrsqrt.f32 %v3151_v63  ;;  %v5645_v18 = vpack.c.bf16 %v3273_v20, %v3271_v61 }
 0x49e   : > { %v9924_v40 = vpop.f32.mrb[96].mxu1  ;;  %v3152_v8 = vmax.f32 %v3021_v11, 1e-24  ;;  %v3023_v43 = vpop.f32.mrb[159].mxu0  ;;  %v3274_v23 = vmul.f32 %v6529_v25, %v11562_v2  ;;  %v11567_v25 = vld [vmem:[#allocation135_spill] sm:$0xff] }
 0x49f   : > { %11560 = vst [vmem:[#allocation60_spill] sm:$0xff] %v9924_v40  ;;  %v6531_v14 = vpop.eup %6530  ;;  %v9926_v31 = vpop.f32.mrb[97].mxu1  ;;  %v3153_v34 = vmax.f32 %v3023_v43, 1e-24  ;;  %5646 = vmatprep.subr.bf16.mxu1 %v5645_v18  ;;  %v11566_v40 = vld [vmem:[#allocation133_spill] sm:$0xff] }
 0x4a0   : > { %11561 = vst [vmem:[#allocation38_spill] sm:$0xff] %v9926_v31  ;;  %v3275_v39 = vmul.f32 %v6531_v14, %v11563_v3  ;;  %6540 = vrsqrt.f32 %v3152_v8  ;;  %5648 = vmatpush1.bf16.msra.mxu1 %v5647_v35  ;;  %v9937_v18 = vpop.trf.xlu0 }
 0x4a1   : > { %v3027_v45 = vpop.f32.mrb[160].mxu0  ;;  %v9932_v57 = vpop.f32.mrb[98].mxu1  ;;  %6542 = vrsqrt.f32 %v3153_v34 }
 0x4a2   : > { %11564 = vst [vmem:[#allocation165_spill] sm:$0xff] %v9932_v57  ;;  %v3154_v63 = vmax.f32 %v3027_v45, 1e-24  ;;  %v3029_v55 = vpop.f32.mrb[161].mxu0  ;;  %v6533_v61 = vpop.eup %6532 }
 0x4a3   : > { %v9934_v20 = vpop.f32.mrb[99].mxu1  ;;  %v3155_v11 = vmax.f32 %v3029_v55, 1e-24  ;;  %v6535_v43 = vpop.eup %6534  ;;  %v3276_v2 = vmul.f32 %v6533_v61, %v11566_v40 }
 0x4a4   : > { %11565 = vst [vmem:[#allocation155_spill] sm:$0xff] %v9934_v20  ;;  %6544 = vrsqrt.f32 %v3154_v63  ;;  %v3277_v8 = vmul.f32 %v6535_v43, %v11567_v25  ;;  %v9945_v61 = vpop.trf.xlu0  ;;  %v11571_v43 = vld [vmem:[#allocation139_spill] sm:$0xff] }
 0x4a5   : > { %v3033_v14 = vpop.f32.mrb[162].mxu0  ;;  %v9940_v3 = vpop.f32.mrb[100].mxu1  ;;  %6546 = vrsqrt.f32 %v3155_v11  ;;  %v5651_v45 = vpack.c.bf16 %v3276_v2, %v3274_v23 }
 0x4a6   : > { %11568 = vst [vmem:[#allocation63_spill] sm:$0xff] %v9940_v3  ;;  %v3156_v35 = vmax.f32 %v3033_v14, 1e-24  ;;  %v3035_v34 = vpop.f32.mrb[163].mxu0  ;;  %v6537_v57 = vpop.eup %6536  ;;  %v5649_v55 = vpack.c.bf16 %v3277_v8, %v3275_v39 }
 0x4a7   : > { %v9942_v31 = vpop.f32.mrb[101].mxu1  ;;  %v3157_v20 = vmax.f32 %v3035_v34, 1e-24  ;;  %v6539_v28 = vpop.eup %6538  ;;  %v3278_v40 = vmul.f32 %v6537_v57, %v11570_v15  ;;  %v11574_v34 = vld [vmem:[#allocation141_spill] sm:$0xff] }
 0x4a8   : > { %11569 = vst [vmem:[#allocation156_spill] sm:$0xff] %v9942_v31  ;;  %6548 = vrsqrt.f32 %v3156_v35  ;;  %5650 = vmatprep.subr.bf16.mxu1 %v5649_v55  ;;  %v3279_v25 = vmul.f32 %v6539_v28, %v11571_v43  ;;  %v9953_v57 = vpop.trf.xlu0  ;;  %v11575_v55 = vld [vmem:[#allocation143_spill] sm:$0xff]  ;;  %v9956_v28 = vpop.trf.xlu1 }
 0x4a9   : > { %v3039_v63 = vpop.f32.mrb[164].mxu0  ;;  %v9948_v3 = vpop.f32.mrb[102].mxu1  ;;  %6550 = vrsqrt.f32 %v3157_v20  ;;  %5652 = vmatpush1.bf16.msra.mxu1 %v5651_v45 }
 0x4aa   : > { %11572 = vst [vmem:[#allocation158_spill] sm:$0xff] %v9948_v3  ;;  %v3158_v11 = vmax.f32 %v3039_v63, 1e-24  ;;  %v3041_v23 = vpop.f32.mrb[165].mxu0  ;;  %v6541_v2 = vpop.eup %6540 }
 0x4ab   : > { %v9950_v14 = vpop.f32.mrb[103].mxu1  ;;  %v3159_v39 = vmax.f32 %v3041_v23, 1e-24  ;;  %v6543_v8 = vpop.eup %6542  ;;  %v3280_v15 = vmul.f32 %v6541_v2, %v11574_v34  ;;  %v11578_v34 = vld [vmem:[#allocation145_spill] sm:$0xff] }
 0x4ac   : > { %11573 = vst [vmem:[#allocation18_spill] sm:$0xff] %v9950_v14  ;;  %6552 = vrsqrt.f32 %v3158_v11  ;;  %v3281_v31 = vmul.f32 %v6543_v8, %v11575_v55  ;;  %v11579_v8 = vld [vmem:[#allocation147_spill] sm:$0xff]  ;;  %v9964_v56 = vpop.trf.xlu1 }
 0x4ad   : > { %v3045_v35 = vpop.f32.mrb[166].mxu0  ;;  %v9958_v43 = vpop.f32.mrb[104].mxu1  ;;  %6554 = vrsqrt.f32 %v3159_v39  ;;  %v5655_v63 = vpack.c.bf16 %v3280_v15, %v3278_v40 }
 0x4ae   : > { %11576 = vst [vmem:[#allocation62_spill] sm:$0xff] %v9958_v43  ;;  %v3160_v20 = vmax.f32 %v3045_v35, 1e-24  ;;  %v3047_v45 = vpop.f32.mrb[167].mxu0  ;;  %v6545_v3 = vpop.eup %6544  ;;  %v5653_v36 = vpack.c.bf16 %v3281_v31, %v3279_v25 }
 0x4af   : > { %v9960_v14 = vpop.f32.mrb[105].mxu1  ;;  %v3161_v23 = vmax.f32 %v3047_v45, 1e-24  ;;  %v6547_v2 = vpop.eup %6546  ;;  %v3282_v49 = vmul.f32 %v6545_v3, %v11578_v34  ;;  %v11582_v45 = vld [vmem:[#allocation76_spill] sm:$0xff] }
 0x4b0   : > { %11577 = vst [vmem:[#allocation103_spill] sm:$0xff] %v9960_v14  ;;  %6556 = vrsqrt.f32 %v3160_v20  ;;  %5654 = vmatprep.subr.bf16.mxu1 %v5653_v36  ;;  %v3283_v55 = vmul.f32 %v6547_v2, %v11579_v8  ;;  %v11583_v20 = vld [vmem:[#allocation81_spill] sm:$0xff]  ;;  %v9972_v2 = vpop.trf.xlu1 }
 0x4b1   : > { %v3051_v11 = vpop.f32.mrb[168].mxu0  ;;  %v9966_v43 = vpop.f32.mrb[106].mxu1  ;;  %6558 = vrsqrt.f32 %v3161_v23  ;;  %5656 = vmatpush1.bf16.msra.mxu1 %v5655_v63 }
 0x4b2   : > { %11580 = vst [vmem:[#allocation105_spill] sm:$0xff] %v9966_v43  ;;  %v3162_v39 = vmax.f32 %v3051_v11, 1e-24  ;;  %v3053_v40 = vpop.f32.mrb[169].mxu0  ;;  %v6549_v15 = vpop.eup %6548 }
 0x4b3   : > { %v9968_v35 = vpop.f32.mrb[107].mxu1  ;;  %v3163_v31 = vmax.f32 %v3053_v40, 1e-24  ;;  %v6551_v25 = vpop.eup %6550  ;;  %v3284_v3 = vmul.f32 %v6549_v15, %v11582_v45  ;;  %v11586_v15 = vld [vmem:[#allocation27_spill] sm:$0xff]  ;;  %v11587_v45 = vld [vmem:[#allocation28_spill] sm:$0xff] }
 0x4b4   : > { %11581 = vst [vmem:[#allocation106_spill] sm:$0xff] %v9968_v35  ;;  %6560 = vrsqrt.f32 %v3162_v39  ;;  %v3285_v34 = vmul.f32 %v6551_v25, %v11583_v20 }
 0x4b5   : > { %v3057_v36 = vpop.f32.mrb[170].mxu0  ;;  %6562 = vrsqrt.f32 %v3163_v31  ;;  %v5659_v23 = vpack.c.bf16 %v3284_v3, %v3282_v49  ;;  %v9974_v11 = vpop.f32.mrb[108].mxu1 }
 0x4b6   : > { %v3164_v8 = vmax.f32 %v3057_v36, 1e-24  ;;  %v3059_v43 = vpop.f32.mrb[171].mxu0  ;;  %11584 = vst [vmem:[#allocation108_spill] sm:$0xff] %v9974_v11  ;;  %v6553_v63 = vpop.eup %6552  ;;  %v5657_v47 = vpack.c.bf16 %v3285_v34, %v3283_v55 }
 0x4b7   : > { %v3165_v14 = vmax.f32 %v3059_v43, 1e-24  ;;  %v9976_v35 = vpop.f32.mrb[109].mxu1  ;;  %v6555_v40 = vpop.eup %6554  ;;  %v3286_v39 = vmul.f32 %v6553_v63, %v11586_v15 }
 0x4b8   : > { %11585 = vst [vmem:[#allocation111_spill] sm:$0xff] %v9976_v35  ;;  %6564 = vrsqrt.f32 %v3164_v8  ;;  %5658 = vmatprep.subr.bf16.mxu1 %v5657_v47  ;;  %v3287_v20 = vmul.f32 %v6555_v40, %v11587_v45  ;;  %v9980_v31 = vpop.trf.xlu1  ;;  %v11590_v8 = vld [vmem:[#allocation98_spill] sm:$0xff] }
 0x4b9   : > { %6566 = vrsqrt.f32 %v3165_v14  ;;  %v3063_v25 = vpop.f32.mrb[172].mxu0  ;;  %5660 = vmatpush1.bf16.msra.mxu1 %v5659_v23  ;;  %v9982_v3 = vpop.f32.mrb[110].mxu1  ;;  %v11591_v14 = vld [vmem:[#allocation30_spill] sm:$0xff] }
 0x4ba   : > { %v3166_v36 = vmax.f32 %v3063_v25, 1e-24  ;;  %v3065_v49 = vpop.f32.mrb[173].mxu0  ;;  %11588 = vst [vmem:[#allocation113_spill] sm:$0xff] %v9982_v3  ;;  %v6557_v43 = vpop.eup %6556 }
 0x4bb   : > { %v3167_v55 = vmax.f32 %v3065_v49, 1e-24  ;;  %v9984_v34 = vpop.f32.mrb[111].mxu1  ;;  %v6559_v11 = vpop.eup %6558  ;;  %v3288_v63 = vmul.f32 %v6557_v43, %v11590_v8 }
 0x4bc   : > { %11589 = vst [vmem:[#allocation114_spill] sm:$0xff] %v9984_v34  ;;  %6568 = vrsqrt.f32 %v3166_v36  ;;  %v3289_v15 = vmul.f32 %v6559_v11, %v11591_v14  ;;  %v9988_v40 = vpop.trf.xlu1  ;;  %v11594_v36 = vld [vmem:[#allocation152_spill] sm:$0xff]  ;;  %v11595_v11 = vld [vmem:[#allocation51_spill] sm:$0xff] }
 0x4bd   : > { %6570 = vrsqrt.f32 %v3167_v55  ;;  %v3069_v47 = vpop.f32.mrb[174].mxu0  ;;  %v5663_v23 = vpack.c.bf16 %v3288_v63, %v3286_v39  ;;  %v9990_v35 = vpop.f32.mrb[112].mxu1 }
 0x4be   : > { %v3168_v45 = vmax.f32 %v3069_v47, 1e-24  ;;  %v3071_v25 = vpop.f32.mrb[175].mxu0  ;;  %11592 = vst [vmem:[#allocation116_spill] sm:$0xff] %v9990_v35  ;;  %v6561_v3 = vpop.eup %6560  ;;  %v5661_v49 = vpack.c.bf16 %v3289_v15, %v3287_v20 }
 0x4bf   : > { %v3169_v22 = vmax.f32 %v3071_v25, 1e-24  ;;  %v9992_v27 = vpop.f32.mrb[113].mxu1  ;;  %v6563_v34 = vpop.eup %6562  ;;  %v3290_v43 = vmul.f32 %v6561_v3, %v11594_v36  ;;  %v11597_v25 = vld [vmem:[#allocation35_spill] sm:$0xff] }
 0x4c0   : > { %11593 = vst [vmem:[#allocation29_spill] sm:$0xff] %v9992_v27  ;;  %6572 = vrsqrt.f32 %v3168_v45  ;;  %5662 = vmatprep.subr.bf16.mxu1 %v5661_v49  ;;  %v3291_v8 = vmul.f32 %v6563_v34, %v11595_v11  ;;  %v9996_v14 = vpop.trf.xlu1 }
 0x4c1   : > { %6574 = vrsqrt.f32 %v3169_v22  ;;  %v3075_v55 = vpop.f32.mrb[176].mxu0  ;;  %5664 = vmatpush1.bf16.msra.mxu1 %v5663_v23  ;;  %v9998_v35 = vpop.f32.mrb[114].mxu1  ;;  %v11599_v22 = vld [vmem:[#allocation40_spill] sm:$0xff] }
 0x4c2   : > { %v6565_v47 = vpop.eup %6564  ;;  %v3170_v39 = vmax.f32 %v3075_v55, 1e-24  ;;  %v3077_v63 = vpop.f32.mrb[177].mxu0  ;;  %11596 = vst [vmem:[#allocation39_spill] sm:$0xff] %v9998_v35 }
 0x4c3   : > { %v6567_v20 = vpop.eup %6566  ;;  %v3171_v15 = vmax.f32 %v3077_v63, 1e-24  ;;  %v3292_v27 = vmul.f32 %v6565_v47, %v11597_v25  ;;  %v10001_v45 = vpop.f32.mrb[115].mxu1 }
 0x4c4   : > { %11598 = vst [vmem:[#allocation46_spill] sm:$0xff] %v10001_v45  ;;  %6576 = vrsqrt.f32 %v3170_v39  ;;  %v3293_v3 = vmul.f32 %v6567_v20, %v11599_v22  ;;  %v10004_v36 = vpop.trf.xlu1  ;;  %v11603_v39 = vld [vmem:[#allocation42_spill] sm:$0xff] }
 0x4c5   : > { %6578 = vrsqrt.f32 %v3171_v15  ;;  %v3081_v49 = vpop.f32.mrb[178].mxu0  ;;  %v5667_v34 = vpack.c.bf16 %v3292_v27, %v3290_v43  ;;  %v10006_v60 = vpop.f32.mrb[116].mxu1 }
 0x4c6   : > { %v6569_v11 = vpop.eup %6568  ;;  %v3172_v55 = vmax.f32 %v3081_v49, 1e-24  ;;  %v3083_v23 = vpop.f32.mrb[179].mxu0  ;;  %v5665_v6 = vpack.c.bf16 %v3293_v3, %v3291_v8  ;;  %11600 = vst [vmem:[#allocation119_spill] sm:$0xff] %v10006_v60  ;;  %v11604_v60 = vld [vmem:[#allocation157_spill] sm:$0xff] }
 0x4c7   : > { %v6571_v35 = vpop.eup %6570  ;;  %v3173_v63 = vmax.f32 %v3083_v23, 1e-24  ;;  %v3294_v47 = vmul.f32 %v6569_v11, %v11601_v42  ;;  %v10009_v25 = vpop.f32.mrb[117].mxu1  ;;  %v11606_v42 = vld [vmem:[#allocation47_spill] sm:$0xff] }
 0x4c8   : > { %11602 = vst [vmem:[#allocation16_spill] sm:$0xff] %v10009_v25  ;;  %6580 = vrsqrt.f32 %v3172_v55  ;;  %5666 = vmatprep.subr.bf16.mxu1 %v5665_v6  ;;  %v3295_v20 = vmul.f32 %v6571_v35, %v11603_v39  ;;  %v10012_v43 = vpop.trf.xlu1 }
 0x4c9   : > { %6582 = vrsqrt.f32 %v3173_v63  ;;  %v3087_v27 = vpop.f32.mrb[180].mxu0  ;;  %5668 = vmatpush1.bf16.msra.mxu1 %v5667_v34 }
 0x4ca   : > { %v6573_v15 = vpop.eup %6572  ;;  %v3174_v22 = vmax.f32 %v3087_v27, 1e-24  ;;  %v3089_v8 = vpop.f32.mrb[181].mxu0 }
 0x4cb   : > { %v6575_v3 = vpop.eup %6574  ;;  %v3175_v49 = vmax.f32 %v3089_v8, 1e-24  ;;  %v3296_v23 = vmul.f32 %v6573_v15, %v11604_v60  ;;  %v10015_v45 = vpop.f32.mrb[118].mxu1  ;;  %v11609_v15 = vld [vmem:[#allocation49_spill] sm:$0xff] }
 0x4cc   : > { %11605 = vst [vmem:[#allocation17_spill] sm:$0xff] %v10015_v45  ;;  %6584 = vrsqrt.f32 %v3174_v22  ;;  %v3297_v11 = vmul.f32 %v6575_v3, %v11606_v42  ;;  %v10018_v6 = vpop.f32.mrb[119].mxu1  ;;  %v10020_v34 = vpop.trf.xlu1 }
 0x4cd   : > { %11607 = vst [vmem:[#allocation19_spill] sm:$0xff] %v10018_v6  ;;  %6586 = vrsqrt.f32 %v3175_v49  ;;  %v3093_v35 = vpop.f32.mrb[182].mxu0  ;;  %v5671_v55 = vpack.c.bf16 %v3296_v23, %v3294_v47 }
 0x4ce   : > { %v6577_v63 = vpop.eup %6576  ;;  %v3176_v39 = vmax.f32 %v3093_v35, 1e-24  ;;  %v3095_v27 = vpop.f32.mrb[183].mxu0  ;;  %v5669_v25 = vpack.c.bf16 %v3297_v11, %v3295_v20 }
 0x4cf   : > { %v6579_v62 = vpop.eup %6578  ;;  %v3177_v8 = vmax.f32 %v3095_v27, 1e-24  ;;  %v3298_v60 = vmul.f32 %v6577_v63, %v11608_v30  ;;  %v11612_v27 = vld [vmem:[#allocation160_spill] sm:$0xff] }
 0x4d0   : > { %6588 = vrsqrt.f32 %v3176_v39  ;;  %5670 = vmatprep.subr.bf16.mxu1 %v5669_v25  ;;  %v3299_v22 = vmul.f32 %v6579_v62, %v11609_v15  ;;  %v10024_v3 = vpop.f32.mrb[120].mxu1  ;;  %v10028_v45 = vpop.trf.xlu1  ;;  %v11613_v25 = vld [vmem:[#allocation53_spill] sm:$0xff] }
 0x4d1   : > { %11610 = vst [vmem:[#allocation21_spill] sm:$0xff] %v10024_v3  ;;  %6590 = vrsqrt.f32 %v3177_v8  ;;  %v3099_v49 = vpop.f32.mrb[184].mxu0  ;;  %5672 = vmatpush1.bf16.msra.mxu1 %v5671_v55  ;;  %v10026_v47 = vpop.f32.mrb[121].mxu1 }
 0x4d2   : > { %11611 = vst [vmem:[#allocation22_spill] sm:$0xff] %v10026_v47  ;;  %v6581_v23 = vpop.eup %6580  ;;  %v3178_v42 = vmax.f32 %v3099_v49, 1e-24  ;;  %v3101_v35 = vpop.f32.mrb[185].mxu0 }
 0x4d3   : > { %v6583_v20 = vpop.eup %6582  ;;  %v3179_v11 = vmax.f32 %v3101_v35, 1e-24  ;;  %v3300_v30 = vmul.f32 %v6581_v23, %v11612_v27 }
 0x4d4   : > { %6592 = vrsqrt.f32 %v3178_v42  ;;  %v3301_v63 = vmul.f32 %v6583_v20, %v11613_v25  ;;  %v10032_v62 = vpop.f32.mrb[122].mxu1  ;;  %v10036_v6 = vpop.trf.xlu1 }
 0x4d5   : > { %6594 = vrsqrt.f32 %v3179_v11  ;;  %v3105_v39 = vpop.f32.mrb[186].mxu0  ;;  %v5675_v8 = vpack.c.bf16 %v3300_v30, %v3298_v60  ;;  %v10034_v55 = vpop.f32.mrb[123].mxu1 }
 0x4d6   : > { %v6585_v15 = vpop.eup %6584  ;;  %v3180_v3 = vmax.f32 %v3105_v39, 1e-24  ;;  %v3107_v49 = vpop.f32.mrb[187].mxu0  ;;  %v5673_v47 = vpack.c.bf16 %v3301_v63, %v3299_v22 }
 0x4d7   : > { %v6587_v41 = vpop.eup %6586  ;;  %v3181_v35 = vmax.f32 %v3107_v49, 1e-24  ;;  %v3302_v23 = vmul.f32 %v6585_v15, %v9264_v26 }
 0x4d8   : > { %6596 = vrsqrt.f32 %v3180_v3  ;;  %5674 = vmatprep.subr.bf16.mxu1 %v5673_v47  ;;  %v3303_v42 = vmul.f32 %v6587_v41, %v9271_v24  ;;  %v10040_v20 = vpop.f32.mrb[124].mxu1  ;;  %v10044_v25 = vpop.trf.xlu1 }
 0x4d9   : > { %11614 = vst [vmem:[#allocation24_spill] sm:$0xff] %v10040_v20  ;;  %6598 = vrsqrt.f32 %v3181_v35  ;;  %v3111_v60 = vpop.f32.mrb[188].mxu0  ;;  %5676 = vmatpush1.bf16.msra.mxu1 %v5675_v8  ;;  %v10042_v11 = vpop.f32.mrb[125].mxu1 }
 0x4da   : > { %11615 = vst [vmem:[#allocation37_spill] sm:$0xff] %v10042_v11  ;;  %v6589_v27 = vpop.eup %6588  ;;  %v3182_v30 = vmax.f32 %v3111_v60, 1e-24  ;;  %v3113_v22 = vpop.f32.mrb[189].mxu0 }
 0x4db   : > { %v6591_v63 = vpop.eup %6590  ;;  %v3183_v39 = vmax.f32 %v3113_v22, 1e-24  ;;  %v3304_v26 = vmul.f32 %v6589_v27, %v9276_v17 }
 0x4dc   : > { %6600 = vrsqrt.f32 %v3182_v30  ;;  %v3305_v3 = vmul.f32 %v6591_v63, %v9284_v32  ;;  %v10048_v24 = vpop.f32.mrb[126].mxu1  ;;  %v10052_v20 = vpop.trf.xlu1 }
 0x4dd   : > { %6602 = vrsqrt.f32 %v3183_v39  ;;  %v3117_v41 = vpop.f32.mrb[190].mxu0  ;;  %v5679_v47 = vpack.c.bf16 %v3304_v26, %v3302_v23  ;;  %v10050_v8 = vpop.f32.mrb[127].mxu1 }
 0x4de   : > { %v6593_v15 = vpop.eup %6592  ;;  %v3184_v49 = vmax.f32 %v3117_v41, 1e-24  ;;  %v3119_v35 = vpop.f32.mrb[191].mxu0  ;;  %v5677_v60 = vpack.c.bf16 %v3305_v3, %v3303_v42 }
 0x4df   : > { %v6595_v11 = vpop.eup %6594  ;;  %v3185_v22 = vmax.f32 %v3119_v35, 1e-24  ;;  %v3306_v17 = vmul.f32 %v6593_v15, %v9321_v7 }
 0x4e0   : > { %6604 = vrsqrt.f32 %v3184_v49  ;;  %5678 = vmatprep.subr.bf16.mxu1 %v5677_v60  ;;  %v3307_v32 = vmul.f32 %v6595_v11, %v9325_v44  ;;  %v10056_v23 = vpop.trf.xlu1 }
 0x4e1   : > { %6606 = vrsqrt.f32 %v3185_v22  ;;  %5680 = vmatpush1.bf16.msra.mxu1 %v5679_v47  ;;  %v5878_v22 = vunpack.i.h.bf16 %v9873_v21  ;;  %v5895_v21 = vunpack.i.l.bf16 %v9886_v9 }
 0x4e2   : > { %v6597_v27 = vpop.eup %6596  ;;  %6608 = vrcp.f32 %v9806_v54 }
 0x4e3   : > { %v6599_v30 = vpop.eup %6598  ;;  %v3308_v63 = vmul.f32 %v6597_v27, %v9330_v13  ;;  %v5898_v27 = vunpack.i.h.bf16 %v9886_v9  ;;  %v5915_v9 = vunpack.i.l.bf16 %v9902_v51  ;;  %6610 = vrcp.f32 %v9816_v53 }
 0x4e4   : > { %v3309_v42 = vmul.f32 %v6599_v30, %v9338_v37  ;;  %v10060_v41 = vpop.trf.xlu1  ;;  %v5903_v30 = vunpack.i.h.bf16 %v9890_v52  ;;  %6612 = vrcp.f32 %v9811_v16 }
 0x4e5   : > { %v5683_v39 = vpack.c.bf16 %v3308_v63, %v3306_v17  ;;  %v5885_v17 = vunpack.i.l.bf16 %v9878_v4  ;;  %v5908_v63 = vunpack.i.h.bf16 %v9894_v38  ;;  %6614 = vrcp.f32 %v9820_v46  ;;  %v11618_v46 = vld [vmem:[#allocation61_spill] sm:$0xff] }
 0x4e6   : > { %v6601_v26 = vpop.eup %6600  ;;  %v5681_v3 = vpack.c.bf16 %v3309_v42, %v3307_v32  ;;  %v5888_v32 = vunpack.i.h.bf16 %v9878_v4  ;;  %v5905_v4 = vunpack.i.l.bf16 %v9894_v38  ;;  %v5913_v42 = vunpack.i.h.bf16 %v9898_v10 }
 0x4e7   : > { %v6603_v7 = vpop.eup %6602  ;;  %v3310_v15 = vmul.f32 %v6601_v26, %v11501_v5  ;;  %v5880_v5 = vunpack.i.l.bf16 %v9876_v59  ;;  %v5923_v26 = vunpack.i.h.bf16 %v9906_v58  ;;  %v5925_v38 = vunpack.i.l.bf16 %v9914_v12 }
 0x4e8   : > { %5682 = vmatprep.subr.bf16.mxu1 %v5681_v3  ;;  %v3311_v44 = vmul.f32 %v6603_v7, %v9395_v0  ;;  %v10064_v47 = vpop.trf.xlu1  ;;  %v5883_v0 = vunpack.i.h.bf16 %v9876_v59  ;;  %v5900_v59 = vunpack.i.l.bf16 %v9890_v52  ;;  %v5920_v52 = vunpack.i.l.bf16 %v9906_v58 }
 0x4e9   : > { %5684 = vmatpush1.bf16.msra.mxu1 %v5683_v39  ;;  %v5918_v39 = vunpack.i.h.bf16 %v9902_v51  ;;  %v5928_v3 = vunpack.i.h.bf16 %v9914_v12  ;;  %v5933_v7 = vunpack.i.h.bf16 %v9922_v29  ;;  %v5935_v51 = vunpack.i.l.bf16 %v9930_v33 }
 0x4ea   : > { %v6605_v11 = vpop.eup %6604  ;;  %v5940_v58 = vunpack.i.l.bf16 %v9937_v18  ;;  %v5945_v12 = vunpack.i.l.bf16 %v9945_v61  ;;  %6616 = vrcp.f32 %v9818_v19  ;;  %v11620_v19 = vld [vmem:[#allocation64_spill] sm:$0xff] }
 0x4eb   : > { %v6607_v49 = vpop.eup %6606  ;;  %v3312_v13 = vmul.f32 %v6605_v11, %v9400_v48  ;;  %v5893_v48 = vunpack.i.h.bf16 %v9882_v1  ;;  %v5948_v11 = vunpack.i.h.bf16 %v9945_v61  ;;  %v5997_v61 = vunpack.i.l.bf16 %v9972_v2 }
 0x4ec   : > { %v3313_v37 = vmul.f32 %v6607_v49, %v9408_v50  ;;  %v5890_v50 = vunpack.i.l.bf16 %v9882_v1  ;;  %v5910_v1 = vunpack.i.l.bf16 %v9898_v10  ;;  %v5930_v10 = vunpack.i.l.bf16 %v9922_v29 }
 0x4ed   : > { %v5687_v35 = vpack.c.bf16 %v3312_v13, %v3310_v15  ;;  %v5938_v15 = vunpack.i.h.bf16 %v9930_v33  ;;  %v5950_v29 = vunpack.i.l.bf16 %v9953_v57  ;;  %v5953_v49 = vunpack.i.h.bf16 %v9953_v57 }
 0x4ee   : > { %v5685_v60 = vpack.c.bf16 %v3313_v37, %v3311_v44  ;;  %v5943_v44 = vunpack.i.h.bf16 %v9937_v18  ;;  %v5987_v33 = vunpack.i.l.bf16 %v9956_v28  ;;  %v5990_v13 = vunpack.i.h.bf16 %v9956_v28 }
 0x4ef   : > { %v5992_v18 = vunpack.i.l.bf16 %v9964_v56  ;;  %v5995_v37 = vunpack.i.h.bf16 %v9964_v56  ;;  %v6002_v57 = vunpack.i.l.bf16 %v9980_v31  ;;  %v6007_v28 = vunpack.i.l.bf16 %v9988_v40 }
 0x4f0   : > { %5686 = vmatprep.subr.bf16.mxu1 %v5685_v60  ;;  %v6005_v60 = vunpack.i.h.bf16 %v9980_v31  ;;  %v6012_v56 = vunpack.i.l.bf16 %v9996_v14  ;;  %v6022_v31 = vunpack.i.l.bf16 %v10012_v43 }
 0x4f1   : > { %5688 = vmatpush1.bf16.msra.mxu1 %v5687_v35  ;;  %v6000_v35 = vunpack.i.h.bf16 %v9972_v2  ;;  %v6017_v2 = vunpack.i.l.bf16 %v10004_v36 }
 0x4f4   : > { %3507 = vmatmul.mubr.f32.vlgmr.msra.gmra.mrb[128].mxu1 %v5878_v22  ;;  %v6010_v22 = vunpack.i.h.bf16 %v9988_v40  ;;  %v6027_v40 = vunpack.i.l.bf16 %v10020_v34 }
 0x4f5   : > { %3512 = vmatprep.mubr.f32.mxu1 %v5880_v5  ;;  %v6015_v5 = vunpack.i.h.bf16 %v9996_v14  ;;  %v6032_v14 = vunpack.i.l.bf16 %v10028_v45 }
 0x4f8   : > { %3513 = vmatmul.mubr.f32.gmra.mrb[130].mxu1 %v5883_v0  ;;  %v6020_v0 = vunpack.i.h.bf16 %v10004_v36  ;;  %v6037_v36 = vunpack.i.l.bf16 %v10036_v6 }
 0x4f9   : > { %3518 = vmatprep.mubr.f32.mxu1 %v5885_v17  ;;  %v6025_v17 = vunpack.i.h.bf16 %v10012_v43  ;;  %v6042_v43 = vunpack.i.l.bf16 %v10044_v25 }
 0x4fc   : > { %3519 = vmatmul.mubr.f32.gmra.mrb[132].mxu1 %v5888_v32  ;;  %v6030_v32 = vunpack.i.h.bf16 %v10020_v34  ;;  %v6047_v34 = vunpack.i.l.bf16 %v10052_v20 }
 0x4fd   : > { %3524 = vmatprep.mubr.f32.mxu1 %v5890_v50  ;;  %v6035_v50 = vunpack.i.h.bf16 %v10028_v45  ;;  %v6052_v45 = vunpack.i.l.bf16 %v10056_v23 }
 0x500   : > { %3525 = vmatmul.mubr.f32.gmra.mrb[134].mxu1 %v5893_v48  ;;  %v6040_v48 = vunpack.i.h.bf16 %v10036_v6  ;;  %v6057_v6 = vunpack.i.l.bf16 %v10060_v41 }
 0x501   : > { %3530 = vmatprep.mubr.f32.mxu1 %v5895_v21  ;;  %v6045_v21 = vunpack.i.h.bf16 %v10044_v25  ;;  %v6062_v25 = vunpack.i.l.bf16 %v10064_v47 }
 0x504   : > { %3531 = vmatmul.mubr.f32.gmra.mrb[136].mxu1 %v5898_v27  ;;  %v6050_v27 = vunpack.i.h.bf16 %v10052_v20 }
 0x505   : > { %3536 = vmatprep.mubr.f32.mxu1 %v5900_v59  ;;  %v6055_v59 = vunpack.i.h.bf16 %v10056_v23 }
 0x508   : > { %3537 = vmatmul.mubr.f32.gmra.mrb[138].mxu1 %v5903_v30  ;;  %v6060_v30 = vunpack.i.h.bf16 %v10060_v41 }
 0x509   : > { %3542 = vmatprep.mubr.f32.mxu1 %v5905_v4  ;;  %v6065_v4 = vunpack.i.h.bf16 %v10064_v47 }
 0x50c   : > { %3543 = vmatmul.mubr.f32.gmra.mrb[140].mxu1 %v5908_v63 }
 0x50d   : > { %3548 = vmatprep.mubr.f32.mxu1 %v5910_v1  ;;  %v6926_v1 = vld [vmem:[#allocation8] sm:$0xff] }
 0x510   : > { %3549 = vmatmul.mubr.f32.gmra.mrb[142].mxu1 %v5913_v42 }
 0x511   : > { %3554 = vmatprep.mubr.f32.mxu1 %v5915_v9  ;;  %v6927_v9 = vld [vmem:[#allocation8 + $0x8] sm:$0xff] }
 0x514   : > { %3555 = vmatmul.mubr.f32.gmra.mrb[144].mxu1 %v5918_v39 }
 0x515   : > { %3560 = vmatprep.mubr.f32.mxu1 %v5920_v52  ;;  %v6928_v52 = vld [vmem:[#allocation8 + $0x10] sm:$0xff] }
 0x518   : > { %3561 = vmatmul.mubr.f32.gmra.mrb[146].mxu1 %v5923_v26 }
 0x519   : > { %3566 = vmatprep.mubr.f32.mxu1 %v5925_v38 }
 0x51c   : > { %3567 = vmatmul.mubr.f32.gmra.mrb[148].mxu1 %v5928_v3  ;;  %v6929_v3 = vld [vmem:[#allocation8 + $0x18] sm:$0xff] }
 0x51d   : > { %3572 = vmatprep.mubr.f32.mxu1 %v5930_v10 }
 0x520   : > { %3573 = vmatmul.mubr.f32.gmra.mrb[150].mxu1 %v5933_v7 }
 0x521   : > { %3578 = vmatprep.mubr.f32.mxu1 %v5935_v51 }
 0x524   : > { %3579 = vmatmul.mubr.f32.gmra.mrb[152].mxu1 %v5938_v15 }
 0x525   : > { %3584 = vmatprep.mubr.f32.mxu1 %v5940_v58 }
 0x528   : > { %3585 = vmatmul.mubr.f32.gmra.mrb[154].mxu1 %v5943_v44 }
 0x529   : > { %3590 = vmatprep.mubr.f32.mxu1 %v5945_v12 }
 0x52c   : > { %3591 = vmatmul.mubr.f32.gmra.mrb[156].mxu1 %v5948_v11  ;;  %v6930_v11 = vld [vmem:[#allocation8 + $0x20] sm:$0xff] }
 0x52d   : > { %3596 = vmatprep.mubr.f32.mxu1 %v5950_v29 }
 0x530   : > { %3597 = vmatmul.mubr.f32.gmra.mrb[158].mxu1 %v5953_v49  ;;  %v6931_v49 = vld [vmem:[#allocation8 + $0x28] sm:$0xff] }
 0x531   : > { %3602 = vmatprep.mubr.f32.mxu1 %v5987_v33 }
 0x534   : > { %3603 = vmatmul.mubr.f32.gmra.mrb[160].mxu1 %v5990_v13 }
 0x535   : > { %3608 = vmatprep.mubr.f32.mxu1 %v5992_v18  ;;  %v6932_v18 = vld [vmem:[#allocation8 + $0x30] sm:$0xff] }
 0x538   : > { %3609 = vmatmul.mubr.f32.gmra.mrb[162].mxu1 %v5995_v37 }
 0x539   : > { %3614 = vmatprep.mubr.f32.mxu1 %v5997_v61 }
 0x53c   : > { %3615 = vmatmul.mubr.f32.gmra.mrb[164].mxu1 %v6000_v35  ;;  %v6933_v35 = vld [vmem:[#allocation8 + $0x38] sm:$0xff] }
 0x53d   : > { %3620 = vmatprep.mubr.f32.mxu1 %v6002_v57 }
 0x540   : > { %3621 = vmatmul.mubr.f32.gmra.mrb[166].mxu1 %v6005_v60 }
 0x541   : > { %3626 = vmatprep.mubr.f32.mxu1 %v6007_v28 }
 0x544   : > { %3627 = vmatmul.mubr.f32.gmra.mrb[168].mxu1 %v6010_v22 }
 0x545   : > { %3632 = vmatprep.mubr.f32.mxu1 %v6012_v56 }
 0x548   : > { %3633 = vmatmul.mubr.f32.gmra.mrb[170].mxu1 %v6015_v5 }
 0x549   : > { %3638 = vmatprep.mubr.f32.mxu1 %v6017_v2 }
 0x54c   : > { %3639 = vmatmul.mubr.f32.gmra.mrb[172].mxu1 %v6020_v0 }
 0x54d   : > { %3644 = vmatprep.mubr.f32.mxu1 %v6022_v31 }
 0x550   : > { %3645 = vmatmul.mubr.f32.gmra.mrb[174].mxu1 %v6025_v17  ;;  %v6934_v17 = vld [vmem:[#allocation8 + $0x40] sm:$0xff] }
 0x551   : > { %3650 = vmatprep.mubr.f32.mxu1 %v6027_v40 }
 0x554   : > { %3651 = vmatmul.mubr.f32.gmra.mrb[176].mxu1 %v6030_v32  ;;  %v6935_v32 = vld [vmem:[#allocation8 + $0x48] sm:$0xff] }
 0x555   : > { %3656 = vmatprep.mubr.f32.mxu1 %v6032_v14 }
 0x558   : > { %3657 = vmatmul.mubr.f32.gmra.mrb[178].mxu1 %v6035_v50 }
 0x559   : > { %3662 = vmatprep.mubr.f32.mxu1 %v6037_v36  ;;  %v6936_v36 = vld [vmem:[#allocation8 + $0x50] sm:$0xff] }
 0x55c   : > { %3663 = vmatmul.mubr.f32.gmra.mrb[180].mxu1 %v6040_v48 }
 0x55d   : > { %3668 = vmatprep.mubr.f32.mxu1 %v6042_v43 }
 0x560   : > { %3669 = vmatmul.mubr.f32.gmra.mrb[182].mxu1 %v6045_v21  ;;  %v6937_v21 = vld [vmem:[#allocation8 + $0x58] sm:$0xff] }
 0x561   : > { %3674 = vmatprep.mubr.f32.mxu1 %v6047_v34 }
 0x564   : > { %3675 = vmatmul.mubr.f32.gmra.mrb[184].mxu1 %v6050_v27 }
 0x565   : > { %3680 = vmatprep.mubr.f32.mxu1 %v6052_v45 }
 0x568   : > { %3681 = vmatmul.mubr.f32.gmra.mrb[186].mxu1 %v6055_v59 }
 0x569   : > { %3686 = vmatprep.mubr.f32.mxu1 %v6057_v6 }
 0x56c   : > { %3687 = vmatmul.mubr.f32.gmra.mrb[188].mxu1 %v6060_v30 }
 0x56d   : > { %3692 = vmatprep.mubr.f32.mxu1 %v6062_v25 }
 0x570   : > { %3693 = vmatmul.mubr.f32.gmra.mrb[190].mxu1 %v6065_v4 }
 0x5c7   : > { %v3508_v20 = vpop.f32.mrb[128].mxu1 }
 0x5c8   : > { %v3510_v63 = vpop.f32.mrb[129].mxu1  ;;  %v3699_v42 = vmul.f32 %v6926_v1, %v3508_v20 }
 0x5c9   : > { %v3700_v23 = vmul.f32 %v6927_v9, %v3510_v63  ;;  %v6938_v63 = vld [vmem:[#allocation8 + $0x60] sm:$0xff] }
 0x5ca   : > { %v3763_v10 = vmul.f32 0.00069053395, %v3699_v42  ;;  %v6939_v42 = vld [vmem:[#allocation8 + $0x68] sm:$0xff] }
 0x5cb   : > { %v3514_v39 = vpop.f32.mrb[130].mxu1  ;;  %v3764_v51 = vmul.f32 0.00069053395, %v3700_v23 }
 0x5cc   : > { %v3701_v26 = vmul.f32 %v6928_v52, %v3514_v39  ;;  %v3516_v38 = vpop.f32.mrb[131].mxu1  ;;  %v6940_v39 = vld [vmem:[#allocation8 + $0x70] sm:$0xff] }
 0x5cd   : > { %v3702_v41 = vmul.f32 %v6929_v3, %v3516_v38  ;;  %v6941_v38 = vld [vmem:[#allocation8 + $0x78] sm:$0xff] }
 0x5ce   : > { %v3765_v7 = vmul.f32 0.00069053395, %v3701_v26 }
 0x5cf   : > { %v3766_v15 = vmul.f32 0.00069053395, %v3702_v41  ;;  %v3520_v58 = vpop.f32.mrb[132].mxu1 }
 0x5d0   : > { %v5691_v47 = vpack.c.bf16 %v3765_v7, %v3763_v10  ;;  %v3522_v44 = vpop.f32.mrb[133].mxu1  ;;  %v3703_v29 = vmul.f32 %v6930_v11, %v3520_v58 }
 0x5d1   : > { %v5689_v12 = vpack.c.bf16 %v3766_v15, %v3764_v51  ;;  %v3704_v33 = vmul.f32 %v6931_v49, %v3522_v44 }
 0x5d2   : > { %v3767_v60 = vmul.f32 0.00069053395, %v3703_v29  ;;  %v6943_v29 = vld [vmem:[#allocation8 + $0x88] sm:$0xff] }
 0x5d3   : > { %v3526_v13 = vpop.f32.mrb[134].mxu1  ;;  %5690 = vmatprep.subr.bf16.mxu0 %v5689_v12  ;;  %v3768_v22 = vmul.f32 0.00069053395, %v3704_v33  ;;  %v6942_v12 = vld [vmem:[#allocation8 + $0x80] sm:$0xff] }
 0x5d4   : > { %v3705_v37 = vmul.f32 %v6932_v18, %v3526_v13  ;;  %v3528_v61 = vpop.f32.mrb[135].mxu1  ;;  %5692 = vmatpush1.bf16.msra.mxu0 %v5691_v47  ;;  %v6944_v13 = vld [vmem:[#allocation8 + $0x90] sm:$0xff] }
 0x5d5   : > { %v3706_v57 = vmul.f32 %v6933_v35, %v3528_v61  ;;  %v6945_v61 = vld [vmem:[#allocation8 + $0x98] sm:$0xff] }
 0x5d6   : > { %v3769_v28 = vmul.f32 0.00069053395, %v3705_v37 }
 0x5d7   : > { %v3770_v56 = vmul.f32 0.00069053395, %v3706_v57  ;;  %v3532_v5 = vpop.f32.mrb[136].mxu1 }
 0x5d8   : > { %v5695_v2 = vpack.c.bf16 %v3769_v28, %v3767_v60  ;;  %v3534_v0 = vpop.f32.mrb[137].mxu1  ;;  %v3707_v40 = vmul.f32 %v6934_v17, %v3532_v5 }
 0x5d9   : > { %v5693_v31 = vpack.c.bf16 %v3770_v56, %v3768_v22  ;;  %v3708_v14 = vmul.f32 %v6935_v32, %v3534_v0 }
 0x5da   : > { %v3771_v27 = vmul.f32 0.00069053395, %v3707_v40  ;;  %v6947_v40 = vld [vmem:[#allocation8 + $0xa8] sm:$0xff] }
 0x5db   : > { %v3538_v50 = vpop.f32.mrb[138].mxu1  ;;  %5694 = vmatprep.subr.bf16.mxu0 %v5693_v31  ;;  %v3772_v59 = vmul.f32 0.00069053395, %v3708_v14  ;;  %v6946_v31 = vld [vmem:[#allocation8 + $0xa0] sm:$0xff] }
 0x5dc   : > { %v3709_v48 = vmul.f32 %v6936_v36, %v3538_v50  ;;  %v3540_v43 = vpop.f32.mrb[139].mxu1  ;;  %5696 = vmatpush1.bf16.msra.mxu0 %v5695_v2  ;;  %v6948_v50 = vld [vmem:[#allocation8 + $0xb0] sm:$0xff] }
 0x5dd   : > { %v3710_v34 = vmul.f32 %v6937_v21, %v3540_v43  ;;  %v6949_v43 = vld [vmem:[#allocation8 + $0xb8] sm:$0xff] }
 0x5de   : > { %v3773_v45 = vmul.f32 0.00069053395, %v3709_v48 }
 0x5df   : > { %v3774_v6 = vmul.f32 0.00069053395, %v3710_v34  ;;  %v3544_v30 = vpop.f32.mrb[140].mxu1 }
 0x5e0   : > { %v5699_v25 = vpack.c.bf16 %v3773_v45, %v3771_v27  ;;  %v3546_v4 = vpop.f32.mrb[141].mxu1  ;;  %v3711_v1 = vmul.f32 %v6938_v63, %v3544_v30 }
 0x5e1   : > { %v5697_v20 = vpack.c.bf16 %v3774_v6, %v3772_v59  ;;  %v3712_v9 = vmul.f32 %v6939_v42, %v3546_v4 }
 0x5e2   : > { %v3775_v41 = vmul.f32 0.00069053395, %v3711_v1  ;;  %v6951_v1 = vld [vmem:[#allocation8 + $0xc8] sm:$0xff] }
 0x5e3   : > { %v3550_v23 = vpop.f32.mrb[142].mxu1  ;;  %5698 = vmatprep.subr.bf16.mxu0 %v5697_v20  ;;  %v3776_v7 = vmul.f32 0.00069053395, %v3712_v9  ;;  %v6950_v20 = vld [vmem:[#allocation8 + $0xc0] sm:$0xff] }
 0x5e4   : > { %v3713_v52 = vmul.f32 %v6940_v39, %v3550_v23  ;;  %v3552_v26 = vpop.f32.mrb[143].mxu1  ;;  %5700 = vmatpush1.bf16.msra.mxu0 %v5699_v25  ;;  %v6952_v23 = vld [vmem:[#allocation8 + $0xd0] sm:$0xff] }
 0x5e5   : > { %v3714_v3 = vmul.f32 %v6941_v38, %v3552_v26  ;;  %v6953_v26 = vld [vmem:[#allocation8 + $0xd8] sm:$0xff] }
 0x5e6   : > { %v3777_v10 = vmul.f32 0.00069053395, %v3713_v52 }
 0x5e7   : > { %v3778_v51 = vmul.f32 0.00069053395, %v3714_v3  ;;  %v3556_v15 = vpop.f32.mrb[144].mxu1 }
 0x5e8   : > { %v5703_v58 = vpack.c.bf16 %v3777_v10, %v3775_v41  ;;  %v3558_v47 = vpop.f32.mrb[145].mxu1  ;;  %v3715_v11 = vmul.f32 %v6942_v12, %v3556_v15 }
 0x5e9   : > { %v5701_v44 = vpack.c.bf16 %v3778_v51, %v3776_v7  ;;  %v3716_v49 = vmul.f32 %v6943_v29, %v3558_v47 }
 0x5ea   : > { %v3779_v57 = vmul.f32 0.00069053395, %v3715_v11  ;;  %v6955_v11 = vld [vmem:[#allocation8 + $0xe8] sm:$0xff] }
 0x5eb   : > { %v3562_v33 = vpop.f32.mrb[146].mxu1  ;;  %5702 = vmatprep.subr.bf16.mxu0 %v5701_v44  ;;  %v3780_v28 = vmul.f32 0.00069053395, %v3716_v49  ;;  %v6954_v44 = vld [vmem:[#allocation8 + $0xe0] sm:$0xff] }
 0x5ec   : > { %v3717_v18 = vmul.f32 %v6944_v13, %v3562_v33  ;;  %v3564_v37 = vpop.f32.mrb[147].mxu1  ;;  %5704 = vmatpush1.bf16.msra.mxu0 %v5703_v58  ;;  %v6956_v33 = vld [vmem:[#allocation8 + $0xf0] sm:$0xff] }
 0x5ed   : > { %v3718_v35 = vmul.f32 %v6945_v61, %v3564_v37  ;;  %v6957_v37 = vld [vmem:[#allocation8 + $0xf8] sm:$0xff] }
 0x5ee   : > { %v3781_v60 = vmul.f32 0.00069053395, %v3717_v18 }
 0x5ef   : > { %v3782_v22 = vmul.f32 0.00069053395, %v3718_v35  ;;  %v3568_v56 = vpop.f32.mrb[148].mxu1 }
 0x5f0   : > { %v5707_v5 = vpack.c.bf16 %v3781_v60, %v3779_v57  ;;  %v3570_v2 = vpop.f32.mrb[149].mxu1  ;;  %v3719_v17 = vmul.f32 %v6946_v31, %v3568_v56 }
 0x5f1   : > { %v5705_v0 = vpack.c.bf16 %v3782_v22, %v3780_v28  ;;  %v3720_v32 = vmul.f32 %v6947_v40, %v3570_v2 }
 0x5f2   : > { %v3783_v34 = vmul.f32 0.00069053395, %v3719_v17  ;;  %v6959_v17 = vld [vmem:[#allocation8 + $0x108] sm:$0xff] }
 0x5f3   : > { %v3574_v14 = vpop.f32.mrb[150].mxu1  ;;  %5706 = vmatprep.subr.bf16.mxu0 %v5705_v0  ;;  %v3784_v45 = vmul.f32 0.00069053395, %v3720_v32  ;;  %v6958_v0 = vld [vmem:[#allocation8 + $0x100] sm:$0xff] }
 0x5f4   : > { %v3721_v36 = vmul.f32 %v6948_v50, %v3574_v14  ;;  %v3576_v48 = vpop.f32.mrb[151].mxu1  ;;  %5708 = vmatpush1.bf16.msra.mxu0 %v5707_v5  ;;  %v6960_v14 = vld [vmem:[#allocation8 + $0x110] sm:$0xff] }
 0x5f5   : > { %v3722_v21 = vmul.f32 %v6949_v43, %v3576_v48  ;;  %v6961_v48 = vld [vmem:[#allocation8 + $0x118] sm:$0xff] }
 0x5f6   : > { %v3785_v27 = vmul.f32 0.00069053395, %v3721_v36 }
 0x5f7   : > { %v3786_v59 = vmul.f32 0.00069053395, %v3722_v21  ;;  %v3580_v6 = vpop.f32.mrb[152].mxu1 }
 0x5f8   : > { %v5711_v30 = vpack.c.bf16 %v3785_v27, %v3783_v34  ;;  %v3582_v25 = vpop.f32.mrb[153].mxu1  ;;  %v3723_v63 = vmul.f32 %v6950_v20, %v3580_v6 }
 0x5f9   : > { %v5709_v4 = vpack.c.bf16 %v3786_v59, %v3784_v45  ;;  %v3724_v42 = vmul.f32 %v6951_v1, %v3582_v25 }
 0x5fa   : > { %v3787_v3 = vmul.f32 0.00069053395, %v3723_v63  ;;  %v6963_v63 = vld [vmem:[#allocation8 + $0x128] sm:$0xff] }
 0x5fb   : > { %v3586_v9 = vpop.f32.mrb[154].mxu1  ;;  %5710 = vmatprep.subr.bf16.mxu0 %v5709_v4  ;;  %v3788_v10 = vmul.f32 0.00069053395, %v3724_v42  ;;  %v6962_v4 = vld [vmem:[#allocation8 + $0x120] sm:$0xff] }
 0x5fc   : > { %v3725_v39 = vmul.f32 %v6952_v23, %v3586_v9  ;;  %v3588_v52 = vpop.f32.mrb[155].mxu1  ;;  %5712 = vmatpush1.bf16.msra.mxu0 %v5711_v30  ;;  %v6964_v9 = vld [vmem:[#allocation8 + $0x130] sm:$0xff] }
 0x5fd   : > { %v3726_v38 = vmul.f32 %v6953_v26, %v3588_v52  ;;  %v6965_v52 = vld [vmem:[#allocation8 + $0x138] sm:$0xff] }
 0x5fe   : > { %v3789_v41 = vmul.f32 0.00069053395, %v3725_v39 }
 0x5ff   : > { %v3790_v7 = vmul.f32 0.00069053395, %v3726_v38  ;;  %v3592_v51 = vpop.f32.mrb[156].mxu1 }
 0x600   : > { %v5715_v15 = vpack.c.bf16 %v3789_v41, %v3787_v3  ;;  %v3594_v58 = vpop.f32.mrb[157].mxu1  ;;  %v3727_v12 = vmul.f32 %v6954_v44, %v3592_v51 }
 0x601   : > { %v5713_v47 = vpack.c.bf16 %v3790_v7, %v3788_v10  ;;  %v3728_v29 = vmul.f32 %v6955_v11, %v3594_v58 }
 0x602   : > { %v3791_v35 = vmul.f32 0.00069053395, %v3727_v12  ;;  %v6967_v12 = vld [vmem:[#allocation8 + $0x148] sm:$0xff] }
 0x603   : > { %v3598_v49 = vpop.f32.mrb[158].mxu1  ;;  %5714 = vmatprep.subr.bf16.mxu0 %v5713_v47  ;;  %v3792_v60 = vmul.f32 0.00069053395, %v3728_v29  ;;  %v6966_v47 = vld [vmem:[#allocation8 + $0x140] sm:$0xff] }
 0x604   : > { %v3729_v13 = vmul.f32 %v6956_v33, %v3598_v49  ;;  %v3600_v18 = vpop.f32.mrb[159].mxu1  ;;  %5716 = vmatpush1.bf16.msra.mxu0 %v5715_v15  ;;  %v6968_v49 = vld [vmem:[#allocation8 + $0x150] sm:$0xff] }
 0x605   : > { %v3730_v61 = vmul.f32 %v6957_v37, %v3600_v18  ;;  %v6969_v18 = vld [vmem:[#allocation8 + $0x158] sm:$0xff] }
 0x606   : > { %v3793_v57 = vmul.f32 0.00069053395, %v3729_v13 }
 0x607   : > { %v3794_v28 = vmul.f32 0.00069053395, %v3730_v61  ;;  %v3604_v22 = vpop.f32.mrb[160].mxu1 }
 0x608   : > { %v5719_v56 = vpack.c.bf16 %v3793_v57, %v3791_v35  ;;  %v3606_v5 = vpop.f32.mrb[161].mxu1  ;;  %v3731_v31 = vmul.f32 %v6958_v0, %v3604_v22 }
 0x609   : > { %v5717_v2 = vpack.c.bf16 %v3794_v28, %v3792_v60  ;;  %v3732_v40 = vmul.f32 %v6959_v17, %v3606_v5 }
 0x60a   : > { %v3795_v21 = vmul.f32 0.00069053395, %v3731_v31  ;;  %v6971_v31 = vld [vmem:[#allocation8 + $0x168] sm:$0xff] }
 0x60b   : > { %v3610_v32 = vpop.f32.mrb[162].mxu1  ;;  %5718 = vmatprep.subr.bf16.mxu0 %v5717_v2  ;;  %v3796_v27 = vmul.f32 0.00069053395, %v3732_v40  ;;  %v6970_v2 = vld [vmem:[#allocation8 + $0x160] sm:$0xff] }
 0x60c   : > { %v3733_v50 = vmul.f32 %v6960_v14, %v3610_v32  ;;  %v3612_v36 = vpop.f32.mrb[163].mxu1  ;;  %5720 = vmatpush1.bf16.msra.mxu0 %v5719_v56  ;;  %v6972_v32 = vld [vmem:[#allocation8 + $0x170] sm:$0xff] }
 0x60d   : > { %v3734_v43 = vmul.f32 %v6961_v48, %v3612_v36  ;;  %v6973_v36 = vld [vmem:[#allocation8 + $0x178] sm:$0xff] }
 0x60e   : > { %v3797_v34 = vmul.f32 0.00069053395, %v3733_v50 }
 0x60f   : > { %v3798_v45 = vmul.f32 0.00069053395, %v3734_v43  ;;  %v3616_v59 = vpop.f32.mrb[164].mxu1 }
 0x610   : > { %v5723_v6 = vpack.c.bf16 %v3797_v34, %v3795_v21  ;;  %v3618_v30 = vpop.f32.mrb[165].mxu1  ;;  %v3735_v20 = vmul.f32 %v6962_v4, %v3616_v59 }
 0x611   : > { %v5721_v25 = vpack.c.bf16 %v3798_v45, %v3796_v27  ;;  %v3736_v1 = vmul.f32 %v6963_v63, %v3618_v30 }
 0x612   : > { %v3799_v38 = vmul.f32 0.00069053395, %v3735_v20  ;;  %v6975_v20 = vld [vmem:[#allocation8 + $0x188] sm:$0xff] }
 0x613   : > { %v3622_v42 = vpop.f32.mrb[166].mxu1  ;;  %5722 = vmatprep.subr.bf16.mxu0 %v5721_v25  ;;  %v3800_v41 = vmul.f32 0.00069053395, %v3736_v1  ;;  %v6974_v25 = vld [vmem:[#allocation8 + $0x180] sm:$0xff] }
 0x614   : > { %v3737_v23 = vmul.f32 %v6964_v9, %v3622_v42  ;;  %v3624_v39 = vpop.f32.mrb[167].mxu1  ;;  %5724 = vmatpush1.bf16.msra.mxu0 %v5723_v6  ;;  %v6976_v42 = vld [vmem:[#allocation8 + $0x190] sm:$0xff] }
 0x615   : > { %v3738_v26 = vmul.f32 %v6965_v52, %v3624_v39  ;;  %v6977_v39 = vld [vmem:[#allocation8 + $0x198] sm:$0xff] }
 0x616   : > { %v3801_v3 = vmul.f32 0.00069053395, %v3737_v23 }
 0x617   : > { %v3802_v10 = vmul.f32 0.00069053395, %v3738_v26  ;;  %v3628_v7 = vpop.f32.mrb[168].mxu1 }
 0x618   : > { %v5727_v51 = vpack.c.bf16 %v3801_v3, %v3799_v38  ;;  %v3630_v15 = vpop.f32.mrb[169].mxu1  ;;  %v3739_v44 = vmul.f32 %v6966_v47, %v3628_v7 }
 0x619   : > { %v5725_v58 = vpack.c.bf16 %v3802_v10, %v3800_v41  ;;  %v3740_v11 = vmul.f32 %v6967_v12, %v3630_v15 }
 0x61a   : > { %v3803_v61 = vmul.f32 0.00069053395, %v3739_v44  ;;  %v6979_v44 = vld [vmem:[#allocation8 + $0x1a8] sm:$0xff] }
 0x61b   : > { %v3634_v29 = vpop.f32.mrb[170].mxu1  ;;  %5726 = vmatprep.subr.bf16.mxu0 %v5725_v58  ;;  %v3804_v57 = vmul.f32 0.00069053395, %v3740_v11  ;;  %v6978_v58 = vld [vmem:[#allocation8 + $0x1a0] sm:$0xff] }
 0x61c   : > { %v3741_v33 = vmul.f32 %v6968_v49, %v3634_v29  ;;  %v3636_v13 = vpop.f32.mrb[171].mxu1  ;;  %5728 = vmatpush1.bf16.msra.mxu0 %v5727_v51  ;;  %v6980_v29 = vld [vmem:[#allocation8 + $0x1b0] sm:$0xff] }
 0x61d   : > { %v3742_v37 = vmul.f32 %v6969_v18, %v3636_v13  ;;  %v6981_v13 = vld [vmem:[#allocation8 + $0x1b8] sm:$0xff] }
 0x61e   : > { %v3805_v35 = vmul.f32 0.00069053395, %v3741_v33 }
 0x61f   : > { %v3806_v60 = vmul.f32 0.00069053395, %v3742_v37  ;;  %v3640_v28 = vpop.f32.mrb[172].mxu1 }
 0x620   : > { %v5731_v22 = vpack.c.bf16 %v3805_v35, %v3803_v61  ;;  %v3642_v56 = vpop.f32.mrb[173].mxu1  ;;  %v3743_v0 = vmul.f32 %v6970_v2, %v3640_v28 }
 0x621   : > { %v5729_v5 = vpack.c.bf16 %v3806_v60, %v3804_v57  ;;  %v3744_v17 = vmul.f32 %v6971_v31, %v3642_v56 }
 0x622   : > { %v3807_v43 = vmul.f32 0.00069053395, %v3743_v0  ;;  %v6983_v0 = vld [vmem:[#allocation8 + $0x1c8] sm:$0xff] }
 0x623   : > { %v3646_v40 = vpop.f32.mrb[174].mxu1  ;;  %5730 = vmatprep.subr.bf16.mxu0 %v5729_v5  ;;  %v3808_v34 = vmul.f32 0.00069053395, %v3744_v17  ;;  %v6982_v5 = vld [vmem:[#allocation8 + $0x1c0] sm:$0xff] }
 0x624   : > { %v3745_v14 = vmul.f32 %v6972_v32, %v3646_v40  ;;  %v3648_v50 = vpop.f32.mrb[175].mxu1  ;;  %5732 = vmatpush1.bf16.msra.mxu0 %v5731_v22  ;;  %v6984_v40 = vld [vmem:[#allocation8 + $0x1d0] sm:$0xff] }
 0x625   : > { %v3746_v48 = vmul.f32 %v6973_v36, %v3648_v50  ;;  %v6985_v50 = vld [vmem:[#allocation8 + $0x1d8] sm:$0xff] }
 0x626   : > { %v3809_v21 = vmul.f32 0.00069053395, %v3745_v14 }
 0x627   : > { %v3810_v27 = vmul.f32 0.00069053395, %v3746_v48  ;;  %v3652_v45 = vpop.f32.mrb[176].mxu1 }
 0x628   : > { %v5735_v59 = vpack.c.bf16 %v3809_v21, %v3807_v43  ;;  %v3654_v6 = vpop.f32.mrb[177].mxu1  ;;  %v3747_v4 = vmul.f32 %v6974_v25, %v3652_v45 }
 0x629   : > { %v5733_v30 = vpack.c.bf16 %v3810_v27, %v3808_v34  ;;  %v3748_v63 = vmul.f32 %v6975_v20, %v3654_v6  ;;  %v6138_v6 = vld [vmem:[#allocation7 + $0x40] sm:$0xff]  }
 0x62a   : > { %v3811_v26 = vmul.f32 0.00069053395, %v3747_v4  ;;  %v6986_v4 = vld [vmem:[#allocation8 + $0x1e0] sm:$0xff]  ;;  %5385 = vmatprep.subr.bf16.mxu1 %v6138_v6 }
 0x62b   : > { %v3658_v1 = vpop.f32.mrb[178].mxu1  ;;  %5734 = vmatprep.subr.bf16.mxu0 %v5733_v30  ;;  %v3812_v3 = vmul.f32 0.00069053395, %v3748_v63  ;;  %v6139_v30 = vld [vmem:[#allocation7] sm:$0xff]   ;;  %v6987_v63 = vld [vmem:[#allocation8 + $0x1e8] sm:$0xff] }
 0x62c   : > { %v3749_v9 = vmul.f32 %v6976_v42, %v3658_v1  ;;  %v3660_v23 = vpop.f32.mrb[179].mxu1  ;;  %5736 = vmatpush1.bf16.msra.mxu0 %v5735_v59  ;;  %5386 = vmatpush3.bf16.msra.mxu1 %v6139_v30  ;;  %v11632_v6 = vld [vmem:[#allocation79_spill] sm:$0xff] }
 0x62d   : > { %v3750_v52 = vmul.f32 %v6977_v39, %v3660_v23  ;;  %v6989_v39 = vld [vmem:[#allocation8 + $0x1f8] sm:$0xff] }
 0x62e   : > { %v3813_v38 = vmul.f32 0.00069053395, %v3749_v9  ;;  %v6988_v9 = vld [vmem:[#allocation8 + $0x1f0] sm:$0xff] }
 0x62f   : > { %v3814_v41 = vmul.f32 0.00069053395, %v3750_v52  ;;  %v3664_v10 = vpop.f32.mrb[180].mxu1 }
 0x630   : > { %v5739_v7 = vpack.c.bf16 %v3813_v38, %v3811_v26  ;;  %v3666_v51 = vpop.f32.mrb[181].mxu1  ;;  %v3751_v47 = vmul.f32 %v6978_v58, %v3664_v10  ;;  %v11616_v10 = vld [vmem:[#allocation134_spill] sm:$0xff]  ;;  %v6141_v58 = vld [vmem:[#allocation7 + $0x8] sm:$0xff]  }
 0x631   : > { %v5737_v15 = vpack.c.bf16 %v3814_v41, %v3812_v3  ;;  %v3752_v12 = vmul.f32 %v6979_v44, %v3666_v51  ;;  %6618 = vrcp.f32 %v11616_v10  ;;  %v6609_v51 = vpop.eup %6608  ;;  %v11617_v44 = vld [vmem:[#allocation33_spill] sm:$0xff] }
 0x632   : > { %v3815_v37 = vmul.f32 0.00069053395, %v3751_v47  ;;  %v6611_v16 = vpop.eup %6610  ;;  %v6142_v47 = vld [vmem:[#allocation7 + $0x50] sm:$0xff]   ;;  %6620 = vrcp.f32 %v11617_v44 }
 0x633   : > { %v3670_v11 = vpop.f32.mrb[182].mxu1  ;;  %5738 = vmatprep.subr.bf16.mxu0 %v5737_v15  ;;  %v3816_v35 = vmul.f32 0.00069053395, %v3752_v12  ;;  %v6140_v15 = vld [vmem:[#allocation7 + $0x48] sm:$0xff]   ;;  %v2331_v12 = vmul.f32 %v6609_v51, %v11618_v46 }
 0x634   : > { %v3753_v49 = vmul.f32 %v6980_v29, %v3670_v11  ;;  %v3672_v33 = vpop.f32.mrb[183].mxu1  ;;  %5740 = vmatpush1.bf16.msra.mxu0 %v5739_v7  ;;  %v11619_v11 = vld [vmem:[#allocation91_spill] sm:$0xff]  ;;  %5387 = vmatprep.subr.bf16.mxu1 %v6140_v15  ;;  %v6613_v29 = vpop.eup %6612  ;;  %v11641_v15 = vld [vmem:[#allocation146_spill] sm:$0xff] }
 0x635   : > { %v3754_v18 = vmul.f32 %v6981_v13, %v3672_v33  ;;  %6622 = vrcp.f32 %v11619_v11  ;;  %5388 = vmatpush3.bf16.msra.mxu1 %v6141_v58  ;;  %v6143_v33 = vld [vmem:[#allocation7 + $0x10] sm:$0xff]   ;;  %v6615_v13 = vpop.eup %6614  ;;  %v11642_v58 = vld [vmem:[#allocation86_spill] sm:$0xff] }
 0x636   : > { %v3817_v61 = vmul.f32 0.00069053395, %v3753_v49  ;;  %v2334_v49 = vmul.f32 %v6611_v16, %v11620_v19  ;;  %5389 = vmatprep.subr.bf16.mxu1 %v6142_v47  ;;  %v11643_v47 = vld [vmem:[#allocation89_spill] sm:$0xff] }
 0x637   : > { %v3818_v57 = vmul.f32 0.00069053395, %v3754_v18  ;;  %v3676_v60 = vpop.f32.mrb[184].mxu1  ;;  %v6144_v18 = vld [vmem:[#allocation7 + $0x58] sm:$0xff]   ;;  %v11645_v19 = vld [vmem:[#allocation25_spill] sm:$0xff] }
 0x638   : > { %v5743_v28 = vpack.c.bf16 %v3817_v61, %v3815_v37  ;;  %v3678_v22 = vpop.f32.mrb[185].mxu1  ;;  %v3755_v2 = vmul.f32 %v6982_v5, %v3676_v60  ;;  %v11621_v37 = vld [vmem:[#allocation84_spill] sm:$0xff]  ;;  %v11622_v61 = vld [vmem:[#allocation94_spill] sm:$0xff]  ;;  %v6617_v60 = vpop.eup %6616 }
 0x639   : > { %v5741_v56 = vpack.c.bf16 %v3818_v57, %v3816_v35  ;;  %v3756_v31 = vmul.f32 %v6983_v0, %v3678_v22  ;;  %6624 = vrcp.f32 %v11621_v37  ;;  %v11623_v35 = vld [vmem:[#allocation67_spill] sm:$0xff]  ;;  %5390 = vmatpush3.bf16.msra.mxu1 %v6143_v33  ;;  %v11625_v0 = vld [vmem:[#allocation136_spill] sm:$0xff]  ;;  %v11647_v33 = vld [vmem:[#allocation97_spill] sm:$0xff] }
 0x63a   : > { %v3819_v48 = vmul.f32 0.00069053395, %v3755_v2  ;;  %6626 = vrcp.f32 %v11622_v61  ;;  %v2333_v57 = vmul.f32 %v6613_v29, %v11623_v35  ;;  %5391 = vmatprep.subr.bf16.mxu1 %v6144_v18  ;;  %v6146_v2 = vld [vmem:[#allocation7 + $0x60] sm:$0xff]   ;;  %v11648_v37 = vld [vmem:[#allocation102_spill] sm:$0xff] }
 0x63b   : > { %v3682_v17 = vpop.f32.mrb[186].mxu1  ;;  %5742 = vmatprep.subr.bf16.mxu0 %v5741_v56  ;;  %v3820_v21 = vmul.f32 0.00069053395, %v3756_v31  ;;  %v6145_v56 = vld [vmem:[#allocation7 + $0x18] sm:$0xff]   ;;  %v6619_v5 = vpop.eup %6618  ;;  %6628 = vrcp.f32 %v11625_v0 }
 0x63c   : > { %v3757_v32 = vmul.f32 %v6984_v40, %v3682_v17  ;;  %v3684_v14 = vpop.f32.mrb[187].mxu1  ;;  %5744 = vmatpush1.bf16.msra.mxu0 %v5743_v28  ;;  %v11624_v28 = vld [vmem:[#allocation70_spill] sm:$0xff]  ;;  %v11627_v17 = vld [vmem:[#allocation69_spill] sm:$0xff] }
 0x63d   : > { %v3758_v36 = vmul.f32 %v6985_v50, %v3684_v14  ;;  %v2336_v22 = vmul.f32 %v6615_v13, %v11624_v28  ;;  %v11626_v31 = vld [vmem:[#allocation138_spill] sm:$0xff]  ;;  %v2335_v40 = vmul.f32 %v6617_v60, %v11627_v17  ;;  %v11628_v14 = vld [vmem:[#allocation72_spill] sm:$0xff]  ;;  %5392 = vmatpush3.bf16.msra.mxu1 %v6145_v56  ;;  %v11651_v28 = vld [vmem:[#allocation101_spill] sm:$0xff] }
 0x63e   : > { %v3821_v43 = vmul.f32 0.00069053395, %v3757_v32  ;;  %6630 = vrcp.f32 %v11626_v31  ;;  %v6621_v32 = vpop.eup %6620  ;;  %v2338_v50 = vmul.f32 %v6619_v5, %v11628_v14  ;;  %5393 = vmatprep.subr.bf16.mxu1 %v6146_v2  ;;  %v11650_v60 = vld [vmem:[#allocation34_spill] sm:$0xff]  ;;  %v11652_v5 = vld [vmem:[#allocation104_spill] sm:$0xff]  ;;  %v11654_v17 = vld [vmem:[#allocation153_spill] sm:$0xff] }
 0x63f   : > { %v3822_v34 = vmul.f32 0.00069053395, %v3758_v36  ;;  %v3688_v27 = vpop.f32.mrb[188].mxu1  ;;  %v6147_v36 = vld [vmem:[#allocation7 + $0x20] sm:$0xff]   ;;  %v11653_v31 = vld [vmem:[#allocation52_spill] sm:$0xff] }
 0x640   : > { %v5747_v45 = vpack.c.bf16 %v3821_v43, %v3819_v48  ;;  %v3690_v59 = vpop.f32.mrb[189].mxu1  ;;  %v3759_v20 = vmul.f32 %v6986_v4, %v3688_v27  ;;  %v6623_v48 = vpop.eup %6622  ;;  %v6148_v43 = vld [vmem:[#allocation7 + $0x68] sm:$0xff]   ;;  %v11631_v27 = vld [vmem:[#allocation75_spill] sm:$0xff] }
 0x641   : > { %v5745_v25 = vpack.c.bf16 %v3822_v34, %v3820_v21  ;;  %v3760_v1 = vmul.f32 %v6987_v63, %v3690_v59  ;;  %v11629_v21 = vld [vmem:[#allocation99_spill] sm:$0xff]  ;;  %v11630_v34 = vld [vmem:[#allocation142_spill] sm:$0xff]  ;;  %v2340_v30 = vmul.f32 %v6623_v48, %v11632_v6  ;;  %5394 = vmatpush3.bf16.msra.mxu1 %v6147_v36  ;;  %v11633_v63 = vld [vmem:[#allocation140_spill] sm:$0xff] }
 0x642   : > { %v3823_v53 = vmul.f32 0.00069053395, %v3759_v20  ;;  %6632 = vrcp.f32 %v11629_v21  ;;  %5395 = vmatprep.subr.bf16.mxu1 %v6148_v43  ;;  %v6150_v20 = vld [vmem:[#allocation7 + $0x70] sm:$0xff]   ;;  %v11658_v21 = vld [vmem:[#allocation36_spill] sm:$0xff] }
 0x643   : > { %v3694_v42 = vpop.f32.mrb[190].mxu1  ;;  %5746 = vmatprep.subr.bf16.mxu0 %v5745_v25  ;;  %v3824_v38 = vmul.f32 0.00069053395, %v3760_v1  ;;  %6634 = vrcp.f32 %v11630_v34  ;;  %v6625_v59 = vpop.eup %6624  ;;  %v6149_v25 = vld [vmem:[#allocation7 + $0x28] sm:$0xff]   ;;  %v11657_v43 = vld [vmem:[#allocation41_spill] sm:$0xff] }
 0x644   : > { %v3761_v23 = vmul.f32 %v6988_v9, %v3694_v42  ;;  %v3696_v54 = vpop.f32.mrb[191].mxu1  ;;  %5748 = vmatpush1.bf16.msra.mxu0 %v5747_v45  ;;  %v2337_v45 = vmul.f32 %v6621_v32, %v11631_v27  ;;  %v6627_v4 = vpop.eup %6626  ;;  %6636 = vrcp.f32 %v11633_v63  ;;  %v11634_v1 = vld [vmem:[#allocation144_spill] sm:$0xff]  ;;  %v11635_v42 = vld [vmem:[#allocation78_spill] sm:$0xff]  ;;  %v11659_v34 = vld [vmem:[#allocation109_spill] sm:$0xff] }
 0x645   : > { %v3762_v52 = vmul.f32 %v6989_v39, %v3696_v54  ;;  %6638 = vrcp.f32 %v11634_v1  ;;  %v2339_v9 = vmul.f32 %v6625_v59, %v11635_v42  ;;  %v11636_v54 = vld [vmem:[#allocation82_spill] sm:$0xff]  ;;  %5396 = vmatpush3.bf16.msra.mxu1 %v6149_v25  ;;  %v11660_v59 = vld [vmem:[#allocation112_spill] sm:$0xff] }
 0x646   : > { %v3825_v26 = vmul.f32 0.00069053395, %v3761_v23  ;;  %v6629_v23 = vpop.eup %6628  ;;  %v2342_v39 = vmul.f32 %v6627_v4, %v11636_v54  ;;  %5397 = vmatprep.subr.bf16.mxu1 %v6150_v20  ;;  %v11661_v25 = vld [vmem:[#allocation88_spill] sm:$0xff]  ;;  %v11662_v4 = vld [vmem:[#allocation154_spill] sm:$0xff]  ;;  %v11663_v20 = vld [vmem:[#allocation115_spill] sm:$0xff] }
 0x647   : > { %v3826_v3 = vmul.f32 0.00069053395, %v3762_v52  ;;  %v6151_v52 = vld [vmem:[#allocation7 + $0x30] sm:$0xff]   ;;  %v11664_v42 = vld [vmem:[#allocation118_spill] sm:$0xff]  ;;  %v11665_v54 = vld [vmem:[#allocation95_spill] sm:$0xff] }
 0x648   : > { %v5751_v41 = vpack.c.bf16 %v3825_v26, %v3823_v53  ;;  %v6631_v53 = vpop.eup %6630  ;;  %v11637_v26 = vld [vmem:[#allocation96_spill] sm:$0xff] }
 0x649   : > { %v5749_v7 = vpack.c.bf16 %v3826_v3, %v3824_v38  ;;  %6640 = vrcp.f32 %v11637_v26  ;;  %v11638_v38 = vld [vmem:[#allocation149_spill] sm:$0xff]  ;;  %5398 = vmatpush3.bf16.msra.mxu1 %v6151_v52 }
 0x64a   : > { %6642 = vrcp.f32 %v11638_v38  ;;  %v11639_v3 = vld [vmem:[#allocation85_spill] sm:$0xff]  ;;  %v11668_v38 = vld [vmem:[#allocation32_spill] sm:$0xff] }
 0x64b   : > { %5750 = vmatprep.subr.bf16.mxu0 %v5749_v7  ;;  %v11640_v7 = vld [vmem:[#allocation90_spill] sm:$0xff]  ;;  %6644 = vrcp.f32 %v11641_v15  ;;  %v11667_v52 = vld [vmem:[#allocation117_spill] sm:$0xff] }
 0x64c   : > { %5752 = vmatpush1.bf16.msra.mxu0 %v5751_v41  ;;  %v2341_v41 = vmul.f32 %v6629_v23, %v11639_v3  ;;  %v6633_v10 = vpop.eup %6632  ;;  %v2344_v51 = vmul.f32 %v6631_v53, %v11640_v7  ;;  %6646 = vrcp.f32 %v11642_v58  ;;  %v11670_v7 = vld [vmem:[#allocation155_spill] sm:$0xff] }
 0x64d   : > { %v6635_v16 = vpop.eup %6634  ;;  %v2343_v44 = vmul.f32 %v6633_v10, %v11643_v47  ;;  %6648 = vrcp.f32 %v11645_v19  ;;  %v11669_v10 = vld [vmem:[#allocation60_spill] sm:$0xff]  ;;  %v11672_v58 = vld [vmem:[#allocation159_spill] sm:$0xff] }
 0x64e   : > { %v6637_v46 = vpop.eup %6636 }
 0x64f   : > { %3892 = vmatmul.mubr.f32.vlgmr.msra.gmra.mrb[192].mxu0 %v2331_v12  ;;  %v11644_v12 = vld [vmem:[#allocation93_spill] sm:$0xff]  ;;  %v6639_v29 = vpop.eup %6638  ;;  %v2345_v13 = vmul.f32 %v6637_v46, %v11647_v33 }
 0x650   : > { %3897 = vmatprep.mubr.f32.mxu0 %v2334_v49  ;;  %v2346_v11 = vmul.f32 %v6635_v16, %v11644_v12  ;;  %v11646_v49 = vld [vmem:[#allocation151_spill] sm:$0xff]  ;;  %v2348_v61 = vmul.f32 %v6639_v29, %v11648_v37  ;;  %v11673_v46 = vld [vmem:[#allocation165_spill] sm:$0xff]  ;;  %v11674_v12 = vld [vmem:[#allocation156_spill] sm:$0xff] }
 0x651   : > { %6650 = vrcp.f32 %v11646_v49  ;;  %v11676_v49 = vld [vmem:[#allocation161_spill] sm:$0xff]  ;;  %v11678_v37 = vld [vmem:[#allocation18_spill] sm:$0xff] }
 0x653   : > { %3898 = vmatmul.mubr.f32.gmra.mrb[194].mxu0 %v2333_v57  ;;  %v6641_v18 = vpop.eup %6640  ;;  %v11649_v57 = vld [vmem:[#allocation150_spill] sm:$0xff] }
 0x654   : > { %3903 = vmatprep.mubr.f32.mxu0 %v2336_v22  ;;  %v6643_v35 = vpop.eup %6642  ;;  %6652 = vrcp.f32 %v11649_v57  ;;  %v2347_v22 = vmul.f32 %v6641_v18, %v11651_v28  ;;  %v11677_v18 = vld [vmem:[#allocation63_spill] sm:$0xff] }
 0x655   : > { %6654 = vrcp.f32 %v11650_v60  ;;  %v6645_v56 = vpop.eup %6644  ;;  %v2350_v2 = vmul.f32 %v6643_v35, %v11652_v5  ;;  %v11680_v60 = vld [vmem:[#allocation162_spill] sm:$0xff]  ;;  %v11682_v5 = vld [vmem:[#allocation103_spill] sm:$0xff] }
 0x656   : > { %v6647_v0 = vpop.eup %6646  ;;  %6656 = vrcp.f32 %v11653_v31 }
 0x657   : > { %3904 = vmatmul.mubr.f32.gmra.mrb[196].mxu0 %v2335_v40  ;;  %6658 = vrcp.f32 %v11654_v17  ;;  %v11655_v40 = vld [vmem:[#allocation107_spill] sm:$0xff]  ;;  %v6649_v14 = vpop.eup %6648  ;;  %v11684_v17 = vld [vmem:[#allocation164_spill] sm:$0xff] }
 0x658   : > { %3909 = vmatprep.mubr.f32.mxu0 %v2338_v50  ;;  %v2349_v32 = vmul.f32 %v6645_v56, %v11655_v40  ;;  %v11656_v50 = vld [vmem:[#allocation110_spill] sm:$0xff]  ;;  %6660 = vrcp.f32 %v11657_v43  ;;  %v2351_v27 = vmul.f32 %v6649_v14, %v11659_v34 }
 0x659   : > { %v2352_v36 = vmul.f32 %v6647_v0, %v11656_v50  ;;  %6662 = vrcp.f32 %v11658_v21  ;;  %v11681_v56 = vld [vmem:[#allocation158_spill] sm:$0xff] }
 0x65a   : > { %6664 = vrcp.f32 %v11661_v25  ;;  %v11685_v14 = vld [vmem:[#allocation62_spill] sm:$0xff] }
 0x65b   : > { %3910 = vmatmul.mubr.f32.gmra.mrb[198].mxu0 %v2337_v45  ;;  %v6651_v48 = vpop.eup %6650  ;;  %6666 = vrcp.f32 %v11662_v4  ;;  %v11686_v50 = vld [vmem:[#allocation106_spill] sm:$0xff]  ;;  %v11692_v4 = vld [vmem:[#allocation57_spill] sm:$0xff] }
 0x65c   : > { %3915 = vmatprep.mubr.f32.mxu0 %v2340_v30  ;;  %v2354_v6 = vmul.f32 %v6651_v48, %v11660_v59  ;;  %6668 = vrcp.f32 %v11665_v54  ;;  %v11688_v21 = vld [vmem:[#allocation58_spill] sm:$0xff]  ;;  %v11690_v59 = vld [vmem:[#allocation111_spill] sm:$0xff] }
 0x65e   : > { %v6653_v45 = vpop.eup %6652 }
 0x65f   : > { %3916 = vmatmul.mubr.f32.gmra.mrb[200].mxu0 %v2339_v9  ;;  %v6655_v30 = vpop.eup %6654  ;;  %v2353_v63 = vmul.f32 %v6653_v45, %v11663_v20  ;;  %v11689_v45 = vld [vmem:[#allocation105_spill] sm:$0xff] }
 0x660   : > { %3921 = vmatprep.mubr.f32.mxu0 %v2342_v39  ;;  %v6657_v1 = vpop.eup %6656  ;;  %v2356_v9 = vmul.f32 %v6655_v30, %v11664_v42  ;;  %v11666_v39 = vld [vmem:[#allocation38_spill] sm:$0xff] }
 0x661   : > { %v6659_v23 = vpop.eup %6658  ;;  %6670 = vrcp.f32 %v11666_v39  ;;  %v2355_v53 = vmul.f32 %v6657_v1, %v11667_v52  ;;  %v11693_v1 = vld [vmem:[#allocation108_spill] sm:$0xff]  ;;  %v11694_v42 = vld [vmem:[#allocation114_spill] sm:$0xff]  ;;  %v11696_v39 = vld [vmem:[#allocation59_spill] sm:$0xff] }
 0x662   : > { %v6661_v26 = vpop.eup %6660  ;;  %v2358_v3 = vmul.f32 %v6659_v23, %v11668_v38  ;;  %6672 = vrcp.f32 %v11669_v10  ;;  %v11698_v38 = vld [vmem:[#allocation29_spill] sm:$0xff] }
 0x663   : > { %3922 = vmatmul.mubr.f32.gmra.mrb[202].mxu0 %v2341_v41  ;;  %v6663_v41 = vpop.eup %6662  ;;  %6674 = vrcp.f32 %v11670_v7  ;;  %v11700_v7 = vld [vmem:[#allocation20_spill] sm:$0xff] }
 0x664   : > { %3927 = vmatprep.mubr.f32.mxu0 %v2344_v51  ;;  %v11671_v51 = vld [vmem:[#allocation120_spill] sm:$0xff]  ;;  %v6665_v15 = vpop.eup %6664  ;;  %v2360_v47 = vmul.f32 %v6663_v41, %v11672_v58  ;;  %6676 = vrcp.f32 %v11673_v46  ;;  %v11702_v58 = vld [vmem:[#allocation46_spill] sm:$0xff] }
 0x665   : > { %v2357_v16 = vmul.f32 %v6661_v26, %v11671_v51  ;;  %6678 = vrcp.f32 %v11674_v12  ;;  %v11697_v26 = vld [vmem:[#allocation113_spill] sm:$0xff]  ;;  %v11704_v12 = vld [vmem:[#allocation66_spill] sm:$0xff] }
 0x666   : > { %6680 = vrcp.f32 %v11677_v18 }
 0x667   : > { %3928 = vmatmul.mubr.f32.gmra.mrb[204].mxu0 %v2343_v44  ;;  %v6667_v44 = vpop.eup %6666  ;;  %6682 = vrcp.f32 %v11678_v37  ;;  %v11708_v37 = vld [vmem:[#allocation71_spill] sm:$0xff] }
 0x668   : > { %3933 = vmatprep.mubr.f32.mxu0 %v2346_v11  ;;  %v11675_v11 = vld [vmem:[#allocation45_spill] sm:$0xff]  ;;  %v6669_v19 = vpop.eup %6668  ;;  %v2362_v33 = vmul.f32 %v6667_v44, %v11676_v49  ;;  %6684 = vrcp.f32 %v11681_v56  ;;  %v11706_v49 = vld [vmem:[#allocation16_spill] sm:$0xff] }
 0x669   : > { %v2359_v29 = vmul.f32 %v6665_v15, %v11675_v11  ;;  %6686 = vrcp.f32 %v11682_v5  ;;  %v11701_v15 = vld [vmem:[#allocation116_spill] sm:$0xff] }
 0x66a   : > { %6688 = vrcp.f32 %v11685_v14  ;;  %v11712_v5 = vld [vmem:[#allocation44_spill] sm:$0xff] }
 0x66b   : > { %3934 = vmatmul.mubr.f32.gmra.mrb[206].mxu0 %v2345_v13  ;;  %v6671_v13 = vpop.eup %6670  ;;  %6690 = vrcp.f32 %v11686_v50  ;;  %v11716_v50 = vld [vmem:[#allocation148_spill] sm:$0xff] }
 0x66c   : > { %3939 = vmatprep.mubr.f32.mxu0 %v2348_v61  ;;  %v11679_v61 = vld [vmem:[#allocation163_spill] sm:$0xff]  ;;  %v6673_v57 = vpop.eup %6672  ;;  %v2364_v28 = vmul.f32 %v6671_v13, %v11680_v60  ;;  %6692 = vrcp.f32 %v11689_v45  ;;  %v11719_v45 = vld [vmem:[#allocation122_spill] sm:$0xff] }
 0x66d   : > { %v2361_v35 = vmul.f32 %v6669_v19, %v11679_v61  ;;  %6694 = vrcp.f32 %v11690_v59  ;;  %v11705_v19 = vld [vmem:[#allocation39_spill] sm:$0xff] }
 0x66e   : > { %6696 = vrcp.f32 %v11693_v1  ;;  %v11710_v60 = vld [vmem:[#allocation19_spill] sm:$0xff] }
 0x66f   : > { %3940 = vmatmul.mubr.f32.gmra.mrb[208].mxu0 %v2347_v22  ;;  %v6675_v22 = vpop.eup %6674  ;;  %6698 = vrcp.f32 %v11694_v42 }
 0x670   : > { %3945 = vmatprep.mubr.f32.mxu0 %v2350_v2  ;;  %v11683_v2 = vld [vmem:[#allocation55_spill] sm:$0xff]  ;;  %v6677_v31 = vpop.eup %6676  ;;  %v2366_v40 = vmul.f32 %v6675_v22, %v11684_v17  ;;  %6700 = vrcp.f32 %v11697_v26  ;;  %v11714_v17 = vld [vmem:[#allocation22_spill] sm:$0xff] }
 0x671   : > { %v2363_v0 = vmul.f32 %v6673_v57, %v11683_v2  ;;  %6702 = vrcp.f32 %v11698_v38  ;;  %v11709_v57 = vld [vmem:[#allocation119_spill] sm:$0xff] }
 0x672   : > { %6704 = vrcp.f32 %v11701_v15 }
 0x673   : > { %3946 = vmatmul.mubr.f32.gmra.mrb[210].mxu0 %v2349_v32  ;;  %v6679_v32 = vpop.eup %6678  ;;  %6706 = vrcp.f32 %v11702_v58  ;;  %v11729_v58 = vld [vmem:[#allocation130_spill] sm:$0xff] }
 0x674   : > { %3951 = vmatprep.mubr.f32.mxu0 %v2352_v36  ;;  %v11687_v36 = vld [vmem:[#allocation54_spill] sm:$0xff]  ;;  %v6681_v43 = vpop.eup %6680  ;;  %v2368_v34 = vmul.f32 %v6679_v32, %v11688_v21  ;;  %6708 = vrcp.f32 %v11705_v19  ;;  %v11732_v19 = vld [vmem:[#allocation132_spill] sm:$0xff] }
 0x675   : > { %v2365_v48 = vmul.f32 %v6677_v31, %v11687_v36  ;;  %6710 = vrcp.f32 %v11706_v49  ;;  %v11713_v31 = vld [vmem:[#allocation17_spill] sm:$0xff]  ;;  %v11718_v21 = vld [vmem:[#allocation74_spill] sm:$0xff] }
 0x676   : > { %6712 = vrcp.f32 %v11709_v57 }
 0x677   : > { %3952 = vmatmul.mubr.f32.gmra.mrb[212].mxu0 %v2351_v27  ;;  %v6683_v27 = vpop.eup %6682  ;;  %6714 = vrcp.f32 %v11710_v60 }
 0x678   : > { %3957 = vmatprep.mubr.f32.mxu0 %v2354_v6  ;;  %v11691_v6 = vld [vmem:[#allocation100_spill] sm:$0xff]  ;;  %v6685_v25 = vpop.eup %6684  ;;  %v2370_v20 = vmul.f32 %v6683_v27, %v11692_v4  ;;  %6716 = vrcp.f32 %v11713_v31 }
 0x679   : > { %v2367_v30 = vmul.f32 %v6681_v43, %v11691_v6  ;;  %v11717_v43 = vld [vmem:[#allocation21_spill] sm:$0xff] }
 0x67b   : > { %3958 = vmatmul.mubr.f32.gmra.mrb[214].mxu0 %v2353_v63  ;;  %v6687_v63 = vpop.eup %6686  ;;  %6718 = vrcp.f32 %v11714_v17 }
 0x67c   : > { %3963 = vmatprep.mubr.f32.mxu0 %v2356_v9  ;;  %v11695_v9 = vld [vmem:[#allocation65_spill] sm:$0xff]  ;;  %v6689_v54 = vpop.eup %6688  ;;  %v2372_v52 = vmul.f32 %v6687_v63, %v11696_v39  ;;  %6720 = vrcp.f32 %v11717_v43  ;;  %v11722_v63 = vld [vmem:[#allocation80_spill] sm:$0xff] }
 0x67d   : > { %v2369_v23 = vmul.f32 %v6685_v25, %v11695_v9  ;;  %v11721_v25 = vld [vmem:[#allocation125_spill] sm:$0xff]  ;;  %v11724_v9 = vld [vmem:[#allocation26_spill] sm:$0xff]  ;;  %v11725_v39 = vld [vmem:[#allocation92_spill] sm:$0xff] }
 0x67f   : > { %3964 = vmatmul.mubr.f32.gmra.mrb[216].mxu0 %v2355_v53  ;;  %v6691_v53 = vpop.eup %6690  ;;  %6722 = vrcp.f32 %v10034_v55  ;;  %v11723_v55 = vld [vmem:[#allocation24_spill] sm:$0xff] }
 0x680   : > { %3969 = vmatprep.mubr.f32.mxu0 %v2358_v3  ;;  %v11699_v3 = vld [vmem:[#allocation68_spill] sm:$0xff]  ;;  %v6693_v10 = vpop.eup %6692  ;;  %v2374_v51 = vmul.f32 %v6691_v53, %v11700_v7  ;;  %6724 = vrcp.f32 %v10032_v62  ;;  %v11726_v53 = vld [vmem:[#allocation127_spill] sm:$0xff]  ;;  %v6152_v7 = vld [vmem:[#allocation7 + $0x78] sm:$0xff]  }
 0x681   : > { %v2371_v41 = vmul.f32 %v6689_v54, %v11699_v3  ;;  %v11727_v3 = vld [vmem:[#allocation128_spill] sm:$0xff]  ;;  %5399 = vmatprep.subr.bf16.mxu1 %v6152_v7 }
 0x683   : > { %3970 = vmatmul.mubr.f32.gmra.mrb[218].mxu0 %v2357_v16  ;;  %v6695_v16 = vpop.eup %6694 }
 0x684   : > { %3975 = vmatprep.mubr.f32.mxu0 %v2360_v47  ;;  %v11703_v47 = vld [vmem:[#allocation23_spill] sm:$0xff]  ;;  %v6697_v46 = vpop.eup %6696  ;;  %v2376_v11 = vmul.f32 %v6695_v16, %v11704_v12 }
 0x685   : > { %v2373_v44 = vmul.f32 %v6693_v10, %v11703_v47 }
 0x687   : > { %3976 = vmatmul.mubr.f32.gmra.mrb[220].mxu0 %v2359_v29  ;;  %v6699_v29 = vpop.eup %6698 }
 0x688   : > { %3981 = vmatprep.mubr.f32.mxu0 %v2362_v33  ;;  %v11707_v33 = vld [vmem:[#allocation73_spill] sm:$0xff]  ;;  %v6701_v18 = vpop.eup %6700  ;;  %v2378_v61 = vmul.f32 %v6699_v29, %v11708_v37 }
 0x689   : > { %v2375_v13 = vmul.f32 %v6697_v46, %v11707_v33 }
 0x68b   : > { %3982 = vmatmul.mubr.f32.gmra.mrb[222].mxu0 %v2361_v35  ;;  %v6703_v35 = vpop.eup %6702 }
 0x68c   : > { %3987 = vmatprep.mubr.f32.mxu0 %v2364_v28  ;;  %v11711_v28 = vld [vmem:[#allocation77_spill] sm:$0xff]  ;;  %v6705_v56 = vpop.eup %6704  ;;  %v2380_v2 = vmul.f32 %v6703_v35, %v11712_v5 }
 0x68d   : > { %v2377_v22 = vmul.f32 %v6701_v18, %v11711_v28 }
 0x68f   : > { %3988 = vmatmul.mubr.f32.gmra.mrb[224].mxu0 %v2363_v0  ;;  %v6707_v0 = vpop.eup %6706 }
 0x690   : > { %3993 = vmatprep.mubr.f32.mxu0 %v2366_v40  ;;  %v11715_v40 = vld [vmem:[#allocation56_spill] sm:$0xff]  ;;  %v6709_v14 = vpop.eup %6708  ;;  %v2382_v36 = vmul.f32 %v6707_v0, %v11716_v50 }
 0x691   : > { %v2379_v32 = vmul.f32 %v6705_v56, %v11715_v40 }
 0x693   : > { %3994 = vmatmul.mubr.f32.gmra.mrb[226].mxu0 %v2365_v48  ;;  %v6711_v48 = vpop.eup %6710 }
 0x694   : > { %3999 = vmatprep.mubr.f32.mxu0 %v2368_v34  ;;  %v2381_v34 = vmul.f32 %v6709_v14, %v11718_v21  ;;  %v6713_v27 = vpop.eup %6712  ;;  %v2384_v59 = vmul.f32 %v6711_v48, %v11719_v45 }
 0x695   : > { %v6715_v6 = vpop.eup %6714  ;;  %v2383_v4 = vmul.f32 %v6713_v27, %v11721_v25 }
 0x696   : > { %v2386_v1 = vmul.f32 %v6715_v6, %v11722_v63 }
 0x697   : > { %4000 = vmatmul.mubr.f32.gmra.mrb[228].mxu0 %v2367_v30  ;;  %v11720_v30 = vld [vmem:[#allocation37_spill] sm:$0xff] }
 0x698   : > { %4005 = vmatprep.mubr.f32.mxu0 %v2370_v20  ;;  %6726 = vrcp.f32 %v11720_v30  ;;  %v6717_v20 = vpop.eup %6716 }
 0x699   : > { %v6719_v42 = vpop.eup %6718  ;;  %6728 = vrcp.f32 %v11723_v55 }
 0x69a   : > { %6730 = vrcp.f32 %v10050_v8  ;;  %v6721_v54 = vpop.eup %6720  ;;  %v2388_v62 = vmul.f32 %v6719_v42, %v11725_v39  ;;  %v11728_v8 = vld [vmem:[#allocation83_spill] sm:$0xff] }
 0x69b   : > { %4006 = vmatmul.mubr.f32.gmra.mrb[230].mxu0 %v2369_v23  ;;  %v2385_v23 = vmul.f32 %v6717_v20, %v11724_v9  ;;  %6732 = vrcp.f32 %v10048_v24  ;;  %v2387_v26 = vmul.f32 %v6721_v54, %v11726_v53  ;;  %v11730_v24 = vld [vmem:[#allocation31_spill] sm:$0xff] }
 0x69c   : > { %4011 = vmatprep.mubr.f32.mxu0 %v2372_v52  ;;  %v6723_v52 = vpop.eup %6722 }
 0x69d   : > { %v6725_v38 = vpop.eup %6724 }
 0x69e   : > { %v2389_v16 = vmul.f32 %v6725_v38, %v11728_v8 }
 0x69f   : > { %4012 = vmatmul.mubr.f32.gmra.mrb[232].mxu0 %v2371_v41  ;;  %v2390_v41 = vmul.f32 %v6723_v52, %v11727_v3 }
 0x6a0   : > { %4017 = vmatprep.mubr.f32.mxu0 %v2374_v51  ;;  %v6153_v51 = vld [vmem:[#allocation7 + $0x38] sm:$0xff]  }
 0x6a1   : > { %5400 = vmatpush3.bf16.msra.mxu1 %v6153_v51 }
 0x6a2   : > { %v6727_v10 = vpop.eup %6726 }
 0x6a3   : > { %4018 = vmatmul.mubr.f32.gmra.mrb[234].mxu0 %v2373_v44  ;;  %v6729_v15 = vpop.eup %6728  ;;  %v2392_v47 = vmul.f32 %v6727_v10, %v11729_v58 }
 0x6a4   : > { %4023 = vmatprep.mubr.f32.mxu0 %v2376_v11  ;;  %v6731_v44 = vpop.eup %6730  ;;  %v2391_v46 = vmul.f32 %v6729_v15, %v11730_v24  ;;  %v11731_v11 = vld [vmem:[#allocation87_spill] sm:$0xff] }
 0x6a5   : > { %v6733_v12 = vpop.eup %6732  ;;  %v2394_v29 = vmul.f32 %v6731_v44, %v11731_v11 }
 0x6a6   : > { %v2393_v49 = vmul.f32 %v6733_v12, %v11732_v19 }
 0x6a7   : > { %4024 = vmatmul.mubr.f32.gmra.mrb[236].mxu0 %v2375_v13 }
 0x6a8   : > { %4029 = vmatprep.mubr.f32.mxu0 %v2378_v61 }
 0x6ab   : > { %4030 = vmatmul.mubr.f32.gmra.mrb[238].mxu0 %v2377_v22 }
 0x6ac   : > { %4035 = vmatprep.mubr.f32.mxu0 %v2380_v2 }
 0x6af   : > { %4036 = vmatmul.mubr.f32.gmra.mrb[240].mxu0 %v2379_v32 }
 0x6b0   : > { %4041 = vmatprep.mubr.f32.mxu0 %v2382_v36 }
 0x6b3   : > { %4042 = vmatmul.mubr.f32.gmra.mrb[242].mxu0 %v2381_v34 }
 0x6b4   : > { %4047 = vmatprep.mubr.f32.mxu0 %v2384_v59 }
 0x6b7   : > { %4048 = vmatmul.mubr.f32.gmra.mrb[244].mxu0 %v2383_v4 }
 0x6b8   : > { %4053 = vmatprep.mubr.f32.mxu0 %v2386_v1 }
 0x6bb   : > { %4054 = vmatmul.mubr.f32.gmra.mrb[246].mxu0 %v2385_v23 }
 0x6bc   : > { %4059 = vmatprep.mubr.f32.mxu0 %v2388_v62 }
 0x6bf   : > { %4060 = vmatmul.mubr.f32.gmra.mrb[248].mxu0 %v2387_v26 }
 0x6c0   : > { %4065 = vmatprep.mubr.f32.mxu0 %v2390_v41 }
 0x6c3   : > { %4066 = vmatmul.mubr.f32.gmra.mrb[250].mxu0 %v2389_v16 }
 0x6c4   : > { %4071 = vmatprep.mubr.f32.mxu0 %v2392_v47 }
 0x6c7   : > { %4072 = vmatmul.mubr.f32.gmra.mrb[252].mxu0 %v2391_v46 }
 0x6c8   : > { %4077 = vmatprep.mubr.f32.mxu0 %v2394_v29 }
 0x6cb   : > { %4078 = vmatmul.mubr.f32.gmra.mrb[254].mxu0 %v2393_v49 }
 0x722   : > { %v3893_v33 = vpop.f32.mrb[192].mxu0 }
 0x723   : > { %v4148_v13 = vmul.f32 0.70710677, %v3893_v33  ;;  %v3895_v18 = vpop.f32.mrb[193].mxu0  ;;  %v4084_v27 = vmul.f32 0.5, %v3893_v33 }
 0x724   : > { %v4149_v37 = vmul.f32 0.70710677, %v3895_v18  ;;  %v4085_v30 = vmul.f32 0.5, %v3895_v18 }
 0x725   : > { %6734 = verf.f32 %v4148_v13 }
 0x726   : > { %6736 = verf.f32 %v4149_v37  ;;  %v3899_v61 = vpop.f32.mrb[194].mxu0 }
 0x727   : > { %v4150_v35 = vmul.f32 0.70710677, %v3899_v61  ;;  %v3901_v57 = vpop.f32.mrb[195].mxu0  ;;  %v4086_v45 = vmul.f32 0.5, %v3899_v61 }
 0x728   : > { %v4151_v60 = vmul.f32 0.70710677, %v3901_v57  ;;  %v4087_v25 = vmul.f32 0.5, %v3901_v57 }
 0x729   : > { %6738 = verf.f32 %v4150_v35 }
 0x72a   : > { %6740 = verf.f32 %v4151_v60  ;;  %v3905_v28 = vpop.f32.mrb[196].mxu0 }
 0x72b   : > { %v4152_v22 = vmul.f32 0.70710677, %v3905_v28  ;;  %v3907_v56 = vpop.f32.mrb[197].mxu0  ;;  %v4088_v8 = vmul.f32 0.5, %v3905_v28 }
 0x72c   : > { %v4153_v5 = vmul.f32 0.70710677, %v3907_v56  ;;  %v4089_v47 = vmul.f32 0.5, %v3907_v56 }
 0x72d   : > { %6742 = verf.f32 %v4152_v22 }
 0x72e   : > { %6744 = verf.f32 %v4153_v5  ;;  %v3911_v2 = vpop.f32.mrb[198].mxu0 }
 0x72f   : > { %v6735_v0 = vpop.eup %6734  ;;  %v4154_v31 = vmul.f32 0.70710677, %v3911_v2  ;;  %v3913_v17 = vpop.f32.mrb[199].mxu0  ;;  %v4090_v16 = vmul.f32 0.5, %v3911_v2 }
 0x730   : > { %v6737_v40 = vpop.eup %6736  ;;  %v4155_v32 = vmul.f32 0.70710677, %v3913_v17  ;;  %v4276_v14 = vadd.f32 1.0, %v6735_v0  ;;  %v4091_v44 = vmul.f32 0.5, %v3913_v17 }
 0x731   : > { %6746 = verf.f32 %v4154_v31  ;;  %v4277_v48 = vadd.f32 1.0, %v6737_v40 }
 0x732   : > { %6748 = verf.f32 %v4155_v32  ;;  %v10257_v50 = vpop.f32.mrb[200].mxu0  ;;  %v4340_v20 = vmul.f32 %v4276_v14, %v4084_v27 }
 0x733   : > { %v6739_v36 = vpop.eup %6738  ;;  %v4156_v43 = vmul.f32 0.70710677, %v10257_v50  ;;  %v10260_v21 = vpop.f32.mrb[201].mxu0  ;;  %v4341_v55 = vmul.f32 %v4277_v48, %v4085_v30  ;;  %v4092_v0 = vmul.f32 0.5, %v10257_v50 }
 0x734   : > { %v6741_v34 = vpop.eup %6740  ;;  %v4278_v59 = vadd.f32 1.0, %v6739_v36  ;;  %v4157_v6 = vmul.f32 0.70710677, %v10260_v21  ;;  %v4093_v32 = vmul.f32 0.5, %v10260_v21 }
 0x735   : > { %v4279_v4 = vadd.f32 1.0, %v6741_v34  ;;  %6750 = verf.f32 %v4156_v43 }
 0x736   : > { %v4342_v63 = vmul.f32 %v4278_v59, %v4086_v45  ;;  %6752 = verf.f32 %v4157_v6  ;;  %v3923_v1 = vpop.f32.mrb[202].mxu0 }
 0x737   : > { %v6743_v42 = vpop.eup %6742  ;;  %v4343_v9 = vmul.f32 %v4279_v4, %v4087_v25  ;;  %v4158_v23 = vmul.f32 0.70710677, %v3923_v1  ;;  %v3925_v54 = vpop.f32.mrb[203].mxu0  ;;  %v4094_v31 = vmul.f32 0.5, %v3923_v1 }
 0x738   : > { %v6745_v39 = vpop.eup %6744  ;;  %v4404_v62 = vpack.c.bf16 %v4342_v63, %v4340_v20  ;;  %v4159_v52 = vmul.f32 0.70710677, %v3925_v54  ;;  %v4280_v26 = vadd.f32 1.0, %v6743_v42  ;;  %v4095_v14 = vmul.f32 0.5, %v3925_v54 }
 0x739   : > { %6754 = verf.f32 %v4158_v23  ;;  %v4405_v53 = vpack.c.bf16 %v4343_v9, %v4341_v55  ;;  %v4281_v41 = vadd.f32 1.0, %v6745_v39 }
 0x73a   : > { %6756 = verf.f32 %v4159_v52  ;;  %v10263_v38 = vpop.f32.mrb[204].mxu0  ;;  %v4344_v46 = vmul.f32 %v4280_v26, %v4088_v8 }
 0x73b   : > { %v6747_v3 = vpop.eup %6746  ;;  %v4160_v10 = vmul.f32 0.70710677, %v10263_v38  ;;  %v10266_v7 = vpop.f32.mrb[205].mxu0  ;;  %4596 = vmatprep.mubr.bf16.mxu1 %v4405_v53  ;;  %v4345_v19 = vmul.f32 %v4281_v41, %v4089_v47  ;;  %v4096_v54 = vmul.f32 0.5, %v10263_v38 }
 0x73c   : > { %v6749_v51 = vpop.eup %6748  ;;  %v4282_v15 = vadd.f32 1.0, %v6747_v3  ;;  %v4161_v58 = vmul.f32 0.70710677, %v10266_v7  ;;  %4597 = vmatmul.mubr.bf16.vlgmr.msra.gmra.mrb[192].mxu1 %v4404_v62  ;;  %v4097_v53 = vmul.f32 0.5, %v10266_v7 }
 0x73d   : > { %v4283_v24 = vadd.f32 1.0, %v6749_v51  ;;  %6758 = verf.f32 %v4160_v10 }
 0x73e   : > { %v4346_v12 = vmul.f32 %v4282_v15, %v4090_v16  ;;  %6760 = verf.f32 %v4161_v58  ;;  %v3935_v11 = vpop.f32.mrb[206].mxu0 }
 0x73f   : > { %v6751_v29 = vpop.eup %6750  ;;  %v4347_v49 = vmul.f32 %v4283_v24, %v4091_v44  ;;  %v4162_v33 = vmul.f32 0.70710677, %v3935_v11  ;;  %v3937_v13 = vpop.f32.mrb[207].mxu0  ;;  %v4098_v39 = vmul.f32 0.5, %v3935_v11 }
 0x740   : > { %v6753_v18 = vpop.eup %6752  ;;  %v4163_v37 = vmul.f32 0.70710677, %v3937_v13  ;;  %v4406_v61 = vpack.c.bf16 %v4346_v12, %v4344_v46  ;;  %v4284_v57 = vadd.f32 1.0, %v6751_v29  ;;  %v4099_v26 = vmul.f32 0.5, %v3937_v13 }
 0x741   : > { %6762 = verf.f32 %v4162_v33  ;;  %v4407_v35 = vpack.c.bf16 %v4347_v49, %v4345_v19  ;;  %v4285_v22 = vadd.f32 1.0, %v6753_v18 }
 0x742   : > { %6764 = verf.f32 %v4163_v37  ;;  %v10269_v60 = vpop.f32.mrb[208].mxu0  ;;  %v4348_v48 = vmul.f32 %v4284_v57, %v4092_v0 }
 0x743   : > { %v6755_v28 = vpop.eup %6754  ;;  %v4164_v56 = vmul.f32 0.70710677, %v10269_v60  ;;  %v10272_v5 = vpop.f32.mrb[209].mxu0  ;;  %4604 = vmatprep.mubr.bf16.mxu1 %v4407_v35  ;;  %v4349_v45 = vmul.f32 %v4285_v22, %v4093_v32  ;;  %v4100_v13 = vmul.f32 0.5, %v10269_v60 }
 0x744   : > { %v6757_v2 = vpop.eup %6756  ;;  %v4286_v17 = vadd.f32 1.0, %v6755_v28  ;;  %v4165_v40 = vmul.f32 0.70710677, %v10272_v5  ;;  %4605 = vmatmul.mubr.bf16.gmra.mrb[196].mxu1 %v4406_v61  ;;  %v4101_v35 = vmul.f32 0.5, %v10272_v5 }
 0x745   : > { %v4287_v36 = vadd.f32 1.0, %v6757_v2  ;;  %6766 = verf.f32 %v4164_v56 }
 0x746   : > { %v4350_v43 = vmul.f32 %v4286_v17, %v4094_v31  ;;  %6768 = verf.f32 %v4165_v40  ;;  %v3947_v34 = vpop.f32.mrb[210].mxu0 }
 0x747   : > { %v6759_v27 = vpop.eup %6758  ;;  %v4351_v59 = vmul.f32 %v4287_v36, %v4095_v14  ;;  %v4166_v6 = vmul.f32 0.70710677, %v3947_v34  ;;  %v3949_v30 = vpop.f32.mrb[211].mxu0  ;;  %v4102_v18 = vmul.f32 0.5, %v3947_v34 }
 0x748   : > { %v6761_v50 = vpop.eup %6760  ;;  %v4167_v25 = vmul.f32 0.70710677, %v3949_v30  ;;  %v4408_v4 = vpack.c.bf16 %v4350_v43, %v4348_v48  ;;  %v4288_v63 = vadd.f32 1.0, %v6759_v27  ;;  %v4103_v57 = vmul.f32 0.5, %v3949_v30 }
 0x749   : > { %6770 = verf.f32 %v4166_v6  ;;  %v4409_v20 = vpack.c.bf16 %v4351_v59, %v4349_v45  ;;  %v4289_v42 = vadd.f32 1.0, %v6761_v50 }
 0x74a   : > { %6772 = verf.f32 %v4167_v25  ;;  %v10277_v21 = vpop.f32.mrb[212].mxu0  ;;  %v4352_v41 = vmul.f32 %v4288_v63, %v4096_v54 }
 0x74b   : > { %v6763_v1 = vpop.eup %6762  ;;  %v4168_v55 = vmul.f32 0.70710677, %v10277_v21  ;;  %v10280_v9 = vpop.f32.mrb[213].mxu0  ;;  %4612 = vmatprep.mubr.bf16.mxu1 %v4409_v20  ;;  %v4353_v16 = vmul.f32 %v4289_v42, %v4097_v53  ;;  %v4104_v30 = vmul.f32 0.5, %v10277_v21 }
 0x74c   : > { %v6765_v23 = vpop.eup %6764  ;;  %v4290_v62 = vadd.f32 1.0, %v6763_v1  ;;  %v4169_v52 = vmul.f32 0.70710677, %v10280_v9  ;;  %4613 = vmatmul.mubr.bf16.gmra.mrb[200].mxu1 %v4408_v4  ;;  %v4105_v20 = vmul.f32 0.5, %v10280_v9 }
 0x74d   : > { %v4291_v3 = vadd.f32 1.0, %v6765_v23  ;;  %6774 = verf.f32 %v4168_v55 }
 0x74e   : > { %v4354_v10 = vmul.f32 %v4290_v62, %v4098_v39  ;;  %6776 = verf.f32 %v4169_v52  ;;  %v3959_v51 = vpop.f32.mrb[214].mxu0 }
 0x74f   : > { %v6767_v8 = vpop.eup %6766  ;;  %v4355_v15 = vmul.f32 %v4291_v3, %v4099_v26  ;;  %v4170_v58 = vmul.f32 0.70710677, %v3959_v51  ;;  %v3961_v47 = vpop.f32.mrb[215].mxu0  ;;  %v4106_v50 = vmul.f32 0.5, %v3959_v51 }
 0x750   : > { %v6769_v38 = vpop.eup %6768  ;;  %v4171_v44 = vmul.f32 0.70710677, %v3961_v47  ;;  %v4410_v24 = vpack.c.bf16 %v4354_v10, %v4352_v41  ;;  %v4292_v12 = vadd.f32 1.0, %v6767_v8  ;;  %v4107_v63 = vmul.f32 0.5, %v3961_v47 }
 0x751   : > { %6778 = verf.f32 %v4170_v58  ;;  %v4411_v46 = vpack.c.bf16 %v4355_v15, %v4353_v16  ;;  %v4293_v29 = vadd.f32 1.0, %v6769_v38 }
 0x752   : > { %6780 = verf.f32 %v4171_v44  ;;  %v10285_v7 = vpop.f32.mrb[216].mxu0  ;;  %v4356_v22 = vmul.f32 %v4292_v12, %v4100_v13 }
 0x753   : > { %v6771_v11 = vpop.eup %6770  ;;  %v4172_v19 = vmul.f32 0.70710677, %v10285_v7  ;;  %v10288_v49 = vpop.f32.mrb[217].mxu0  ;;  %4620 = vmatprep.mubr.bf16.mxu1 %v4411_v46  ;;  %v4357_v31 = vmul.f32 %v4293_v29, %v4101_v35  ;;  %v4108_v47 = vmul.f32 0.5, %v10285_v7 }
 0x754   : > { %v6773_v33 = vpop.eup %6772  ;;  %v4294_v37 = vadd.f32 1.0, %v6771_v11  ;;  %v4173_v61 = vmul.f32 0.70710677, %v10288_v49  ;;  %4621 = vmatmul.mubr.bf16.gmra.mrb[204].mxu1 %v4410_v24  ;;  %v4109_v46 = vmul.f32 0.5, %v10288_v49 }
 0x755   : > { %v4295_v28 = vadd.f32 1.0, %v6773_v33  ;;  %6782 = verf.f32 %v4172_v19 }
 0x756   : > { %v4358_v56 = vmul.f32 %v4294_v37, %v4102_v18  ;;  %6784 = verf.f32 %v4173_v61  ;;  %v3971_v2 = vpop.f32.mrb[218].mxu0 }
 0x757   : > { %v6775_v0 = vpop.eup %6774  ;;  %v4359_v17 = vmul.f32 %v4295_v28, %v4103_v57  ;;  %v4174_v40 = vmul.f32 0.70710677, %v3971_v2  ;;  %v3973_v32 = vpop.f32.mrb[219].mxu0  ;;  %v4110_v38 = vmul.f32 0.5, %v3971_v2 }
 0x758   : > { %v6777_v60 = vpop.eup %6776  ;;  %v4175_v14 = vmul.f32 0.70710677, %v3973_v32  ;;  %v4412_v36 = vpack.c.bf16 %v4358_v56, %v4356_v22  ;;  %v4296_v43 = vadd.f32 1.0, %v6775_v0  ;;  %v4111_v12 = vmul.f32 0.5, %v3973_v32 }
 0x759   : > { %6786 = verf.f32 %v4174_v40  ;;  %v4413_v48 = vpack.c.bf16 %v4359_v17, %v4357_v31  ;;  %v4297_v27 = vadd.f32 1.0, %v6777_v60 }
 0x75a   : > { %6788 = verf.f32 %v4175_v14  ;;  %v10293_v5 = vpop.f32.mrb[220].mxu0  ;;  %v4360_v42 = vmul.f32 %v4296_v43, %v4104_v30 }
 0x75b   : > { %v6779_v34 = vpop.eup %6778  ;;  %v4176_v45 = vmul.f32 0.70710677, %v10293_v5  ;;  %v10296_v59 = vpop.f32.mrb[221].mxu0  ;;  %4628 = vmatprep.mubr.bf16.mxu1 %v4413_v48  ;;  %v4361_v39 = vmul.f32 %v4297_v27, %v4105_v20  ;;  %v4112_v32 = vmul.f32 0.5, %v10293_v5 }
 0x75c   : > { %v6781_v6 = vpop.eup %6780  ;;  %v4298_v25 = vadd.f32 1.0, %v6779_v34  ;;  %v4177_v4 = vmul.f32 0.70710677, %v10296_v59  ;;  %4629 = vmatmul.mubr.bf16.gmra.mrb[208].mxu1 %v4412_v36  ;;  %v4113_v48 = vmul.f32 0.5, %v10296_v59 }
 0x75d   : > { %v4299_v1 = vadd.f32 1.0, %v6781_v6  ;;  %6790 = verf.f32 %v4176_v45 }
 0x75e   : > { %v4362_v55 = vmul.f32 %v4298_v25, %v4106_v50  ;;  %6792 = verf.f32 %v4177_v4  ;;  %v3983_v23 = vpop.f32.mrb[222].mxu0 }
 0x75f   : > { %v6783_v54 = vpop.eup %6782  ;;  %v4363_v62 = vmul.f32 %v4299_v1, %v4107_v63  ;;  %v4178_v52 = vmul.f32 0.70710677, %v3983_v23  ;;  %v3985_v53 = vpop.f32.mrb[223].mxu0  ;;  %v4114_v60 = vmul.f32 0.5, %v3983_v23 }
 0x760   : > { %v6785_v21 = vpop.eup %6784  ;;  %v4179_v26 = vmul.f32 0.70710677, %v3985_v53  ;;  %v4414_v3 = vpack.c.bf16 %v4362_v55, %v4360_v42  ;;  %v4300_v10 = vadd.f32 1.0, %v6783_v54  ;;  %v4115_v43 = vmul.f32 0.5, %v3985_v53 }
 0x761   : > { %6794 = verf.f32 %v4178_v52  ;;  %v4415_v41 = vpack.c.bf16 %v4363_v62, %v4361_v39  ;;  %v4301_v8 = vadd.f32 1.0, %v6785_v21 }
 0x762   : > { %6796 = verf.f32 %v4179_v26  ;;  %v10301_v9 = vpop.f32.mrb[224].mxu0  ;;  %v4364_v29 = vmul.f32 %v4300_v10, %v4108_v47 }
 0x763   : > { %v6787_v51 = vpop.eup %6786  ;;  %v4180_v16 = vmul.f32 0.70710677, %v10301_v9  ;;  %v10304_v15 = vpop.f32.mrb[225].mxu0  ;;  %4636 = vmatprep.mubr.bf16.mxu1 %v4415_v41  ;;  %v4365_v18 = vmul.f32 %v4301_v8, %v4109_v46  ;;  %v4116_v53 = vmul.f32 0.5, %v10301_v9 }
 0x764   : > { %v6789_v58 = vpop.eup %6788  ;;  %v4302_v44 = vadd.f32 1.0, %v6787_v51  ;;  %v4181_v24 = vmul.f32 0.70710677, %v10304_v15  ;;  %4637 = vmatmul.mubr.bf16.gmra.mrb[212].mxu1 %v4414_v3  ;;  %v4117_v41 = vmul.f32 0.5, %v10304_v15 }
 0x765   : > { %v4303_v11 = vadd.f32 1.0, %v6789_v58  ;;  %6798 = verf.f32 %v4180_v16 }
 0x766   : > { %v4366_v19 = vmul.f32 %v4302_v44, %v4110_v38  ;;  %6800 = verf.f32 %v4181_v24  ;;  %v3995_v33 = vpop.f32.mrb[226].mxu0 }
 0x767   : > { %v6791_v13 = vpop.eup %6790  ;;  %v4367_v37 = vmul.f32 %v4303_v11, %v4111_v12  ;;  %v4182_v61 = vmul.f32 0.70710677, %v3995_v33  ;;  %v3997_v35 = vpop.f32.mrb[227].mxu0  ;;  %v4118_v21 = vmul.f32 0.5, %v3995_v33 }
 0x768   : > { %v6793_v7 = vpop.eup %6792  ;;  %v4183_v57 = vmul.f32 0.70710677, %v3997_v35  ;;  %v4416_v28 = vpack.c.bf16 %v4366_v19, %v4364_v29  ;;  %v4304_v56 = vadd.f32 1.0, %v6791_v13  ;;  %v4119_v10 = vmul.f32 0.5, %v3997_v35 }
 0x769   : > { %6802 = verf.f32 %v4182_v61  ;;  %v4417_v22 = vpack.c.bf16 %v4367_v37, %v4365_v18  ;;  %v4305_v0 = vadd.f32 1.0, %v6793_v7 }
 0x76a   : > { %6804 = verf.f32 %v4183_v57  ;;  %v10309_v49 = vpop.f32.mrb[228].mxu0  ;;  %v4368_v27 = vmul.f32 %v4304_v56, %v4112_v32 }
 0x76b   : > { %v6795_v2 = vpop.eup %6794  ;;  %v4184_v31 = vmul.f32 0.70710677, %v10309_v49  ;;  %v10312_v17 = vpop.f32.mrb[229].mxu0  ;;  %4644 = vmatprep.mubr.bf16.mxu1 %v4417_v22  ;;  %v4369_v50 = vmul.f32 %v4305_v0, %v4113_v48  ;;  %v4120_v35 = vmul.f32 0.5, %v10309_v49 }
 0x76c   : > { %v6797_v40 = vpop.eup %6796  ;;  %v4306_v14 = vadd.f32 1.0, %v6795_v2  ;;  %v4185_v36 = vmul.f32 0.70710677, %v10312_v17  ;;  %4645 = vmatmul.mubr.bf16.gmra.mrb[216].mxu1 %v4416_v28  ;;  %v4121_v22 = vmul.f32 0.5, %v10312_v17 }
 0x76d   : > { %v4307_v34 = vadd.f32 1.0, %v6797_v40  ;;  %6806 = verf.f32 %v4184_v31 }
 0x76e   : > { %v4370_v45 = vmul.f32 %v4306_v14, %v4114_v60  ;;  %6808 = verf.f32 %v4185_v36  ;;  %v4007_v6 = vpop.f32.mrb[230].mxu0 }
 0x76f   : > { %v6799_v30 = vpop.eup %6798  ;;  %v4371_v25 = vmul.f32 %v4307_v34, %v4115_v43  ;;  %v4186_v4 = vmul.f32 0.70710677, %v4007_v6  ;;  %v4009_v20 = vpop.f32.mrb[231].mxu0  ;;  %v4122_v7 = vmul.f32 0.5, %v4007_v6 }
 0x770   : > { %v6801_v5 = vpop.eup %6800  ;;  %v4187_v63 = vmul.f32 0.70710677, %v4009_v20  ;;  %v4418_v1 = vpack.c.bf16 %v4370_v45, %v4368_v27  ;;  %v4308_v55 = vadd.f32 1.0, %v6799_v30  ;;  %v4123_v56 = vmul.f32 0.5, %v4009_v20 }
 0x771   : > { %6810 = verf.f32 %v4186_v4  ;;  %v4419_v42 = vpack.c.bf16 %v4371_v25, %v4369_v50  ;;  %v4309_v54 = vadd.f32 1.0, %v6801_v5 }
 0x772   : > { %6812 = verf.f32 %v4187_v63  ;;  %v10317_v59 = vpop.f32.mrb[232].mxu0  ;;  %v4372_v8 = vmul.f32 %v4308_v55, %v4116_v53 }
 0x773   : > { %v6803_v23 = vpop.eup %6802  ;;  %v4188_v39 = vmul.f32 0.70710677, %v10317_v59  ;;  %v10320_v62 = vpop.f32.mrb[233].mxu0  ;;  %4652 = vmatprep.mubr.bf16.mxu1 %v4419_v42  ;;  %v4373_v38 = vmul.f32 %v4309_v54, %v4117_v41  ;;  %v4124_v20 = vmul.f32 0.5, %v10317_v59 }
 0x774   : > { %v6805_v52 = vpop.eup %6804  ;;  %v4310_v26 = vadd.f32 1.0, %v6803_v23  ;;  %v4189_v3 = vmul.f32 0.70710677, %v10320_v62  ;;  %4653 = vmatmul.mubr.bf16.gmra.mrb[220].mxu1 %v4418_v1  ;;  %v4125_v42 = vmul.f32 0.5, %v10320_v62 }
 0x775   : > { %v4311_v51 = vadd.f32 1.0, %v6805_v52  ;;  %6814 = verf.f32 %v4188_v39 }
 0x776   : > { %v4374_v16 = vmul.f32 %v4310_v26, %v4118_v21  ;;  %6816 = verf.f32 %v4189_v3  ;;  %v4019_v58 = vpop.f32.mrb[234].mxu0 }
 0x777   : > { %v6807_v47 = vpop.eup %6806  ;;  %v4375_v44 = vmul.f32 %v4311_v51, %v4119_v10  ;;  %v4190_v24 = vmul.f32 0.70710677, %v4019_v58  ;;  %v4021_v46 = vpop.f32.mrb[235].mxu0  ;;  %v4126_v5 = vmul.f32 0.5, %v4019_v58 }
 0x778   : > { %v6809_v9 = vpop.eup %6808  ;;  %v4191_v12 = vmul.f32 0.70710677, %v4021_v46  ;;  %v4420_v11 = vpack.c.bf16 %v4374_v16, %v4372_v8  ;;  %v4312_v19 = vadd.f32 1.0, %v6807_v47  ;;  %v4127_v55 = vmul.f32 0.5, %v4021_v46 }
 0x779   : > { %6818 = verf.f32 %v4190_v24  ;;  %v4421_v29 = vpack.c.bf16 %v4375_v44, %v4373_v38  ;;  %v4313_v13 = vadd.f32 1.0, %v6809_v9 }
 0x77a   : > { %6820 = verf.f32 %v4191_v12  ;;  %v10325_v15 = vpop.f32.mrb[236].mxu0  ;;  %v4376_v0 = vmul.f32 %v4312_v19, %v4120_v35 }
 0x77b   : > { %v6811_v33 = vpop.eup %6810  ;;  %v4192_v18 = vmul.f32 0.70710677, %v10325_v15  ;;  %v10328_v37 = vpop.f32.mrb[237].mxu0  ;;  %4660 = vmatprep.mubr.bf16.mxu1 %v4421_v29  ;;  %v4377_v60 = vmul.f32 %v4313_v13, %v4121_v22  ;;  %v4128_v46 = vmul.f32 0.5, %v10325_v15 }
 0x77c   : > { %v6813_v61 = vpop.eup %6812  ;;  %v4314_v57 = vadd.f32 1.0, %v6811_v33  ;;  %v4193_v28 = vmul.f32 0.70710677, %v10328_v37  ;;  %4661 = vmatmul.mubr.bf16.gmra.mrb[224].mxu1 %v4420_v11  ;;  %v4129_v29 = vmul.f32 0.5, %v10328_v37 }
 0x77d   : > { %v4315_v2 = vadd.f32 1.0, %v6813_v61  ;;  %6822 = verf.f32 %v4192_v18 }
 0x77e   : > { %v4378_v31 = vmul.f32 %v4314_v57, %v4122_v7  ;;  %6824 = verf.f32 %v4193_v28  ;;  %v4031_v40 = vpop.f32.mrb[238].mxu0 }
 0x77f   : > { %v6815_v32 = vpop.eup %6814  ;;  %v4379_v14 = vmul.f32 %v4315_v2, %v4123_v56  ;;  %v4194_v36 = vmul.f32 0.70710677, %v4031_v40  ;;  %v4033_v48 = vpop.f32.mrb[239].mxu0  ;;  %v4130_v9 = vmul.f32 0.5, %v4031_v40 }
 0x780   : > { %v6817_v49 = vpop.eup %6816  ;;  %v4195_v43 = vmul.f32 0.70710677, %v4033_v48  ;;  %v4422_v34 = vpack.c.bf16 %v4378_v31, %v4376_v0  ;;  %v4316_v45 = vadd.f32 1.0, %v6815_v32  ;;  %v4131_v19 = vmul.f32 0.5, %v4033_v48 }
 0x781   : > { %6826 = verf.f32 %v4194_v36  ;;  %v4423_v27 = vpack.c.bf16 %v4379_v14, %v4377_v60  ;;  %v4317_v30 = vadd.f32 1.0, %v6817_v49 }
 0x782   : > { %6828 = verf.f32 %v4195_v43  ;;  %v10333_v17 = vpop.f32.mrb[240].mxu0  ;;  %v4380_v54 = vmul.f32 %v4316_v45, %v4124_v20 }
 0x783   : > { %v6819_v6 = vpop.eup %6818  ;;  %v4196_v50 = vmul.f32 0.70710677, %v10333_v17  ;;  %v10336_v25 = vpop.f32.mrb[241].mxu0  ;;  %4668 = vmatprep.mubr.bf16.mxu1 %v4423_v27  ;;  %v4381_v21 = vmul.f32 %v4317_v30, %v4125_v42  ;;  %v4132_v48 = vmul.f32 0.5, %v10333_v17 }
 0x784   : > { %v6821_v4 = vpop.eup %6820  ;;  %v4318_v63 = vadd.f32 1.0, %v6819_v6  ;;  %v4197_v1 = vmul.f32 0.70710677, %v10336_v25  ;;  %4669 = vmatmul.mubr.bf16.gmra.mrb[228].mxu1 %v4422_v34  ;;  %v4133_v27 = vmul.f32 0.5, %v10336_v25 }
 0x785   : > { %v4319_v23 = vadd.f32 1.0, %v6821_v4  ;;  %6830 = verf.f32 %v4196_v50 }
 0x786   : > { %v4382_v39 = vmul.f32 %v4318_v63, %v4126_v5  ;;  %6832 = verf.f32 %v4197_v1  ;;  %v4043_v52 = vpop.f32.mrb[242].mxu0 }
 0x787   : > { %v6823_v53 = vpop.eup %6822  ;;  %v4383_v26 = vmul.f32 %v4319_v23, %v4127_v55  ;;  %v4198_v3 = vmul.f32 0.70710677, %v4043_v52  ;;  %v4045_v41 = vpop.f32.mrb[243].mxu0  ;;  %v4134_v49 = vmul.f32 0.5, %v4043_v52 }
 0x788   : > { %v6825_v59 = vpop.eup %6824  ;;  %v4199_v10 = vmul.f32 0.70710677, %v4045_v41  ;;  %v4424_v51 = vpack.c.bf16 %v4382_v39, %v4380_v54  ;;  %v4320_v16 = vadd.f32 1.0, %v6823_v53  ;;  %v4135_v45 = vmul.f32 0.5, %v4045_v41 }
 0x789   : > { %6834 = verf.f32 %v4198_v3  ;;  %v4425_v8 = vpack.c.bf16 %v4383_v26, %v4381_v21  ;;  %v4321_v47 = vadd.f32 1.0, %v6825_v59 }
 0x78a   : > { %6836 = verf.f32 %v4199_v10  ;;  %v10341_v62 = vpop.f32.mrb[244].mxu0  ;;  %v4384_v13 = vmul.f32 %v4320_v16, %v4128_v46 }
 0x78b   : > { %v6827_v58 = vpop.eup %6826  ;;  %v4200_v38 = vmul.f32 0.70710677, %v10341_v62  ;;  %v10344_v44 = vpop.f32.mrb[245].mxu0  ;;  %4676 = vmatprep.mubr.bf16.mxu1 %v4425_v8  ;;  %v4385_v7 = vmul.f32 %v4321_v47, %v4129_v29  ;;  %v4136_v41 = vmul.f32 0.5, %v10341_v62 }
 0x78c   : > { %v6829_v24 = vpop.eup %6828  ;;  %v4322_v12 = vadd.f32 1.0, %v6827_v58  ;;  %v4201_v11 = vmul.f32 0.70710677, %v10344_v44  ;;  %4677 = vmatmul.mubr.bf16.gmra.mrb[232].mxu1 %v4424_v51  ;;  %v4137_v8 = vmul.f32 0.5, %v10344_v44 }
 0x78d   : > { %v4323_v33 = vadd.f32 1.0, %v6829_v24  ;;  %6838 = verf.f32 %v4200_v38 }
 0x78e   : > { %v4386_v18 = vmul.f32 %v4322_v12, %v4130_v9  ;;  %6840 = verf.f32 %v4201_v11  ;;  %v4055_v61 = vpop.f32.mrb[246].mxu0 }
 0x78f   : > { %v6831_v35 = vpop.eup %6830  ;;  %v4387_v57 = vmul.f32 %v4323_v33, %v4131_v19  ;;  %v4202_v28 = vmul.f32 0.70710677, %v4055_v61  ;;  %v4057_v22 = vpop.f32.mrb[247].mxu0  ;;  %v4138_v59 = vmul.f32 0.5, %v4055_v61 }
 0x790   : > { %v6833_v15 = vpop.eup %6832  ;;  %v4203_v56 = vmul.f32 0.70710677, %v4057_v22  ;;  %v4426_v2 = vpack.c.bf16 %v4386_v18, %v4384_v13  ;;  %v4324_v31 = vadd.f32 1.0, %v6831_v35  ;;  %v4139_v16 = vmul.f32 0.5, %v4057_v22 }
 0x791   : > { %6842 = verf.f32 %v4202_v28  ;;  %v4427_v0 = vpack.c.bf16 %v4387_v57, %v4385_v7  ;;  %v4325_v32 = vadd.f32 1.0, %v6833_v15 }
 0x792   : > { %6844 = verf.f32 %v4203_v56  ;;  %v10349_v37 = vpop.f32.mrb[248].mxu0  ;;  %v4388_v30 = vmul.f32 %v4324_v31, %v4132_v48 }
 0x793   : > { %v6835_v40 = vpop.eup %6834  ;;  %v4204_v60 = vmul.f32 0.70710677, %v10349_v37  ;;  %v10352_v14 = vpop.f32.mrb[249].mxu0  ;;  %4684 = vmatprep.mubr.bf16.mxu1 %v4427_v0  ;;  %v4389_v5 = vmul.f32 %v4325_v32, %v4133_v27  ;;  %v4140_v7 = vmul.f32 0.5, %v10349_v37 }
 0x794   : > { %v6837_v36 = vpop.eup %6836  ;;  %v4326_v43 = vadd.f32 1.0, %v6835_v40  ;;  %v4205_v34 = vmul.f32 0.70710677, %v10352_v14  ;;  %4685 = vmatmul.mubr.bf16.gmra.mrb[236].mxu1 %v4426_v2  ;;  %v4141_v22 = vmul.f32 0.5, %v10352_v14 }
 0x795   : > { %v4327_v6 = vadd.f32 1.0, %v6837_v36  ;;  %6846 = verf.f32 %v4204_v60 }
 0x796   : > { %v4390_v50 = vmul.f32 %v4326_v43, %v4134_v49  ;;  %6848 = verf.f32 %v4205_v34  ;;  %v4067_v4 = vpop.f32.mrb[250].mxu0 }
 0x797   : > { %v6839_v20 = vpop.eup %6838  ;;  %v4391_v63 = vmul.f32 %v4327_v6, %v4135_v45  ;;  %v4206_v1 = vmul.f32 0.70710677, %v4067_v4  ;;  %v4069_v42 = vpop.f32.mrb[251].mxu0  ;;  %v4142_v57 = vmul.f32 0.5, %v4067_v4 }
 0x798   : > { %v6841_v17 = vpop.eup %6840  ;;  %v4207_v55 = vmul.f32 0.70710677, %v4069_v42  ;;  %v4428_v23 = vpack.c.bf16 %v4390_v50, %v4388_v30  ;;  %v4328_v39 = vadd.f32 1.0, %v6839_v20  ;;  %v4143_v15 = vmul.f32 0.5, %v4069_v42 }
 0x799   : > { %6850 = verf.f32 %v4206_v1  ;;  %v4429_v54 = vpack.c.bf16 %v4391_v63, %v4389_v5  ;;  %v4329_v53 = vadd.f32 1.0, %v6841_v17 }
 0x79a   : > { %6852 = verf.f32 %v4207_v55  ;;  %v4073_v25 = vpop.f32.mrb[252].mxu0  ;;  %v4392_v47 = vmul.f32 %v4328_v39, %v4136_v41 }
 0x79b   : > { %v6843_v52 = vpop.eup %6842  ;;  %v4208_v21 = vmul.f32 0.70710677, %v4073_v25  ;;  %v4075_v26 = vpop.f32.mrb[253].mxu0  ;;  %4692 = vmatprep.mubr.bf16.mxu1 %v4429_v54  ;;  %v4393_v9 = vmul.f32 %v4329_v53, %v4137_v8  ;;  %v4144_v27 = vmul.f32 0.5, %v4073_v25 }
 0x79c   : > { %v6845_v3 = vpop.eup %6844  ;;  %v4330_v10 = vadd.f32 1.0, %v6843_v52  ;;  %v4209_v51 = vmul.f32 0.70710677, %v4075_v26  ;;  %4693 = vmatmul.mubr.bf16.gmra.mrb[240].mxu1 %v4428_v23  ;;  %v4145_v14 = vmul.f32 0.5, %v4075_v26 }
 0x79d   : > { %v4331_v58 = vadd.f32 1.0, %v6845_v3  ;;  %6854 = verf.f32 %v4208_v21 }
 0x79e   : > { %v4394_v38 = vmul.f32 %v4330_v10, %v4138_v59  ;;  %6856 = verf.f32 %v4209_v51  ;;  %v4079_v24 = vpop.f32.mrb[254].mxu0 }
 0x79f   : > { %v6847_v46 = vpop.eup %6846  ;;  %v4395_v12 = vmul.f32 %v4331_v58, %v4139_v16  ;;  %v4210_v11 = vmul.f32 0.70710677, %v4079_v24  ;;  %v4081_v29 = vpop.f32.mrb[255].mxu0  ;;  %v4146_v45 = vmul.f32 0.5, %v4079_v24 }
 0x7a0   : > { %v6849_v19 = vpop.eup %6848  ;;  %v4211_v62 = vmul.f32 0.70710677, %v4081_v29  ;;  %v4430_v33 = vpack.c.bf16 %v4394_v38, %v4392_v47  ;;  %v4332_v18 = vadd.f32 1.0, %v6847_v46  ;;  %v4147_v30 = vmul.f32 0.5, %v4081_v29 }
 0x7a1   : > { %6858 = verf.f32 %v4210_v11  ;;  %v4431_v13 = vpack.c.bf16 %v4395_v12, %v4393_v9  ;;  %v4333_v61 = vadd.f32 1.0, %v6849_v19 }
 0x7a2   : > { %6860 = verf.f32 %v4211_v62  ;;  %v4396_v2 = vmul.f32 %v4332_v18, %v4140_v7 }
 0x7a3   : > { %v6851_v44 = vpop.eup %6850  ;;  %4700 = vmatprep.mubr.bf16.mxu1 %v4431_v13  ;;  %v4397_v40 = vmul.f32 %v4333_v61, %v4141_v22 }
 0x7a4   : > { %v6853_v35 = vpop.eup %6852  ;;  %v4334_v28 = vadd.f32 1.0, %v6851_v44  ;;  %4701 = vmatmul.mubr.bf16.gmra.mrb[244].mxu1 %v4430_v33 }
 0x7a5   : > { %v4335_v56 = vadd.f32 1.0, %v6853_v35 }
 0x7a6   : > { %v4398_v0 = vmul.f32 %v4334_v28, %v4142_v57 }
 0x7a7   : > { %v6855_v31 = vpop.eup %6854  ;;  %v4399_v32 = vmul.f32 %v4335_v56, %v4143_v15 }
 0x7a8   : > { %v6857_v60 = vpop.eup %6856  ;;  %v4432_v36 = vpack.c.bf16 %v4398_v0, %v4396_v2  ;;  %v4336_v49 = vadd.f32 1.0, %v6855_v31 }
 0x7a9   : > { %v4433_v48 = vpack.c.bf16 %v4399_v32, %v4397_v40  ;;  %v4337_v34 = vadd.f32 1.0, %v6857_v60 }
 0x7aa   : > { %v4400_v4 = vmul.f32 %v4336_v49, %v4144_v27 }
 0x7ab   : > { %v6859_v43 = vpop.eup %6858  ;;  %4708 = vmatprep.mubr.bf16.mxu1 %v4433_v48  ;;  %v4401_v5 = vmul.f32 %v4337_v34, %v4145_v14 }
 0x7ac   : > { %v6861_v37 = vpop.eup %6860  ;;  %v4338_v6 = vadd.f32 1.0, %v6859_v43  ;;  %4709 = vmatmul.mubr.bf16.gmra.mrb[248].mxu1 %v4432_v36 }
 0x7ad   : > { %v4339_v50 = vadd.f32 1.0, %v6861_v37 }
 0x7ae   : > { %v4402_v20 = vmul.f32 %v4338_v6, %v4146_v45 }
 0x7af   : > { %v4403_v63 = vmul.f32 %v4339_v50, %v4147_v30 }
 0x7b0   : > { %v4434_v1 = vpack.c.bf16 %v4402_v20, %v4400_v4 }
 0x7b1   : > { %v4435_v42 = vpack.c.bf16 %v4403_v63, %v4401_v5 }
 0x7b3   : > { %4716 = vmatprep.mubr.bf16.mxu1 %v4435_v42 }
 0x7b4   : > { %4717 = vmatmul.mubr.bf16.gmra.mrb[252].mxu1 %v4434_v1 }
 0x80f   : > { %v5401_v17 = vpop.f32.mrb[192].mxu1 }
 0x810   : > { %v5402_v55 = vpop.f32.mrb[193].mxu1 }
 0x811   : > { %v10361_v23 = vadd.f32 %v5402_v55, %v5401_v17  ;;  %v5404_v54 = vpop.f32.mrb[194].mxu1 }
 0x812   : > { %v5405_v39 = vpop.f32.mrb[195].mxu1 }
 0x813   : > { %v10363_v25 = vadd.f32 %v5405_v39, %v5404_v54  ;;  %4725 = vadd.xlane.f32.xlu0 %v10361_v23 }
 0x815   : > { %4727 = vadd.xlane.f32.xlu1 %v10363_v25 }
 0x817   : > { %v5407_v52 = vpop.f32.mrb[196].mxu1 }
 0x818   : > { %v5408_v53 = vpop.f32.mrb[197].mxu1 }
 0x819   : > { %v10367_v21 = vadd.f32 %v5408_v53, %v5407_v52  ;;  %v5410_v26 = vpop.f32.mrb[198].mxu1 }
 0x81a   : > { %v5411_v3 = vpop.f32.mrb[199].mxu1 }
 0x81b   : > { %v10369_v41 = vadd.f32 %v5411_v3, %v5410_v26  ;;  %4729 = vadd.xlane.f32.xlu0 %v10367_v21 }
 0x81d   : > { %4731 = vadd.xlane.f32.xlu1 %v10369_v41 }
 0x81f   : > { %v5413_v59 = vpop.f32.mrb[200].mxu1 }
 0x820   : > { %v5414_v10 = vpop.f32.mrb[201].mxu1 }
 0x821   : > { %v10373_v51 = vadd.f32 %v5414_v10, %v5413_v59  ;;  %v5416_v8 = vpop.f32.mrb[202].mxu1 }
 0x822   : > { %v5417_v16 = vpop.f32.mrb[203].mxu1 }
 0x823   : > { %v10375_v58 = vadd.f32 %v5417_v16, %v5416_v8  ;;  %4733 = vadd.xlane.f32.xlu0 %v10373_v51 }
 0x825   : > { %4735 = vadd.xlane.f32.xlu1 %v10375_v58 }
 0x827   : > { %v5419_v47 = vpop.f32.mrb[204].mxu1 }
 0x828   : > { %v5420_v38 = vpop.f32.mrb[205].mxu1 }
 0x829   : > { %v10379_v24 = vadd.f32 %v5420_v38, %v5419_v47  ;;  %v5422_v46 = vpop.f32.mrb[206].mxu1 }
 0x82a   : > { %v5423_v9 = vpop.f32.mrb[207].mxu1 }
 0x82b   : > { %v10381_v12 = vadd.f32 %v5423_v9, %v5422_v46  ;;  %4737 = vadd.xlane.f32.xlu0 %v10379_v24 }
 0x82d   : > { %4739 = vadd.xlane.f32.xlu1 %v10381_v12 }
 0x82f   : > { %v5425_v11 = vpop.f32.mrb[208].mxu1 }
 0x830   : > { %v5426_v29 = vpop.f32.mrb[209].mxu1 }
 0x831   : > { %v10385_v19 = vadd.f32 %v5426_v29, %v5425_v11  ;;  %v5428_v62 = vpop.f32.mrb[210].mxu1 }
 0x832   : > { %v5429_v33 = vpop.f32.mrb[211].mxu1 }
 0x833   : > { %v10387_v13 = vadd.f32 %v5429_v33, %v5428_v62  ;;  %4741 = vadd.xlane.f32.xlu0 %v10385_v19 }
 0x835   : > { %4743 = vadd.xlane.f32.xlu1 %v10387_v13 }
 0x837   : > { %v5431_v18 = vpop.f32.mrb[212].mxu1 }
 0x838   : > { %v5432_v44 = vpop.f32.mrb[213].mxu1 }
 0x839   : > { %v10391_v61 = vadd.f32 %v5432_v44, %v5431_v18  ;;  %v5434_v35 = vpop.f32.mrb[214].mxu1 }
 0x83a   : > { %v5435_v7 = vpop.f32.mrb[215].mxu1 }
 0x83b   : > { %v10393_v57 = vadd.f32 %v5435_v7, %v5434_v35  ;;  %4745 = vadd.xlane.f32.xlu0 %v10391_v61 }
 0x83d   : > { %4747 = vadd.xlane.f32.xlu1 %v10393_v57 }
 0x83f   : > { %v5437_v28 = vpop.f32.mrb[216].mxu1 }
 0x840   : > { %v5438_v22 = vpop.f32.mrb[217].mxu1 }
 0x841   : > { %v10397_v15 = vadd.f32 %v5438_v22, %v5437_v28  ;;  %v5440_v56 = vpop.f32.mrb[218].mxu1 }
 0x842   : > { %v5441_v2 = vpop.f32.mrb[219].mxu1 }
 0x843   : > { %v10399_v0 = vadd.f32 %v5441_v2, %v5440_v56  ;;  %4749 = vadd.xlane.f32.xlu0 %v10397_v15 }
 0x845   : > { %4751 = vadd.xlane.f32.xlu1 %v10399_v0 }
 0x847   : > { %v5443_v31 = vpop.f32.mrb[220].mxu1 }
 0x848   : > { %v5444_v40 = vpop.f32.mrb[221].mxu1 }
 0x849   : > { %v10403_v32 = vadd.f32 %v5444_v40, %v5443_v31  ;;  %v5446_v60 = vpop.f32.mrb[222].mxu1 }
 0x84a   : > { %v5447_v36 = vpop.f32.mrb[223].mxu1 }
 0x84b   : > { %v10405_v48 = vadd.f32 %v5447_v36, %v5446_v60  ;;  %4753 = vadd.xlane.f32.xlu0 %v10403_v32 }
 0x84d   : > { %4755 = vadd.xlane.f32.xlu1 %v10405_v48 }
 0x84f   : > { %v5449_v49 = vpop.f32.mrb[224].mxu1 }
 0x850   : > { %v5450_v43 = vpop.f32.mrb[225].mxu1 }
 0x851   : > { %v10409_v34 = vadd.f32 %v5450_v43, %v5449_v49  ;;  %v5452_v37 = vpop.f32.mrb[226].mxu1 }
 0x852   : > { %v5453_v27 = vpop.f32.mrb[227].mxu1 }
 0x853   : > { %v10411_v45 = vadd.f32 %v5453_v27, %v5452_v37  ;;  %4757 = vadd.xlane.f32.xlu0 %v10409_v34 }
 0x855   : > { %4759 = vadd.xlane.f32.xlu1 %v10411_v45 }
 0x857   : > { %v5455_v6 = vpop.f32.mrb[228].mxu1 }
 0x858   : > { %v5456_v14 = vpop.f32.mrb[229].mxu1 }
 0x859   : > { %v10415_v30 = vadd.f32 %v5456_v14, %v5455_v6  ;;  %v5458_v50 = vpop.f32.mrb[230].mxu1  ;;  %v11733_v14 = vld [vmem:[#allocation15_spill] sm:$0xff] }
 0x85a   : > { %v5459_v4 = vpop.f32.mrb[231].mxu1 }
 0x85b   : > { %v10417_v20 = vadd.f32 %v5459_v4, %v5458_v50  ;;  %4761 = vadd.xlane.f32.xlu0 %v10415_v30 }
 0x85d   : > { %4763 = vadd.xlane.f32.xlu1 %v10417_v20 }
 0x85f   : > { %v5461_v5 = vpop.f32.mrb[232].mxu1 }
 0x860   : > { %v5462_v63 = vpop.f32.mrb[233].mxu1 }
 0x861   : > { %v10421_v1 = vadd.f32 %v5462_v63, %v5461_v5  ;;  %v5464_v42 = vpop.f32.mrb[234].mxu1 }
 0x862   : > { %v5465_v17 = vpop.f32.mrb[235].mxu1 }
 0x863   : > { %v10423_v55 = vadd.f32 %v5465_v17, %v5464_v42  ;;  %4765 = vadd.xlane.f32.xlu0 %v10421_v1 }
 0x865   : > { %4767 = vadd.xlane.f32.xlu1 %v10423_v55 }
 0x867   : > { %v5467_v54 = vpop.f32.mrb[236].mxu1 }
 0x868   : > { %v5468_v39 = vpop.f32.mrb[237].mxu1 }
 0x869   : > { %v10427_v52 = vadd.f32 %v5468_v39, %v5467_v54  ;;  %v5470_v53 = vpop.f32.mrb[238].mxu1 }
 0x86a   : > { %v5471_v26 = vpop.f32.mrb[239].mxu1 }
 0x86b   : > { %v10429_v3 = vadd.f32 %v5471_v26, %v5470_v53  ;;  %4769 = vadd.xlane.f32.xlu0 %v10427_v52 }
 0x86d   : > { %4771 = vadd.xlane.f32.xlu1 %v10429_v3 }
 0x86f   : > { %v5473_v59 = vpop.f32.mrb[240].mxu1 }
 0x870   : > { %v5474_v10 = vpop.f32.mrb[241].mxu1 }
 0x871   : > { %v10433_v8 = vadd.f32 %v5474_v10, %v5473_v59  ;;  %v5476_v16 = vpop.f32.mrb[242].mxu1 }
 0x872   : > { %v5477_v47 = vpop.f32.mrb[243].mxu1 }
 0x873   : > { %v10435_v38 = vadd.f32 %v5477_v47, %v5476_v16  ;;  %4773 = vadd.xlane.f32.xlu0 %v10433_v8 }
 0x875   : > { %4775 = vadd.xlane.f32.xlu1 %v10435_v38 }
 0x877   : > { %v5479_v46 = vpop.f32.mrb[244].mxu1 }
 0x878   : > { %v5480_v9 = vpop.f32.mrb[245].mxu1 }
 0x879   : > { %v10439_v11 = vadd.f32 %v5480_v9, %v5479_v46  ;;  %v5482_v29 = vpop.f32.mrb[246].mxu1 }
 0x87a   : > { %v5483_v62 = vpop.f32.mrb[247].mxu1 }
 0x87b   : > { %v10441_v33 = vadd.f32 %v5483_v62, %v5482_v29  ;;  %4777 = vadd.xlane.f32.xlu0 %v10439_v11 }
 0x87d   : > { %4779 = vadd.xlane.f32.xlu1 %v10441_v33 }
 0x87f   : > { %v5485_v18 = vpop.f32.mrb[248].mxu1 }
 0x880   : > { %v5486_v44 = vpop.f32.mrb[249].mxu1 }
 0x881   : > { %v10445_v35 = vadd.f32 %v5486_v44, %v5485_v18  ;;  %v5488_v7 = vpop.f32.mrb[250].mxu1 }
 0x882   : > { %v5489_v28 = vpop.f32.mrb[251].mxu1 }
 0x883   : > { %v10447_v22 = vadd.f32 %v5489_v28, %v5488_v7  ;;  %4781 = vadd.xlane.f32.xlu0 %v10445_v35 }
 0x885   : > { %4783 = vadd.xlane.f32.xlu1 %v10447_v22 }
 0x887   : > { %v5491_v56 = vpop.f32.mrb[252].mxu1 }
 0x888   : > { %v5492_v2 = vpop.f32.mrb[253].mxu1 }
 0x889   : > { %v10451_v31 = vadd.f32 %v5492_v2, %v5491_v56  ;;  %v5494_v40 = vpop.f32.mrb[254].mxu1 }
 0x88a   : > { %v5495_v60 = vpop.f32.mrb[255].mxu1 }
 0x88b   : > { %v10453_v36 = vadd.f32 %v5495_v60, %v5494_v40  ;;  %4785 = vadd.xlane.f32.xlu0 %v10451_v31 }
 0x88d   : > { %4787 = vadd.xlane.f32.xlu1 %v10453_v36 }
 0x8a0   : > { %v4726_v49 = vpop.xlane.xlu0 %4725 }
 0x8a1   : > { %v4789_v43 = vmul.f32 0.015625, %v4726_v49 }
 0x8a2   : > { %v4728_v37 = vpop.xlane.xlu1 %4727 }
 0x8a3   : > { %v4821_v27 = vsub.f32 %v10361_v23, %v4789_v43  ;;  %v4790_v6 = vmul.f32 0.015625, %v4728_v37 }
 0x8a5   : > { %v10459_v50 = vmul.f32 %v11733_v14, %v4821_v27  ;;  %v4822_v4 = vsub.f32 %v10363_v25, %v4790_v6 }
 0x8a7   : > { %v10463_v5 = vmul.f32 %v11733_v14, %v4822_v4  ;;  %v4885_v63 = vmul.f32 %v10459_v50, %v10459_v50 }
 0x8a8   : > { %v4730_v42 = vpop.xlane.xlu0 %4729 }
 0x8a9   : > { %v4791_v17 = vmul.f32 0.015625, %v4730_v42  ;;  %4917 = vadd.xlane.f32.xlu0 %v4885_v63  ;;  %v4886_v54 = vmul.f32 %v10463_v5, %v10463_v5 }
 0x8aa   : > { %v4732_v39 = vpop.xlane.xlu1 %4731 }
 0x8ab   : > { %v4823_v23 = vsub.f32 %v10367_v21, %v4791_v17  ;;  %v4792_v53 = vmul.f32 0.015625, %v4732_v39  ;;  %4919 = vadd.xlane.f32.xlu1 %v4886_v54 }
 0x8ad   : > { %v10471_v26 = vmul.f32 %v11733_v14, %v4823_v23  ;;  %v4824_v25 = vsub.f32 %v10369_v41, %v4792_v53 }
 0x8af   : > { %v10475_v59 = vmul.f32 %v11733_v14, %v4824_v25  ;;  %v4887_v10 = vmul.f32 %v10471_v26, %v10471_v26 }
 0x8b0   : > { %v4734_v16 = vpop.xlane.xlu0 %4733 }
 0x8b1   : > { %v4793_v47 = vmul.f32 0.015625, %v4734_v16  ;;  %4921 = vadd.xlane.f32.xlu0 %v4887_v10  ;;  %v4888_v46 = vmul.f32 %v10475_v59, %v10475_v59 }
 0x8b2   : > { %v4736_v21 = vpop.xlane.xlu1 %4735 }
 0x8b3   : > { %v4825_v9 = vsub.f32 %v10373_v51, %v4793_v47  ;;  %v4794_v29 = vmul.f32 0.015625, %v4736_v21  ;;  %4923 = vadd.xlane.f32.xlu1 %v4888_v46 }
 0x8b5   : > { %v10483_v62 = vmul.f32 %v11733_v14, %v4825_v9  ;;  %v4826_v41 = vsub.f32 %v10375_v58, %v4794_v29 }
 0x8b7   : > { %v10487_v18 = vmul.f32 %v11733_v14, %v4826_v41  ;;  %v4889_v44 = vmul.f32 %v10483_v62, %v10483_v62 }
 0x8b8   : > { %v4738_v7 = vpop.xlane.xlu0 %4737 }
 0x8b9   : > { %v4795_v28 = vmul.f32 0.015625, %v4738_v7  ;;  %4925 = vadd.xlane.f32.xlu0 %v4889_v44  ;;  %v4890_v56 = vmul.f32 %v10487_v18, %v10487_v18 }
 0x8ba   : > { %v4740_v51 = vpop.xlane.xlu1 %4739 }
 0x8bb   : > { %v4827_v2 = vsub.f32 %v10379_v24, %v4795_v28  ;;  %v4796_v40 = vmul.f32 0.015625, %v4740_v51  ;;  %4927 = vadd.xlane.f32.xlu1 %v4890_v56 }
 0x8bd   : > { %v10495_v60 = vmul.f32 %v11733_v14, %v4827_v2  ;;  %v4828_v58 = vsub.f32 %v10381_v12, %v4796_v40 }
 0x8bf   : > { %v10499_v49 = vmul.f32 %v11733_v14, %v4828_v58  ;;  %v4891_v43 = vmul.f32 %v10495_v60, %v10495_v60 }
 0x8c0   : > { %v4742_v37 = vpop.xlane.xlu0 %4741 }
 0x8c1   : > { %v4797_v27 = vmul.f32 0.015625, %v4742_v37  ;;  %4929 = vadd.xlane.f32.xlu0 %v4891_v43  ;;  %v4892_v6 = vmul.f32 %v10499_v49, %v10499_v49 }
 0x8c2   : > { %v4744_v24 = vpop.xlane.xlu1 %4743 }
 0x8c3   : > { %v4829_v4 = vsub.f32 %v10385_v19, %v4797_v27  ;;  %v4798_v63 = vmul.f32 0.015625, %v4744_v24  ;;  %4931 = vadd.xlane.f32.xlu1 %v4892_v6 }
 0x8c5   : > { %v10507_v42 = vmul.f32 %v11733_v14, %v4829_v4  ;;  %v4830_v12 = vsub.f32 %v10387_v13, %v4798_v63 }
 0x8c7   : > { %v10511_v17 = vmul.f32 %v11733_v14, %v4830_v12  ;;  %v4893_v54 = vmul.f32 %v10507_v42, %v10507_v42 }
 0x8c8   : > { %v4746_v39 = vpop.xlane.xlu0 %4745 }
 0x8c9   : > { %v4799_v23 = vmul.f32 0.015625, %v4746_v39  ;;  %4933 = vadd.xlane.f32.xlu0 %v4893_v54  ;;  %v4894_v53 = vmul.f32 %v10511_v17, %v10511_v17 }
 0x8ca   : > { %v4748_v19 = vpop.xlane.xlu1 %4747 }
 0x8cb   : > { %v4831_v25 = vsub.f32 %v10391_v61, %v4799_v23  ;;  %v4800_v10 = vmul.f32 0.015625, %v4748_v19  ;;  %4935 = vadd.xlane.f32.xlu1 %v4894_v53 }
 0x8cd   : > { %v10519_v16 = vmul.f32 %v11733_v14, %v4831_v25  ;;  %v4832_v13 = vsub.f32 %v10393_v57, %v4800_v10 }
 0x8cf   : > { %v10523_v47 = vmul.f32 %v11733_v14, %v4832_v13  ;;  %v4895_v46 = vmul.f32 %v10519_v16, %v10519_v16 }
 0x8d0   : > { %v4750_v21 = vpop.xlane.xlu0 %4749 }
 0x8d1   : > { %v4801_v9 = vmul.f32 0.015625, %v4750_v21  ;;  %4937 = vadd.xlane.f32.xlu0 %v4895_v46  ;;  %v4896_v29 = vmul.f32 %v10523_v47, %v10523_v47 }
 0x8d2   : > { %v4752_v61 = vpop.xlane.xlu1 %4751 }
 0x8d3   : > { %v4833_v41 = vsub.f32 %v10397_v15, %v4801_v9  ;;  %v4802_v44 = vmul.f32 0.015625, %v4752_v61  ;;  %4939 = vadd.xlane.f32.xlu1 %v4896_v29 }
 0x8d5   : > { %v10531_v7 = vmul.f32 %v11733_v14, %v4833_v41  ;;  %v4834_v57 = vsub.f32 %v10399_v0, %v4802_v44 }
 0x8d7   : > { %v10535_v28 = vmul.f32 %v11733_v14, %v4834_v57  ;;  %v4897_v56 = vmul.f32 %v10531_v7, %v10531_v7 }
 0x8d8   : > { %v4754_v51 = vpop.xlane.xlu0 %4753 }
 0x8d9   : > { %v4803_v2 = vmul.f32 0.015625, %v4754_v51  ;;  %4941 = vadd.xlane.f32.xlu0 %v4897_v56  ;;  %v4898_v40 = vmul.f32 %v10535_v28, %v10535_v28 }
 0x8da   : > { %v4756_v15 = vpop.xlane.xlu1 %4755 }
 0x8db   : > { %v4835_v58 = vsub.f32 %v10403_v32, %v4803_v2  ;;  %v4804_v43 = vmul.f32 0.015625, %v4756_v15  ;;  %4943 = vadd.xlane.f32.xlu1 %v4898_v40 }
 0x8dd   : > { %v10543_v37 = vmul.f32 %v11733_v14, %v4835_v58  ;;  %v4836_v0 = vsub.f32 %v10405_v48, %v4804_v43 }
 0x8df   : > { %v10547_v27 = vmul.f32 %v11733_v14, %v4836_v0  ;;  %v4899_v6 = vmul.f32 %v10543_v37, %v10543_v37 }
 0x8e0   : > { %v4758_v24 = vpop.xlane.xlu0 %4757 }
 0x8e1   : > { %v4805_v4 = vmul.f32 0.015625, %v4758_v24  ;;  %4945 = vadd.xlane.f32.xlu0 %v4899_v6  ;;  %v4900_v63 = vmul.f32 %v10547_v27, %v10547_v27 }
 0x8e2   : > { %v4760_v32 = vpop.xlane.xlu1 %4759 }
 0x8e3   : > { %v4837_v12 = vsub.f32 %v10409_v34, %v4805_v4  ;;  %v4806_v54 = vmul.f32 0.015625, %v4760_v32  ;;  %4947 = vadd.xlane.f32.xlu1 %v4900_v63 }
 0x8e5   : > { %v10555_v39 = vmul.f32 %v11733_v14, %v4837_v12  ;;  %v4838_v48 = vsub.f32 %v10411_v45, %v4806_v54 }
 0x8e7   : > { %v10559_v23 = vmul.f32 %v11733_v14, %v4838_v48  ;;  %v4901_v53 = vmul.f32 %v10555_v39, %v10555_v39 }
 0x8e8   : > { %v4762_v19 = vpop.xlane.xlu0 %4761 }
 0x8e9   : > { %v4807_v25 = vmul.f32 0.015625, %v4762_v19  ;;  %4949 = vadd.xlane.f32.xlu0 %v4901_v53  ;;  %v4902_v10 = vmul.f32 %v10559_v23, %v10559_v23 }
 0x8ea   : > { %v4764_v34 = vpop.xlane.xlu1 %4763 }
 0x8eb   : > { %v4839_v13 = vsub.f32 %v10415_v30, %v4807_v25  ;;  %v4808_v46 = vmul.f32 0.015625, %v4764_v34  ;;  %4951 = vadd.xlane.f32.xlu1 %v4902_v10 }
 0x8ed   : > { %v10567_v21 = vmul.f32 %v11733_v14, %v4839_v13  ;;  %v4840_v45 = vsub.f32 %v10417_v20, %v4808_v46 }
 0x8ef   : > { %v10571_v9 = vmul.f32 %v11733_v14, %v4840_v45  ;;  %v4903_v29 = vmul.f32 %v10567_v21, %v10567_v21 }
 0x8f0   : > { %v4766_v61 = vpop.xlane.xlu0 %4765 }
 0x8f1   : > { %v4809_v41 = vmul.f32 0.015625, %v4766_v61  ;;  %4953 = vadd.xlane.f32.xlu0 %v4903_v29  ;;  %v4904_v44 = vmul.f32 %v10571_v9, %v10571_v9 }
 0x8f2   : > { %v4768_v30 = vpop.xlane.xlu1 %4767 }
 0x8f3   : > { %v4841_v57 = vsub.f32 %v10421_v1, %v4809_v41  ;;  %v4810_v56 = vmul.f32 0.015625, %v4768_v30  ;;  %4955 = vadd.xlane.f32.xlu1 %v4904_v44 }
 0x8f5   : > { %v10579_v51 = vmul.f32 %v11733_v14, %v4841_v57  ;;  %v4842_v20 = vsub.f32 %v10423_v55, %v4810_v56 }
 0x8f7   : > { %v10583_v2 = vmul.f32 %v11733_v14, %v4842_v20  ;;  %v4905_v40 = vmul.f32 %v10579_v51, %v10579_v51 }
 0x8f8   : > { %v4770_v15 = vpop.xlane.xlu0 %4769 }
 0x8f9   : > { %v4811_v58 = vmul.f32 0.015625, %v4770_v15  ;;  %4957 = vadd.xlane.f32.xlu0 %v4905_v40  ;;  %v4906_v43 = vmul.f32 %v10583_v2, %v10583_v2 }
 0x8fa   : > { %v4772_v1 = vpop.xlane.xlu1 %4771 }
 0x8fb   : > { %v4843_v0 = vsub.f32 %v10427_v52, %v4811_v58  ;;  %v4812_v6 = vmul.f32 0.015625, %v4772_v1  ;;  %4959 = vadd.xlane.f32.xlu1 %v4906_v43 }
 0x8fd   : > { %v10591_v24 = vmul.f32 %v11733_v14, %v4843_v0  ;;  %v4844_v55 = vsub.f32 %v10429_v3, %v4812_v6 }
 0x8ff   : > { %v10595_v4 = vmul.f32 %v11733_v14, %v4844_v55  ;;  %v4907_v63 = vmul.f32 %v10591_v24, %v10591_v24 }
 0x900   : > { %v4774_v32 = vpop.xlane.xlu0 %4773 }
 0x901   : > { %v4813_v12 = vmul.f32 0.015625, %v4774_v32  ;;  %4961 = vadd.xlane.f32.xlu0 %v4907_v63  ;;  %v4908_v54 = vmul.f32 %v10595_v4, %v10595_v4 }
 0x902   : > { %v4776_v52 = vpop.xlane.xlu1 %4775 }
 0x903   : > { %v4845_v48 = vsub.f32 %v10433_v8, %v4813_v12  ;;  %v4814_v53 = vmul.f32 0.015625, %v4776_v52  ;;  %4963 = vadd.xlane.f32.xlu1 %v4908_v54 }
 0x905   : > { %v10603_v19 = vmul.f32 %v11733_v14, %v4845_v48  ;;  %v4846_v3 = vsub.f32 %v10435_v38, %v4814_v53 }
 0x907   : > { %v10607_v25 = vmul.f32 %v11733_v14, %v4846_v3  ;;  %v4909_v10 = vmul.f32 %v10603_v19, %v10603_v19 }
 0x908   : > { %v4778_v34 = vpop.xlane.xlu0 %4777 }
 0x909   : > { %v4815_v13 = vmul.f32 0.015625, %v4778_v34  ;;  %4965 = vadd.xlane.f32.xlu0 %v4909_v10  ;;  %v4910_v46 = vmul.f32 %v10607_v25, %v10607_v25 }
 0x90a   : > { %v4780_v8 = vpop.xlane.xlu1 %4779 }
 0x90b   : > { %v4847_v45 = vsub.f32 %v10439_v11, %v4815_v13  ;;  %v4816_v29 = vmul.f32 0.015625, %v4780_v8  ;;  %4967 = vadd.xlane.f32.xlu1 %v4910_v46 }
 0x90d   : > { %v10615_v61 = vmul.f32 %v11733_v14, %v4847_v45  ;;  %v4848_v38 = vsub.f32 %v10441_v33, %v4816_v29 }
 0x90f   : > { %v10619_v41 = vmul.f32 %v11733_v14, %v4848_v38  ;;  %v4911_v44 = vmul.f32 %v10615_v61, %v10615_v61  ;;  %v10652_v38 = vld [vmem:[%s10809_s4] ss:$0 sm:$0xff] }
 0x910   : > { %v4782_v30 = vpop.xlane.xlu0 %4781 }
 0x911   : > { %v4817_v57 = vmul.f32 0.015625, %v4782_v30  ;;  %4969 = vadd.xlane.f32.xlu0 %v4911_v44  ;;  %v4912_v56 = vmul.f32 %v10619_v41, %v10619_v41 }
 0x912   : > { %v4784_v11 = vpop.xlane.xlu1 %4783 }
 0x913   : > { %v4849_v20 = vsub.f32 %v10445_v35, %v4817_v57  ;;  %v4818_v40 = vmul.f32 0.015625, %v4784_v11  ;;  %4971 = vadd.xlane.f32.xlu1 %v4912_v56 }
 0x915   : > { %v10627_v15 = vmul.f32 %v11733_v14, %v4849_v20  ;;  %v4850_v33 = vsub.f32 %v10447_v22, %v4818_v40 }
 0x917   : > { %v10631_v58 = vmul.f32 %v11733_v14, %v4850_v33  ;;  %v4913_v43 = vmul.f32 %v10627_v15, %v10627_v15 }
 0x918   : > { %v4786_v1 = vpop.xlane.xlu0 %4785 }
 0x919   : > { %v4819_v0 = vmul.f32 0.015625, %v4786_v1  ;;  %4973 = vadd.xlane.f32.xlu0 %v4913_v43  ;;  %v4914_v6 = vmul.f32 %v10631_v58, %v10631_v58 }
 0x91a   : > { %v4788_v35 = vpop.xlane.xlu1 %4787 }
 0x91b   : > { %v4851_v55 = vsub.f32 %v10451_v31, %v4819_v0  ;;  %v4820_v63 = vmul.f32 0.015625, %v4788_v35  ;;  %4975 = vadd.xlane.f32.xlu1 %v4914_v6 }
 0x91d   : > { %v10639_v32 = vmul.f32 %v11733_v14, %v4851_v55  ;;  %v4852_v22 = vsub.f32 %v10453_v36, %v4820_v63 }
 0x91f   : > { %v10643_v12 = vmul.f32 %v11733_v14, %v4852_v22  ;;  %v4915_v54 = vmul.f32 %v10639_v32, %v10639_v32 }
 0x921   : > { %4977 = vadd.xlane.f32.xlu0 %v4915_v54  ;;  %v4916_v52 = vmul.f32 %v10643_v12, %v10643_v12 }
 0x923   : > { %4979 = vadd.xlane.f32.xlu1 %v4916_v52 }
 0x936   : > { %v4918_v48 = vpop.xlane.xlu0 %4917 }
 0x937   : > { %v4981_v31 = vmul.f32 0.015625, %v4918_v48 }
 0x938   : > { %v4920_v53 = vpop.xlane.xlu1 %4919 }
 0x939   : > { %v5013_v3 = vadd.f32 1e-05, %v4981_v31  ;;  %v4982_v10 = vmul.f32 0.015625, %v4920_v53 }
 0x93b   : > { %6862 = vrsqrt.f32 %v5013_v3  ;;  %v5014_v34 = vadd.f32 1e-05, %v4982_v10 }
 0x93d   : > { %6864 = vrsqrt.f32 %v5014_v34 }
 0x93e   : > { %v4922_v36 = vpop.xlane.xlu0 %4921 }
 0x93f   : > { %v4983_v13 = vmul.f32 0.015625, %v4922_v36 }
 0x940   : > { %v4924_v14 = vpop.xlane.xlu1 %4923 }
 0x941   : > { %v5015_v46 = vadd.f32 1e-05, %v4983_v13  ;;  %v4984_v8 = vmul.f32 0.015625, %v4924_v14 }
 0x943   : > { %6866 = vrsqrt.f32 %v5015_v46  ;;  %v5016_v45 = vadd.f32 1e-05, %v4984_v8 }
 0x945   : > { %v6863_v29 = vpop.eup %6862  ;;  %6868 = vrsqrt.f32 %v5016_v45 }
 0x946   : > { %v5077_v44 = vmul.f32 %v6863_v29, %v10459_v50  ;;  %v4926_v30 = vpop.xlane.xlu0 %4925 }
 0x947   : > { %v6865_v57 = vpop.eup %6864  ;;  %v4985_v56 = vmul.f32 0.015625, %v4926_v30 }
 0x948   : > { %v5116_v11 = vmul.f32 %v10652_v38, %v5077_v44  ;;  %v5078_v20 = vmul.f32 %v6865_v57, %v10463_v5  ;;  %v4928_v40 = vpop.xlane.xlu1 %4927 }
 0x949   : > { %v5017_v33 = vadd.f32 1e-05, %v4985_v56  ;;  %v4986_v43 = vmul.f32 0.015625, %v4928_v40 }
 0x94a   : > { %5148 = vst [vmem:[%s10659_s16] sm:$0xff] %v5116_v11  ;;  %v5117_v1 = vmul.f32 %v10652_v38, %v5078_v20 }
 0x94b   : > { %6870 = vrsqrt.f32 %v5017_v33  ;;  %v5018_v50 = vadd.f32 1e-05, %v4986_v43 }
 0x94c   : > { %5149 = vst [vmem:[%s10659_s16 + $0x8] sm:$0xff] %v5117_v1 }
 0x94d   : > { %v6867_v0 = vpop.eup %6866  ;;  %6872 = vrsqrt.f32 %v5018_v50 }
 0x94e   : > { %v5079_v5 = vmul.f32 %v6867_v0, %v10471_v26  ;;  %v4930_v6 = vpop.xlane.xlu0 %4929 }
 0x94f   : > { %v6869_v35 = vpop.eup %6868  ;;  %v4987_v55 = vmul.f32 0.015625, %v4930_v6 }
 0x950   : > { %v5118_v63 = vmul.f32 %v10652_v38, %v5079_v5  ;;  %v5080_v22 = vmul.f32 %v6869_v35, %v10475_v59  ;;  %v4932_v54 = vpop.xlane.xlu1 %4931 }
 0x951   : > { %v5019_v52 = vadd.f32 1e-05, %v4987_v55  ;;  %v4988_v48 = vmul.f32 0.015625, %v4932_v54 }
 0x952   : > { %5150 = vst [vmem:[%s10659_s16 + $0x10] sm:$0xff] %v5118_v63  ;;  %v5119_v31 = vmul.f32 %v10652_v38, %v5080_v22 }
 0x953   : > { %6874 = vrsqrt.f32 %v5019_v52  ;;  %v5020_v53 = vadd.f32 1e-05, %v4988_v48 }
 0x954   : > { %5151 = vst [vmem:[%s10659_s16 + $0x18] sm:$0xff] %v5119_v31 }
 0x955   : > { %v6871_v3 = vpop.eup %6870  ;;  %6876 = vrsqrt.f32 %v5020_v53 }
 0x956   : > { %v5081_v26 = vmul.f32 %v6871_v3, %v10483_v62  ;;  %v4934_v10 = vpop.xlane.xlu0 %4933 }
 0x957   : > { %v6873_v34 = vpop.eup %6872  ;;  %v4989_v36 = vmul.f32 0.015625, %v4934_v10 }
 0x958   : > { %v5120_v59 = vmul.f32 %v10652_v38, %v5081_v26  ;;  %v5082_v13 = vmul.f32 %v6873_v34, %v10487_v18  ;;  %v4936_v14 = vpop.xlane.xlu1 %4935 }
 0x959   : > { %v5021_v46 = vadd.f32 1e-05, %v4989_v36  ;;  %v4990_v8 = vmul.f32 0.015625, %v4936_v14 }
 0x95a   : > { %5152 = vst [vmem:[%s10659_s16 + $0x20] sm:$0xff] %v5120_v59  ;;  %v5121_v45 = vmul.f32 %v10652_v38, %v5082_v13 }
 0x95b   : > { %6878 = vrsqrt.f32 %v5021_v46  ;;  %v5022_v29 = vadd.f32 1e-05, %v4990_v8 }
 0x95c   : > { %5153 = vst [vmem:[%s10659_s16 + $0x28] sm:$0xff] %v5121_v45 }
 0x95d   : > { %v6875_v44 = vpop.eup %6874  ;;  %6880 = vrsqrt.f32 %v5022_v29 }
 0x95e   : > { %v5083_v62 = vmul.f32 %v6875_v44, %v10495_v60  ;;  %v4938_v30 = vpop.xlane.xlu0 %4937 }
 0x95f   : > { %v6877_v57 = vpop.eup %6876  ;;  %v4991_v56 = vmul.f32 0.015625, %v4938_v30 }
 0x960   : > { %v5122_v18 = vmul.f32 %v10652_v38, %v5083_v62  ;;  %v5084_v11 = vmul.f32 %v6877_v57, %v10499_v49  ;;  %v4940_v20 = vpop.xlane.xlu1 %4939 }
 0x961   : > { %v5023_v40 = vadd.f32 1e-05, %v4991_v56  ;;  %v4992_v33 = vmul.f32 0.015625, %v4940_v20 }
 0x962   : > { %5154 = vst [vmem:[%s10659_s16 + $0x30] sm:$0xff] %v5122_v18  ;;  %v5123_v43 = vmul.f32 %v10652_v38, %v5084_v11 }
 0x963   : > { %6882 = vrsqrt.f32 %v5023_v40  ;;  %v5024_v1 = vadd.f32 1e-05, %v4992_v33 }
 0x964   : > { %5155 = vst [vmem:[%s10659_s16 + $0x38] sm:$0xff] %v5123_v43 }
 0x965   : > { %v6879_v50 = vpop.eup %6878  ;;  %6884 = vrsqrt.f32 %v5024_v1 }
 0x966   : > { %v5085_v60 = vmul.f32 %v6879_v50, %v10507_v42  ;;  %v4942_v0 = vpop.xlane.xlu0 %4941 }
 0x967   : > { %v6881_v5 = vpop.eup %6880  ;;  %v4993_v6 = vmul.f32 0.015625, %v4942_v0 }
 0x968   : > { %v5124_v49 = vmul.f32 %v10652_v38, %v5085_v60  ;;  %v5086_v35 = vmul.f32 %v6881_v5, %v10511_v17  ;;  %v4944_v55 = vpop.xlane.xlu1 %4943 }
 0x969   : > { %v5025_v63 = vadd.f32 1e-05, %v4993_v6  ;;  %v4994_v22 = vmul.f32 0.015625, %v4944_v55 }
 0x96a   : > { %5156 = vst [vmem:[%s10659_s16 + $0x40] sm:$0xff] %v5124_v49  ;;  %v5125_v54 = vmul.f32 %v10652_v38, %v5086_v35 }
 0x96b   : > { %6886 = vrsqrt.f32 %v5025_v63  ;;  %v5026_v52 = vadd.f32 1e-05, %v4994_v22 }
 0x96c   : > { %5157 = vst [vmem:[%s10659_s16 + $0x48] sm:$0xff] %v5125_v54 }
 0x96d   : > { %v6883_v48 = vpop.eup %6882  ;;  %6888 = vrsqrt.f32 %v5026_v52 }
 0x96e   : > { %v5087_v42 = vmul.f32 %v6883_v48, %v10519_v16  ;;  %v4946_v31 = vpop.xlane.xlu0 %4945 }
 0x96f   : > { %v6885_v53 = vpop.eup %6884  ;;  %v4995_v3 = vmul.f32 0.015625, %v4946_v31 }
 0x970   : > { %v5126_v17 = vmul.f32 %v10652_v38, %v5087_v42  ;;  %v5088_v26 = vmul.f32 %v6885_v53, %v10523_v47  ;;  %v4948_v10 = vpop.xlane.xlu1 %4947 }
 0x971   : > { %v5027_v34 = vadd.f32 1e-05, %v4995_v3  ;;  %v4996_v36 = vmul.f32 0.015625, %v4948_v10 }
 0x972   : > { %5158 = vst [vmem:[%s10659_s16 + $0x50] sm:$0xff] %v5126_v17  ;;  %v5127_v59 = vmul.f32 %v10652_v38, %v5088_v26 }
 0x973   : > { %6890 = vrsqrt.f32 %v5027_v34  ;;  %v5028_v13 = vadd.f32 1e-05, %v4996_v36 }
 0x974   : > { %5159 = vst [vmem:[%s10659_s16 + $0x58] sm:$0xff] %v5127_v59 }
 0x975   : > { %v6887_v14 = vpop.eup %6886  ;;  %6892 = vrsqrt.f32 %v5028_v13 }
 0x976   : > { %v5089_v16 = vmul.f32 %v6887_v14, %v10531_v7  ;;  %v4950_v46 = vpop.xlane.xlu0 %4949 }
 0x977   : > { %v6889_v8 = vpop.eup %6888  ;;  %v4997_v45 = vmul.f32 0.015625, %v4950_v46 }
 0x978   : > { %v5128_v47 = vmul.f32 %v10652_v38, %v5089_v16  ;;  %v5090_v29 = vmul.f32 %v6889_v8, %v10535_v28  ;;  %v4952_v44 = vpop.xlane.xlu1 %4951 }
 0x979   : > { %v5029_v62 = vadd.f32 1e-05, %v4997_v45  ;;  %v4998_v30 = vmul.f32 0.015625, %v4952_v44 }
 0x97a   : > { %5160 = vst [vmem:[%s10659_s16 + $0x60] sm:$0xff] %v5128_v47  ;;  %v5129_v57 = vmul.f32 %v10652_v38, %v5090_v29 }
 0x97b   : > { %6894 = vrsqrt.f32 %v5029_v62  ;;  %v5030_v56 = vadd.f32 1e-05, %v4998_v30 }
 0x97c   : > { %5161 = vst [vmem:[%s10659_s16 + $0x68] sm:$0xff] %v5129_v57 }
 0x97d   : > { %v6891_v18 = vpop.eup %6890  ;;  %6896 = vrsqrt.f32 %v5030_v56 }
 0x97e   : > { %v5091_v7 = vmul.f32 %v6891_v18, %v10543_v37  ;;  %v4954_v11 = vpop.xlane.xlu0 %4953 }
 0x97f   : > { %v6893_v20 = vpop.eup %6892  ;;  %v4999_v40 = vmul.f32 0.015625, %v4954_v11 }
 0x980   : > { %v5130_v28 = vmul.f32 %v10652_v38, %v5091_v7  ;;  %v5092_v33 = vmul.f32 %v6893_v20, %v10547_v27  ;;  %v4956_v43 = vpop.xlane.xlu1 %4955 }
 0x981   : > { %v5031_v1 = vadd.f32 1e-05, %v4999_v40  ;;  %v5000_v50 = vmul.f32 0.015625, %v4956_v43 }
 0x982   : > { %5162 = vst [vmem:[%s10659_s16 + $0x70] sm:$0xff] %v5130_v28  ;;  %v5131_v60 = vmul.f32 %v10652_v38, %v5092_v33 }
 0x983   : > { %6898 = vrsqrt.f32 %v5031_v1  ;;  %v5032_v0 = vadd.f32 1e-05, %v5000_v50 }
 0x984   : > { %5163 = vst [vmem:[%s10659_s16 + $0x78] sm:$0xff] %v5131_v60 }
 0x985   : > { %v6895_v5 = vpop.eup %6894  ;;  %6900 = vrsqrt.f32 %v5032_v0 }
 0x986   : > { %v5093_v37 = vmul.f32 %v6895_v5, %v10555_v39  ;;  %v4958_v6 = vpop.xlane.xlu0 %4957 }
 0x987   : > { %v6897_v49 = vpop.eup %6896  ;;  %v5001_v35 = vmul.f32 0.015625, %v4958_v6 }
 0x988   : > { %v5132_v27 = vmul.f32 %v10652_v38, %v5093_v37  ;;  %v5094_v55 = vmul.f32 %v6897_v49, %v10559_v23  ;;  %v4960_v63 = vpop.xlane.xlu1 %4959 }
 0x989   : > { %v5033_v22 = vadd.f32 1e-05, %v5001_v35  ;;  %v5002_v54 = vmul.f32 0.015625, %v4960_v63 }
 0x98a   : > { %5164 = vst [vmem:[%s10659_s16 + $0x80] sm:$0xff] %v5132_v27  ;;  %v5133_v52 = vmul.f32 %v10652_v38, %v5094_v55 }
 0x98b   : > { %6902 = vrsqrt.f32 %v5033_v22  ;;  %v5034_v48 = vadd.f32 1e-05, %v5002_v54 }
 0x98c   : > { %5165 = vst [vmem:[%s10659_s16 + $0x88] sm:$0xff] %v5133_v52 }
 0x98d   : > { %v6899_v42 = vpop.eup %6898  ;;  %6904 = vrsqrt.f32 %v5034_v48 }
 0x98e   : > { %v5095_v39 = vmul.f32 %v6899_v42, %v10567_v21  ;;  %v4962_v31 = vpop.xlane.xlu0 %4961 }
 0x98f   : > { %v6901_v53 = vpop.eup %6900  ;;  %v5003_v3 = vmul.f32 0.015625, %v4962_v31 }
 0x990   : > { %v5134_v23 = vmul.f32 %v10652_v38, %v5095_v39  ;;  %v5096_v17 = vmul.f32 %v6901_v53, %v10571_v9  ;;  %v4964_v26 = vpop.xlane.xlu1 %4963 }
 0x991   : > { %v5035_v10 = vadd.f32 1e-05, %v5003_v3  ;;  %v5004_v34 = vmul.f32 0.015625, %v4964_v26 }
 0x992   : > { %5166 = vst [vmem:[%s10659_s16 + $0x90] sm:$0xff] %v5134_v23  ;;  %v5135_v36 = vmul.f32 %v10652_v38, %v5096_v17 }
 0x993   : > { %6906 = vrsqrt.f32 %v5035_v10  ;;  %v5036_v59 = vadd.f32 1e-05, %v5004_v34 }
 0x994   : > { %5167 = vst [vmem:[%s10659_s16 + $0x98] sm:$0xff] %v5135_v36 }
 0x995   : > { %v6903_v13 = vpop.eup %6902  ;;  %6908 = vrsqrt.f32 %v5036_v59 }
 0x996   : > { %v5097_v21 = vmul.f32 %v6903_v13, %v10579_v51  ;;  %v4966_v14 = vpop.xlane.xlu0 %4965 }
 0x997   : > { %v6905_v16 = vpop.eup %6904  ;;  %v5005_v46 = vmul.f32 0.015625, %v4966_v14 }
 0x998   : > { %v5136_v9 = vmul.f32 %v10652_v38, %v5097_v21  ;;  %v5098_v8 = vmul.f32 %v6905_v16, %v10583_v2  ;;  %v4968_v45 = vpop.xlane.xlu1 %4967 }
 0x999   : > { %v5037_v47 = vadd.f32 1e-05, %v5005_v46  ;;  %v5006_v29 = vmul.f32 0.015625, %v4968_v45 }
 0x99a   : > { %5168 = vst [vmem:[%s10659_s16 + $0xa0] sm:$0xff] %v5136_v9  ;;  %v5137_v44 = vmul.f32 %v10652_v38, %v5098_v8 }
 0x99b   : > { %6910 = vrsqrt.f32 %v5037_v47  ;;  %v5038_v62 = vadd.f32 1e-05, %v5006_v29 }
 0x99c   : > { %5169 = vst [vmem:[%s10659_s16 + $0xa8] sm:$0xff] %v5137_v44 }
 0x99d   : > { %v6907_v30 = vpop.eup %6906  ;;  %6912 = vrsqrt.f32 %v5038_v62 }
 0x99e   : > { %v5099_v51 = vmul.f32 %v6907_v30, %v10591_v24  ;;  %v4970_v57 = vpop.xlane.xlu0 %4969 }
 0x99f   : > { %v6909_v56 = vpop.eup %6908  ;;  %v5007_v18 = vmul.f32 0.015625, %v4970_v57 }
 0x9a0   : > { %v5138_v2 = vmul.f32 %v10652_v38, %v5099_v51  ;;  %v5100_v7 = vmul.f32 %v6909_v56, %v10595_v4  ;;  %v4972_v11 = vpop.xlane.xlu1 %4971 }
 0x9a1   : > { %v5039_v20 = vadd.f32 1e-05, %v5007_v18  ;;  %v5008_v40 = vmul.f32 0.015625, %v4972_v11 }
 0x9a2   : > { %5170 = vst [vmem:[%s10659_s16 + $0xb0] sm:$0xff] %v5138_v2  ;;  %v5139_v28 = vmul.f32 %v10652_v38, %v5100_v7 }
 0x9a3   : > { %6914 = vrsqrt.f32 %v5039_v20  ;;  %v5040_v33 = vadd.f32 1e-05, %v5008_v40 }
 0x9a4   : > { %5171 = vst [vmem:[%s10659_s16 + $0xb8] sm:$0xff] %v5139_v28 }
 0x9a5   : > { %v6911_v43 = vpop.eup %6910  ;;  %6916 = vrsqrt.f32 %v5040_v33 }
 0x9a6   : > { %v5101_v24 = vmul.f32 %v6911_v43, %v10603_v19  ;;  %v4974_v1 = vpop.xlane.xlu0 %4973 }
 0x9a7   : > { %v6913_v50 = vpop.eup %6912  ;;  %v5009_v60 = vmul.f32 0.015625, %v4974_v1 }
 0x9a8   : > { %v5140_v4 = vmul.f32 %v10652_v38, %v5101_v24  ;;  %v5102_v0 = vmul.f32 %v6913_v50, %v10607_v25  ;;  %v4976_v5 = vpop.xlane.xlu1 %4975 }
 0x9a9   : > { %v5041_v37 = vadd.f32 1e-05, %v5009_v60  ;;  %v5010_v6 = vmul.f32 0.015625, %v4976_v5 }
 0x9aa   : > { %5172 = vst [vmem:[%s10659_s16 + $0xc0] sm:$0xff] %v5140_v4  ;;  %v5141_v49 = vmul.f32 %v10652_v38, %v5102_v0 }
 0x9ab   : > { %6918 = vrsqrt.f32 %v5041_v37  ;;  %v5042_v35 = vadd.f32 1e-05, %v5010_v6 }
 0x9ac   : > { %5173 = vst [vmem:[%s10659_s16 + $0xc8] sm:$0xff] %v5141_v49 }
 0x9ad   : > { %v6915_v27 = vpop.eup %6914  ;;  %6920 = vrsqrt.f32 %v5042_v35 }
 0x9ae   : > { %v5103_v19 = vmul.f32 %v6915_v27, %v10615_v61  ;;  %v4978_v55 = vpop.xlane.xlu0 %4977 }
 0x9af   : > { %v6917_v63 = vpop.eup %6916  ;;  %v5011_v22 = vmul.f32 0.015625, %v4978_v55 }
 0x9b0   : > { %v5142_v25 = vmul.f32 %v10652_v38, %v5103_v19  ;;  %v5104_v54 = vmul.f32 %v6917_v63, %v10619_v41  ;;  %v4980_v52 = vpop.xlane.xlu1 %4979 }
 0x9b1   : > { %v5043_v48 = vadd.f32 1e-05, %v5011_v22  ;;  %v5012_v42 = vmul.f32 0.015625, %v4980_v52 }
 0x9b2   : > { %5174 = vst [vmem:[%s10659_s16 + $0xd0] sm:$0xff] %v5142_v25  ;;  %v5143_v39 = vmul.f32 %v10652_v38, %v5104_v54 }
 0x9b3   : > { %6922 = vrsqrt.f32 %v5043_v48  ;;  %v5044_v31 = vadd.f32 1e-05, %v5012_v42 }
 0x9b4   : > { %5175 = vst [vmem:[%s10659_s16 + $0xd8] sm:$0xff] %v5143_v39 }
 0x9b5   : > { %v6919_v61 = vpop.eup %6918  ;;  %6924 = vrsqrt.f32 %v5044_v31 }
 0x9b6   : > { %v5105_v53 = vmul.f32 %v6919_v61, %v10627_v15 }
 0x9b7   : > { %v6921_v3 = vpop.eup %6920 }
 0x9b8   : > { %v5144_v41 = vmul.f32 %v10652_v38, %v5105_v53  ;;  %v5106_v23 = vmul.f32 %v6921_v3, %v10631_v58 }
 0x9ba   : > { %5176 = vst [vmem:[%s10659_s16 + $0xe0] sm:$0xff] %v5144_v41  ;;  %v5145_v17 = vmul.f32 %v10652_v38, %v5106_v23 }
 0x9bc   : > { %5177 = vst [vmem:[%s10659_s16 + $0xe8] sm:$0xff] %v5145_v17 }
 0x9bd   : > { %v6923_v26 = vpop.eup %6922 }
 0x9be   : > { %v5107_v10 = vmul.f32 %v6923_v26, %v10639_v32 }
 0x9bf   : > { %v6925_v34 = vpop.eup %6924 }
 0x9c0   : > { %v5146_v15 = vmul.f32 %v10652_v38, %v5107_v10  ;;  %v5108_v36 = vmul.f32 %v6925_v34, %v10643_v12 }
 0x9c2   : > { %5178 = vst [vmem:[%s10659_s16 + $0xf0] sm:$0xff] %v5146_v15  ;;  %v5147_v58 = vmul.f32 %v10652_v38, %v5108_v36 }
 0x9c4   : > { %5179 = vst [vmem:[%s10659_s16 + $0xf8] sm:$0xff] %v5147_v58 }
 0x9c5   : > { %7117 = shalt.err (!%p7114_p4)
}
 0x9c6   : > { %s7118_s27 = scalar_lea.hbm %s10756_s26, 4096  ;;  %s7122_s19 = scalar_lea.hbm %s10811_s6, 8192 }
 0x9c7   : > { %p7119_p9 = scmp.ne.s32.totalorder %s10756_s26, %s7118_s27  ;;  %p7123_p8 = scmp.lt.u32.totalorder %s10756_s26, %s10811_s6 }
 0x9c8   : > { %p7124_p13 = scmp.lt.u32.totalorder %s7122_s19, %s7118_s27  ;;  %p7126_p10 = scmp.lt.u32.totalorder %s7118_s27, %s10756_s26 }
 0x9c9   : > { %p7120_p0 = pnand %p7119_p9, %p7374_p5 }
 0x9ca   : > { %p7125_p6 = por %p7124_p13, %p7123_p8 }
 0x9cb   : > { %p7121_p11 = pneg %p7120_p0 }
 0x9cc   : > { %p7127_p3 = por %p7126_p10, %p7125_p6 }
 0x9ce   : > { %p7128_p7 = pnand %p7127_p3, %p7121_p11 }
 0x9d0   : > { %7131 = shalt.err (!%p7128_p7)
}
 0x9d1   : > { %s7195_s10 = smov 128   ;;  %s7196_s9 = smov 8  }
 0x9d2   : > { %5767 = dma.vmem_to_hbm [thread:$0]  (%p7374_p5), %s10758_s18, 4096, %s10756_s26, %s5181_s25, %s7195_s10, %s7195_s10, %s7196_s9  }
 0x9d3 PF: > { %s5209_s12 = sand.u32 1, %s7166_s21   ;;  %p11734_p12 = scmp.ne.s32.totalorder %s11074_s28, 0 }
 0x9d4   : > { %p11735_p2 = scmp.ge.s32.totalorder %s7178_s24, 2  ;;  %s5210_s11 = scalar_lea.sflag [#allocation4], %s5209_s12 }
 0x9d6   : > { %p5784_p1 = pnand %p11735_p2, %p11734_p12 }
 0x9d8   : > { %7161 = dma.done.wait (!%p5784_p1), %s5210_s11, 4096  }
 0x9d9   : > { %7163 = vsyncadd (!%p5784_p1), %s5210_s11, 4294963200  ;;  %p21_p4 = scmp.ge.s32.totalorder %s7360_s30, 4   ;;  %s11736_s21 = smov %s7170_s22 }
 0x9da   : > { %s11737_s22 = smov %s7174_s23  ;;  %s11738_s23 = smov %s7370_s13 }
 0x9db   : > { %s11739_s24 = smov %s7360_s30  ;;  %23 = sbr.rel (!%p21_p4) target bundleno = 7 (0x7), region = 101 }
 0x9e2   :  { %5215 = vsyncpa [#allocation3], 1 }
 0x9e3   :  { %5217 = vsyncpa [#allocation3 + $0x1], 1 }
 0x9e4   :  { %5218 = vsyncpa [#allocation6], 1 }
 0x9e5   :  { %5219 = vsyncpa [#allocation9], 1 }
 0x9e6   :  { %5220 = vsyncpa [#allocation4], 1 }
 0x9e7   :  { %5222 = vsyncpa [#allocation4 + $0x1], 1 }

</bundles_post_ra>
